<compile_context>
chip_gen: v7x
topology: tpu7x:2x2x1
jax: 0.10.0
libtpu: 0.0.40
codegen_flags: <defaults>
</compile_context>

<pallas_src>
import functools
import math

import jax
import jax.numpy as jnp
from jax import lax
from jax.experimental import pallas as pl
from jax.experimental.pallas import tpu as pltpu

_EPS = 1e-5   # nn.BatchNorm2d default eps

# (input_channels, num_channels, use_1x1conv, stride) per Residual_apt block.
_CFG = [(4, 4, False, 1), (4, 4, False, 1),
        (4, 8, True, 2), (8, 8, False, 1),
        (8, 16, True, 2), (16, 16, False, 1),
        (16, 32, True, 2), (32, 32, False, 1)]

_W_LANES = 32    # widest Cout packed into the weight slab
_V_LANES = 32    # widest per-channel vector


def _round8(n):
    return (n + 7) & ~7


# ------------------------- packed-parameter layout ----------------------------

def _layout(cfg):
    """Row offsets of every packed tensor inside the weight / vector slabs."""
    wmeta, vmeta = {}, {}
    woff = 0
    voff = 0

    def add_w(name, rows, cols):
        nonlocal woff
        wmeta[name] = (woff, rows, cols)
        woff += _round8(rows)          # 8-aligned starts -> cheap sublane slices

    def add_v(name, cols):
        nonlocal voff
        vmeta[name] = (voff, cols)
        voff += 1

    add_w('stem_w', 3, 4)
    add_v('stem_g', 4)
    add_v('stem_b', 4)
    for i, (cin, cout, use_1x1, _s) in enumerate(cfg):
        add_w(f'b{i}_w1', 3 * cin, cout)
        add_v(f'b{i}_g1', cout)
        add_v(f'b{i}_b1', cout)
        add_w(f'b{i}_w2', 3 * cout, cout)
        add_v(f'b{i}_g2', cout)
        add_v(f'b{i}_b2', cout)
        if use_1x1:
            add_w(f'b{i}_w3', cin, cout)
            add_v(f'b{i}_b3', cout)
    add_w('lin_w', 32, 5)
    add_v('lin_b', 5)
    return wmeta, vmeta, _round8(woff), _round8(voff)


def pack_params(params, cfg):
    """Pack all conv/linear weights and per-channel vectors into 2 slabs."""
    wmeta, vmeta, wrows, vrows = _layout(cfg)
    wslab = jnp.zeros((wrows, _W_LANES), jnp.float32)
    vslab = jnp.zeros((vrows, _V_LANES), jnp.float32)

    def put_w(slab, name, w2d):
        off, rows, cols = wmeta[name]
        return slab.at[off:off + rows, :cols].set(
            w2d.reshape(rows, cols).astype(jnp.float32))

    def put_v(slab, name, vec):
        row, cols = vmeta[name]
        return slab.at[row, :cols].set(vec.reshape(-1).astype(jnp.float32))

    wslab = put_w(wslab, 'stem_w', params['stem_w'])
    vslab = put_v(vslab, 'stem_g', params['stem_g'])
    vslab = put_v(vslab, 'stem_b', params['stem_be'])
    for i, (p, (cin, cout, use_1x1, _s)) in enumerate(zip(params['blocks'], cfg)):
        wslab = put_w(wslab, f'b{i}_w1', p['w1'])
        vslab = put_v(vslab, f'b{i}_g1', p['g1'])
        vslab = put_v(vslab, f'b{i}_b1', p['be1'])
        wslab = put_w(wslab, f'b{i}_w2', p['w2'])
        vslab = put_v(vslab, f'b{i}_g2', p['g2'])
        vslab = put_v(vslab, f'b{i}_b2', p['be2'])
        if use_1x1:
            wslab = put_w(wslab, f'b{i}_w3', p['w3'])
            vslab = put_v(vslab, f'b{i}_b3', p['b3'])
    wslab = put_w(wslab, 'lin_w', params['lin_w'])
    vslab = put_v(vslab, 'lin_b', params['lin_b'])
    return {'wslab': wslab, 'vslab': vslab}


# ----------------------------- fused Pallas kernel ----------------------------

def _make_fused_kernel(n, w_in, cfg):
    """Build the whole-network kernel for batch n and input width w_in."""
    f32 = jnp.float32
    assert (w_in & (w_in - 1)) == 0, "input width must be a power of two"
    wmeta, vmeta, _, _ = _layout(cfg)

    def kernel(x_ref, w_ref, v_ref, o_ref, ds_scratch):
        def read_w(name):
            off, rows, cols = wmeta[name]
            return w_ref[off:off + rows, 0:cols]

        def read_v(name):
            row, cols = vmeta[name]
            return v_ref[row:row + 1, 0:cols]

        def mm(a, b):
            return jnp.dot(a, b, preferred_element_type=f32)

        def patches1x3(x, m, w):
            # (M, 3*Cin) im2col patches: [x[w-1], x[w], x[w+1]] on lanes, with
            # zero padding at each batch segment's W edges via an iota mask.
            c = x.shape[1]
            pos = lax.broadcasted_iota(jnp.int32, (m, c), 0) & (w - 1)
            xp = jnp.where(pos == 0, 0.0, pltpu.roll(x, 1, 0))        # x[w-1]
            xn = jnp.where(pos == w - 1, 0.0, pltpu.roll(x, m - 1, 0))  # x[w+1]
            return jnp.concatenate([xp, x, xn], axis=1)

        def conv1x3(x, name, m, w, stride):
            """(1,3) conv, pad 1.  Returns (y, stride-2-downsampled x or None)."""
            c = x.shape[1]
            p = patches1x3(x, m, w)
            x_ds = None
            if stride == 2:
                # stride-2 == keep even rows; do it on the patches BEFORE the
                # dot via a sublane-strided load from VMEM scratch, so the
                # matmul only sees M/2 rows.
                ds_scratch[0:m, 0:3 * c] = p
                p = ds_scratch[pl.ds(0, m // 2, stride=2), pl.ds(0, 3 * c)]
                x_ds = p[:, c:2 * c]           # middle taps == downsampled x
            return mm(p, read_w(name)), x_ds

        def batchnorm(y, gname, bname):
            # Training-mode BatchNorm2d, one-pass stats: var = E[y^2] - mu^2.
            c = y.shape[1]
            stats = jnp.mean(jnp.concatenate([y, y * y], axis=1),
                             axis=0, keepdims=True)          # (1, 2c)
            mu = stats[:, :c]
            var = stats[:, c:] - mu * mu
            scale = read_v(gname) * lax.rsqrt(var + _EPS)
            return y * scale + (read_v(bname) - mu * scale)

        # ---------------- forward pass (fully unrolled at trace time) --------
        x = x_ref[...]                         # (n*w_in, 1)
        m, w = n * w_in, w_in

        # Stem: Conv2d(1,4,(1,3),pad=(0,1)) + BatchNorm2d(4)   (no ReLU)
        y, _ = conv1x3(x, 'stem_w', m, w, 1)
        y = batchnorm(y, 'stem_g', 'stem_b')

        # MaxPool2d((1,3), stride=1, padding=(0,1))
        pos = lax.broadcasted_iota(jnp.int32, y.shape, 0) & (w - 1)
        y_prev = jnp.where(pos == 0, y, pltpu.roll(y, 1, 0))       # edge -> self
        y_next = jnp.where(pos == w - 1, y, pltpu.roll(y, m - 1, 0))
        x = jnp.maximum(jnp.maximum(y_prev, y_next), y)

        # Residual_apt blocks
        for i, (_cin, _cout, use_1x1, stride) in enumerate(cfg):
            m_out, w_out = m // stride, w // stride

            yb, x_ds = conv1x3(x, f'b{i}_w1', m, w, stride)
            yb = jnp.maximum(batchnorm(yb, f'b{i}_g1', f'b{i}_b1'), 0.0)  # relu
            yb, _ = conv1x3(yb, f'b{i}_w2', m_out, w_out, 1)
            yb = batchnorm(yb, f'b{i}_g2', f'b{i}_b2')

            if use_1x1:                                       # 1x1 shortcut conv
                xs = mm(x_ds if stride == 2 else x, read_w(f'b{i}_w3'))
                xs = xs + read_v(f'b{i}_b3')
            else:
                xs = x
            x = jnp.maximum(yb + xs, 0.0)                     # Y += X; relu
            m, w = m_out, w_out

        # AdaptiveAvgPool2d((1,1)) + Flatten + Linear(32, 5)
        bi = lax.broadcasted_iota(jnp.int32, (n, m), 0)
        ri = lax.broadcasted_iota(jnp.int32, (n, m), 1)
        pool = jnp.where((ri >= bi * w) & (ri < (bi + 1) * w), 1.0 / w, 0.0)
        pooled = mm(pool.astype(f32), x)                      # (n, 32)
        out = mm(pooled, read_w('lin_w')) + read_v('lin_b')   # (n, 5)
        o_ref[...] = out.astype(o_ref.dtype)

    return kernel


# --------------------------------- wrapper ------------------------------------

def resnet_apt_4(packed, cfg, inputs):
    """Forward pass.  inputs: (B, L) -> logits (B, 5)."""
    b, l = inputs.shape
    # torch.reshape(inputs, (B,1,1,L)) -> NWC, flattened to (B*L, 1)
    x_flat = inputs.reshape(b * l, 1).astype(jnp.float32)
    vmem = pl.BlockSpec(memory_space=pltpu.MemorySpace.VMEM)
    return pl.pallas_call(
        _make_fused_kernel(b, l, cfg),
        out_shape=jax.ShapeDtypeStruct((b, 5), jnp.float32),
        in_specs=[vmem, vmem, vmem],
        out_specs=vmem,
        scratch_shapes=[pltpu.VMEM((b * l, 128), jnp.float32)],  # stride-2 stage
    )(x_flat, packed['wslab'], packed['vslab'])


# ----------------------------- parameter creation -----------------------------

def _uniform(key, shape, bound):
    return jax.random.uniform(key, shape, jnp.float32, -bound, bound)


def _init_conv3(key, cin, cout):
    # Laid out (tap, cin, cout); tap k multiplies input at w-1+k.
    return _uniform(key, (3, cin, cout), 1.0 / math.sqrt(cin * 3))


def _init_bn(c):
    # PyTorch BatchNorm2d defaults: weight=1, bias=0.
    return jnp.ones((1, c), jnp.float32), jnp.zeros((1, c), jnp.float32)


def init_params(key):
    cfg = _CFG
    keys = jax.random.split(key, 2 + len(cfg))
    params = {'stem_w': _init_conv3(keys[0], 1, 4)}
    params['stem_g'], params['stem_be'] = _init_bn(4)
    blocks = []
    for i, (cin, cout, use_1x1, _s) in enumerate(cfg):
        k1, k2, k3, k4 = jax.random.split(keys[1 + i], 4)
        p = {'w1': _init_conv3(k1, cin, cout),
             'w2': _init_conv3(k2, cout, cout)}
        p['g1'], p['be1'] = _init_bn(cout)
        p['g2'], p['be2'] = _init_bn(cout)
        if use_1x1:
            bound = 1.0 / math.sqrt(cin)
            p['w3'] = _uniform(k3, (cin, cout), bound)
            p['b3'] = _uniform(k4, (1, cout), bound)
        blocks.append(p)
    params['blocks'] = blocks
    kl, kb = jax.random.split(keys[-1])
    bound = 1.0 / math.sqrt(32)
    params['lin_w'] = _uniform(kl, (32, 5), bound)
    params['lin_b'] = _uniform(kb, (1, 5), bound)
    return params, cfg


# ---------------------------- plain-JAX reference ------------------------------

def _ref_forward(params, cfg, inputs):
    """im2col-based reference with full-precision matmuls (for self-check)."""
    hp = lax.Precision.HIGHEST
    b, l = inputs.shape
    x = inputs.reshape(b, l, 1).astype(jnp.float32)

    def conv1x3(x, w3d, stride):
        n, wd, cin = x.shape
        xp = jnp.pad(x, ((0, 0), (1, 1), (0, 0)))
        wout = (wd - 1) // stride + 1
        cols = [xp[:, k:k + (wout - 1) * stride + 1:stride, :] for k in range(3)]
        patches = jnp.concatenate(cols, axis=-1)
        return jnp.einsum('nwk,kc->nwc', patches,
                          w3d.reshape(3 * cin, -1), precision=hp)

    def bn(y, g, be):
        mu = jnp.mean(y, axis=(0, 1), keepdims=True)
        var = jnp.mean((y - mu) ** 2, axis=(0, 1), keepdims=True)
        return ((y - mu) * lax.rsqrt(var + _EPS) * g.reshape(1, 1, -1)
                + be.reshape(1, 1, -1))

    y = bn(conv1x3(x, params['stem_w'], 1), params['stem_g'], params['stem_be'])
    neg = jnp.full((b, 1, y.shape[-1]), -jnp.inf, y.dtype)
    yp = jnp.concatenate([neg, y, neg], axis=1)
    wd = y.shape[1]
    x = jnp.maximum(jnp.maximum(yp[:, :wd], yp[:, 1:wd + 1]), yp[:, 2:wd + 2])

    for p, (_cin, _cout, use_1x1, stride) in zip(params['blocks'], cfg):
        yb = jax.nn.relu(bn(conv1x3(x, p['w1'], stride), p['g1'], p['be1']))
        yb = bn(conv1x3(yb, p['w2'], 1), p['g2'], p['be2'])
        if use_1x1:
            xs = jnp.einsum('nwc,cd->nwd', x[:, ::stride, :], p['w3'],
                            precision=hp) + p['b3'].reshape(1, 1, -1)
        else:
            xs = x
        x = jax.nn.relu(yb + xs)

    pooled = jnp.mean(x, axis=1)
    return jnp.dot(pooled, params['lin_w'], precision=hp) + params['lin_b']


# ------------------------------------ main -------------------------------------

if __name__ == "__main__":
    key = jax.random.PRNGKey(0)
    kp, kx = jax.random.split(key)
    params, cfg = init_params(kp)
    packed = pack_params(params, cfg)

    # (B, L) signal; the torch forward reshapes it to (B, 1, 1, L).
    inputs = jax.random.normal(kx, (2, 64), jnp.float32)

    fwd = jax.jit(functools.partial(resnet_apt_4, packed, cfg))
    out = jax.block_until_ready(fwd(inputs))
    assert out.shape == (2, 5), out.shape
    assert bool(jnp.all(jnp.isfinite(out)))

    ref = _ref_forward(params, cfg, inputs)
    err = float(jnp.max(jnp.abs(out - ref)))
    assert err < 1e-2, f"mismatch vs plain-JAX reference: {err}"

    print("KERNEL_OK")
</pallas_src>

<mosaic_0001>
module attributes {stable_mosaic.version = 11 : i64} {
  func.func @kernel(%arg0: memref<128x1xf32, #tpu.memory_space<vmem>>, %arg1: memref<728x32xf32, #tpu.memory_space<vmem>>, %arg2: memref<40x32xf32, #tpu.memory_space<vmem>>, %arg3: memref<2x5xf32, #tpu.memory_space<vmem>>, %arg4: memref<128x128xf32, #tpu.memory_space<vmem>>) attributes {dimension_semantics = [], scalar_prefetch = 0 : i64, scratch_operands = 1 : i64, tpu.core_type = #tpu.core_type<tc>} {
    %c0 = arith.constant 0 : index
    %c0_0 = arith.constant 0 : index
    %0 = vector.load %arg0[%c0, %c0_0] : memref<128x1xf32, #tpu.memory_space<vmem>>, vector<128x1xf32>
    %1 = tpu.iota {dimensions = array<i32: 0>} : vector<128x1xi32>
    %c63_i32 = arith.constant 63 : i32
    %2 = vector.broadcast %c63_i32 : i32 to vector<128x1xi32>
    %3 = arith.andi %1, %2 : vector<128x1xi32>
    %c0_i32 = arith.constant 0 : i32
    %4 = vector.broadcast %c0_i32 : i32 to vector<128x1xi32>
    %5 = arith.cmpi eq, %3, %4 : vector<128x1xi32>
    %c1_i32 = arith.constant 1 : i32
    %6 = tpu.dynamic_rotate %0 by %c1_i32 dim 0 : vector<128x1xf32>, i32 -> vector<128x1xf32>
    %cst = arith.constant 0.000000e+00 : f32
    %7 = vector.broadcast %cst : f32 to vector<128x1xf32>
    %8 = arith.select %5, %7, %6 : vector<128x1xi1>, vector<128x1xf32>
    %c63_i32_1 = arith.constant 63 : i32
    %9 = vector.broadcast %c63_i32_1 : i32 to vector<128x1xi32>
    %10 = arith.cmpi eq, %3, %9 : vector<128x1xi32>
    %c127_i32 = arith.constant 127 : i32
    %11 = tpu.dynamic_rotate %0 by %c127_i32 dim 0 : vector<128x1xf32>, i32 -> vector<128x1xf32>
    %cst_2 = arith.constant 0.000000e+00 : f32
    %12 = vector.broadcast %cst_2 : f32 to vector<128x1xf32>
    %13 = arith.select %10, %12, %11 : vector<128x1xi1>, vector<128x1xf32>
    %14 = tpu.concatenate %8, %0, %13 in 1 : vector<128x1xf32>, vector<128x1xf32>, vector<128x1xf32> -> vector<128x3xf32>
    %c0_3 = arith.constant 0 : index
    %c0_4 = arith.constant 0 : index
    %15 = vector.load %arg1[%c0_3, %c0_4] : memref<728x32xf32, #tpu.memory_space<vmem>>, vector<3x4xf32>
    %cst_5 = arith.constant dense<0.000000e+00> : vector<128x4xf32>
    %16 = tpu.matmul %14, %15, %cst_5 {dimension_numbers = #tpu.dot_dimension_numbers<[1], [0], [0], [1], [0, 0, 1, 1], [], []>} : vector<128x3xf32>, vector<3x4xf32>, vector<128x4xf32> -> vector<128x4xf32>
    %17 = arith.mulf %16, %16 : vector<128x4xf32>
    %18 = tpu.concatenate %16, %17 in 1 : vector<128x4xf32>, vector<128x4xf32> -> vector<128x8xf32>
    %cst_6 = arith.constant dense<0.000000e+00> : vector<8xf32>
    %19 = vector.multi_reduction <add>, %18, %cst_6 [0] : vector<128x8xf32> to vector<8xf32>
    %20 = vector.shape_cast %19 : vector<8xf32> to vector<1x8xf32>
    %cst_7 = arith.constant 1.280000e+02 : f32
    %21 = vector.broadcast %cst_7 : f32 to vector<1x8xf32>
    %22 = arith.divf %20, %21 : vector<1x8xf32>
    %23 = vector.extract_strided_slice %22 {offsets = [0, 0], sizes = [1, 4], strides = [1, 1]} : vector<1x8xf32> to vector<1x4xf32>
    %24 = vector.extract_strided_slice %22 {offsets = [0, 4], sizes = [1, 4], strides = [1, 1]} : vector<1x8xf32> to vector<1x4xf32>
    %25 = arith.mulf %23, %23 : vector<1x4xf32>
    %26 = arith.subf %24, %25 : vector<1x4xf32>
    %c0_8 = arith.constant 0 : index
    %c0_9 = arith.constant 0 : index
    %27 = vector.load %arg2[%c0_8, %c0_9] : memref<40x32xf32, #tpu.memory_space<vmem>>, vector<1x4xf32>
    %cst_10 = arith.constant 9.99999974E-6 : f32
    %28 = vector.broadcast %cst_10 : f32 to vector<1x4xf32>
    %29 = arith.addf %26, %28 : vector<1x4xf32>
    %30 = math.rsqrt %29 : vector<1x4xf32>
    %31 = arith.mulf %27, %30 : vector<1x4xf32>
    %32 = vector.broadcast %31 : vector<1x4xf32> to vector<128x4xf32>
    %33 = arith.mulf %16, %32 : vector<128x4xf32>
    %c1 = arith.constant 1 : index
    %c0_11 = arith.constant 0 : index
    %34 = vector.load %arg2[%c1, %c0_11] : memref<40x32xf32, #tpu.memory_space<vmem>>, vector<1x4xf32>
    %35 = arith.mulf %23, %31 : vector<1x4xf32>
    %36 = arith.subf %34, %35 : vector<1x4xf32>
    %37 = vector.broadcast %36 : vector<1x4xf32> to vector<128x4xf32>
    %38 = arith.addf %33, %37 : vector<128x4xf32>
    %39 = tpu.iota {dimensions = array<i32: 0>} : vector<128x4xi32>
    %c63_i32_12 = arith.constant 63 : i32
    %40 = vector.broadcast %c63_i32_12 : i32 to vector<128x4xi32>
    %41 = arith.andi %39, %40 : vector<128x4xi32>
    %c0_i32_13 = arith.constant 0 : i32
    %42 = vector.broadcast %c0_i32_13 : i32 to vector<128x4xi32>
    %43 = arith.cmpi eq, %41, %42 : vector<128x4xi32>
    %c1_i32_14 = arith.constant 1 : i32
    %44 = tpu.dynamic_rotate %38 by %c1_i32_14 dim 0 : vector<128x4xf32>, i32 -> vector<128x4xf32>
    %45 = arith.select %43, %38, %44 : vector<128x4xi1>, vector<128x4xf32>
    %c63_i32_15 = arith.constant 63 : i32
    %46 = vector.broadcast %c63_i32_15 : i32 to vector<128x4xi32>
    %47 = arith.cmpi eq, %41, %46 : vector<128x4xi32>
    %c127_i32_16 = arith.constant 127 : i32
    %48 = tpu.dynamic_rotate %38 by %c127_i32_16 dim 0 : vector<128x4xf32>, i32 -> vector<128x4xf32>
    %49 = arith.select %47, %38, %48 : vector<128x4xi1>, vector<128x4xf32>
    %50 = arith.maximumf %45, %49 : vector<128x4xf32>
    %51 = arith.maximumf %50, %38 : vector<128x4xf32>
    %52 = tpu.iota {dimensions = array<i32: 0>} : vector<128x4xi32>
    %c63_i32_17 = arith.constant 63 : i32
    %53 = vector.broadcast %c63_i32_17 : i32 to vector<128x4xi32>
    %54 = arith.andi %52, %53 : vector<128x4xi32>
    %c0_i32_18 = arith.constant 0 : i32
    %55 = vector.broadcast %c0_i32_18 : i32 to vector<128x4xi32>
    %56 = arith.cmpi eq, %54, %55 : vector<128x4xi32>
    %c1_i32_19 = arith.constant 1 : i32
    %57 = tpu.dynamic_rotate %51 by %c1_i32_19 dim 0 : vector<128x4xf32>, i32 -> vector<128x4xf32>
    %cst_20 = arith.constant 0.000000e+00 : f32
    %58 = vector.broadcast %cst_20 : f32 to vector<128x4xf32>
    %59 = arith.select %56, %58, %57 : vector<128x4xi1>, vector<128x4xf32>
    %c63_i32_21 = arith.constant 63 : i32
    %60 = vector.broadcast %c63_i32_21 : i32 to vector<128x4xi32>
    %61 = arith.cmpi eq, %54, %60 : vector<128x4xi32>
    %c127_i32_22 = arith.constant 127 : i32
    %62 = tpu.dynamic_rotate %51 by %c127_i32_22 dim 0 : vector<128x4xf32>, i32 -> vector<128x4xf32>
    %cst_23 = arith.constant 0.000000e+00 : f32
    %63 = vector.broadcast %cst_23 : f32 to vector<128x4xf32>
    %64 = arith.select %61, %63, %62 : vector<128x4xi1>, vector<128x4xf32>
    %65 = tpu.concatenate %59, %51, %64 in 1 : vector<128x4xf32>, vector<128x4xf32>, vector<128x4xf32> -> vector<128x12xf32>
    %c8 = arith.constant 8 : index
    %c0_24 = arith.constant 0 : index
    %66 = vector.load %arg1[%c8, %c0_24] : memref<728x32xf32, #tpu.memory_space<vmem>>, vector<12x4xf32>
    %cst_25 = arith.constant dense<0.000000e+00> : vector<128x4xf32>
    %67 = tpu.matmul %65, %66, %cst_25 {dimension_numbers = #tpu.dot_dimension_numbers<[1], [0], [0], [1], [0, 0, 1, 1], [], []>} : vector<128x12xf32>, vector<12x4xf32>, vector<128x4xf32> -> vector<128x4xf32>
    %68 = arith.mulf %67, %67 : vector<128x4xf32>
    %69 = tpu.concatenate %67, %68 in 1 : vector<128x4xf32>, vector<128x4xf32> -> vector<128x8xf32>
    %cst_26 = arith.constant dense<0.000000e+00> : vector<8xf32>
    %70 = vector.multi_reduction <add>, %69, %cst_26 [0] : vector<128x8xf32> to vector<8xf32>
    %71 = vector.shape_cast %70 : vector<8xf32> to vector<1x8xf32>
    %cst_27 = arith.constant 1.280000e+02 : f32
    %72 = vector.broadcast %cst_27 : f32 to vector<1x8xf32>
    %73 = arith.divf %71, %72 : vector<1x8xf32>
    %74 = vector.extract_strided_slice %73 {offsets = [0, 0], sizes = [1, 4], strides = [1, 1]} : vector<1x8xf32> to vector<1x4xf32>
    %75 = vector.extract_strided_slice %73 {offsets = [0, 4], sizes = [1, 4], strides = [1, 1]} : vector<1x8xf32> to vector<1x4xf32>
    %76 = arith.mulf %74, %74 : vector<1x4xf32>
    %77 = arith.subf %75, %76 : vector<1x4xf32>
    %c2 = arith.constant 2 : index
    %c0_28 = arith.constant 0 : index
    %78 = vector.load %arg2[%c2, %c0_28] : memref<40x32xf32, #tpu.memory_space<vmem>>, vector<1x4xf32>
    %cst_29 = arith.constant 9.99999974E-6 : f32
    %79 = vector.broadcast %cst_29 : f32 to vector<1x4xf32>
    %80 = arith.addf %77, %79 : vector<1x4xf32>
    %81 = math.rsqrt %80 : vector<1x4xf32>
    %82 = arith.mulf %78, %81 : vector<1x4xf32>
    %83 = vector.broadcast %82 : vector<1x4xf32> to vector<128x4xf32>
    %84 = arith.mulf %67, %83 : vector<128x4xf32>
    %c3 = arith.constant 3 : index
    %c0_30 = arith.constant 0 : index
    %85 = vector.load %arg2[%c3, %c0_30] : memref<40x32xf32, #tpu.memory_space<vmem>>, vector<1x4xf32>
    %86 = arith.mulf %74, %82 : vector<1x4xf32>
    %87 = arith.subf %85, %86 : vector<1x4xf32>
    %88 = vector.broadcast %87 : vector<1x4xf32> to vector<128x4xf32>
    %89 = arith.addf %84, %88 : vector<128x4xf32>
    %cst_31 = arith.constant 0.000000e+00 : f32
    %90 = vector.broadcast %cst_31 : f32 to vector<128x4xf32>
    %91 = arith.maximumf %89, %90 : vector<128x4xf32>
    %92 = tpu.iota {dimensions = array<i32: 0>} : vector<128x4xi32>
    %c63_i32_32 = arith.constant 63 : i32
    %93 = vector.broadcast %c63_i32_32 : i32 to vector<128x4xi32>
    %94 = arith.andi %92, %93 : vector<128x4xi32>
    %c0_i32_33 = arith.constant 0 : i32
    %95 = vector.broadcast %c0_i32_33 : i32 to vector<128x4xi32>
    %96 = arith.cmpi eq, %94, %95 : vector<128x4xi32>
    %c1_i32_34 = arith.constant 1 : i32
    %97 = tpu.dynamic_rotate %91 by %c1_i32_34 dim 0 : vector<128x4xf32>, i32 -> vector<128x4xf32>
    %cst_35 = arith.constant 0.000000e+00 : f32
    %98 = vector.broadcast %cst_35 : f32 to vector<128x4xf32>
    %99 = arith.select %96, %98, %97 : vector<128x4xi1>, vector<128x4xf32>
    %c63_i32_36 = arith.constant 63 : i32
    %100 = vector.broadcast %c63_i32_36 : i32 to vector<128x4xi32>
    %101 = arith.cmpi eq, %94, %100 : vector<128x4xi32>
    %c127_i32_37 = arith.constant 127 : i32
    %102 = tpu.dynamic_rotate %91 by %c127_i32_37 dim 0 : vector<128x4xf32>, i32 -> vector<128x4xf32>
    %cst_38 = arith.constant 0.000000e+00 : f32
    %103 = vector.broadcast %cst_38 : f32 to vector<128x4xf32>
    %104 = arith.select %101, %103, %102 : vector<128x4xi1>, vector<128x4xf32>
    %105 = tpu.concatenate %99, %91, %104 in 1 : vector<128x4xf32>, vector<128x4xf32>, vector<128x4xf32> -> vector<128x12xf32>
    %c24 = arith.constant 24 : index
    %c0_39 = arith.constant 0 : index
    %106 = vector.load %arg1[%c24, %c0_39] : memref<728x32xf32, #tpu.memory_space<vmem>>, vector<12x4xf32>
    %cst_40 = arith.constant dense<0.000000e+00> : vector<128x4xf32>
    %107 = tpu.matmul %105, %106, %cst_40 {dimension_numbers = #tpu.dot_dimension_numbers<[1], [0], [0], [1], [0, 0, 1, 1], [], []>} : vector<128x12xf32>, vector<12x4xf32>, vector<128x4xf32> -> vector<128x4xf32>
    %108 = arith.mulf %107, %107 : vector<128x4xf32>
    %109 = tpu.concatenate %107, %108 in 1 : vector<128x4xf32>, vector<128x4xf32> -> vector<128x8xf32>
    %cst_41 = arith.constant dense<0.000000e+00> : vector<8xf32>
    %110 = vector.multi_reduction <add>, %109, %cst_41 [0] : vector<128x8xf32> to vector<8xf32>
    %111 = vector.shape_cast %110 : vector<8xf32> to vector<1x8xf32>
    %cst_42 = arith.constant 1.280000e+02 : f32
    %112 = vector.broadcast %cst_42 : f32 to vector<1x8xf32>
    %113 = arith.divf %111, %112 : vector<1x8xf32>
    %114 = vector.extract_strided_slice %113 {offsets = [0, 0], sizes = [1, 4], strides = [1, 1]} : vector<1x8xf32> to vector<1x4xf32>
    %115 = vector.extract_strided_slice %113 {offsets = [0, 4], sizes = [1, 4], strides = [1, 1]} : vector<1x8xf32> to vector<1x4xf32>
    %116 = arith.mulf %114, %114 : vector<1x4xf32>
    %117 = arith.subf %115, %116 : vector<1x4xf32>
    %c4 = arith.constant 4 : index
    %c0_43 = arith.constant 0 : index
    %118 = vector.load %arg2[%c4, %c0_43] : memref<40x32xf32, #tpu.memory_space<vmem>>, vector<1x4xf32>
    %cst_44 = arith.constant 9.99999974E-6 : f32
    %119 = vector.broadcast %cst_44 : f32 to vector<1x4xf32>
    %120 = arith.addf %117, %119 : vector<1x4xf32>
    %121 = math.rsqrt %120 : vector<1x4xf32>
    %122 = arith.mulf %118, %121 : vector<1x4xf32>
    %123 = vector.broadcast %122 : vector<1x4xf32> to vector<128x4xf32>
    %124 = arith.mulf %107, %123 : vector<128x4xf32>
    %c5 = arith.constant 5 : index
    %c0_45 = arith.constant 0 : index
    %125 = vector.load %arg2[%c5, %c0_45] : memref<40x32xf32, #tpu.memory_space<vmem>>, vector<1x4xf32>
    %126 = arith.mulf %114, %122 : vector<1x4xf32>
    %127 = arith.subf %125, %126 : vector<1x4xf32>
    %128 = vector.broadcast %127 : vector<1x4xf32> to vector<128x4xf32>
    %129 = arith.addf %124, %128 : vector<128x4xf32>
    %130 = arith.addf %129, %51 : vector<128x4xf32>
    %cst_46 = arith.constant 0.000000e+00 : f32
    %131 = vector.broadcast %cst_46 : f32 to vector<128x4xf32>
    %132 = arith.maximumf %130, %131 : vector<128x4xf32>
    %133 = tpu.iota {dimensions = array<i32: 0>} : vector<128x4xi32>
    %c63_i32_47 = arith.constant 63 : i32
    %134 = vector.broadcast %c63_i32_47 : i32 to vector<128x4xi32>
    %135 = arith.andi %133, %134 : vector<128x4xi32>
    %c0_i32_48 = arith.constant 0 : i32
    %136 = vector.broadcast %c0_i32_48 : i32 to vector<128x4xi32>
    %137 = arith.cmpi eq, %135, %136 : vector<128x4xi32>
    %c1_i32_49 = arith.constant 1 : i32
    %138 = tpu.dynamic_rotate %132 by %c1_i32_49 dim 0 : vector<128x4xf32>, i32 -> vector<128x4xf32>
    %cst_50 = arith.constant 0.000000e+00 : f32
    %139 = vector.broadcast %cst_50 : f32 to vector<128x4xf32>
    %140 = arith.select %137, %139, %138 : vector<128x4xi1>, vector<128x4xf32>
    %c63_i32_51 = arith.constant 63 : i32
    %141 = vector.broadcast %c63_i32_51 : i32 to vector<128x4xi32>
    %142 = arith.cmpi eq, %135, %141 : vector<128x4xi32>
    %c127_i32_52 = arith.constant 127 : i32
    %143 = tpu.dynamic_rotate %132 by %c127_i32_52 dim 0 : vector<128x4xf32>, i32 -> vector<128x4xf32>
    %cst_53 = arith.constant 0.000000e+00 : f32
    %144 = vector.broadcast %cst_53 : f32 to vector<128x4xf32>
    %145 = arith.select %142, %144, %143 : vector<128x4xi1>, vector<128x4xf32>
    %146 = tpu.concatenate %140, %132, %145 in 1 : vector<128x4xf32>, vector<128x4xf32>, vector<128x4xf32> -> vector<128x12xf32>
    %c40 = arith.constant 40 : index
    %c0_54 = arith.constant 0 : index
    %147 = vector.load %arg1[%c40, %c0_54] : memref<728x32xf32, #tpu.memory_space<vmem>>, vector<12x4xf32>
    %cst_55 = arith.constant dense<0.000000e+00> : vector<128x4xf32>
    %148 = tpu.matmul %146, %147, %cst_55 {dimension_numbers = #tpu.dot_dimension_numbers<[1], [0], [0], [1], [0, 0, 1, 1], [], []>} : vector<128x12xf32>, vector<12x4xf32>, vector<128x4xf32> -> vector<128x4xf32>
    %149 = arith.mulf %148, %148 : vector<128x4xf32>
    %150 = tpu.concatenate %148, %149 in 1 : vector<128x4xf32>, vector<128x4xf32> -> vector<128x8xf32>
    %cst_56 = arith.constant dense<0.000000e+00> : vector<8xf32>
    %151 = vector.multi_reduction <add>, %150, %cst_56 [0] : vector<128x8xf32> to vector<8xf32>
    %152 = vector.shape_cast %151 : vector<8xf32> to vector<1x8xf32>
    %cst_57 = arith.constant 1.280000e+02 : f32
    %153 = vector.broadcast %cst_57 : f32 to vector<1x8xf32>
    %154 = arith.divf %152, %153 : vector<1x8xf32>
    %155 = vector.extract_strided_slice %154 {offsets = [0, 0], sizes = [1, 4], strides = [1, 1]} : vector<1x8xf32> to vector<1x4xf32>
    %156 = vector.extract_strided_slice %154 {offsets = [0, 4], sizes = [1, 4], strides = [1, 1]} : vector<1x8xf32> to vector<1x4xf32>
    %157 = arith.mulf %155, %155 : vector<1x4xf32>
    %158 = arith.subf %156, %157 : vector<1x4xf32>
    %c6 = arith.constant 6 : index
    %c0_58 = arith.constant 0 : index
    %159 = vector.load %arg2[%c6, %c0_58] : memref<40x32xf32, #tpu.memory_space<vmem>>, vector<1x4xf32>
    %cst_59 = arith.constant 9.99999974E-6 : f32
    %160 = vector.broadcast %cst_59 : f32 to vector<1x4xf32>
    %161 = arith.addf %158, %160 : vector<1x4xf32>
    %162 = math.rsqrt %161 : vector<1x4xf32>
    %163 = arith.mulf %159, %162 : vector<1x4xf32>
    %164 = vector.broadcast %163 : vector<1x4xf32> to vector<128x4xf32>
    %165 = arith.mulf %148, %164 : vector<128x4xf32>
    %c7 = arith.constant 7 : index
    %c0_60 = arith.constant 0 : index
    %166 = vector.load %arg2[%c7, %c0_60] : memref<40x32xf32, #tpu.memory_space<vmem>>, vector<1x4xf32>
    %167 = arith.mulf %155, %163 : vector<1x4xf32>
    %168 = arith.subf %166, %167 : vector<1x4xf32>
    %169 = vector.broadcast %168 : vector<1x4xf32> to vector<128x4xf32>
    %170 = arith.addf %165, %169 : vector<128x4xf32>
    %cst_61 = arith.constant 0.000000e+00 : f32
    %171 = vector.broadcast %cst_61 : f32 to vector<128x4xf32>
    %172 = arith.maximumf %170, %171 : vector<128x4xf32>
    %173 = tpu.iota {dimensions = array<i32: 0>} : vector<128x4xi32>
    %c63_i32_62 = arith.constant 63 : i32
    %174 = vector.broadcast %c63_i32_62 : i32 to vector<128x4xi32>
    %175 = arith.andi %173, %174 : vector<128x4xi32>
    %c0_i32_63 = arith.constant 0 : i32
    %176 = vector.broadcast %c0_i32_63 : i32 to vector<128x4xi32>
    %177 = arith.cmpi eq, %175, %176 : vector<128x4xi32>
    %c1_i32_64 = arith.constant 1 : i32
    %178 = tpu.dynamic_rotate %172 by %c1_i32_64 dim 0 : vector<128x4xf32>, i32 -> vector<128x4xf32>
    %cst_65 = arith.constant 0.000000e+00 : f32
    %179 = vector.broadcast %cst_65 : f32 to vector<128x4xf32>
    %180 = arith.select %177, %179, %178 : vector<128x4xi1>, vector<128x4xf32>
    %c63_i32_66 = arith.constant 63 : i32
    %181 = vector.broadcast %c63_i32_66 : i32 to vector<128x4xi32>
    %182 = arith.cmpi eq, %175, %181 : vector<128x4xi32>
    %c127_i32_67 = arith.constant 127 : i32
    %183 = tpu.dynamic_rotate %172 by %c127_i32_67 dim 0 : vector<128x4xf32>, i32 -> vector<128x4xf32>
    %cst_68 = arith.constant 0.000000e+00 : f32
    %184 = vector.broadcast %cst_68 : f32 to vector<128x4xf32>
    %185 = arith.select %182, %184, %183 : vector<128x4xi1>, vector<128x4xf32>
    %186 = tpu.concatenate %180, %172, %185 in 1 : vector<128x4xf32>, vector<128x4xf32>, vector<128x4xf32> -> vector<128x12xf32>
    %c56 = arith.constant 56 : index
    %c0_69 = arith.constant 0 : index
    %187 = vector.load %arg1[%c56, %c0_69] : memref<728x32xf32, #tpu.memory_space<vmem>>, vector<12x4xf32>
    %cst_70 = arith.constant dense<0.000000e+00> : vector<128x4xf32>
    %188 = tpu.matmul %186, %187, %cst_70 {dimension_numbers = #tpu.dot_dimension_numbers<[1], [0], [0], [1], [0, 0, 1, 1], [], []>} : vector<128x12xf32>, vector<12x4xf32>, vector<128x4xf32> -> vector<128x4xf32>
    %189 = arith.mulf %188, %188 : vector<128x4xf32>
    %190 = tpu.concatenate %188, %189 in 1 : vector<128x4xf32>, vector<128x4xf32> -> vector<128x8xf32>
    %cst_71 = arith.constant dense<0.000000e+00> : vector<8xf32>
    %191 = vector.multi_reduction <add>, %190, %cst_71 [0] : vector<128x8xf32> to vector<8xf32>
    %192 = vector.shape_cast %191 : vector<8xf32> to vector<1x8xf32>
    %cst_72 = arith.constant 1.280000e+02 : f32
    %193 = vector.broadcast %cst_72 : f32 to vector<1x8xf32>
    %194 = arith.divf %192, %193 : vector<1x8xf32>
    %195 = vector.extract_strided_slice %194 {offsets = [0, 0], sizes = [1, 4], strides = [1, 1]} : vector<1x8xf32> to vector<1x4xf32>
    %196 = vector.extract_strided_slice %194 {offsets = [0, 4], sizes = [1, 4], strides = [1, 1]} : vector<1x8xf32> to vector<1x4xf32>
    %197 = arith.mulf %195, %195 : vector<1x4xf32>
    %198 = arith.subf %196, %197 : vector<1x4xf32>
    %c8_73 = arith.constant 8 : index
    %c0_74 = arith.constant 0 : index
    %199 = vector.load %arg2[%c8_73, %c0_74] : memref<40x32xf32, #tpu.memory_space<vmem>>, vector<1x4xf32>
    %cst_75 = arith.constant 9.99999974E-6 : f32
    %200 = vector.broadcast %cst_75 : f32 to vector<1x4xf32>
    %201 = arith.addf %198, %200 : vector<1x4xf32>
    %202 = math.rsqrt %201 : vector<1x4xf32>
    %203 = arith.mulf %199, %202 : vector<1x4xf32>
    %204 = vector.broadcast %203 : vector<1x4xf32> to vector<128x4xf32>
    %205 = arith.mulf %188, %204 : vector<128x4xf32>
    %c9 = arith.constant 9 : index
    %c0_76 = arith.constant 0 : index
    %206 = vector.load %arg2[%c9, %c0_76] : memref<40x32xf32, #tpu.memory_space<vmem>>, vector<1x4xf32>
    %207 = arith.mulf %195, %203 : vector<1x4xf32>
    %208 = arith.subf %206, %207 : vector<1x4xf32>
    %209 = vector.broadcast %208 : vector<1x4xf32> to vector<128x4xf32>
    %210 = arith.addf %205, %209 : vector<128x4xf32>
    %211 = arith.addf %210, %132 : vector<128x4xf32>
    %cst_77 = arith.constant 0.000000e+00 : f32
    %212 = vector.broadcast %cst_77 : f32 to vector<128x4xf32>
    %213 = arith.maximumf %211, %212 : vector<128x4xf32>
    %214 = tpu.iota {dimensions = array<i32: 0>} : vector<128x4xi32>
    %c63_i32_78 = arith.constant 63 : i32
    %215 = vector.broadcast %c63_i32_78 : i32 to vector<128x4xi32>
    %216 = arith.andi %214, %215 : vector<128x4xi32>
    %c0_i32_79 = arith.constant 0 : i32
    %217 = vector.broadcast %c0_i32_79 : i32 to vector<128x4xi32>
    %218 = arith.cmpi eq, %216, %217 : vector<128x4xi32>
    %c1_i32_80 = arith.constant 1 : i32
    %219 = tpu.dynamic_rotate %213 by %c1_i32_80 dim 0 : vector<128x4xf32>, i32 -> vector<128x4xf32>
    %cst_81 = arith.constant 0.000000e+00 : f32
    %220 = vector.broadcast %cst_81 : f32 to vector<128x4xf32>
    %221 = arith.select %218, %220, %219 : vector<128x4xi1>, vector<128x4xf32>
    %c63_i32_82 = arith.constant 63 : i32
    %222 = vector.broadcast %c63_i32_82 : i32 to vector<128x4xi32>
    %223 = arith.cmpi eq, %216, %222 : vector<128x4xi32>
    %c127_i32_83 = arith.constant 127 : i32
    %224 = tpu.dynamic_rotate %213 by %c127_i32_83 dim 0 : vector<128x4xf32>, i32 -> vector<128x4xf32>
    %cst_84 = arith.constant 0.000000e+00 : f32
    %225 = vector.broadcast %cst_84 : f32 to vector<128x4xf32>
    %226 = arith.select %223, %225, %224 : vector<128x4xi1>, vector<128x4xf32>
    %227 = tpu.concatenate %221, %213, %226 in 1 : vector<128x4xf32>, vector<128x4xf32>, vector<128x4xf32> -> vector<128x12xf32>
    %c0_85 = arith.constant 0 : index
    %c0_86 = arith.constant 0 : index
    %228 = vector.load %arg4[%c0_85, %c0_86] : memref<128x128xf32, #tpu.memory_space<vmem>>, vector<128x12xf32>
    tpu.vector_store %arg4[%c0_85, %c0_86], %227 {strides = array<i32>} : memref<128x128xf32, #tpu.memory_space<vmem>>, vector<128x12xf32>,
    %c0_87 = arith.constant 0 : index
    %c0_88 = arith.constant 0 : index
    %229 = tpu.strided_load %arg4[%c0_87, %c0_88] {strides = array<i32: 2, 1>} : memref<128x128xf32, #tpu.memory_space<vmem>>, vector<64x12xf32>
    %230 = vector.extract_strided_slice %229 {offsets = [0, 4], sizes = [64, 4], strides = [1, 1]} : vector<64x12xf32> to vector<64x4xf32>
    %c72 = arith.constant 72 : index
    %c0_89 = arith.constant 0 : index
    %231 = vector.load %arg1[%c72, %c0_89] : memref<728x32xf32, #tpu.memory_space<vmem>>, vector<12x8xf32>
    %cst_90 = arith.constant dense<0.000000e+00> : vector<64x8xf32>
    %232 = tpu.matmul %229, %231, %cst_90 {dimension_numbers = #tpu.dot_dimension_numbers<[1], [0], [0], [1], [0, 0, 1, 1], [], []>} : vector<64x12xf32>, vector<12x8xf32>, vector<64x8xf32> -> vector<64x8xf32>
    %233 = arith.mulf %232, %232 : vector<64x8xf32>
    %234 = tpu.concatenate %232, %233 in 1 : vector<64x8xf32>, vector<64x8xf32> -> vector<64x16xf32>
    %cst_91 = arith.constant dense<0.000000e+00> : vector<16xf32>
    %235 = vector.multi_reduction <add>, %234, %cst_91 [0] : vector<64x16xf32> to vector<16xf32>
    %236 = vector.shape_cast %235 : vector<16xf32> to vector<1x16xf32>
    %cst_92 = arith.constant 6.400000e+01 : f32
    %237 = vector.broadcast %cst_92 : f32 to vector<1x16xf32>
    %238 = arith.divf %236, %237 : vector<1x16xf32>
    %239 = vector.extract_strided_slice %238 {offsets = [0, 0], sizes = [1, 8], strides = [1, 1]} : vector<1x16xf32> to vector<1x8xf32>
    %240 = vector.extract_strided_slice %238 {offsets = [0, 8], sizes = [1, 8], strides = [1, 1]} : vector<1x16xf32> to vector<1x8xf32>
    %241 = arith.mulf %239, %239 : vector<1x8xf32>
    %242 = arith.subf %240, %241 : vector<1x8xf32>
    %c10 = arith.constant 10 : index
    %c0_93 = arith.constant 0 : index
    %243 = vector.load %arg2[%c10, %c0_93] : memref<40x32xf32, #tpu.memory_space<vmem>>, vector<1x8xf32>
    %cst_94 = arith.constant 9.99999974E-6 : f32
    %244 = vector.broadcast %cst_94 : f32 to vector<1x8xf32>
    %245 = arith.addf %242, %244 : vector<1x8xf32>
    %246 = math.rsqrt %245 : vector<1x8xf32>
    %247 = arith.mulf %243, %246 : vector<1x8xf32>
    %248 = vector.broadcast %247 : vector<1x8xf32> to vector<64x8xf32>
    %249 = arith.mulf %232, %248 : vector<64x8xf32>
    %c11 = arith.constant 11 : index
    %c0_95 = arith.constant 0 : index
    %250 = vector.load %arg2[%c11, %c0_95] : memref<40x32xf32, #tpu.memory_space<vmem>>, vector<1x8xf32>
    %251 = arith.mulf %239, %247 : vector<1x8xf32>
    %252 = arith.subf %250, %251 : vector<1x8xf32>
    %253 = vector.broadcast %252 : vector<1x8xf32> to vector<64x8xf32>
    %254 = arith.addf %249, %253 : vector<64x8xf32>
    %cst_96 = arith.constant 0.000000e+00 : f32
    %255 = vector.broadcast %cst_96 : f32 to vector<64x8xf32>
    %256 = arith.maximumf %254, %255 : vector<64x8xf32>
    %257 = tpu.iota {dimensions = array<i32: 0>} : vector<64x8xi32>
    %c31_i32 = arith.constant 31 : i32
    %258 = vector.broadcast %c31_i32 : i32 to vector<64x8xi32>
    %259 = arith.andi %257, %258 : vector<64x8xi32>
    %c0_i32_97 = arith.constant 0 : i32
    %260 = vector.broadcast %c0_i32_97 : i32 to vector<64x8xi32>
    %261 = arith.cmpi eq, %259, %260 : vector<64x8xi32>
    %c1_i32_98 = arith.constant 1 : i32
    %262 = tpu.dynamic_rotate %256 by %c1_i32_98 dim 0 : vector<64x8xf32>, i32 -> vector<64x8xf32>
    %cst_99 = arith.constant 0.000000e+00 : f32
    %263 = vector.broadcast %cst_99 : f32 to vector<64x8xf32>
    %264 = arith.select %261, %263, %262 : vector<64x8xi1>, vector<64x8xf32>
    %c31_i32_100 = arith.constant 31 : i32
    %265 = vector.broadcast %c31_i32_100 : i32 to vector<64x8xi32>
    %266 = arith.cmpi eq, %259, %265 : vector<64x8xi32>
    %c63_i32_101 = arith.constant 63 : i32
    %267 = tpu.dynamic_rotate %256 by %c63_i32_101 dim 0 : vector<64x8xf32>, i32 -> vector<64x8xf32>
    %cst_102 = arith.constant 0.000000e+00 : f32
    %268 = vector.broadcast %cst_102 : f32 to vector<64x8xf32>
    %269 = arith.select %266, %268, %267 : vector<64x8xi1>, vector<64x8xf32>
    %270 = tpu.concatenate %264, %256, %269 in 1 : vector<64x8xf32>, vector<64x8xf32>, vector<64x8xf32> -> vector<64x24xf32>
    %c88 = arith.constant 88 : index
    %c0_103 = arith.constant 0 : index
    %271 = vector.load %arg1[%c88, %c0_103] : memref<728x32xf32, #tpu.memory_space<vmem>>, vector<24x8xf32>
    %cst_104 = arith.constant dense<0.000000e+00> : vector<64x8xf32>
    %272 = tpu.matmul %270, %271, %cst_104 {dimension_numbers = #tpu.dot_dimension_numbers<[1], [0], [0], [1], [0, 0, 1, 1], [], []>} : vector<64x24xf32>, vector<24x8xf32>, vector<64x8xf32> -> vector<64x8xf32>
    %273 = arith.mulf %272, %272 : vector<64x8xf32>
    %274 = tpu.concatenate %272, %273 in 1 : vector<64x8xf32>, vector<64x8xf32> -> vector<64x16xf32>
    %cst_105 = arith.constant dense<0.000000e+00> : vector<16xf32>
    %275 = vector.multi_reduction <add>, %274, %cst_105 [0] : vector<64x16xf32> to vector<16xf32>
    %276 = vector.shape_cast %275 : vector<16xf32> to vector<1x16xf32>
    %cst_106 = arith.constant 6.400000e+01 : f32
    %277 = vector.broadcast %cst_106 : f32 to vector<1x16xf32>
    %278 = arith.divf %276, %277 : vector<1x16xf32>
    %279 = vector.extract_strided_slice %278 {offsets = [0, 0], sizes = [1, 8], strides = [1, 1]} : vector<1x16xf32> to vector<1x8xf32>
    %280 = vector.extract_strided_slice %278 {offsets = [0, 8], sizes = [1, 8], strides = [1, 1]} : vector<1x16xf32> to vector<1x8xf32>
    %281 = arith.mulf %279, %279 : vector<1x8xf32>
    %282 = arith.subf %280, %281 : vector<1x8xf32>
    %c12 = arith.constant 12 : index
    %c0_107 = arith.constant 0 : index
    %283 = vector.load %arg2[%c12, %c0_107] : memref<40x32xf32, #tpu.memory_space<vmem>>, vector<1x8xf32>
    %cst_108 = arith.constant 9.99999974E-6 : f32
    %284 = vector.broadcast %cst_108 : f32 to vector<1x8xf32>
    %285 = arith.addf %282, %284 : vector<1x8xf32>
    %286 = math.rsqrt %285 : vector<1x8xf32>
    %287 = arith.mulf %283, %286 : vector<1x8xf32>
    %288 = vector.broadcast %287 : vector<1x8xf32> to vector<64x8xf32>
    %289 = arith.mulf %272, %288 : vector<64x8xf32>
    %c13 = arith.constant 13 : index
    %c0_109 = arith.constant 0 : index
    %290 = vector.load %arg2[%c13, %c0_109] : memref<40x32xf32, #tpu.memory_space<vmem>>, vector<1x8xf32>
    %291 = arith.mulf %279, %287 : vector<1x8xf32>
    %292 = arith.subf %290, %291 : vector<1x8xf32>
    %293 = vector.broadcast %292 : vector<1x8xf32> to vector<64x8xf32>
    %294 = arith.addf %289, %293 : vector<64x8xf32>
    %c112 = arith.constant 112 : index
    %c0_110 = arith.constant 0 : index
    %295 = vector.load %arg1[%c112, %c0_110] : memref<728x32xf32, #tpu.memory_space<vmem>>, vector<4x8xf32>
    %cst_111 = arith.constant dense<0.000000e+00> : vector<64x8xf32>
    %296 = tpu.matmul %230, %295, %cst_111 {dimension_numbers = #tpu.dot_dimension_numbers<[1], [0], [0], [1], [0, 0, 1, 1], [], []>} : vector<64x4xf32>, vector<4x8xf32>, vector<64x8xf32> -> vector<64x8xf32>
    %c14 = arith.constant 14 : index
    %c0_112 = arith.constant 0 : index
    %297 = vector.load %arg2[%c14, %c0_112] : memref<40x32xf32, #tpu.memory_space<vmem>>, vector<1x8xf32>
    %298 = vector.broadcast %297 : vector<1x8xf32> to vector<64x8xf32>
    %299 = arith.addf %296, %298 : vector<64x8xf32>
    %300 = arith.addf %294, %299 : vector<64x8xf32>
    %cst_113 = arith.constant 0.000000e+00 : f32
    %301 = vector.broadcast %cst_113 : f32 to vector<64x8xf32>
    %302 = arith.maximumf %300, %301 : vector<64x8xf32>
    %303 = tpu.iota {dimensions = array<i32: 0>} : vector<64x8xi32>
    %c31_i32_114 = arith.constant 31 : i32
    %304 = vector.broadcast %c31_i32_114 : i32 to vector<64x8xi32>
    %305 = arith.andi %303, %304 : vector<64x8xi32>
    %c0_i32_115 = arith.constant 0 : i32
    %306 = vector.broadcast %c0_i32_115 : i32 to vector<64x8xi32>
    %307 = arith.cmpi eq, %305, %306 : vector<64x8xi32>
    %c1_i32_116 = arith.constant 1 : i32
    %308 = tpu.dynamic_rotate %302 by %c1_i32_116 dim 0 : vector<64x8xf32>, i32 -> vector<64x8xf32>
    %cst_117 = arith.constant 0.000000e+00 : f32
    %309 = vector.broadcast %cst_117 : f32 to vector<64x8xf32>
    %310 = arith.select %307, %309, %308 : vector<64x8xi1>, vector<64x8xf32>
    %c31_i32_118 = arith.constant 31 : i32
    %311 = vector.broadcast %c31_i32_118 : i32 to vector<64x8xi32>
    %312 = arith.cmpi eq, %305, %311 : vector<64x8xi32>
    %c63_i32_119 = arith.constant 63 : i32
    %313 = tpu.dynamic_rotate %302 by %c63_i32_119 dim 0 : vector<64x8xf32>, i32 -> vector<64x8xf32>
    %cst_120 = arith.constant 0.000000e+00 : f32
    %314 = vector.broadcast %cst_120 : f32 to vector<64x8xf32>
    %315 = arith.select %312, %314, %313 : vector<64x8xi1>, vector<64x8xf32>
    %316 = tpu.concatenate %310, %302, %315 in 1 : vector<64x8xf32>, vector<64x8xf32>, vector<64x8xf32> -> vector<64x24xf32>
    %c120 = arith.constant 120 : index
    %c0_121 = arith.constant 0 : index
    %317 = vector.load %arg1[%c120, %c0_121] : memref<728x32xf32, #tpu.memory_space<vmem>>, vector<24x8xf32>
    %cst_122 = arith.constant dense<0.000000e+00> : vector<64x8xf32>
    %318 = tpu.matmul %316, %317, %cst_122 {dimension_numbers = #tpu.dot_dimension_numbers<[1], [0], [0], [1], [0, 0, 1, 1], [], []>} : vector<64x24xf32>, vector<24x8xf32>, vector<64x8xf32> -> vector<64x8xf32>
    %319 = arith.mulf %318, %318 : vector<64x8xf32>
    %320 = tpu.concatenate %318, %319 in 1 : vector<64x8xf32>, vector<64x8xf32> -> vector<64x16xf32>
    %cst_123 = arith.constant dense<0.000000e+00> : vector<16xf32>
    %321 = vector.multi_reduction <add>, %320, %cst_123 [0] : vector<64x16xf32> to vector<16xf32>
    %322 = vector.shape_cast %321 : vector<16xf32> to vector<1x16xf32>
    %cst_124 = arith.constant 6.400000e+01 : f32
    %323 = vector.broadcast %cst_124 : f32 to vector<1x16xf32>
    %324 = arith.divf %322, %323 : vector<1x16xf32>
    %325 = vector.extract_strided_slice %324 {offsets = [0, 0], sizes = [1, 8], strides = [1, 1]} : vector<1x16xf32> to vector<1x8xf32>
    %326 = vector.extract_strided_slice %324 {offsets = [0, 8], sizes = [1, 8], strides = [1, 1]} : vector<1x16xf32> to vector<1x8xf32>
    %327 = arith.mulf %325, %325 : vector<1x8xf32>
    %328 = arith.subf %326, %327 : vector<1x8xf32>
    %c15 = arith.constant 15 : index
    %c0_125 = arith.constant 0 : index
    %329 = vector.load %arg2[%c15, %c0_125] : memref<40x32xf32, #tpu.memory_space<vmem>>, vector<1x8xf32>
    %cst_126 = arith.constant 9.99999974E-6 : f32
    %330 = vector.broadcast %cst_126 : f32 to vector<1x8xf32>
    %331 = arith.addf %328, %330 : vector<1x8xf32>
    %332 = math.rsqrt %331 : vector<1x8xf32>
    %333 = arith.mulf %329, %332 : vector<1x8xf32>
    %334 = vector.broadcast %333 : vector<1x8xf32> to vector<64x8xf32>
    %335 = arith.mulf %318, %334 : vector<64x8xf32>
    %c16 = arith.constant 16 : index
    %c0_127 = arith.constant 0 : index
    %336 = vector.load %arg2[%c16, %c0_127] : memref<40x32xf32, #tpu.memory_space<vmem>>, vector<1x8xf32>
    %337 = arith.mulf %325, %333 : vector<1x8xf32>
    %338 = arith.subf %336, %337 : vector<1x8xf32>
    %339 = vector.broadcast %338 : vector<1x8xf32> to vector<64x8xf32>
    %340 = arith.addf %335, %339 : vector<64x8xf32>
    %cst_128 = arith.constant 0.000000e+00 : f32
    %341 = vector.broadcast %cst_128 : f32 to vector<64x8xf32>
    %342 = arith.maximumf %340, %341 : vector<64x8xf32>
    %343 = tpu.iota {dimensions = array<i32: 0>} : vector<64x8xi32>
    %c31_i32_129 = arith.constant 31 : i32
    %344 = vector.broadcast %c31_i32_129 : i32 to vector<64x8xi32>
    %345 = arith.andi %343, %344 : vector<64x8xi32>
    %c0_i32_130 = arith.constant 0 : i32
    %346 = vector.broadcast %c0_i32_130 : i32 to vector<64x8xi32>
    %347 = arith.cmpi eq, %345, %346 : vector<64x8xi32>
    %c1_i32_131 = arith.constant 1 : i32
    %348 = tpu.dynamic_rotate %342 by %c1_i32_131 dim 0 : vector<64x8xf32>, i32 -> vector<64x8xf32>
    %cst_132 = arith.constant 0.000000e+00 : f32
    %349 = vector.broadcast %cst_132 : f32 to vector<64x8xf32>
    %350 = arith.select %347, %349, %348 : vector<64x8xi1>, vector<64x8xf32>
    %c31_i32_133 = arith.constant 31 : i32
    %351 = vector.broadcast %c31_i32_133 : i32 to vector<64x8xi32>
    %352 = arith.cmpi eq, %345, %351 : vector<64x8xi32>
    %c63_i32_134 = arith.constant 63 : i32
    %353 = tpu.dynamic_rotate %342 by %c63_i32_134 dim 0 : vector<64x8xf32>, i32 -> vector<64x8xf32>
    %cst_135 = arith.constant 0.000000e+00 : f32
    %354 = vector.broadcast %cst_135 : f32 to vector<64x8xf32>
    %355 = arith.select %352, %354, %353 : vector<64x8xi1>, vector<64x8xf32>
    %356 = tpu.concatenate %350, %342, %355 in 1 : vector<64x8xf32>, vector<64x8xf32>, vector<64x8xf32> -> vector<64x24xf32>
    %c144 = arith.constant 144 : index
    %c0_136 = arith.constant 0 : index
    %357 = vector.load %arg1[%c144, %c0_136] : memref<728x32xf32, #tpu.memory_space<vmem>>, vector<24x8xf32>
    %cst_137 = arith.constant dense<0.000000e+00> : vector<64x8xf32>
    %358 = tpu.matmul %356, %357, %cst_137 {dimension_numbers = #tpu.dot_dimension_numbers<[1], [0], [0], [1], [0, 0, 1, 1], [], []>} : vector<64x24xf32>, vector<24x8xf32>, vector<64x8xf32> -> vector<64x8xf32>
    %359 = arith.mulf %358, %358 : vector<64x8xf32>
    %360 = tpu.concatenate %358, %359 in 1 : vector<64x8xf32>, vector<64x8xf32> -> vector<64x16xf32>
    %cst_138 = arith.constant dense<0.000000e+00> : vector<16xf32>
    %361 = vector.multi_reduction <add>, %360, %cst_138 [0] : vector<64x16xf32> to vector<16xf32>
    %362 = vector.shape_cast %361 : vector<16xf32> to vector<1x16xf32>
    %cst_139 = arith.constant 6.400000e+01 : f32
    %363 = vector.broadcast %cst_139 : f32 to vector<1x16xf32>
    %364 = arith.divf %362, %363 : vector<1x16xf32>
    %365 = vector.extract_strided_slice %364 {offsets = [0, 0], sizes = [1, 8], strides = [1, 1]} : vector<1x16xf32> to vector<1x8xf32>
    %366 = vector.extract_strided_slice %364 {offsets = [0, 8], sizes = [1, 8], strides = [1, 1]} : vector<1x16xf32> to vector<1x8xf32>
    %367 = arith.mulf %365, %365 : vector<1x8xf32>
    %368 = arith.subf %366, %367 : vector<1x8xf32>
    %c17 = arith.constant 17 : index
    %c0_140 = arith.constant 0 : index
    %369 = vector.load %arg2[%c17, %c0_140] : memref<40x32xf32, #tpu.memory_space<vmem>>, vector<1x8xf32>
    %cst_141 = arith.constant 9.99999974E-6 : f32
    %370 = vector.broadcast %cst_141 : f32 to vector<1x8xf32>
    %371 = arith.addf %368, %370 : vector<1x8xf32>
    %372 = math.rsqrt %371 : vector<1x8xf32>
    %373 = arith.mulf %369, %372 : vector<1x8xf32>
    %374 = vector.broadcast %373 : vector<1x8xf32> to vector<64x8xf32>
    %375 = arith.mulf %358, %374 : vector<64x8xf32>
    %c18 = arith.constant 18 : index
    %c0_142 = arith.constant 0 : index
    %376 = vector.load %arg2[%c18, %c0_142] : memref<40x32xf32, #tpu.memory_space<vmem>>, vector<1x8xf32>
    %377 = arith.mulf %365, %373 : vector<1x8xf32>
    %378 = arith.subf %376, %377 : vector<1x8xf32>
    %379 = vector.broadcast %378 : vector<1x8xf32> to vector<64x8xf32>
    %380 = arith.addf %375, %379 : vector<64x8xf32>
    %381 = arith.addf %380, %302 : vector<64x8xf32>
    %cst_143 = arith.constant 0.000000e+00 : f32
    %382 = vector.broadcast %cst_143 : f32 to vector<64x8xf32>
    %383 = arith.maximumf %381, %382 : vector<64x8xf32>
    %384 = tpu.iota {dimensions = array<i32: 0>} : vector<64x8xi32>
    %c31_i32_144 = arith.constant 31 : i32
    %385 = vector.broadcast %c31_i32_144 : i32 to vector<64x8xi32>
    %386 = arith.andi %384, %385 : vector<64x8xi32>
    %c0_i32_145 = arith.constant 0 : i32
    %387 = vector.broadcast %c0_i32_145 : i32 to vector<64x8xi32>
    %388 = arith.cmpi eq, %386, %387 : vector<64x8xi32>
    %c1_i32_146 = arith.constant 1 : i32
    %389 = tpu.dynamic_rotate %383 by %c1_i32_146 dim 0 : vector<64x8xf32>, i32 -> vector<64x8xf32>
    %cst_147 = arith.constant 0.000000e+00 : f32
    %390 = vector.broadcast %cst_147 : f32 to vector<64x8xf32>
    %391 = arith.select %388, %390, %389 : vector<64x8xi1>, vector<64x8xf32>
    %c31_i32_148 = arith.constant 31 : i32
    %392 = vector.broadcast %c31_i32_148 : i32 to vector<64x8xi32>
    %393 = arith.cmpi eq, %386, %392 : vector<64x8xi32>
    %c63_i32_149 = arith.constant 63 : i32
    %394 = tpu.dynamic_rotate %383 by %c63_i32_149 dim 0 : vector<64x8xf32>, i32 -> vector<64x8xf32>
    %cst_150 = arith.constant 0.000000e+00 : f32
    %395 = vector.broadcast %cst_150 : f32 to vector<64x8xf32>
    %396 = arith.select %393, %395, %394 : vector<64x8xi1>, vector<64x8xf32>
    %397 = tpu.concatenate %391, %383, %396 in 1 : vector<64x8xf32>, vector<64x8xf32>, vector<64x8xf32> -> vector<64x24xf32>
    %c0_151 = arith.constant 0 : index
    %c0_152 = arith.constant 0 : index
    %398 = vector.load %arg4[%c0_151, %c0_152] : memref<128x128xf32, #tpu.memory_space<vmem>>, vector<64x24xf32>
    tpu.vector_store %arg4[%c0_151, %c0_152], %397 {strides = array<i32>} : memref<128x128xf32, #tpu.memory_space<vmem>>, vector<64x24xf32>,
    %c0_153 = arith.constant 0 : index
    %c0_154 = arith.constant 0 : index
    %399 = tpu.strided_load %arg4[%c0_153, %c0_154] {strides = array<i32: 2, 1>} : memref<128x128xf32, #tpu.memory_space<vmem>>, vector<32x24xf32>
    %400 = vector.extract_strided_slice %399 {offsets = [0, 8], sizes = [32, 8], strides = [1, 1]} : vector<32x24xf32> to vector<32x8xf32>
    %c168 = arith.constant 168 : index
    %c0_155 = arith.constant 0 : index
    %401 = vector.load %arg1[%c168, %c0_155] : memref<728x32xf32, #tpu.memory_space<vmem>>, vector<24x16xf32>
    %cst_156 = arith.constant dense<0.000000e+00> : vector<32x16xf32>
    %402 = tpu.matmul %399, %401, %cst_156 {dimension_numbers = #tpu.dot_dimension_numbers<[1], [0], [0], [1], [0, 0, 1, 1], [], []>} : vector<32x24xf32>, vector<24x16xf32>, vector<32x16xf32> -> vector<32x16xf32>
    %403 = arith.mulf %402, %402 : vector<32x16xf32>
    %404 = tpu.concatenate %402, %403 in 1 : vector<32x16xf32>, vector<32x16xf32> -> vector<32x32xf32>
    %cst_157 = arith.constant dense<0.000000e+00> : vector<32xf32>
    %405 = vector.multi_reduction <add>, %404, %cst_157 [0] : vector<32x32xf32> to vector<32xf32>
    %406 = vector.shape_cast %405 : vector<32xf32> to vector<1x32xf32>
    %cst_158 = arith.constant 3.200000e+01 : f32
    %407 = vector.broadcast %cst_158 : f32 to vector<1x32xf32>
    %408 = arith.divf %406, %407 : vector<1x32xf32>
    %409 = vector.extract_strided_slice %408 {offsets = [0, 0], sizes = [1, 16], strides = [1, 1]} : vector<1x32xf32> to vector<1x16xf32>
    %410 = vector.extract_strided_slice %408 {offsets = [0, 16], sizes = [1, 16], strides = [1, 1]} : vector<1x32xf32> to vector<1x16xf32>
    %411 = arith.mulf %409, %409 : vector<1x16xf32>
    %412 = arith.subf %410, %411 : vector<1x16xf32>
    %c19 = arith.constant 19 : index
    %c0_159 = arith.constant 0 : index
    %413 = vector.load %arg2[%c19, %c0_159] : memref<40x32xf32, #tpu.memory_space<vmem>>, vector<1x16xf32>
    %cst_160 = arith.constant 9.99999974E-6 : f32
    %414 = vector.broadcast %cst_160 : f32 to vector<1x16xf32>
    %415 = arith.addf %412, %414 : vector<1x16xf32>
    %416 = math.rsqrt %415 : vector<1x16xf32>
    %417 = arith.mulf %413, %416 : vector<1x16xf32>
    %418 = vector.broadcast %417 : vector<1x16xf32> to vector<32x16xf32>
    %419 = arith.mulf %402, %418 : vector<32x16xf32>
    %c20 = arith.constant 20 : index
    %c0_161 = arith.constant 0 : index
    %420 = vector.load %arg2[%c20, %c0_161] : memref<40x32xf32, #tpu.memory_space<vmem>>, vector<1x16xf32>
    %421 = arith.mulf %409, %417 : vector<1x16xf32>
    %422 = arith.subf %420, %421 : vector<1x16xf32>
    %423 = vector.broadcast %422 : vector<1x16xf32> to vector<32x16xf32>
    %424 = arith.addf %419, %423 : vector<32x16xf32>
    %cst_162 = arith.constant 0.000000e+00 : f32
    %425 = vector.broadcast %cst_162 : f32 to vector<32x16xf32>
    %426 = arith.maximumf %424, %425 : vector<32x16xf32>
    %427 = tpu.iota {dimensions = array<i32: 0>} : vector<32x16xi32>
    %c15_i32 = arith.constant 15 : i32
    %428 = vector.broadcast %c15_i32 : i32 to vector<32x16xi32>
    %429 = arith.andi %427, %428 : vector<32x16xi32>
    %c0_i32_163 = arith.constant 0 : i32
    %430 = vector.broadcast %c0_i32_163 : i32 to vector<32x16xi32>
    %431 = arith.cmpi eq, %429, %430 : vector<32x16xi32>
    %c1_i32_164 = arith.constant 1 : i32
    %432 = tpu.dynamic_rotate %426 by %c1_i32_164 dim 0 : vector<32x16xf32>, i32 -> vector<32x16xf32>
    %cst_165 = arith.constant 0.000000e+00 : f32
    %433 = vector.broadcast %cst_165 : f32 to vector<32x16xf32>
    %434 = arith.select %431, %433, %432 : vector<32x16xi1>, vector<32x16xf32>
    %c15_i32_166 = arith.constant 15 : i32
    %435 = vector.broadcast %c15_i32_166 : i32 to vector<32x16xi32>
    %436 = arith.cmpi eq, %429, %435 : vector<32x16xi32>
    %c31_i32_167 = arith.constant 31 : i32
    %437 = tpu.dynamic_rotate %426 by %c31_i32_167 dim 0 : vector<32x16xf32>, i32 -> vector<32x16xf32>
    %cst_168 = arith.constant 0.000000e+00 : f32
    %438 = vector.broadcast %cst_168 : f32 to vector<32x16xf32>
    %439 = arith.select %436, %438, %437 : vector<32x16xi1>, vector<32x16xf32>
    %440 = tpu.concatenate %434, %426, %439 in 1 : vector<32x16xf32>, vector<32x16xf32>, vector<32x16xf32> -> vector<32x48xf32>
    %c192 = arith.constant 192 : index
    %c0_169 = arith.constant 0 : index
    %441 = vector.load %arg1[%c192, %c0_169] : memref<728x32xf32, #tpu.memory_space<vmem>>, vector<48x16xf32>
    %cst_170 = arith.constant dense<0.000000e+00> : vector<32x16xf32>
    %442 = tpu.matmul %440, %441, %cst_170 {dimension_numbers = #tpu.dot_dimension_numbers<[1], [0], [0], [1], [0, 0, 1, 1], [], []>} : vector<32x48xf32>, vector<48x16xf32>, vector<32x16xf32> -> vector<32x16xf32>
    %443 = arith.mulf %442, %442 : vector<32x16xf32>
    %444 = tpu.concatenate %442, %443 in 1 : vector<32x16xf32>, vector<32x16xf32> -> vector<32x32xf32>
    %cst_171 = arith.constant dense<0.000000e+00> : vector<32xf32>
    %445 = vector.multi_reduction <add>, %444, %cst_171 [0] : vector<32x32xf32> to vector<32xf32>
    %446 = vector.shape_cast %445 : vector<32xf32> to vector<1x32xf32>
    %cst_172 = arith.constant 3.200000e+01 : f32
    %447 = vector.broadcast %cst_172 : f32 to vector<1x32xf32>
    %448 = arith.divf %446, %447 : vector<1x32xf32>
    %449 = vector.extract_strided_slice %448 {offsets = [0, 0], sizes = [1, 16], strides = [1, 1]} : vector<1x32xf32> to vector<1x16xf32>
    %450 = vector.extract_strided_slice %448 {offsets = [0, 16], sizes = [1, 16], strides = [1, 1]} : vector<1x32xf32> to vector<1x16xf32>
    %451 = arith.mulf %449, %449 : vector<1x16xf32>
    %452 = arith.subf %450, %451 : vector<1x16xf32>
    %c21 = arith.constant 21 : index
    %c0_173 = arith.constant 0 : index
    %453 = vector.load %arg2[%c21, %c0_173] : memref<40x32xf32, #tpu.memory_space<vmem>>, vector<1x16xf32>
    %cst_174 = arith.constant 9.99999974E-6 : f32
    %454 = vector.broadcast %cst_174 : f32 to vector<1x16xf32>
    %455 = arith.addf %452, %454 : vector<1x16xf32>
    %456 = math.rsqrt %455 : vector<1x16xf32>
    %457 = arith.mulf %453, %456 : vector<1x16xf32>
    %458 = vector.broadcast %457 : vector<1x16xf32> to vector<32x16xf32>
    %459 = arith.mulf %442, %458 : vector<32x16xf32>
    %c22 = arith.constant 22 : index
    %c0_175 = arith.constant 0 : index
    %460 = vector.load %arg2[%c22, %c0_175] : memref<40x32xf32, #tpu.memory_space<vmem>>, vector<1x16xf32>
    %461 = arith.mulf %449, %457 : vector<1x16xf32>
    %462 = arith.subf %460, %461 : vector<1x16xf32>
    %463 = vector.broadcast %462 : vector<1x16xf32> to vector<32x16xf32>
    %464 = arith.addf %459, %463 : vector<32x16xf32>
    %c240 = arith.constant 240 : index
    %c0_176 = arith.constant 0 : index
    %465 = vector.load %arg1[%c240, %c0_176] : memref<728x32xf32, #tpu.memory_space<vmem>>, vector<8x16xf32>
    %cst_177 = arith.constant dense<0.000000e+00> : vector<32x16xf32>
    %466 = tpu.matmul %400, %465, %cst_177 {dimension_numbers = #tpu.dot_dimension_numbers<[1], [0], [0], [1], [0, 0, 1, 1], [], []>} : vector<32x8xf32>, vector<8x16xf32>, vector<32x16xf32> -> vector<32x16xf32>
    %c23 = arith.constant 23 : index
    %c0_178 = arith.constant 0 : index
    %467 = vector.load %arg2[%c23, %c0_178] : memref<40x32xf32, #tpu.memory_space<vmem>>, vector<1x16xf32>
    %468 = vector.broadcast %467 : vector<1x16xf32> to vector<32x16xf32>
    %469 = arith.addf %466, %468 : vector<32x16xf32>
    %470 = arith.addf %464, %469 : vector<32x16xf32>
    %cst_179 = arith.constant 0.000000e+00 : f32
    %471 = vector.broadcast %cst_179 : f32 to vector<32x16xf32>
    %472 = arith.maximumf %470, %471 : vector<32x16xf32>
    %473 = tpu.iota {dimensions = array<i32: 0>} : vector<32x16xi32>
    %c15_i32_180 = arith.constant 15 : i32
    %474 = vector.broadcast %c15_i32_180 : i32 to vector<32x16xi32>
    %475 = arith.andi %473, %474 : vector<32x16xi32>
    %c0_i32_181 = arith.constant 0 : i32
    %476 = vector.broadcast %c0_i32_181 : i32 to vector<32x16xi32>
    %477 = arith.cmpi eq, %475, %476 : vector<32x16xi32>
    %c1_i32_182 = arith.constant 1 : i32
    %478 = tpu.dynamic_rotate %472 by %c1_i32_182 dim 0 : vector<32x16xf32>, i32 -> vector<32x16xf32>
    %cst_183 = arith.constant 0.000000e+00 : f32
    %479 = vector.broadcast %cst_183 : f32 to vector<32x16xf32>
    %480 = arith.select %477, %479, %478 : vector<32x16xi1>, vector<32x16xf32>
    %c15_i32_184 = arith.constant 15 : i32
    %481 = vector.broadcast %c15_i32_184 : i32 to vector<32x16xi32>
    %482 = arith.cmpi eq, %475, %481 : vector<32x16xi32>
    %c31_i32_185 = arith.constant 31 : i32
    %483 = tpu.dynamic_rotate %472 by %c31_i32_185 dim 0 : vector<32x16xf32>, i32 -> vector<32x16xf32>
    %cst_186 = arith.constant 0.000000e+00 : f32
    %484 = vector.broadcast %cst_186 : f32 to vector<32x16xf32>
    %485 = arith.select %482, %484, %483 : vector<32x16xi1>, vector<32x16xf32>
    %486 = tpu.concatenate %480, %472, %485 in 1 : vector<32x16xf32>, vector<32x16xf32>, vector<32x16xf32> -> vector<32x48xf32>
    %c248 = arith.constant 248 : index
    %c0_187 = arith.constant 0 : index
    %487 = vector.load %arg1[%c248, %c0_187] : memref<728x32xf32, #tpu.memory_space<vmem>>, vector<48x16xf32>
    %cst_188 = arith.constant dense<0.000000e+00> : vector<32x16xf32>
    %488 = tpu.matmul %486, %487, %cst_188 {dimension_numbers = #tpu.dot_dimension_numbers<[1], [0], [0], [1], [0, 0, 1, 1], [], []>} : vector<32x48xf32>, vector<48x16xf32>, vector<32x16xf32> -> vector<32x16xf32>
    %489 = arith.mulf %488, %488 : vector<32x16xf32>
    %490 = tpu.concatenate %488, %489 in 1 : vector<32x16xf32>, vector<32x16xf32> -> vector<32x32xf32>
    %cst_189 = arith.constant dense<0.000000e+00> : vector<32xf32>
    %491 = vector.multi_reduction <add>, %490, %cst_189 [0] : vector<32x32xf32> to vector<32xf32>
    %492 = vector.shape_cast %491 : vector<32xf32> to vector<1x32xf32>
    %cst_190 = arith.constant 3.200000e+01 : f32
    %493 = vector.broadcast %cst_190 : f32 to vector<1x32xf32>
    %494 = arith.divf %492, %493 : vector<1x32xf32>
    %495 = vector.extract_strided_slice %494 {offsets = [0, 0], sizes = [1, 16], strides = [1, 1]} : vector<1x32xf32> to vector<1x16xf32>
    %496 = vector.extract_strided_slice %494 {offsets = [0, 16], sizes = [1, 16], strides = [1, 1]} : vector<1x32xf32> to vector<1x16xf32>
    %497 = arith.mulf %495, %495 : vector<1x16xf32>
    %498 = arith.subf %496, %497 : vector<1x16xf32>
    %c24_191 = arith.constant 24 : index
    %c0_192 = arith.constant 0 : index
    %499 = vector.load %arg2[%c24_191, %c0_192] : memref<40x32xf32, #tpu.memory_space<vmem>>, vector<1x16xf32>
    %cst_193 = arith.constant 9.99999974E-6 : f32
    %500 = vector.broadcast %cst_193 : f32 to vector<1x16xf32>
    %501 = arith.addf %498, %500 : vector<1x16xf32>
    %502 = math.rsqrt %501 : vector<1x16xf32>
    %503 = arith.mulf %499, %502 : vector<1x16xf32>
    %504 = vector.broadcast %503 : vector<1x16xf32> to vector<32x16xf32>
    %505 = arith.mulf %488, %504 : vector<32x16xf32>
    %c25 = arith.constant 25 : index
    %c0_194 = arith.constant 0 : index
    %506 = vector.load %arg2[%c25, %c0_194] : memref<40x32xf32, #tpu.memory_space<vmem>>, vector<1x16xf32>
    %507 = arith.mulf %495, %503 : vector<1x16xf32>
    %508 = arith.subf %506, %507 : vector<1x16xf32>
    %509 = vector.broadcast %508 : vector<1x16xf32> to vector<32x16xf32>
    %510 = arith.addf %505, %509 : vector<32x16xf32>
    %cst_195 = arith.constant 0.000000e+00 : f32
    %511 = vector.broadcast %cst_195 : f32 to vector<32x16xf32>
    %512 = arith.maximumf %510, %511 : vector<32x16xf32>
    %513 = tpu.iota {dimensions = array<i32: 0>} : vector<32x16xi32>
    %c15_i32_196 = arith.constant 15 : i32
    %514 = vector.broadcast %c15_i32_196 : i32 to vector<32x16xi32>
    %515 = arith.andi %513, %514 : vector<32x16xi32>
    %c0_i32_197 = arith.constant 0 : i32
    %516 = vector.broadcast %c0_i32_197 : i32 to vector<32x16xi32>
    %517 = arith.cmpi eq, %515, %516 : vector<32x16xi32>
    %c1_i32_198 = arith.constant 1 : i32
    %518 = tpu.dynamic_rotate %512 by %c1_i32_198 dim 0 : vector<32x16xf32>, i32 -> vector<32x16xf32>
    %cst_199 = arith.constant 0.000000e+00 : f32
    %519 = vector.broadcast %cst_199 : f32 to vector<32x16xf32>
    %520 = arith.select %517, %519, %518 : vector<32x16xi1>, vector<32x16xf32>
    %c15_i32_200 = arith.constant 15 : i32
    %521 = vector.broadcast %c15_i32_200 : i32 to vector<32x16xi32>
    %522 = arith.cmpi eq, %515, %521 : vector<32x16xi32>
    %c31_i32_201 = arith.constant 31 : i32
    %523 = tpu.dynamic_rotate %512 by %c31_i32_201 dim 0 : vector<32x16xf32>, i32 -> vector<32x16xf32>
    %cst_202 = arith.constant 0.000000e+00 : f32
    %524 = vector.broadcast %cst_202 : f32 to vector<32x16xf32>
    %525 = arith.select %522, %524, %523 : vector<32x16xi1>, vector<32x16xf32>
    %526 = tpu.concatenate %520, %512, %525 in 1 : vector<32x16xf32>, vector<32x16xf32>, vector<32x16xf32> -> vector<32x48xf32>
    %c296 = arith.constant 296 : index
    %c0_203 = arith.constant 0 : index
    %527 = vector.load %arg1[%c296, %c0_203] : memref<728x32xf32, #tpu.memory_space<vmem>>, vector<48x16xf32>
    %cst_204 = arith.constant dense<0.000000e+00> : vector<32x16xf32>
    %528 = tpu.matmul %526, %527, %cst_204 {dimension_numbers = #tpu.dot_dimension_numbers<[1], [0], [0], [1], [0, 0, 1, 1], [], []>} : vector<32x48xf32>, vector<48x16xf32>, vector<32x16xf32> -> vector<32x16xf32>
    %529 = arith.mulf %528, %528 : vector<32x16xf32>
    %530 = tpu.concatenate %528, %529 in 1 : vector<32x16xf32>, vector<32x16xf32> -> vector<32x32xf32>
    %cst_205 = arith.constant dense<0.000000e+00> : vector<32xf32>
    %531 = vector.multi_reduction <add>, %530, %cst_205 [0] : vector<32x32xf32> to vector<32xf32>
    %532 = vector.shape_cast %531 : vector<32xf32> to vector<1x32xf32>
    %cst_206 = arith.constant 3.200000e+01 : f32
    %533 = vector.broadcast %cst_206 : f32 to vector<1x32xf32>
    %534 = arith.divf %532, %533 : vector<1x32xf32>
    %535 = vector.extract_strided_slice %534 {offsets = [0, 0], sizes = [1, 16], strides = [1, 1]} : vector<1x32xf32> to vector<1x16xf32>
    %536 = vector.extract_strided_slice %534 {offsets = [0, 16], sizes = [1, 16], strides = [1, 1]} : vector<1x32xf32> to vector<1x16xf32>
    %537 = arith.mulf %535, %535 : vector<1x16xf32>
    %538 = arith.subf %536, %537 : vector<1x16xf32>
    %c26 = arith.constant 26 : index
    %c0_207 = arith.constant 0 : index
    %539 = vector.load %arg2[%c26, %c0_207] : memref<40x32xf32, #tpu.memory_space<vmem>>, vector<1x16xf32>
    %cst_208 = arith.constant 9.99999974E-6 : f32
    %540 = vector.broadcast %cst_208 : f32 to vector<1x16xf32>
    %541 = arith.addf %538, %540 : vector<1x16xf32>
    %542 = math.rsqrt %541 : vector<1x16xf32>
    %543 = arith.mulf %539, %542 : vector<1x16xf32>
    %544 = vector.broadcast %543 : vector<1x16xf32> to vector<32x16xf32>
    %545 = arith.mulf %528, %544 : vector<32x16xf32>
    %c27 = arith.constant 27 : index
    %c0_209 = arith.constant 0 : index
    %546 = vector.load %arg2[%c27, %c0_209] : memref<40x32xf32, #tpu.memory_space<vmem>>, vector<1x16xf32>
    %547 = arith.mulf %535, %543 : vector<1x16xf32>
    %548 = arith.subf %546, %547 : vector<1x16xf32>
    %549 = vector.broadcast %548 : vector<1x16xf32> to vector<32x16xf32>
    %550 = arith.addf %545, %549 : vector<32x16xf32>
    %551 = arith.addf %550, %472 : vector<32x16xf32>
    %cst_210 = arith.constant 0.000000e+00 : f32
    %552 = vector.broadcast %cst_210 : f32 to vector<32x16xf32>
    %553 = arith.maximumf %551, %552 : vector<32x16xf32>
    %554 = tpu.iota {dimensions = array<i32: 0>} : vector<32x16xi32>
    %c15_i32_211 = arith.constant 15 : i32
    %555 = vector.broadcast %c15_i32_211 : i32 to vector<32x16xi32>
    %556 = arith.andi %554, %555 : vector<32x16xi32>
    %c0_i32_212 = arith.constant 0 : i32
    %557 = vector.broadcast %c0_i32_212 : i32 to vector<32x16xi32>
    %558 = arith.cmpi eq, %556, %557 : vector<32x16xi32>
    %c1_i32_213 = arith.constant 1 : i32
    %559 = tpu.dynamic_rotate %553 by %c1_i32_213 dim 0 : vector<32x16xf32>, i32 -> vector<32x16xf32>
    %cst_214 = arith.constant 0.000000e+00 : f32
    %560 = vector.broadcast %cst_214 : f32 to vector<32x16xf32>
    %561 = arith.select %558, %560, %559 : vector<32x16xi1>, vector<32x16xf32>
    %c15_i32_215 = arith.constant 15 : i32
    %562 = vector.broadcast %c15_i32_215 : i32 to vector<32x16xi32>
    %563 = arith.cmpi eq, %556, %562 : vector<32x16xi32>
    %c31_i32_216 = arith.constant 31 : i32
    %564 = tpu.dynamic_rotate %553 by %c31_i32_216 dim 0 : vector<32x16xf32>, i32 -> vector<32x16xf32>
    %cst_217 = arith.constant 0.000000e+00 : f32
    %565 = vector.broadcast %cst_217 : f32 to vector<32x16xf32>
    %566 = arith.select %563, %565, %564 : vector<32x16xi1>, vector<32x16xf32>
    %567 = tpu.concatenate %561, %553, %566 in 1 : vector<32x16xf32>, vector<32x16xf32>, vector<32x16xf32> -> vector<32x48xf32>
    %c0_218 = arith.constant 0 : index
    %c0_219 = arith.constant 0 : index
    %568 = vector.load %arg4[%c0_218, %c0_219] : memref<128x128xf32, #tpu.memory_space<vmem>>, vector<32x48xf32>
    tpu.vector_store %arg4[%c0_218, %c0_219], %567 {strides = array<i32>} : memref<128x128xf32, #tpu.memory_space<vmem>>, vector<32x48xf32>,
    %c0_220 = arith.constant 0 : index
    %c0_221 = arith.constant 0 : index
    %569 = tpu.strided_load %arg4[%c0_220, %c0_221] {strides = array<i32: 2, 1>} : memref<128x128xf32, #tpu.memory_space<vmem>>, vector<16x48xf32>
    %570 = vector.extract_strided_slice %569 {offsets = [0, 16], sizes = [16, 16], strides = [1, 1]} : vector<16x48xf32> to vector<16x16xf32>
    %c344 = arith.constant 344 : index
    %c0_222 = arith.constant 0 : index
    %571 = vector.load %arg1[%c344, %c0_222] : memref<728x32xf32, #tpu.memory_space<vmem>>, vector<48x32xf32>
    %cst_223 = arith.constant dense<0.000000e+00> : vector<16x32xf32>
    %572 = tpu.matmul %569, %571, %cst_223 {dimension_numbers = #tpu.dot_dimension_numbers<[1], [0], [0], [1], [0, 0, 1, 1], [], []>} : vector<16x48xf32>, vector<48x32xf32>, vector<16x32xf32> -> vector<16x32xf32>
    %573 = arith.mulf %572, %572 : vector<16x32xf32>
    %574 = tpu.concatenate %572, %573 in 1 : vector<16x32xf32>, vector<16x32xf32> -> vector<16x64xf32>
    %cst_224 = arith.constant dense<0.000000e+00> : vector<64xf32>
    %575 = vector.multi_reduction <add>, %574, %cst_224 [0] : vector<16x64xf32> to vector<64xf32>
    %576 = vector.shape_cast %575 : vector<64xf32> to vector<1x64xf32>
    %cst_225 = arith.constant 1.600000e+01 : f32
    %577 = vector.broadcast %cst_225 : f32 to vector<1x64xf32>
    %578 = arith.divf %576, %577 : vector<1x64xf32>
    %579 = vector.extract_strided_slice %578 {offsets = [0, 0], sizes = [1, 32], strides = [1, 1]} : vector<1x64xf32> to vector<1x32xf32>
    %580 = vector.extract_strided_slice %578 {offsets = [0, 32], sizes = [1, 32], strides = [1, 1]} : vector<1x64xf32> to vector<1x32xf32>
    %581 = arith.mulf %579, %579 : vector<1x32xf32>
    %582 = arith.subf %580, %581 : vector<1x32xf32>
    %c28 = arith.constant 28 : index
    %c0_226 = arith.constant 0 : index
    %583 = vector.load %arg2[%c28, %c0_226] : memref<40x32xf32, #tpu.memory_space<vmem>>, vector<1x32xf32>
    %cst_227 = arith.constant 9.99999974E-6 : f32
    %584 = vector.broadcast %cst_227 : f32 to vector<1x32xf32>
    %585 = arith.addf %582, %584 : vector<1x32xf32>
    %586 = math.rsqrt %585 : vector<1x32xf32>
    %587 = arith.mulf %583, %586 : vector<1x32xf32>
    %588 = vector.broadcast %587 : vector<1x32xf32> to vector<16x32xf32>
    %589 = arith.mulf %572, %588 : vector<16x32xf32>
    %c29 = arith.constant 29 : index
    %c0_228 = arith.constant 0 : index
    %590 = vector.load %arg2[%c29, %c0_228] : memref<40x32xf32, #tpu.memory_space<vmem>>, vector<1x32xf32>
    %591 = arith.mulf %579, %587 : vector<1x32xf32>
    %592 = arith.subf %590, %591 : vector<1x32xf32>
    %593 = vector.broadcast %592 : vector<1x32xf32> to vector<16x32xf32>
    %594 = arith.addf %589, %593 : vector<16x32xf32>
    %cst_229 = arith.constant 0.000000e+00 : f32
    %595 = vector.broadcast %cst_229 : f32 to vector<16x32xf32>
    %596 = arith.maximumf %594, %595 : vector<16x32xf32>
    %597 = tpu.iota {dimensions = array<i32: 0>} : vector<16x32xi32>
    %c7_i32 = arith.constant 7 : i32
    %598 = vector.broadcast %c7_i32 : i32 to vector<16x32xi32>
    %599 = arith.andi %597, %598 : vector<16x32xi32>
    %c0_i32_230 = arith.constant 0 : i32
    %600 = vector.broadcast %c0_i32_230 : i32 to vector<16x32xi32>
    %601 = arith.cmpi eq, %599, %600 : vector<16x32xi32>
    %c1_i32_231 = arith.constant 1 : i32
    %602 = tpu.dynamic_rotate %596 by %c1_i32_231 dim 0 : vector<16x32xf32>, i32 -> vector<16x32xf32>
    %cst_232 = arith.constant 0.000000e+00 : f32
    %603 = vector.broadcast %cst_232 : f32 to vector<16x32xf32>
    %604 = arith.select %601, %603, %602 : vector<16x32xi1>, vector<16x32xf32>
    %c7_i32_233 = arith.constant 7 : i32
    %605 = vector.broadcast %c7_i32_233 : i32 to vector<16x32xi32>
    %606 = arith.cmpi eq, %599, %605 : vector<16x32xi32>
    %c15_i32_234 = arith.constant 15 : i32
    %607 = tpu.dynamic_rotate %596 by %c15_i32_234 dim 0 : vector<16x32xf32>, i32 -> vector<16x32xf32>
    %cst_235 = arith.constant 0.000000e+00 : f32
    %608 = vector.broadcast %cst_235 : f32 to vector<16x32xf32>
    %609 = arith.select %606, %608, %607 : vector<16x32xi1>, vector<16x32xf32>
    %610 = tpu.concatenate %604, %596, %609 in 1 : vector<16x32xf32>, vector<16x32xf32>, vector<16x32xf32> -> vector<16x96xf32>
    %c392 = arith.constant 392 : index
    %c0_236 = arith.constant 0 : index
    %611 = vector.load %arg1[%c392, %c0_236] : memref<728x32xf32, #tpu.memory_space<vmem>>, vector<96x32xf32>
    %cst_237 = arith.constant dense<0.000000e+00> : vector<16x32xf32>
    %612 = tpu.matmul %610, %611, %cst_237 {dimension_numbers = #tpu.dot_dimension_numbers<[1], [0], [0], [1], [0, 0, 1, 1], [], []>} : vector<16x96xf32>, vector<96x32xf32>, vector<16x32xf32> -> vector<16x32xf32>
    %613 = arith.mulf %612, %612 : vector<16x32xf32>
    %614 = tpu.concatenate %612, %613 in 1 : vector<16x32xf32>, vector<16x32xf32> -> vector<16x64xf32>
    %cst_238 = arith.constant dense<0.000000e+00> : vector<64xf32>
    %615 = vector.multi_reduction <add>, %614, %cst_238 [0] : vector<16x64xf32> to vector<64xf32>
    %616 = vector.shape_cast %615 : vector<64xf32> to vector<1x64xf32>
    %cst_239 = arith.constant 1.600000e+01 : f32
    %617 = vector.broadcast %cst_239 : f32 to vector<1x64xf32>
    %618 = arith.divf %616, %617 : vector<1x64xf32>
    %619 = vector.extract_strided_slice %618 {offsets = [0, 0], sizes = [1, 32], strides = [1, 1]} : vector<1x64xf32> to vector<1x32xf32>
    %620 = vector.extract_strided_slice %618 {offsets = [0, 32], sizes = [1, 32], strides = [1, 1]} : vector<1x64xf32> to vector<1x32xf32>
    %621 = arith.mulf %619, %619 : vector<1x32xf32>
    %622 = arith.subf %620, %621 : vector<1x32xf32>
    %c30 = arith.constant 30 : index
    %c0_240 = arith.constant 0 : index
    %623 = vector.load %arg2[%c30, %c0_240] : memref<40x32xf32, #tpu.memory_space<vmem>>, vector<1x32xf32>
    %cst_241 = arith.constant 9.99999974E-6 : f32
    %624 = vector.broadcast %cst_241 : f32 to vector<1x32xf32>
    %625 = arith.addf %622, %624 : vector<1x32xf32>
    %626 = math.rsqrt %625 : vector<1x32xf32>
    %627 = arith.mulf %623, %626 : vector<1x32xf32>
    %628 = vector.broadcast %627 : vector<1x32xf32> to vector<16x32xf32>
    %629 = arith.mulf %612, %628 : vector<16x32xf32>
    %c31 = arith.constant 31 : index
    %c0_242 = arith.constant 0 : index
    %630 = vector.load %arg2[%c31, %c0_242] : memref<40x32xf32, #tpu.memory_space<vmem>>, vector<1x32xf32>
    %631 = arith.mulf %619, %627 : vector<1x32xf32>
    %632 = arith.subf %630, %631 : vector<1x32xf32>
    %633 = vector.broadcast %632 : vector<1x32xf32> to vector<16x32xf32>
    %634 = arith.addf %629, %633 : vector<16x32xf32>
    %c488 = arith.constant 488 : index
    %c0_243 = arith.constant 0 : index
    %635 = vector.load %arg1[%c488, %c0_243] : memref<728x32xf32, #tpu.memory_space<vmem>>, vector<16x32xf32>
    %cst_244 = arith.constant dense<0.000000e+00> : vector<16x32xf32>
    %636 = tpu.matmul %570, %635, %cst_244 {dimension_numbers = #tpu.dot_dimension_numbers<[1], [0], [0], [1], [0, 0, 1, 1], [], []>} : vector<16x16xf32>, vector<16x32xf32>, vector<16x32xf32> -> vector<16x32xf32>
    %c32 = arith.constant 32 : index
    %c0_245 = arith.constant 0 : index
    %637 = vector.load %arg2[%c32, %c0_245] : memref<40x32xf32, #tpu.memory_space<vmem>>, vector<1x32xf32>
    %638 = vector.broadcast %637 : vector<1x32xf32> to vector<16x32xf32>
    %639 = arith.addf %636, %638 : vector<16x32xf32>
    %640 = arith.addf %634, %639 : vector<16x32xf32>
    %cst_246 = arith.constant 0.000000e+00 : f32
    %641 = vector.broadcast %cst_246 : f32 to vector<16x32xf32>
    %642 = arith.maximumf %640, %641 : vector<16x32xf32>
    %643 = tpu.iota {dimensions = array<i32: 0>} : vector<16x32xi32>
    %c7_i32_247 = arith.constant 7 : i32
    %644 = vector.broadcast %c7_i32_247 : i32 to vector<16x32xi32>
    %645 = arith.andi %643, %644 : vector<16x32xi32>
    %c0_i32_248 = arith.constant 0 : i32
    %646 = vector.broadcast %c0_i32_248 : i32 to vector<16x32xi32>
    %647 = arith.cmpi eq, %645, %646 : vector<16x32xi32>
    %c1_i32_249 = arith.constant 1 : i32
    %648 = tpu.dynamic_rotate %642 by %c1_i32_249 dim 0 : vector<16x32xf32>, i32 -> vector<16x32xf32>
    %cst_250 = arith.constant 0.000000e+00 : f32
    %649 = vector.broadcast %cst_250 : f32 to vector<16x32xf32>
    %650 = arith.select %647, %649, %648 : vector<16x32xi1>, vector<16x32xf32>
    %c7_i32_251 = arith.constant 7 : i32
    %651 = vector.broadcast %c7_i32_251 : i32 to vector<16x32xi32>
    %652 = arith.cmpi eq, %645, %651 : vector<16x32xi32>
    %c15_i32_252 = arith.constant 15 : i32
    %653 = tpu.dynamic_rotate %642 by %c15_i32_252 dim 0 : vector<16x32xf32>, i32 -> vector<16x32xf32>
    %cst_253 = arith.constant 0.000000e+00 : f32
    %654 = vector.broadcast %cst_253 : f32 to vector<16x32xf32>
    %655 = arith.select %652, %654, %653 : vector<16x32xi1>, vector<16x32xf32>
    %656 = tpu.concatenate %650, %642, %655 in 1 : vector<16x32xf32>, vector<16x32xf32>, vector<16x32xf32> -> vector<16x96xf32>
    %c504 = arith.constant 504 : index
    %c0_254 = arith.constant 0 : index
    %657 = vector.load %arg1[%c504, %c0_254] : memref<728x32xf32, #tpu.memory_space<vmem>>, vector<96x32xf32>
    %cst_255 = arith.constant dense<0.000000e+00> : vector<16x32xf32>
    %658 = tpu.matmul %656, %657, %cst_255 {dimension_numbers = #tpu.dot_dimension_numbers<[1], [0], [0], [1], [0, 0, 1, 1], [], []>} : vector<16x96xf32>, vector<96x32xf32>, vector<16x32xf32> -> vector<16x32xf32>
    %659 = arith.mulf %658, %658 : vector<16x32xf32>
    %660 = tpu.concatenate %658, %659 in 1 : vector<16x32xf32>, vector<16x32xf32> -> vector<16x64xf32>
    %cst_256 = arith.constant dense<0.000000e+00> : vector<64xf32>
    %661 = vector.multi_reduction <add>, %660, %cst_256 [0] : vector<16x64xf32> to vector<64xf32>
    %662 = vector.shape_cast %661 : vector<64xf32> to vector<1x64xf32>
    %cst_257 = arith.constant 1.600000e+01 : f32
    %663 = vector.broadcast %cst_257 : f32 to vector<1x64xf32>
    %664 = arith.divf %662, %663 : vector<1x64xf32>
    %665 = vector.extract_strided_slice %664 {offsets = [0, 0], sizes = [1, 32], strides = [1, 1]} : vector<1x64xf32> to vector<1x32xf32>
    %666 = vector.extract_strided_slice %664 {offsets = [0, 32], sizes = [1, 32], strides = [1, 1]} : vector<1x64xf32> to vector<1x32xf32>
    %667 = arith.mulf %665, %665 : vector<1x32xf32>
    %668 = arith.subf %666, %667 : vector<1x32xf32>
    %c33 = arith.constant 33 : index
    %c0_258 = arith.constant 0 : index
    %669 = vector.load %arg2[%c33, %c0_258] : memref<40x32xf32, #tpu.memory_space<vmem>>, vector<1x32xf32>
    %cst_259 = arith.constant 9.99999974E-6 : f32
    %670 = vector.broadcast %cst_259 : f32 to vector<1x32xf32>
    %671 = arith.addf %668, %670 : vector<1x32xf32>
    %672 = math.rsqrt %671 : vector<1x32xf32>
    %673 = arith.mulf %669, %672 : vector<1x32xf32>
    %674 = vector.broadcast %673 : vector<1x32xf32> to vector<16x32xf32>
    %675 = arith.mulf %658, %674 : vector<16x32xf32>
    %c34 = arith.constant 34 : index
    %c0_260 = arith.constant 0 : index
    %676 = vector.load %arg2[%c34, %c0_260] : memref<40x32xf32, #tpu.memory_space<vmem>>, vector<1x32xf32>
    %677 = arith.mulf %665, %673 : vector<1x32xf32>
    %678 = arith.subf %676, %677 : vector<1x32xf32>
    %679 = vector.broadcast %678 : vector<1x32xf32> to vector<16x32xf32>
    %680 = arith.addf %675, %679 : vector<16x32xf32>
    %cst_261 = arith.constant 0.000000e+00 : f32
    %681 = vector.broadcast %cst_261 : f32 to vector<16x32xf32>
    %682 = arith.maximumf %680, %681 : vector<16x32xf32>
    %683 = tpu.iota {dimensions = array<i32: 0>} : vector<16x32xi32>
    %c7_i32_262 = arith.constant 7 : i32
    %684 = vector.broadcast %c7_i32_262 : i32 to vector<16x32xi32>
    %685 = arith.andi %683, %684 : vector<16x32xi32>
    %c0_i32_263 = arith.constant 0 : i32
    %686 = vector.broadcast %c0_i32_263 : i32 to vector<16x32xi32>
    %687 = arith.cmpi eq, %685, %686 : vector<16x32xi32>
    %c1_i32_264 = arith.constant 1 : i32
    %688 = tpu.dynamic_rotate %682 by %c1_i32_264 dim 0 : vector<16x32xf32>, i32 -> vector<16x32xf32>
    %cst_265 = arith.constant 0.000000e+00 : f32
    %689 = vector.broadcast %cst_265 : f32 to vector<16x32xf32>
    %690 = arith.select %687, %689, %688 : vector<16x32xi1>, vector<16x32xf32>
    %c7_i32_266 = arith.constant 7 : i32
    %691 = vector.broadcast %c7_i32_266 : i32 to vector<16x32xi32>
    %692 = arith.cmpi eq, %685, %691 : vector<16x32xi32>
    %c15_i32_267 = arith.constant 15 : i32
    %693 = tpu.dynamic_rotate %682 by %c15_i32_267 dim 0 : vector<16x32xf32>, i32 -> vector<16x32xf32>
    %cst_268 = arith.constant 0.000000e+00 : f32
    %694 = vector.broadcast %cst_268 : f32 to vector<16x32xf32>
    %695 = arith.select %692, %694, %693 : vector<16x32xi1>, vector<16x32xf32>
    %696 = tpu.concatenate %690, %682, %695 in 1 : vector<16x32xf32>, vector<16x32xf32>, vector<16x32xf32> -> vector<16x96xf32>
    %c600 = arith.constant 600 : index
    %c0_269 = arith.constant 0 : index
    %697 = vector.load %arg1[%c600, %c0_269] : memref<728x32xf32, #tpu.memory_space<vmem>>, vector<96x32xf32>
    %cst_270 = arith.constant dense<0.000000e+00> : vector<16x32xf32>
    %698 = tpu.matmul %696, %697, %cst_270 {dimension_numbers = #tpu.dot_dimension_numbers<[1], [0], [0], [1], [0, 0, 1, 1], [], []>} : vector<16x96xf32>, vector<96x32xf32>, vector<16x32xf32> -> vector<16x32xf32>
    %699 = arith.mulf %698, %698 : vector<16x32xf32>
    %700 = tpu.concatenate %698, %699 in 1 : vector<16x32xf32>, vector<16x32xf32> -> vector<16x64xf32>
    %cst_271 = arith.constant dense<0.000000e+00> : vector<64xf32>
    %701 = vector.multi_reduction <add>, %700, %cst_271 [0] : vector<16x64xf32> to vector<64xf32>
    %702 = vector.shape_cast %701 : vector<64xf32> to vector<1x64xf32>
    %cst_272 = arith.constant 1.600000e+01 : f32
    %703 = vector.broadcast %cst_272 : f32 to vector<1x64xf32>
    %704 = arith.divf %702, %703 : vector<1x64xf32>
    %705 = vector.extract_strided_slice %704 {offsets = [0, 0], sizes = [1, 32], strides = [1, 1]} : vector<1x64xf32> to vector<1x32xf32>
    %706 = vector.extract_strided_slice %704 {offsets = [0, 32], sizes = [1, 32], strides = [1, 1]} : vector<1x64xf32> to vector<1x32xf32>
    %707 = arith.mulf %705, %705 : vector<1x32xf32>
    %708 = arith.subf %706, %707 : vector<1x32xf32>
    %c35 = arith.constant 35 : index
    %c0_273 = arith.constant 0 : index
    %709 = vector.load %arg2[%c35, %c0_273] : memref<40x32xf32, #tpu.memory_space<vmem>>, vector<1x32xf32>
    %cst_274 = arith.constant 9.99999974E-6 : f32
    %710 = vector.broadcast %cst_274 : f32 to vector<1x32xf32>
    %711 = arith.addf %708, %710 : vector<1x32xf32>
    %712 = math.rsqrt %711 : vector<1x32xf32>
    %713 = arith.mulf %709, %712 : vector<1x32xf32>
    %714 = vector.broadcast %713 : vector<1x32xf32> to vector<16x32xf32>
    %715 = arith.mulf %698, %714 : vector<16x32xf32>
    %c36 = arith.constant 36 : index
    %c0_275 = arith.constant 0 : index
    %716 = vector.load %arg2[%c36, %c0_275] : memref<40x32xf32, #tpu.memory_space<vmem>>, vector<1x32xf32>
    %717 = arith.mulf %705, %713 : vector<1x32xf32>
    %718 = arith.subf %716, %717 : vector<1x32xf32>
    %719 = vector.broadcast %718 : vector<1x32xf32> to vector<16x32xf32>
    %720 = arith.addf %715, %719 : vector<16x32xf32>
    %721 = arith.addf %720, %642 : vector<16x32xf32>
    %cst_276 = arith.constant 0.000000e+00 : f32
    %722 = vector.broadcast %cst_276 : f32 to vector<16x32xf32>
    %723 = arith.maximumf %721, %722 : vector<16x32xf32>
    %724 = tpu.iota {dimensions = array<i32: 0>} : vector<2x16xi32>
    %725 = tpu.iota {dimensions = array<i32: 1>} : vector<2x16xi32>
    %c8_i32 = arith.constant 8 : i32
    %726 = vector.broadcast %c8_i32 : i32 to vector<2x16xi32>
    %727 = arith.muli %724, %726 : vector<2x16xi32>
    %728 = arith.cmpi sge, %725, %727 : vector<2x16xi32>
    %c1_i32_277 = arith.constant 1 : i32
    %729 = vector.broadcast %c1_i32_277 : i32 to vector<2x16xi32>
    %730 = arith.addi %724, %729 : vector<2x16xi32>
    %c8_i32_278 = arith.constant 8 : i32
    %731 = vector.broadcast %c8_i32_278 : i32 to vector<2x16xi32>
    %732 = arith.muli %730, %731 : vector<2x16xi32>
    %733 = arith.cmpi slt, %725, %732 : vector<2x16xi32>
    %734 = arith.andi %728, %733 : vector<2x16xi1>
    %cst_279 = arith.constant 1.250000e-01 : f32
    %cst_280 = arith.constant 0.000000e+00 : f32
    %735 = vector.broadcast %cst_279 : f32 to vector<2x16xf32>
    %736 = vector.broadcast %cst_280 : f32 to vector<2x16xf32>
    %737 = arith.select %734, %735, %736 : vector<2x16xi1>, vector<2x16xf32>
    %cst_281 = arith.constant dense<0.000000e+00> : vector<2x32xf32>
    %738 = tpu.matmul %737, %723, %cst_281 {dimension_numbers = #tpu.dot_dimension_numbers<[1], [0], [0], [1], [0, 0, 1, 1], [], []>} : vector<2x16xf32>, vector<16x32xf32>, vector<2x32xf32> -> vector<2x32xf32>
    %c696 = arith.constant 696 : index
    %c0_282 = arith.constant 0 : index
    %739 = vector.load %arg1[%c696, %c0_282] : memref<728x32xf32, #tpu.memory_space<vmem>>, vector<32x5xf32>
    %cst_283 = arith.constant dense<0.000000e+00> : vector<2x5xf32>
    %740 = tpu.matmul %738, %739, %cst_283 {dimension_numbers = #tpu.dot_dimension_numbers<[1], [0], [0], [1], [0, 0, 1, 1], [], []>} : vector<2x32xf32>, vector<32x5xf32>, vector<2x5xf32> -> vector<2x5xf32>
    %c37 = arith.constant 37 : index
    %c0_284 = arith.constant 0 : index
    %741 = vector.load %arg2[%c37, %c0_284] : memref<40x32xf32, #tpu.memory_space<vmem>>, vector<1x5xf32>
    %742 = vector.broadcast %741 : vector<1x5xf32> to vector<2x5xf32>
    %743 = arith.addf %740, %742 : vector<2x5xf32>
    %c0_285 = arith.constant 0 : index
    %c0_286 = arith.constant 0 : index
    %744 = vector.load %arg3[%c0_285, %c0_286] : memref<2x5xf32, #tpu.memory_space<vmem>>, vector<2x5xf32>
    tpu.vector_store %arg3[%c0_285, %c0_286], %743 {strides = array<i32>} : memref<2x5xf32, #tpu.memory_space<vmem>>, vector<2x5xf32>,
    return
  }
}

</mosaic_0001>

<bundles_post_ra>
// kernel: resnet_apt_4.1
= control target key start
LH: loop header
LB: loop body
LE: loop exit
PB: predicated region body
PF: predicated region fallthrough
CT: control target
= control target key end

     0   :  { %8 = vsyncpa [#allocation4], 0  ;;  %s13013_s0 = inlined_call_operand.vmem [shape: f32[128,1], index: 0, kind: input, shape index: {}]   ;;  %s13014_s1 = inlined_call_operand.hbm [shape: f32[728,32], index: 1, kind: input, shape index: {}]   ;;  %s13015_s2 = inlined_call_operand.vmem [shape: f32[40,32], index: 2, kind: input, shape index: {}]   ;;  %s13016_s3 = inlined_call_operand.hbm [shape: f32[2,5], index: 3, kind: output, shape index: {}]  }
   0x1   :  { %9 = vsyncpa [#allocation5], 0  ;;  %s8741_s12 = smov [#allocation3]   ;;  %s8693_s16 = scalar_lea.hbm %s13014_s1, 11648 }
   0x2   :  { %s17_s13 = sshll.u32 %s8741_s12, 4  ;;  %p8694_p0 = scmp.ne.s32.totalorder %s13014_s1, %s8693_s16  ;;  %s18_s13 = int_to_ptr.vmem [resolvable:$true] %s17_s13 }
   0x3   :  { %p8697_p1 = scmp.lt.u32.totalorder %s8693_s16, %s13014_s1 }
   0x5   :  { %p8699_p2 = pnand %p8697_p1, %p8694_p0 }
   0x7   :  { %8702 = shalt.err (!%p8699_p2)
}
   0x8   :  { %s8703_s21 = scalar_lea.vmem %s18_s13, 11648  ;;  %p8708_p4 = scmp.lt.s32.totalorder %s18_s13, %s18_s13 }
   0x9   :  { %p8704_p3 = scmp.ne.s32.totalorder %s18_s13, %s8703_s21  ;;  %p8709_p5 = scmp.lt.s32.totalorder %s8703_s21, %s8703_s21 }
   0xb   :  { %p8710_p6 = por %p8709_p5, %p8708_p4 }
   0xd   :  { %p8711_p7 = pnand %p8710_p6, %p8704_p3 }
   0xf   :  { %8714 = shalt.err (!%p8711_p7)
}
  0x10   :  { %s8742_s22 = smov 128   ;;  %s8743_s23 = smov 8  }
  0x11   :  { %23 = dma.hbm_to_vmem [thread:$0]  %s13014_s1, 11648, %s18_s13, [#allocation4], %s8742_s22, %s8742_s22, %s8743_s23  }
  0x12   :  { %8737 = dma.done.wait [#allocation4], 11648  }
  0x13   :  { %8738 = vsyncadd [#allocation4], 4294955648  ;;  %v13017_v0 = vlaneseq  ;;  %v32_v2 = vld [vmem:[%s13013_s0 + $0x18] sm:$0xff]  ;;  %v8801_v3 = vld [vmem:[%s13013_s0] sm:$0xff]  ;;  %s8744_s1 = smov 1   ;;  %vm420_vm1 = vcmask 1042432  }
  0x14   :  { %v30_v4 = vld [vmem:[%s13013_s0 + $0x8] sm:$0xff]  ;;  %230 = vrot.lane.b32.xlu1 %v32_v2, %s8744_s1  ;;  %224 = vrot.lane.b32.xlu0 %v8801_v3, %s8744_s1  ;;  %v159_v5 = vrot.slane %v8801_v3, 1  ;;  %v31_v6 = vld [vmem:[%s13013_s0 + $0x10] sm:$0xff]  ;;  %s8745_s9 = smov 2   ;;  %v162_v12 = vrot.slane %v32_v2, 1  ;;  %v97_v15 = vrot.slane %v32_v2, 7 }
  0x15   :  { %v8793_v1 = vshrl.u32 %v13017_v0, 7  ;;  %v160_v7 = vrot.slane %v30_v4, 1  ;;  %v161_v8 = vrot.slane %v31_v6, 1  ;;  %v33_v9 = vld [vmem:[%s13013_s0 + $0x20] sm:$0xff]  ;;  %v370_v11 = vld [vmem:[#allocation3] sm:$0x7] }
  0x16   :  { %v163_v14 = vrot.slane %v33_v9, 1  ;;  %8045 = vmatprep.subr.msk.mxu0 %vm420_vm1, %v370_v11  ;;  %v95_v16 = vrot.slane %v30_v4, 7  ;;  %v96_v17 = vrot.slane %v31_v6, 7  ;;  %v94_v18 = vrot.slane %v8801_v3, 7  ;;  %v34_v21 = vld [vmem:[%s13013_s0 + $0x28] sm:$0xff]  ;;  %v35_v23 = vld [vmem:[%s13013_s0 + $0x30] sm:$0xff] }
  0x17   :  { %vm175_vm0 = vcmp.lt.s32.totalorder %v8793_v1, 7  ;;  %8046 = vmatpush3.msk.msra.mxu0 %vm420_vm1, %v370_v11  ;;  %vm110_vm2 = vcmp.lt.s32.totalorder %v8793_v1, 1  ;;  %v99_v22 = vrot.slane %v34_v21, 7  ;;  %v36_v24 = vld [vmem:[%s13013_s0 + $0x38] sm:$0xff]  ;;  %v98_v29 = vrot.slane %v33_v9, 7  ;;  %v37_v33 = vld [vmem:[%s13013_s0 + $0x40] sm:$0xff] }
  0x18   :  { %v190_v10 = vsel %vm175_vm0, %v159_v5, %v160_v7  ;;  %226 = vrot.lane.b32.xlu0 %v30_v4, %s8744_s1  ;;  %v189_v13 = vsel %vm175_vm0, %v160_v7, %v161_v8  ;;  %v188_v19 = vsel %vm175_vm0, %v161_v8, %v162_v12  ;;  %v187_v20 = vsel %vm175_vm0, %v162_v12, %v163_v14  ;;  %v38_v35 = vld [vmem:[%s13013_s0 + $0x48] sm:$0xff]  ;;  %v40_v51 = vld [vmem:[%s13013_s0 + $0x58] sm:$0xff]  ;;  %v39_v52 = vld [vmem:[%s13013_s0 + $0x50] sm:$0xff]  ;;  %s8749_s27 = smov 120   ;;  %s8750_s5 = smov 16  }
  0x19   :  { %288 = vrot.lane.b32.xlu1 %v190_v10, %s8745_s9  ;;  %v8844_v25 = vsel %vm110_vm2, %v96_v17, %v97_v15  ;;  %v8850_v26 = vsel %vm110_vm2, %v94_v18, %v95_v16  ;;  %v101_v27 = vrot.slane %v36_v24, 7  ;;  %v8856_v28 = vsel %vm110_vm2, %v95_v16, %v96_v17  ;;  %v42_v61 = vld [vmem:[%s13013_s0 + $0x68] sm:$0xff]  ;;  %v41_v62 = vld [vmem:[%s13013_s0 + $0x60] sm:$0xff]  ;;  %v8953_v11 = vld [vmem:[%s13013_s0 + $0x70] sm:$0xff]  ;;  %s8752_s22 = smov 32   ;;  %s8754_s14 = smov 64  }
  0x1a   :  { %v164_v30 = vrot.slane %v34_v21, 1  ;;  %v165_v31 = vrot.slane %v35_v23, 1  ;;  %v100_v32 = vrot.slane %v35_v23, 7  ;;  %v8862_v34 = vadd.s32 56, %v8793_v1  ;;  %s8758_s4 = smov [#allocation6]  }
  0x1b   :  { %v8869_v36 = vsel %vm110_vm2, %v97_v15, %v98_v29  ;;  %v8873_v37 = vsel %vm110_vm2, %v98_v29, %v99_v22  ;;  %v103_v38 = vrot.slane %v38_v35, 7  ;;  %v102_v41 = vrot.slane %v37_v33, 7 }
  0x1c   :  { %228 = vrot.lane.b32.xlu0 %v31_v6, %s8744_s1  ;;  %13024 = vst [vmem:[#allocation9_spill] sm:$0xff] %v8862_v34  ;;  %v8877_v39 = vsel %vm110_vm2, %v99_v22, %v100_v32  ;;  %v8881_v40 = vsel %vm110_vm2, %v100_v32, %v101_v27  ;;  %v186_v42 = vsel %vm175_vm0, %v163_v14, %v164_v30  ;;  %v166_v45 = vrot.slane %v36_v24, 1 }
  0x1d   :  { %290 = vrot.lane.b32.xlu1 %v189_v13, %s8745_s9  ;;  %v185_v43 = vsel %vm175_vm0, %v164_v30, %v165_v31  ;;  %v8891_v44 = vsel %vm110_vm2, %v101_v27, %v102_v41  ;;  %v69_v46 = vand.u32 63, %v8862_v34  ;;  %v167_v47 = vrot.slane %v37_v33, 1 }
  0x1e   :  { %v8896_v48 = vsel %vm110_vm2, %v102_v41, %v103_v38  ;;  %v105_v53 = vrot.slane %v40_v51, 7  ;;  %v104_v54 = vrot.slane %v39_v52, 7  ;;  %v184_v55 = vsel %vm175_vm0, %v165_v31, %v166_v45 }
  0x1f   :  { %vm8900_vm3 = vcmp.eq.s32.totalorder %v69_v46, 63  ;;  %v183_v50 = vsel %vm175_vm0, %v166_v45, %v167_v47  ;;  %v168_v59 = vrot.slane %v38_v35, 1  ;;  %v169_v60 = vrot.slane %v39_v52, 1 }
  0x20   :  { %292 = vrot.lane.b32.xlu0 %v188_v19, %s8745_s9  ;;  %v199_v56 = vsel %vm8900_vm3, 0.0, %v183_v50  ;;  %v8920_v57 = vsel %vm110_vm2, %v103_v38, %v104_v54  ;;  %v8924_v58 = vsel %vm110_vm2, %v104_v54, %v105_v53  ;;  %v107_v63 = vrot.slane %v42_v61, 7 }
  0x21   :  { %294 = vrot.lane.b32.xlu1 %v187_v20, %s8745_s9  ;;  %v106_v2 = vrot.slane %v41_v62, 7  ;;  %v182_v4 = vsel %vm175_vm0, %v167_v47, %v168_v59  ;;  %v181_v6 = vsel %vm175_vm0, %v168_v59, %v169_v60  ;;  %v171_v10 = vrot.slane %v41_v62, 1  ;;  %v8975_v20 = vld [vmem:[%s13013_s0 + $0x78] sm:$0xff]  ;;  %s8746_s0 = smov 4  }
  0x22   :  { %v108_v12 = vrot.slane %v8953_v11, 7  ;;  %v172_v16 = vrot.slane %v42_v61, 1  ;;  %v173_v17 = vrot.slane %v8953_v11, 1  ;;  %v61_v19 = vadd.s32 120, %v8793_v1 }
  0x23   :  { %v8942_v7 = vsel %vm110_vm2, %v105_v53, %v106_v2  ;;  %v8946_v8 = vsel %vm110_vm2, %v106_v2, %v107_v63  ;;  %v109_v32 = vrot.slane %v8975_v20, 7  ;;  %vm336_vm6 = vcmask 7168  }
  0x24   :  { %232 = vrot.lane.b32.xlu0 %v33_v9, %s8744_s1  ;;  %v170_v9 = vrot.slane %v40_v51, 1  ;;  %v8966_v15 = vsel %vm110_vm2, %v107_v63, %v108_v12  ;;  %v177_v22 = vsel %vm175_vm0, %v172_v16, %v173_v17  ;;  %vm353_vm7 = vcmask 15360  }
  0x25   :  { %234 = vrot.lane.b32.xlu1 %v34_v21, %s8744_s1  ;;  %v178_v21 = vsel %vm175_vm0, %v171_v10, %v172_v16  ;;  %vm371_vm8 = vcmask 23552   ;;  %vm649_vm10 = vcmask 31744   ;;  %vm666_vm11 = vcmask 64512  }
  0x26   :  { %v180_v13 = vsel %vm175_vm0, %v169_v60, %v170_v9  ;;  %v179_v14 = vsel %vm175_vm0, %v170_v9, %v171_v10  ;;  %vm1198_vm12 = vcmask 1043456   ;;  %vm8748_vm13 = vmmov 1  }
  0x27   :  { %vm9498_vm14 = vmpackc.low %vm1198_vm12, %vm8748_vm13  ;;  %vm1149_vm15 = vcmask 97280   ;;  %vm4038_vm1 = vcmask 130048   ;;  %vm5837_vm13 = vcmask 392192  }
  0x28   :  { %296 = vrot.lane.b32.xlu0 %v186_v42, %s8745_s9 }
  0x29   :  { %298 = vrot.lane.b32.xlu1 %v185_v43, %s8745_s9 }
  0x2c   :  { %236 = vrot.lane.b32.xlu0 %v35_v23, %s8744_s1  ;;  %v174_v23 = vrot.slane %v8975_v20, 1 }
  0x2d   :  { %238 = vrot.lane.b32.xlu1 %v36_v24, %s8744_s1  ;;  %v77_v24 = vand.u32 63, %v61_v19 }
  0x2e   :  { %v191_v29 = vsel %vm175_vm0, %v174_v23, %v159_v5  ;;  %v176_v30 = vsel %vm175_vm0, %v173_v17, %v174_v23  ;;  %v62_v5 = vand.u32 63, %v8793_v1 }
  0x2f   :  { %vm8986_vm4 = vcmp.eq.s32.totalorder %v77_v24, 63 }
  0x30   :  { %300 = vrot.lane.b32.xlu0 %v184_v55, %s8745_s9  ;;  %v207_v31 = vsel %vm8986_vm4, 0.0, %v191_v29  ;;  %vm9006_vm5 = vcmp.eq.s32.totalorder %v62_v5, 0 }
  0x31   :  { %302 = vrot.lane.b32.xlu1 %v199_v56, %s8745_s9 }
  0x34   :  { %240 = vrot.lane.b32.xlu0 %v37_v33, %s8744_s1 }
  0x35   :  { %242 = vrot.lane.b32.xlu1 %v38_v35, %s8744_s1  ;;  %v126_v35 = vsel %vm110_vm2, %v109_v32, %v94_v18 }
  0x36   :  { %v127_v42 = vsel %vm9006_vm5, 0.0, %v126_v35 }
  0x38   :  { %304 = vrot.lane.b32.xlu0 %v182_v4, %s8745_s9  ;;  %v54_v4 = vadd.s32 64, %v8793_v1 }
  0x39   :  { %306 = vrot.lane.b32.xlu1 %v181_v6, %s8745_s9 }
  0x3a   :  { %v70_v10 = vand.u32 63, %v54_v4 }
  0x3c   :  { %244 = vrot.lane.b32.xlu0 %v39_v52, %s8744_s1  ;;  %vm9049_vm9 = vcmp.eq.s32.totalorder %v70_v10, 0 }
  0x3d   :  { %246 = vrot.lane.b32.xlu1 %v40_v51, %s8744_s1 }
  0x40   :  { %308 = vrot.lane.b32.xlu0 %v180_v13, %s8745_s9 }
  0x41   :  { %310 = vrot.lane.b32.xlu1 %v179_v14, %s8745_s9 }
  0x44   :  { %248 = vrot.lane.b32.xlu0 %v41_v62, %s8744_s1 }
  0x45   :  { %250 = vrot.lane.b32.xlu1 %v42_v61, %s8744_s1 }
  0x48   :  { %312 = vrot.lane.b32.xlu0 %v178_v21, %s8745_s9 }
  0x49   :  { %314 = vrot.lane.b32.xlu1 %v177_v22, %s8745_s9 }
  0x4c   :  { %252 = vrot.lane.b32.xlu0 %v8953_v11, %s8744_s1 }
  0x4d   :  { %254 = vrot.lane.b32.xlu1 %v8975_v20, %s8744_s1  ;;  %s8747_s1 = smov 124  }
  0x50   :  { %316 = vrot.lane.b32.xlu0 %v176_v30, %s8745_s9 }
  0x51   :  { %318 = vrot.lane.b32.xlu1 %v207_v31, %s8745_s9 }
  0x86   :  { %v231_v38 = vpop.permute.xlu1 %230  ;;  %v225_v41 = vpop.permute.xlu0 %224 }
  0x87   :  { %v337_v43 = vsel %vm336_vm6, %v127_v42, %v225_v41  ;;  %v340_v52 = vsel %vm336_vm6, %v8844_v25, %v231_v38 }
  0x8a   :  { %v227_v45 = vpop.permute.xlu0 %226 }
  0x8b   :  { %v289_v46 = vpop.permute.xlu1 %288  ;;  %v338_v3 = vsel %vm336_vm6, %v8850_v26, %v227_v45 }
  0x8c   :  { %v354_v47 = vsel %vm353_vm7, %v337_v43, %v289_v46 }
  0x8d   :  { %8047 = vmatprep.mubr.msk.f32.mxu0 %vm371_vm8, %v354_v47 }
  0x8e   :  { %v229_v18 = vpop.permute.xlu0 %228 }
  0x8f   :  { %v291_v50 = vpop.permute.xlu1 %290  ;;  %v339_v53 = vsel %vm336_vm6, %v8856_v28, %v229_v18 }
  0x90   :  { %v355_v51 = vsel %vm353_vm7, %v338_v3, %v291_v50 }
  0x91   :  { %8048 = vmatmul.mubr.msk.f32.vlgmr.msra.gmra.mrb[0].mxu0 %vm371_vm8, %v355_v51 }
  0x92   :  { %v293_v54 = vpop.permute.xlu0 %292 }
  0x93   :  { %v295_v55 = vpop.permute.xlu1 %294  ;;  %v356_v56 = vsel %vm353_vm7, %v339_v53, %v293_v54 }
  0x94   :  { %v357_v59 = vsel %vm353_vm7, %v340_v52, %v295_v55  ;;  %8050 = vmatprep.mubr.msk.f32.mxu0 %vm371_vm8, %v356_v56 }
  0x95   :  { %8051 = vmatmul.mubr.msk.f32.gmra.mrb[2].mxu0 %vm371_vm8, %v357_v59 }
  0x96   :  { %v233_v26 = vpop.permute.xlu0 %232 }
  0x97   :  { %v235_v60 = vpop.permute.xlu1 %234  ;;  %v341_v61 = vsel %vm336_vm6, %v8869_v36, %v233_v26 }
  0x98   :  { %v342_v25 = vsel %vm336_vm6, %v8873_v37, %v235_v60 }
  0x9a   :  { %v297_v62 = vpop.permute.xlu0 %296 }
  0x9b   :  { %v299_v28 = vpop.permute.xlu1 %298  ;;  %v358_v63 = vsel %vm353_vm7, %v341_v61, %v297_v62 }
  0x9c   :  { %v359_v2 = vsel %vm353_vm7, %v342_v25, %v299_v28  ;;  %8053 = vmatprep.mubr.msk.f32.mxu0 %vm371_vm8, %v358_v63 }
  0x9d   :  { %8054 = vmatmul.mubr.msk.f32.gmra.mrb[4].mxu0 %vm371_vm8, %v359_v2 }
  0x9e   :  { %v237_v6 = vpop.permute.xlu0 %236 }
  0x9f   :  { %v239_v9 = vpop.permute.xlu1 %238  ;;  %v343_v36 = vsel %vm336_vm6, %v8877_v39, %v237_v6  ;;  %v135_v39 = vsel %vm9049_vm9, 0.0, %v8891_v44 }
  0xa0   :  { %v344_v37 = vsel %vm336_vm6, %v8881_v40, %v239_v9 }
  0xa2   :  { %v301_v13 = vpop.permute.xlu0 %300 }
  0xa3   :  { %v303_v14 = vpop.permute.xlu1 %302  ;;  %v360_v16 = vsel %vm353_vm7, %v343_v36, %v301_v13 }
  0xa4   :  { %v361_v17 = vsel %vm353_vm7, %v344_v37, %v303_v14  ;;  %8056 = vmatprep.mubr.msk.f32.mxu0 %vm371_vm8, %v360_v16 }
  0xa5   :  { %8057 = vmatmul.mubr.msk.f32.gmra.mrb[6].mxu0 %vm371_vm8, %v361_v17 }
  0xa6   :  { %v241_v21 = vpop.permute.xlu0 %240 }
  0xa7   :  { %v243_v22 = vpop.permute.xlu1 %242  ;;  %v345_v40 = vsel %vm336_vm6, %v135_v39, %v241_v21 }
  0xa8   :  { %v346_v23 = vsel %vm336_vm6, %v8896_v48, %v243_v22 }
  0xaa   :  { %v305_v24 = vpop.permute.xlu0 %304 }
  0xab   :  { %v307_v29 = vpop.permute.xlu1 %306  ;;  %v362_v30 = vsel %vm353_vm7, %v345_v40, %v305_v24 }
  0xac   :  { %v363_v31 = vsel %vm353_vm7, %v346_v23, %v307_v29  ;;  %8059 = vmatprep.mubr.msk.f32.mxu0 %vm371_vm8, %v362_v30 }
  0xad   :  { %8060 = vmatmul.mubr.msk.f32.gmra.mrb[8].mxu0 %vm371_vm8, %v363_v31 }
  0xae   :  { %v245_v5 = vpop.permute.xlu0 %244 }
  0xaf   :  { %v247_v35 = vpop.permute.xlu1 %246  ;;  %v347_v44 = vsel %vm336_vm6, %v8920_v57, %v245_v5 }
  0xb0   :  { %v348_v38 = vsel %vm336_vm6, %v8924_v58, %v247_v35 }
  0xb2   :  { %v309_v41 = vpop.permute.xlu0 %308 }
  0xb3   :  { %v311_v48 = vpop.permute.xlu1 %310  ;;  %v364_v42 = vsel %vm353_vm7, %v347_v44, %v309_v41 }
  0xb4   :  { %v365_v43 = vsel %vm353_vm7, %v348_v38, %v311_v48  ;;  %8062 = vmatprep.mubr.msk.f32.mxu0 %vm371_vm8, %v364_v42 }
  0xb5   :  { %8063 = vmatmul.mubr.msk.f32.gmra.mrb[10].mxu0 %vm371_vm8, %v365_v43 }
  0xb6   :  { %v249_v45 = vpop.permute.xlu0 %248 }
  0xb7   :  { %v251_v46 = vpop.permute.xlu1 %250  ;;  %v349_v47 = vsel %vm336_vm6, %v8942_v7, %v249_v45  ;;  %v111_v7 = vsel %vm110_vm2, %v108_v12, %v109_v32 }
  0xb8   :  { %v350_v57 = vsel %vm336_vm6, %v8946_v8, %v251_v46 }
  0xba   :  { %v313_v3 = vpop.permute.xlu0 %312 }
  0xbb   :  { %v315_v58 = vpop.permute.xlu1 %314  ;;  %v366_v18 = vsel %vm353_vm7, %v349_v47, %v313_v3 }
  0xbc   :  { %v367_v50 = vsel %vm353_vm7, %v350_v57, %v315_v58  ;;  %8065 = vmatprep.mubr.msk.f32.mxu0 %vm371_vm8, %v366_v18 }
  0xbd   :  { %8066 = vmatmul.mubr.msk.f32.gmra.mrb[12].mxu0 %vm371_vm8, %v367_v50 }
  0xbe   :  { %v253_v51 = vpop.permute.xlu0 %252 }
  0xbf   :  { %v255_v52 = vpop.permute.xlu1 %254  ;;  %v351_v8 = vsel %vm336_vm6, %v8966_v15, %v253_v51 }
  0xc0   :  { %v352_v53 = vsel %vm336_vm6, %v111_v7, %v255_v52  ;;  %vm4266_vm6 = vcmask 195584  }
  0xc2   :  { %v317_v54 = vpop.permute.xlu0 %316 }
  0xc3   :  { %v319_v55 = vpop.permute.xlu1 %318  ;;  %v368_v56 = vsel %vm353_vm7, %v351_v8, %v317_v54 }
  0xc4   :  { %v369_v59 = vsel %vm353_vm7, %v352_v53, %v319_v55  ;;  %8068 = vmatprep.mubr.msk.f32.mxu0 %vm371_vm8, %v368_v56 }
  0xc5   :  { %8069 = vmatmul.mubr.msk.f32.gmra.mrb[14].mxu0 %vm371_vm8, %v369_v59  ;;  %vm5702_vm8 = vcmask 261120  }
 0x164   :  { %v9093_v20 = vpop.f32.mrb[0].mxu0 }
 0x165   :  { %v570_v11 = vmul.f32 %v9093_v20, %v9093_v20  ;;  %v9097_v12 = vpop.f32.mrb[1].mxu0 }
 0x166   :  { %v569_v15 = vmul.f32 %v9097_v12, %v9097_v12 }
 0x167   :  { %603 = vrot.lane.b32.xlu1 %v570_v11, %s8746_s0 }
 0x168   :  { %601 = vrot.lane.b32.xlu0 %v569_v15, %s8746_s0  ;;  %v9103_v32 = vpop.f32.mrb[2].mxu0 }
 0x169   :  { %v572_v26 = vmul.f32 %v9103_v32, %v9103_v32  ;;  %v9107_v60 = vpop.f32.mrb[3].mxu0 }
 0x16a   :  { %v571_v61 = vmul.f32 %v9107_v60, %v9107_v60 }
 0x16b   :  { %607 = vrot.lane.b32.xlu1 %v572_v26, %s8746_s0 }
 0x16c   :  { %605 = vrot.lane.b32.xlu0 %v571_v61, %s8746_s0 }
 0x170   :  { %v9113_v25 = vpop.f32.mrb[4].mxu0 }
 0x171   :  { %v574_v62 = vmul.f32 %v9113_v25, %v9113_v25  ;;  %v9117_v28 = vpop.f32.mrb[5].mxu0 }
 0x172   :  { %v573_v63 = vmul.f32 %v9117_v28, %v9117_v28 }
 0x173   :  { %611 = vrot.lane.b32.xlu1 %v574_v62, %s8746_s0 }
 0x174   :  { %609 = vrot.lane.b32.xlu0 %v573_v63, %s8746_s0 }
 0x178   :  { %v9123_v2 = vpop.f32.mrb[6].mxu0 }
 0x179   :  { %v576_v4 = vmul.f32 %v9123_v2, %v9123_v2  ;;  %v9127_v6 = vpop.f32.mrb[7].mxu0 }
 0x17a   :  { %v575_v9 = vmul.f32 %v9127_v6, %v9127_v6 }
 0x17b   :  { %615 = vrot.lane.b32.xlu1 %v576_v4, %s8746_s0 }
 0x17c   :  { %613 = vrot.lane.b32.xlu0 %v575_v9, %s8746_s0 }
 0x180   :  { %v9133_v10 = vpop.f32.mrb[8].mxu0 }
 0x181   :  { %v578_v36 = vmul.f32 %v9133_v10, %v9133_v10  ;;  %v9137_v37 = vpop.f32.mrb[9].mxu0 }
 0x182   :  { %v577_v13 = vmul.f32 %v9137_v37, %v9137_v37 }
 0x183   :  { %619 = vrot.lane.b32.xlu1 %v578_v36, %s8746_s0 }
 0x184   :  { %617 = vrot.lane.b32.xlu0 %v577_v13, %s8746_s0 }
 0x188   :  { %v9143_v14 = vpop.f32.mrb[10].mxu0 }
 0x189   :  { %v580_v16 = vmul.f32 %v9143_v14, %v9143_v14  ;;  %v9147_v17 = vpop.f32.mrb[11].mxu0 }
 0x18a   :  { %v579_v21 = vmul.f32 %v9147_v17, %v9147_v17 }
 0x18b   :  { %623 = vrot.lane.b32.xlu1 %v580_v16, %s8746_s0 }
 0x18c   :  { %621 = vrot.lane.b32.xlu0 %v579_v21, %s8746_s0 }
 0x190   :  { %v9153_v22 = vpop.f32.mrb[12].mxu0 }
 0x191   :  { %v582_v39 = vmul.f32 %v9153_v22, %v9153_v22  ;;  %v9157_v40 = vpop.f32.mrb[13].mxu0 }
 0x192   :  { %v581_v23 = vmul.f32 %v9157_v40, %v9157_v40 }
 0x193   :  { %627 = vrot.lane.b32.xlu1 %v582_v39, %s8746_s0 }
 0x194   :  { %625 = vrot.lane.b32.xlu0 %v581_v23, %s8746_s0 }
 0x198   :  { %v9163_v24 = vpop.f32.mrb[14].mxu0 }
 0x199   :  { %v584_v29 = vmul.f32 %v9163_v24, %v9163_v24  ;;  %v9167_v30 = vpop.f32.mrb[15].mxu0 }
 0x19a   :  { %v583_v31 = vmul.f32 %v9167_v30, %v9167_v30 }
 0x19b   :  { %631 = vrot.lane.b32.xlu1 %v584_v29, %s8746_s0 }
 0x19c   :  { %629 = vrot.lane.b32.xlu0 %v583_v31, %s8746_s0 }
 0x1d9   :  { %v604_v5 = vpop.permute.xlu1 %603 }
 0x1da   :  { %v651_v35 = vsel %vm649_vm10, %v9093_v20, %v604_v5  ;;  %v602_v44 = vpop.permute.xlu0 %601 }
 0x1db   :  { %v668_v38 = vsel %vm666_vm11, %v651_v35, 0.0  ;;  %v650_v41 = vsel %vm649_vm10, %v9097_v12, %v602_v44 }
 0x1dc   :  { %v667_v48 = vsel %vm666_vm11, %v650_v41, 0.0 }
 0x1dd   :  { %v669_v42 = vadd.f32 %v668_v38, %v667_v48  ;;  %v608_v43 = vpop.permute.xlu1 %607 }
 0x1de   :  { %v606_v45 = vpop.permute.xlu0 %605  ;;  %v653_v46 = vsel %vm649_vm10, %v9103_v32, %v608_v43 }
 0x1df   :  { %v652_v47 = vsel %vm649_vm10, %v9107_v60, %v606_v45  ;;  %v672_v58 = vsel %vm666_vm11, %v653_v46, 0.0 }
 0x1e0   :  { %v670_v57 = vsel %vm666_vm11, %v652_v47, 0.0 }
 0x1e1   :  { %v671_v3 = vadd.f32 %v670_v57, %v669_v42 }
 0x1e3   :  { %v673_v18 = vadd.f32 %v672_v58, %v671_v3 }
 0x1e5   :  { %v612_v50 = vpop.permute.xlu1 %611 }
 0x1e6   :  { %v610_v51 = vpop.permute.xlu0 %609  ;;  %v655_v52 = vsel %vm649_vm10, %v9113_v25, %v612_v50 }
 0x1e7   :  { %v654_v7 = vsel %vm649_vm10, %v9117_v28, %v610_v51  ;;  %v676_v54 = vsel %vm666_vm11, %v655_v52, 0.0 }
 0x1e8   :  { %v674_v8 = vsel %vm666_vm11, %v654_v7, 0.0 }
 0x1e9   :  { %v675_v53 = vadd.f32 %v674_v8, %v673_v18 }
 0x1eb   :  { %v677_v55 = vadd.f32 %v676_v54, %v675_v53 }
 0x1ed   :  { %v616_v56 = vpop.permute.xlu1 %615 }
 0x1ee   :  { %v614_v59 = vpop.permute.xlu0 %613  ;;  %v657_v11 = vsel %vm649_vm10, %v9123_v2, %v616_v56 }
 0x1ef   :  { %v656_v15 = vsel %vm649_vm10, %v9127_v6, %v614_v59  ;;  %v680_v62 = vsel %vm666_vm11, %v657_v11, 0.0 }
 0x1f0   :  { %v678_v26 = vsel %vm666_vm11, %v656_v15, 0.0 }
 0x1f1   :  { %v679_v61 = vadd.f32 %v678_v26, %v677_v55 }
 0x1f3   :  { %v681_v63 = vadd.f32 %v680_v62, %v679_v61 }
 0x1f5   :  { %v620_v4 = vpop.permute.xlu1 %619 }
 0x1f6   :  { %v618_v9 = vpop.permute.xlu0 %617  ;;  %v659_v36 = vsel %vm649_vm10, %v9133_v10, %v620_v4 }
 0x1f7   :  { %v658_v13 = vsel %vm649_vm10, %v9137_v37, %v618_v9  ;;  %v684_v39 = vsel %vm666_vm11, %v659_v36, 0.0 }
 0x1f8   :  { %v682_v16 = vsel %vm666_vm11, %v658_v13, 0.0  ;;  %v712_v13 = vld [vmem:[%s13015_s2] sm:$0x1] }
 0x1f9   :  { %v683_v21 = vadd.f32 %v682_v16, %v681_v63  ;;  %v9227_v16 = vsub.s32 0, %v8793_v1 }
 0x1fb   :  { %v685_v23 = vadd.f32 %v684_v39, %v683_v21 }
 0x1fd   :  { %v624_v29 = vpop.permute.xlu1 %623 }
 0x1fe   :  { %v622_v31 = vpop.permute.xlu0 %621  ;;  %v661_v5 = vsel %vm649_vm10, %v9143_v14, %v624_v29 }
 0x1ff   :  { %v660_v35 = vsel %vm649_vm10, %v9147_v17, %v622_v31  ;;  %v688_v41 = vsel %vm666_vm11, %v661_v5, 0.0 }
 0x200   :  { %v686_v44 = vsel %vm666_vm11, %v660_v35, 0.0 }
 0x201   :  { %v687_v38 = vadd.f32 %v686_v44, %v685_v23  ;;  %v740_v23 = vld [vmem:[%s13015_s2 + $0x1] sm:$0x1] }
 0x203   :  { %v689_v48 = vadd.f32 %v688_v41, %v687_v38 }
 0x205   :  { %v628_v42 = vpop.permute.xlu1 %627 }
 0x206   :  { %v626_v43 = vpop.permute.xlu0 %625  ;;  %v663_v45 = vsel %vm649_vm10, %v9153_v22, %v628_v42 }
 0x207   :  { %v662_v46 = vsel %vm649_vm10, %v9157_v40, %v626_v43  ;;  %v692_v3 = vsel %vm666_vm11, %v663_v45, 0.0 }
 0x208   :  { %v690_v47 = vsel %vm666_vm11, %v662_v46, 0.0 }
 0x209   :  { %v691_v57 = vadd.f32 %v690_v47, %v689_v48 }
 0x20b   :  { %v693_v58 = vadd.f32 %v692_v3, %v691_v57 }
 0x20d   :  { %v632_v18 = vpop.permute.xlu1 %631 }
 0x20e   :  { %v630_v50 = vpop.permute.xlu0 %629  ;;  %v665_v51 = vsel %vm649_vm10, %v9163_v24, %v632_v18 }
 0x20f   :  { %v664_v52 = vsel %vm649_vm10, %v9167_v30, %v630_v50  ;;  %v696_v53 = vsel %vm666_vm11, %v665_v51, 0.0 }
 0x210   :  { %v694_v7 = vsel %vm666_vm11, %v664_v52, 0.0 }
 0x211   :  { %v695_v8 = vadd.f32 %v694_v7, %v693_v58 }
 0x213   :  { %v697_v54 = vadd.f32 %v696_v53, %v695_v8 }
 0x215   :  { %v698_v55 = vrot.slane %v697_v54, 4 }
 0x217   :  { %v699_v56 = vadd.f32 %v698_v55, %v697_v54 }
 0x219   :  { %v700_v59 = vrot.slane %v699_v56, 2 }
 0x21b   :  { %v701_v11 = vadd.f32 %v700_v59, %v699_v56 }
 0x21d   :  { %v702_v15 = vrot.slane %v701_v11, 1 }
 0x21f   :  { %v703_v26 = vadd.f32 %v702_v15, %v701_v11 }
 0x221   :  { %v705_v61 = vmul.f32 0.0078125, %v703_v26 }
 0x223   :  { %v706_v62 = vmul.f32 %v705_v61, %v705_v61 }
 0x225   :  { %708 = vrot.lane.b32.xlu0 %v706_v62, %s8746_s0 }
 0x297   :  { %v709_v63 = vpop.permute.xlu0 %708 }
 0x298   :  { %v711_v4 = vsub.f32 %v705_v61, %v709_v63 }
 0x29a   :  { %v713_v9 = vadd.f32 1e-05, %v711_v4 }
 0x29c   :  { %8659 = vrsqrt.f32 %v713_v9 }
 0x2a6   :  { %v8660_v36 = vpop.eup %8659 }
 0x2a7   :  { %716 = vrot.lane.b32.xlu1 %v8660_v36, %s8747_s1 }
 0x319   :  { %v717_v21 = vpop.permute.xlu1 %716 }
 0x31a   :  { %v719_v39 = vmul.f32 %v717_v21, %v712_v13 }
 0x31c   :  { %v9233_v29 = vrot.slane %v719_v39, %v9227_v16  ;;  %v741_v31 = vmul.f32 %v719_v39, %v705_v61 }
 0x31e   :  { %v742_v5 = vsub.f32 %v740_v23, %v741_v31  ;;  %v725_v35 = vmul.f32 %v9093_v20, %v9233_v29  ;;  %v726_v44 = vmul.f32 %v9233_v29, %v9107_v60  ;;  %v727_v38 = vmul.f32 %v9103_v32, %v9233_v29 }
 0x31f   :  { %v724_v41 = vmul.f32 %v9233_v29, %v9097_v12  ;;  %v728_v48 = vmul.f32 %v9233_v29, %v9117_v28  ;;  %v729_v42 = vmul.f32 %v9113_v25, %v9233_v29  ;;  %v730_v43 = vmul.f32 %v9233_v29, %v9127_v6 }
 0x320   :  { %v9250_v20 = vrot.slane %v742_v5, %v9227_v16  ;;  %v731_v60 = vmul.f32 %v9123_v2, %v9233_v29  ;;  %v733_v32 = vmul.f32 %v9133_v10, %v9233_v29  ;;  %v734_v12 = vmul.f32 %v9233_v29, %v9147_v17 }
 0x321   :  { %v735_v28 = vmul.f32 %v9143_v14, %v9233_v29  ;;  %v732_v25 = vmul.f32 %v9233_v29, %v9137_v37  ;;  %v739_v6 = vmul.f32 %v9163_v24, %v9233_v29  ;;  %v9266_v45 = vmul.f32 %v9233_v29, %v9157_v40 }
 0x322   :  { %v9269_v2 = vadd.f32 %v9250_v20, %v725_v35  ;;  %v749_v10 = vadd.f32 %v9250_v20, %v726_v44  ;;  %v750_v17 = vadd.f32 %v9250_v20, %v727_v38  ;;  %v9274_v46 = vadd.f32 %v9250_v20, %v724_v41 }
 0x323   :  { %v751_v14 = vadd.f32 %v9250_v20, %v728_v48  ;;  %v752_v37 = vadd.f32 %v9250_v20, %v729_v42  ;;  %v9279_v24 = vadd.f32 %v9250_v20, %v730_v43  ;;  %v9282_v40 = vadd.f32 %v9250_v20, %v731_v60 }
 0x324   :  { %v764_v47 = vrot.slane %v9269_v2, 7  ;;  %v765_v57 = vrot.slane %v749_v10, 7  ;;  %v813_v3 = vrot.slane %v749_v10, 1  ;;  %v814_v58 = vrot.slane %v750_v17, 1 }
 0x325   :  { %v763_v18 = vrot.slane %v9274_v46, 7  ;;  %v812_v50 = vrot.slane %v9269_v2, 1  ;;  %v766_v51 = vrot.slane %v750_v17, 7  ;;  %v767_v52 = vrot.slane %v751_v14, 7 }
 0x326   :  { %v792_v7 = vsel %vm110_vm2, %v764_v47, %v765_v57  ;;  %v839_v8 = vsel %vm175_vm0, %v813_v3, %v814_v58  ;;  %v815_v53 = vrot.slane %v751_v14, 1  ;;  %v816_v54 = vrot.slane %v752_v37, 1 }
 0x327   :  { %v861_v55 = vmax.f32 %v792_v7, %v839_v8  ;;  %v793_v56 = vsel %vm110_vm2, %v763_v18, %v764_v47  ;;  %v840_v59 = vsel %vm175_vm0, %v812_v50, %v813_v3  ;;  %v790_v11 = vsel %vm110_vm2, %v766_v51, %v767_v52 }
 0x328   :  { %v860_v15 = vmax.f32 %v793_v56, %v840_v59  ;;  %v837_v26 = vsel %vm175_vm0, %v815_v53, %v816_v54  ;;  %v791_v61 = vsel %vm110_vm2, %v765_v57, %v766_v51  ;;  %v838_v62 = vsel %vm175_vm0, %v814_v58, %v815_v53 }
 0x329   :  { %v9305_v63 = vmax.f32 %v861_v55, %v749_v10  ;;  %v863_v4 = vmax.f32 %v790_v11, %v837_v26  ;;  %v862_v9 = vmax.f32 %v791_v61, %v838_v62  ;;  %v768_v36 = vrot.slane %v752_v37, 7 }
 0x32a   :  { %v9308_v13 = vmax.f32 %v860_v15, %v9269_v2  ;;  %v769_v21 = vrot.slane %v9279_v24, 7  ;;  %v817_v39 = vrot.slane %v9279_v24, 1  ;;  %v818_v23 = vrot.slane %v9282_v40, 1 }
 0x32b   :  { %1007 = vrot.lane.b32.xlu0 %v9305_v63, %s8746_s0  ;;  %v9315_v31 = vmax.f32 %v863_v4, %v751_v14  ;;  %v9317_v5 = vmax.f32 %v862_v9, %v750_v17  ;;  %v789_v35 = vsel %vm110_vm2, %v767_v52, %v768_v36  ;;  %v756_v44 = vadd.f32 %v9250_v20, %v733_v32 }
 0x32c   :  { %1005 = vrot.lane.b32.xlu1 %v9308_v13, %s8746_s0  ;;  %v788_v38 = vsel %vm110_vm2, %v768_v36, %v769_v21  ;;  %v835_v41 = vsel %vm175_vm0, %v817_v39, %v818_v23  ;;  %v836_v48 = vsel %vm175_vm0, %v816_v54, %v817_v39  ;;  %v757_v42 = vadd.f32 %v9250_v20, %v734_v12 }
 0x32d   :  { %v865_v43 = vmax.f32 %v788_v38, %v835_v41  ;;  %v864_v60 = vmax.f32 %v789_v35, %v836_v48  ;;  %v9332_v2 = vadd.f32 %v9250_v20, %v735_v28  ;;  %v772_v32 = vrot.slane %v756_v44, 7 }
 0x32e   :  { %v773_v10 = vrot.slane %v757_v42, 7  ;;  %v821_v17 = vrot.slane %v757_v42, 1  ;;  %v755_v14 = vadd.f32 %v9250_v20, %v732_v25  ;;  %v820_v47 = vrot.slane %v756_v44, 1 }
 0x32f   :  { %1011 = vrot.lane.b32.xlu0 %v9315_v31, %s8746_s0  ;;  %v9338_v57 = vmax.f32 %v865_v43, %v9279_v24  ;;  %v9340_v3 = vmax.f32 %v864_v60, %v752_v37  ;;  %v822_v12 = vrot.slane %v9332_v2, 1  ;;  %v9344_v58 = vadd.f32 %v9250_v20, %v739_v6 }
 0x330   :  { %1009 = vrot.lane.b32.xlu1 %v9317_v5, %s8746_s0  ;;  %v784_v28 = vsel %vm110_vm2, %v772_v32, %v773_v10  ;;  %v771_v25 = vrot.slane %v755_v14, 7  ;;  %v832_v51 = vsel %vm175_vm0, %v820_v47, %v821_v17  ;;  %v811_v24 = vrot.slane %v9274_v46, 1 }
 0x331   :  { %v831_v37 = vsel %vm175_vm0, %v821_v17, %v822_v12  ;;  %v778_v52 = vrot.slane %v9344_v58, 7  ;;  %v9358_v6 = vadd.f32 %v9250_v20, %v9266_v45  ;;  %v774_v7 = vrot.slane %v9332_v2, 7 }
 0x332   :  { %v869_v8 = vmax.f32 %v784_v28, %v831_v37  ;;  %v785_v53 = vsel %vm110_vm2, %v771_v25, %v772_v32  ;;  %v841_v54 = vsel %vm175_vm0, %v811_v24, %v812_v50  ;;  %v770_v55 = vrot.slane %v9282_v40, 7 }
 0x333   :  { %1015 = vrot.lane.b32.xlu0 %v9338_v57, %s8746_s0  ;;  %v868_v56 = vmax.f32 %v785_v53, %v832_v51  ;;  %v794_v45 = vsel %vm110_vm2, %v778_v52, %v763_v18  ;;  %v783_v59 = vsel %vm110_vm2, %v773_v10, %v774_v7  ;;  %v823_v11 = vrot.slane %v9358_v6, 1 }
 0x334   :  { %1013 = vrot.lane.b32.xlu1 %v9340_v3, %s8746_s0  ;;  %v9379_v50 = vmax.f32 %v869_v8, %v757_v42  ;;  %v795_v15 = vsel %vm9006_vm5, %v9274_v46, %v794_v45  ;;  %v786_v26 = vsel %vm110_vm2, %v770_v55, %v771_v25  ;;  %v819_v61 = vrot.slane %v755_v14, 1 }
 0x335   :  { %v9386_v62 = vmax.f32 %v868_v56, %v756_v44  ;;  %v859_v18 = vmax.f32 %v795_v15, %v841_v54  ;;  %v830_v4 = vsel %vm175_vm0, %v822_v12, %v823_v11  ;;  %v803_v9 = vsel %vm9049_vm9, %v755_v14, %v786_v26 }
 0x336   :  { %v870_v36 = vmax.f32 %v783_v59, %v830_v4  ;;  %v833_v39 = vsel %vm175_vm0, %v819_v61, %v820_v47  ;;  %v787_v35 = vsel %vm110_vm2, %v769_v21, %v770_v55  ;;  %v834_v38 = vsel %vm175_vm0, %v818_v23, %v819_v61 }
 0x337   :  { %1023 = vrot.lane.b32.xlu0 %v9379_v50, %s8746_s0  ;;  %v9401_v44 = vmax.f32 %v859_v18, %v9274_v46  ;;  %v867_v41 = vmax.f32 %v803_v9, %v833_v39  ;;  %v850_v48 = vsel %vm8900_vm3, %v9282_v40, %v834_v38  ;;  %v737_v46 = vmul.f32 %v9153_v22, %v9233_v29 }
 0x338   :  { %1021 = vrot.lane.b32.xlu1 %v9386_v62, %s8746_s0  ;;  %v9409_v42 = vmax.f32 %v870_v36, %v9332_v2  ;;  %v866_v21 = vmax.f32 %v787_v35, %v850_v48  ;;  %v941_v60 = vrot.slane %v9305_v63, 1  ;;  %v942_v2 = vrot.slane %v9317_v5, 1 }
 0x339   :  { %v9411_v43 = vmax.f32 %v867_v41, %v755_v14  ;;  %v775_v32 = vrot.slane %v9358_v6, 7  ;;  %v760_v10 = vadd.f32 %v9250_v20, %v737_v46  ;;  %v826_v17 = vrot.slane %v9344_v58, 1  ;;  %v1147_v46 = vld [vmem:[#allocation3 + $0x8] sm:$0xff] }
 0x33a   :  { %v9414_v23 = vmax.f32 %v866_v21, %v9282_v40  ;;  %v738_v40 = vmul.f32 %v9233_v29, %v9167_v30  ;;  %v940_v14 = vrot.slane %v9308_v13, 1  ;;  %v967_v30 = vsel %vm175_vm0, %v941_v60, %v942_v2 }
 0x33b   :  { %1003 = vrot.lane.b32.xlu0 %v9401_v44, %s8746_s0  ;;  %v782_v22 = vsel %vm110_vm2, %v774_v7, %v775_v32  ;;  %v824_v47 = vrot.slane %v760_v10, 1  ;;  %v776_v28 = vrot.slane %v760_v10, 7  ;;  %v943_v29 = vrot.slane %v9315_v31, 1 }
 0x33c   :  { %1025 = vrot.lane.b32.xlu1 %v9409_v42, %s8746_s0  ;;  %v761_v12 = vadd.f32 %v9250_v20, %v738_v40  ;;  %v944_v25 = vrot.slane %v9340_v3, 1  ;;  %v842_v51 = vsel %vm175_vm0, %v826_v17, %v811_v24  ;;  %v968_v20 = vsel %vm175_vm0, %v940_v14, %v941_v60  ;;  %v1148_v60 = vld [vmem:[#allocation3 + $0x10] sm:$0xf] }
 0x33d   :  { %v829_v37 = vsel %vm175_vm0, %v823_v11, %v824_v47  ;;  %v781_v7 = vsel %vm110_vm2, %v775_v32, %v776_v28  ;;  %v858_v55 = vsel %vm8986_vm4, %v9344_v58, %v842_v51  ;;  %v939_v4 = vrot.slane %v9401_v44, 1 }
 0x33e   :  { %v825_v8 = vrot.slane %v761_v12, 1  ;;  %v777_v53 = vrot.slane %v761_v12, 7  ;;  %v871_v54 = vmax.f32 %v782_v22, %v829_v37  ;;  %v965_v18 = vsel %vm175_vm0, %v943_v29, %v944_v25 }
 0x33f   :  { %1019 = vrot.lane.b32.xlu0 %v9411_v43, %s8746_s0  ;;  %v945_v9 = vrot.slane %v9338_v57, 1  ;;  %v966_v36 = vsel %vm175_vm0, %v942_v2, %v943_v29  ;;  %v969_v35 = vsel %vm175_vm0, %v939_v4, %v940_v14  ;;  %v949_v38 = vrot.slane %v9379_v50, 1 }
 0x340   :  { %1017 = vrot.lane.b32.xlu1 %v9414_v23, %s8746_s0  ;;  %v828_v24 = vsel %vm175_vm0, %v824_v47, %v825_v8  ;;  %v780_v56 = vsel %vm110_vm2, %v776_v28, %v777_v53  ;;  %v827_v45 = vsel %vm175_vm0, %v825_v8, %v826_v17  ;;  %v779_v59 = vsel %vm110_vm2, %v777_v53, %v778_v52 }
 0x341   :  { %v9465_v11 = vmax.f32 %v871_v54, %v9358_v6  ;;  %v872_v15 = vmax.f32 %v781_v7, %v828_v24  ;;  %v873_v26 = vmax.f32 %v780_v56, %v827_v45  ;;  %v874_v61 = vmax.f32 %v779_v59, %v858_v55 }
 0x342   :  { %v950_v41 = vrot.slane %v9409_v42, 1  ;;  %v964_v48 = vsel %vm175_vm0, %v944_v25, %v945_v9  ;;  %v948_v21 = vrot.slane %v9386_v62, 1  ;;  %v8462_v2 = vpack.c.bf16 %v1148_v60, %v1147_v46 }
 0x343   :  { %1071 = vrot.lane.b32.xlu0 %v967_v30, %s8743_s23  ;;  %v9474_v39 = vmax.f32 %v872_v15, %v760_v10  ;;  %v9476_v52 = vmax.f32 %v873_v26, %v761_v12  ;;  %v9479_v6 = vmax.f32 %v874_v61, %v9344_v58  ;;  %v951_v10 = vrot.slane %v9465_v11, 1 }
 0x344   :  { %1069 = vrot.lane.b32.xlu1 %v968_v20, %s8743_s23  ;;  %v959_v58 = vsel %vm175_vm0, %v949_v38, %v950_v41  ;;  %v960_v32 = vsel %vm175_vm0, %v948_v21, %v949_v38  ;;  %v13035_v40 = vmov 0  ;;  %v946_v17 = vrot.slane %v9414_v23, 1  ;;  %8464 = vmatprep.subr.msk.bf16.mxu1 %vm9498_vm14, %v8462_v2 }
 0x345   :  { %13033 = vst [vmem:[#allocation10_spill] sm:$0xff] %v9476_v52  ;;  %13034 = vst [vmem:[#allocation11_spill] sm:$0xff] %v9479_v6  ;;  %v13036_v40 = vsel %vm9498_vm14, 4294967295, %v13035_v40  ;;  %v947_v14 = vrot.slane %v9411_v43, 1  ;;  %8467 = vmatpush3.bf16.msk.msra.mxu1 %vm9498_vm14, %v8462_v2  ;;  %v958_v22 = vsel %vm175_vm0, %v950_v41, %v951_v10  ;;  %v952_v29 = vrot.slane %v9474_v39, 1 }
 0x346   :  { %13037 = vst [vmem:[#allocation12_spill] sm:$0xff] %v13036_v40  ;;  %v963_v12 = vsel %vm175_vm0, %v945_v9, %v946_v17  ;;  %v953_v25 = vrot.slane %v9476_v52, 1  ;;  %v954_v7 = vrot.slane %v9479_v6, 1  ;;  %v893_v60 = vrot.slane %v9305_v63, 7 }
 0x347   :  { %1075 = vrot.lane.b32.xlu0 %v965_v18, %s8743_s23  ;;  %v962_v47 = vsel %vm175_vm0, %v946_v17, %v947_v14  ;;  %v961_v30 = vsel %vm175_vm0, %v947_v14, %v948_v21  ;;  %v957_v51 = vsel %vm175_vm0, %v951_v10, %v952_v29  ;;  %v894_v10 = vrot.slane %v9317_v5, 7 }
 0x348   :  { %1073 = vrot.lane.b32.xlu1 %v966_v36, %s8743_s23  ;;  %v978_v28 = vsel %vm8900_vm3, 0.0, %v962_v47  ;;  %v956_v37 = vsel %vm175_vm0, %v952_v29, %v953_v25  ;;  %v970_v8 = vsel %vm175_vm0, %v954_v7, %v939_v4  ;;  %v955_v53 = vsel %vm175_vm0, %v953_v25, %v954_v7 }
 0x349   :  { %v986_v20 = vsel %vm8986_vm4, 0.0, %v970_v8  ;;  %v891_v36 = vrot.slane %v9401_v44, 7  ;;  %v896_v7 = vrot.slane %v9340_v3, 7 }
 0x34b   :  { %1067 = vrot.lane.b32.xlu0 %v969_v35, %s8743_s23  ;;  %v906_v35 = vrot.slane %v9479_v6, 7 }
 0x34c   :  { %1077 = vrot.lane.b32.xlu1 %v964_v48, %s8743_s23  ;;  %v892_v48 = vrot.slane %v9308_v13, 7 }
 0x34d   :  { %v922_v21 = vsel %vm110_vm2, %v906_v35, %v891_v36 }
 0x34e   :  { %v923_v2 = vsel %vm9006_vm5, 0.0, %v922_v21  ;;  %v898_v21 = vrot.slane %v9414_v23, 7 }
 0x34f   :  { %1087 = vrot.lane.b32.xlu0 %v959_v58, %s8743_s23 }
 0x350   :  { %1085 = vrot.lane.b32.xlu1 %v960_v32, %s8743_s23  ;;  %v921_v32 = vsel %vm110_vm2, %v891_v36, %v892_v48  ;;  %v897_v36 = vrot.slane %v9338_v57, 7 }
 0x353   :  { %1027 = vrot.lane.b32.xlu0 %v9465_v11, %s8746_s0 }
 0x354   :  { %1089 = vrot.lane.b32.xlu1 %v958_v22, %s8743_s23  ;;  %v920_v22 = vsel %vm110_vm2, %v892_v48, %v893_v60  ;;  %v899_v48 = vrot.slane %v9411_v43, 7 }
 0x357   :  { %1079 = vrot.lane.b32.xlu0 %v963_v12, %s8743_s23  ;;  %v895_v12 = vrot.slane %v9315_v31, 7 }
 0x358   :  { %1081 = vrot.lane.b32.xlu1 %v978_v28, %s8743_s23 }
 0x35b   :  { %1083 = vrot.lane.b32.xlu0 %v961_v30, %s8743_s23 }
 0x35c   :  { %1029 = vrot.lane.b32.xlu1 %v9474_v39, %s8746_s0 }
 0x35f   :  { %1091 = vrot.lane.b32.xlu0 %v957_v51, %s8743_s23 }
 0x360   :  { %1093 = vrot.lane.b32.xlu1 %v956_v37, %s8743_s23  ;;  %v919_v37 = vsel %vm110_vm2, %v893_v60, %v894_v10 }
 0x363   :  { %1031 = vrot.lane.b32.xlu0 %v9476_v52, %s8746_s0 }
 0x364   :  { %1033 = vrot.lane.b32.xlu1 %v9479_v6, %s8746_s0 }
 0x367   :  { %1095 = vrot.lane.b32.xlu0 %v955_v53, %s8743_s23  ;;  %v918_v53 = vsel %vm110_vm2, %v894_v10, %v895_v12  ;;  %v914_v10 = vsel %vm110_vm2, %v898_v21, %v899_v48 }
 0x368   :  { %1097 = vrot.lane.b32.xlu1 %v986_v20, %s8743_s23 }
 0x39d   :  { %v1008_v54 = vpop.permute.xlu0 %1007 }
 0x39e   :  { %v1006_v55 = vpop.permute.xlu1 %1005  ;;  %v1117_v29 = vsel %vm649_vm10, %v920_v22, %v1008_v54 }
 0x39f   :  { %v1116_v47 = vsel %vm649_vm10, %v921_v32, %v1006_v55  ;;  %v900_v32 = vrot.slane %v9386_v62, 7 }
 0x3a1   :  { %v1012_v24 = vpop.permute.xlu0 %1011 }
 0x3a2   :  { %v1010_v56 = vpop.permute.xlu1 %1009  ;;  %v1119_v55 = vsel %vm649_vm10, %v918_v53, %v1012_v24 }
 0x3a3   :  { %v1118_v20 = vsel %vm649_vm10, %v919_v37, %v1010_v56 }
 0x3a5   :  { %v1016_v45 = vpop.permute.xlu0 %1015 }
 0x3a6   :  { %v1014_v59 = vpop.permute.xlu1 %1013 }
 0x3a9   :  { %v9548_v15 = vpop.permute.xlu0 %1023 }
 0x3aa   :  { %v9550_v26 = vpop.permute.xlu1 %1021 }
 0x3ad   :  { %v1004_v61 = vpop.permute.xlu0 %1003 }
 0x3ae   :  { %v9552_v18 = vpop.permute.xlu1 %1025  ;;  %v1115_v17 = vsel %vm649_vm10, %v923_v2, %v1004_v61 }
 0x3b1   :  { %v9554_v4 = vpop.permute.xlu0 %1019 }
 0x3b2   :  { %v1018_v9 = vpop.permute.xlu1 %1017 }
 0x3b5   :  { %v1072_v38 = vpop.permute.xlu0 %1071 }
 0x3b6   :  { %v1070_v41 = vpop.permute.xlu1 %1069  ;;  %v1133_v51 = vsel %vm666_vm11, %v1117_v29, %v1072_v38  ;;  %v902_v29 = vrot.slane %v9409_v42, 7 }
 0x3b7   :  { %v1132_v25 = vsel %vm666_vm11, %v1116_v47, %v1070_v41  ;;  %v917_v41 = vsel %vm110_vm2, %v895_v12, %v896_v7 }
 0x3b8   :  { %v1120_v24 = vsel %vm649_vm10, %v917_v41, %v1014_v59  ;;  %v901_v59 = vrot.slane %v9379_v50, 7 }
 0x3b9   :  { %v1076_v46 = vpop.permute.xlu0 %1075 }
 0x3ba   :  { %v1074_v58 = vpop.permute.xlu1 %1073  ;;  %v1135_v38 = vsel %vm666_vm11, %v1119_v55, %v1076_v46  ;;  %v916_v46 = vsel %vm110_vm2, %v896_v7, %v897_v36  ;;  %v903_v7 = vrot.slane %v9465_v11, 7 }
 0x3bb   :  { %v1134_v61 = vsel %vm666_vm11, %v1118_v20, %v1074_v58  ;;  %v1121_v2 = vsel %vm649_vm10, %v916_v46, %v1016_v45  ;;  %v931_v45 = vsel %vm9049_vm9, 0.0, %v914_v10 }
 0x3bd   :  { %v1068_v14 = vpop.permute.xlu0 %1067 }
 0x3be   :  { %v1078_v28 = vpop.permute.xlu1 %1077  ;;  %v1131_v30 = vsel %vm666_vm11, %v1115_v17, %v1068_v14  ;;  %v915_v17 = vsel %vm110_vm2, %v897_v36, %v898_v21  ;;  %v911_v36 = vsel %vm110_vm2, %v901_v59, %v902_v29 }
 0x3bf   :  { %8075 = vmatprep.mubr.msk.f32.mxu1 %vm1149_vm15, %v1131_v30  ;;  %v1136_v58 = vsel %vm666_vm11, %v1120_v24, %v1078_v28  ;;  %v1122_v22 = vsel %vm649_vm10, %v915_v17, %v1018_v9  ;;  %v913_v30 = vsel %vm110_vm2, %v899_v48, %v900_v32  ;;  %v1123_v9 = vsel %vm649_vm10, %v931_v45, %v9554_v4 }
 0x3c0   :  { %8076 = vmatmul.mubr.msk.f32.vlgmr.msra.gmra.mrb[0].mxu1 %vm1149_vm15, %v1132_v25  ;;  %v1124_v37 = vsel %vm649_vm10, %v913_v30, %v9550_v26  ;;  %v904_v26 = vrot.slane %v9474_v39, 7  ;;  %v1126_v41 = vsel %vm649_vm10, %v911_v36, %v9552_v18  ;;  %v905_v24 = vrot.slane %v9476_v52, 7 }
 0x3c1   :  { %v1088_v8 = vpop.permute.xlu0 %1087  ;;  %8078 = vmatprep.mubr.msk.f32.mxu1 %vm1149_vm15, %v1133_v51  ;;  %v912_v51 = vsel %vm110_vm2, %v900_v32, %v901_v59 }
 0x3c2   :  { %v1086_v54 = vpop.permute.xlu1 %1085  ;;  %v1125_v55 = vsel %vm649_vm10, %v912_v51, %v9548_v15  ;;  %v910_v15 = vsel %vm110_vm2, %v902_v29, %v903_v7  ;;  %v907_v10 = vsel %vm110_vm2, %v905_v24, %v906_v35 }
 0x3c3   :  { %v1141_v4 = vsel %vm666_vm11, %v1125_v55, %v1088_v8 }
 0x3c4   :  { %8079 = vmatmul.mubr.msk.f32.gmra.mrb[2].mxu1 %vm1149_vm15, %v1134_v61  ;;  %v1140_v61 = vsel %vm666_vm11, %v1124_v37, %v1086_v54 }
 0x3c5   :  { %v1028_v60 = vpop.permute.xlu0 %1027  ;;  %8081 = vmatprep.mubr.msk.f32.mxu1 %vm1149_vm15, %v1135_v38 }
 0x3c6   :  { %v1090_v56 = vpop.permute.xlu1 %1089  ;;  %v1127_v48 = vsel %vm649_vm10, %v910_v15, %v1028_v60  ;;  %v908_v60 = vsel %vm110_vm2, %v904_v26, %v905_v24 }
 0x3c7   :  { %v1142_v8 = vsel %vm666_vm11, %v1126_v41, %v1090_v56 }
 0x3c8   :  { %8082 = vmatmul.mubr.msk.f32.gmra.mrb[4].mxu1 %vm1149_vm15, %v1136_v58  ;;  %v909_v58 = vsel %vm110_vm2, %v903_v7, %v904_v26 }
 0x3c9   :  { %v1080_v14 = vpop.permute.xlu0 %1079 }
 0x3ca   :  { %v1137_v47 = vsel %vm666_vm11, %v1121_v2, %v1080_v14  ;;  %v1082_v12 = vpop.permute.xlu1 %1081 }
 0x3cb   :  { %v1138_v28 = vsel %vm666_vm11, %v1122_v22, %v1082_v12  ;;  %8084 = vmatprep.mubr.msk.f32.mxu1 %vm1149_vm15, %v1137_v47 }
 0x3cc   :  { %8085 = vmatmul.mubr.msk.f32.gmra.mrb[6].mxu1 %vm1149_vm15, %v1138_v28 }
 0x3cd   :  { %v1084_v25 = vpop.permute.xlu0 %1083 }
 0x3ce   :  { %v1139_v53 = vsel %vm666_vm11, %v1123_v9, %v1084_v25  ;;  %v1030_v20 = vpop.permute.xlu1 %1029 }
 0x3cf   :  { %8087 = vmatprep.mubr.msk.f32.mxu1 %vm1149_vm15, %v1139_v53  ;;  %v1128_v18 = vsel %vm649_vm10, %v909_v58, %v1030_v20 }
 0x3d0   :  { %8088 = vmatmul.mubr.msk.f32.gmra.mrb[8].mxu1 %vm1149_vm15, %v1140_v61 }
 0x3d1   :  { %v1092_v38 = vpop.permute.xlu0 %1091  ;;  %8090 = vmatprep.mubr.msk.f32.mxu1 %vm1149_vm15, %v1141_v4 }
 0x3d2   :  { %v1094_v54 = vpop.permute.xlu1 %1093  ;;  %v1143_v21 = vsel %vm666_vm11, %v1127_v48, %v1092_v38 }
 0x3d3   :  { %v1144_v32 = vsel %vm666_vm11, %v1128_v18, %v1094_v54 }
 0x3d4   :  { %8091 = vmatmul.mubr.msk.f32.gmra.mrb[10].mxu1 %vm1149_vm15, %v1142_v8 }
 0x3d5   :  { %v1032_v46 = vpop.permute.xlu0 %1031  ;;  %8093 = vmatprep.mubr.msk.f32.mxu1 %vm1149_vm15, %v1143_v21 }
 0x3d6   :  { %v1034_v2 = vpop.permute.xlu1 %1033  ;;  %v1129_v56 = vsel %vm649_vm10, %v908_v60, %v1032_v46 }
 0x3d7   :  { %v1130_v14 = vsel %vm649_vm10, %v907_v10, %v1034_v2 }
 0x3d8   :  { %8094 = vmatmul.mubr.msk.f32.gmra.mrb[12].mxu1 %vm1149_vm15, %v1144_v32 }
 0x3d9   :  { %v1096_v17 = vpop.permute.xlu0 %1095 }
 0x3da   :  { %v1145_v59 = vsel %vm666_vm11, %v1129_v56, %v1096_v17  ;;  %v1098_v22 = vpop.permute.xlu1 %1097 }
 0x3db   :  { %v1146_v47 = vsel %vm666_vm11, %v1130_v14, %v1098_v22  ;;  %8096 = vmatprep.mubr.msk.f32.mxu1 %vm1149_vm15, %v1145_v59 }
 0x3dc   :  { %8097 = vmatmul.mubr.msk.f32.gmra.mrb[14].mxu1 %vm1149_vm15, %v1146_v47 }
 0x493   :  { %v9664_v12 = vpop.f32.mrb[0].mxu1 }
 0x494   :  { %v1348_v28 = vmul.f32 %v9664_v12, %v9664_v12  ;;  %v9668_v45 = vpop.f32.mrb[1].mxu1 }
 0x495   :  { %v1347_v35 = vmul.f32 %v9668_v45, %v9668_v45 }
 0x496   :  { %1381 = vrot.lane.b32.xlu1 %v1348_v28, %s8746_s0 }
 0x497   :  { %1379 = vrot.lane.b32.xlu0 %v1347_v35, %s8746_s0  ;;  %v9674_v30 = vpop.f32.mrb[2].mxu1 }
 0x498   :  { %v1350_v29 = vmul.f32 %v9674_v30, %v9674_v30  ;;  %v9678_v9 = vpop.f32.mrb[3].mxu1 }
 0x499   :  { %v1349_v25 = vmul.f32 %v9678_v9, %v9678_v9 }
 0x49a   :  { %1385 = vrot.lane.b32.xlu1 %v1350_v29, %s8746_s0 }
 0x49b   :  { %1383 = vrot.lane.b32.xlu0 %v1349_v25, %s8746_s0  ;;  %v9684_v51 = vpop.f32.mrb[4].mxu1 }
 0x49c   :  { %v1352_v37 = vmul.f32 %v9684_v51, %v9684_v51  ;;  %v9688_v7 = vpop.f32.mrb[5].mxu1 }
 0x49d   :  { %v1351_v53 = vmul.f32 %v9688_v7, %v9688_v7 }
 0x49e   :  { %1389 = vrot.lane.b32.xlu1 %v1352_v37, %s8746_s0 }
 0x49f   :  { %1387 = vrot.lane.b32.xlu0 %v1351_v53, %s8746_s0  ;;  %v9694_v20 = vpop.f32.mrb[6].mxu1 }
 0x4a0   :  { %v1354_v55 = vmul.f32 %v9694_v20, %v9694_v20  ;;  %v9698_v61 = vpop.f32.mrb[7].mxu1 }
 0x4a1   :  { %v1353_v4 = vmul.f32 %v9698_v61, %v9698_v61 }
 0x4a2   :  { %1393 = vrot.lane.b32.xlu1 %v1354_v55, %s8746_s0 }
 0x4a3   :  { %1391 = vrot.lane.b32.xlu0 %v1353_v4, %s8746_s0  ;;  %v9704_v36 = vpop.f32.mrb[8].mxu1 }
 0x4a4   :  { %v1356_v26 = vmul.f32 %v9704_v36, %v9704_v36  ;;  %v9708_v38 = vpop.f32.mrb[9].mxu1 }
 0x4a5   :  { %v1355_v41 = vmul.f32 %v9708_v38, %v9708_v38 }
 0x4a6   :  { %1397 = vrot.lane.b32.xlu1 %v1356_v26, %s8746_s0 }
 0x4a7   :  { %1395 = vrot.lane.b32.xlu0 %v1355_v41, %s8746_s0  ;;  %v9714_v15 = vpop.f32.mrb[10].mxu1 }
 0x4a8   :  { %v1358_v54 = vmul.f32 %v9714_v15, %v9714_v15  ;;  %v9718_v48 = vpop.f32.mrb[11].mxu1 }
 0x4a9   :  { %v1357_v8 = vmul.f32 %v9718_v48, %v9718_v48 }
 0x4aa   :  { %1401 = vrot.lane.b32.xlu1 %v1358_v54, %s8746_s0 }
 0x4ab   :  { %1399 = vrot.lane.b32.xlu0 %v1357_v8, %s8746_s0  ;;  %v9724_v21 = vpop.f32.mrb[12].mxu1 }
 0x4ac   :  { %v1360_v24 = vmul.f32 %v9724_v21, %v9724_v21  ;;  %v9728_v58 = vpop.f32.mrb[13].mxu1 }
 0x4ad   :  { %v1359_v46 = vmul.f32 %v9728_v58, %v9728_v58 }
 0x4ae   :  { %1405 = vrot.lane.b32.xlu1 %v1360_v24, %s8746_s0 }
 0x4af   :  { %1403 = vrot.lane.b32.xlu0 %v1359_v46, %s8746_s0  ;;  %v9734_v18 = vpop.f32.mrb[14].mxu1 }
 0x4b0   :  { %v1362_v2 = vmul.f32 %v9734_v18, %v9734_v18  ;;  %v9738_v32 = vpop.f32.mrb[15].mxu1 }
 0x4b1   :  { %v1361_v60 = vmul.f32 %v9738_v32, %v9738_v32 }
 0x4b2   :  { %1409 = vrot.lane.b32.xlu1 %v1362_v2, %s8746_s0 }
 0x4b3   :  { %1407 = vrot.lane.b32.xlu0 %v1361_v60, %s8746_s0 }
 0x508   :  { %v1382_v56 = vpop.permute.xlu1 %1381 }
 0x509   :  { %v1428_v10 = vsel %vm649_vm10, %v9664_v12, %v1382_v56  ;;  %v1380_v17 = vpop.permute.xlu0 %1379 }
 0x50a   :  { %v1444_v14 = vsel %vm666_vm11, %v1428_v10, 0.0  ;;  %v1427_v59 = vsel %vm649_vm10, %v9668_v45, %v1380_v17 }
 0x50b   :  { %v1443_v22 = vsel %vm666_vm11, %v1427_v59, 0.0 }
 0x50c   :  { %v1445_v47 = vadd.f32 %v1444_v14, %v1443_v22  ;;  %v1386_v28 = vpop.permute.xlu1 %1385 }
 0x50d   :  { %v1384_v35 = vpop.permute.xlu0 %1383  ;;  %v1430_v29 = vsel %vm649_vm10, %v9674_v30, %v1386_v28 }
 0x50e   :  { %v1429_v25 = vsel %vm649_vm10, %v9678_v9, %v1384_v35  ;;  %v1448_v4 = vsel %vm666_vm11, %v1430_v29, 0.0 }
 0x50f   :  { %v1446_v37 = vsel %vm666_vm11, %v1429_v25, 0.0 }
 0x510   :  { %v1447_v53 = vadd.f32 %v1446_v37, %v1445_v47  ;;  %v1390_v55 = vpop.permute.xlu1 %1389 }
 0x511   :  { %v1388_v26 = vpop.permute.xlu0 %1387  ;;  %v1432_v41 = vsel %vm649_vm10, %v9684_v51, %v1390_v55 }
 0x512   :  { %v1449_v54 = vadd.f32 %v1448_v4, %v1447_v53  ;;  %v1431_v8 = vsel %vm649_vm10, %v9688_v7, %v1388_v26  ;;  %v1452_v60 = vsel %vm666_vm11, %v1432_v41, 0.0 }
 0x513   :  { %v1450_v24 = vsel %vm666_vm11, %v1431_v8, 0.0 }
 0x514   :  { %v1451_v46 = vadd.f32 %v1450_v24, %v1449_v54  ;;  %v1394_v2 = vpop.permute.xlu1 %1393 }
 0x515   :  { %v1392_v56 = vpop.permute.xlu0 %1391  ;;  %v1434_v10 = vsel %vm649_vm10, %v9694_v20, %v1394_v2 }
 0x516   :  { %v1453_v17 = vadd.f32 %v1452_v60, %v1451_v46  ;;  %v1433_v14 = vsel %vm649_vm10, %v9698_v61, %v1392_v56  ;;  %v1456_v28 = vsel %vm666_vm11, %v1434_v10, 0.0 }
 0x517   :  { %v1454_v59 = vsel %vm666_vm11, %v1433_v14, 0.0 }
 0x518   :  { %v1455_v22 = vadd.f32 %v1454_v59, %v1453_v17  ;;  %v1398_v47 = vpop.permute.xlu1 %1397 }
 0x519   :  { %v1396_v35 = vpop.permute.xlu0 %1395  ;;  %v1436_v29 = vsel %vm649_vm10, %v9704_v36, %v1398_v47 }
 0x51a   :  { %v1457_v25 = vadd.f32 %v1456_v28, %v1455_v22  ;;  %v1435_v37 = vsel %vm649_vm10, %v9708_v38, %v1396_v35  ;;  %v1460_v26 = vsel %vm666_vm11, %v1436_v29, 0.0 }
 0x51b   :  { %v1458_v53 = vsel %vm666_vm11, %v1435_v37, 0.0 }
 0x51c   :  { %v1459_v55 = vadd.f32 %v1458_v53, %v1457_v25  ;;  %v1402_v4 = vpop.permute.xlu1 %1401 }
 0x51d   :  { %v1400_v41 = vpop.permute.xlu0 %1399  ;;  %v1438_v54 = vsel %vm649_vm10, %v9714_v15, %v1402_v4 }
 0x51e   :  { %v1461_v8 = vadd.f32 %v1460_v26, %v1459_v55  ;;  %v1437_v24 = vsel %vm649_vm10, %v9718_v48, %v1400_v41  ;;  %v1464_v56 = vsel %vm666_vm11, %v1438_v54, 0.0 }
 0x51f   :  { %v1462_v46 = vsel %vm666_vm11, %v1437_v24, 0.0 }
 0x520   :  { %v1463_v2 = vadd.f32 %v1462_v46, %v1461_v8  ;;  %v1406_v60 = vpop.permute.xlu1 %1405 }
 0x521   :  { %v1404_v10 = vpop.permute.xlu0 %1403  ;;  %v1440_v17 = vsel %vm649_vm10, %v9724_v21, %v1406_v60 }
 0x522   :  { %v1465_v14 = vadd.f32 %v1464_v56, %v1463_v2  ;;  %v1439_v59 = vsel %vm649_vm10, %v9728_v58, %v1404_v10  ;;  %v1468_v35 = vsel %vm666_vm11, %v1440_v17, 0.0 }
 0x523   :  { %v1466_v22 = vsel %vm666_vm11, %v1439_v59, 0.0 }
 0x524   :  { %v1467_v47 = vadd.f32 %v1466_v22, %v1465_v14  ;;  %v1410_v28 = vpop.permute.xlu1 %1409 }
 0x525   :  { %v1408_v29 = vpop.permute.xlu0 %1407  ;;  %v1442_v25 = vsel %vm649_vm10, %v9734_v18, %v1410_v28 }
 0x526   :  { %v1469_v37 = vadd.f32 %v1468_v35, %v1467_v47  ;;  %v1441_v53 = vsel %vm649_vm10, %v9738_v32, %v1408_v29  ;;  %v1472_v26 = vsel %vm666_vm11, %v1442_v25, 0.0  ;;  %v1487_v47 = vld [vmem:[%s13015_s2 + $0x2] sm:$0x1]  ;;  %v1811_v29 = vld [vmem:[#allocation3 + $0x20] sm:$0xf] }
 0x527   :  { %v1470_v55 = vsel %vm666_vm11, %v1441_v53, 0.0  ;;  %v1810_v35 = vld [vmem:[#allocation3 + $0x18] sm:$0xff] }
 0x528   :  { %v1471_v4 = vadd.f32 %v1470_v55, %v1469_v37  ;;  %v8468_v37 = vpack.c.bf16 %v1811_v29, %v1810_v35  ;;  %v1515_v53 = vld [vmem:[%s13015_s2 + $0x3] sm:$0x1] }
 0x52a   :  { %v1473_v41 = vadd.f32 %v1472_v26, %v1471_v4  ;;  %8470 = vmatprep.subr.msk.bf16.mxu0 %vm9498_vm14, %v8468_v37 }
 0x52b   :  { %8473 = vmatpush3.bf16.msk.msra.mxu0 %vm9498_vm14, %v8468_v37 }
 0x52c   :  { %v1474_v54 = vrot.slane %v1473_v41, 4 }
 0x52e   :  { %v1475_v8 = vadd.f32 %v1474_v54, %v1473_v41 }
 0x530   :  { %v1476_v24 = vrot.slane %v1475_v8, 2 }
 0x532   :  { %v1477_v46 = vadd.f32 %v1476_v24, %v1475_v8 }
 0x534   :  { %v1478_v2 = vrot.slane %v1477_v46, 1 }
 0x536   :  { %v1479_v60 = vadd.f32 %v1478_v2, %v1477_v46 }
 0x538   :  { %v1480_v56 = vmul.f32 0.0078125, %v1479_v60 }
 0x53a   :  { %v1481_v10 = vmul.f32 %v1480_v56, %v1480_v56 }
 0x53c   :  { %1483 = vrot.lane.b32.xlu0 %v1481_v10, %s8746_s0 }
 0x5ae   :  { %v1484_v17 = vpop.permute.xlu0 %1483 }
 0x5af   :  { %v1486_v14 = vsub.f32 %v1480_v56, %v1484_v17 }
 0x5b1   :  { %v1488_v59 = vadd.f32 1e-05, %v1486_v14 }
 0x5b3   :  { %8661 = vrsqrt.f32 %v1488_v59 }
 0x5bd   :  { %v8662_v22 = vpop.eup %8661 }
 0x5be   :  { %1491 = vrot.lane.b32.xlu1 %v8662_v22, %s8747_s1 }
 0x630   :  { %v1492_v28 = vpop.permute.xlu1 %1491 }
 0x631   :  { %v1494_v25 = vmul.f32 %v1492_v28, %v1487_v47 }
 0x633   :  { %v9801_v55 = vrot.slane %v1494_v25, %v9227_v16  ;;  %v1516_v4 = vmul.f32 %v1494_v25, %v1480_v56 }
 0x635   :  { %v1517_v26 = vsub.f32 %v1515_v53, %v1516_v4  ;;  %v1500_v41 = vmul.f32 %v9664_v12, %v9801_v55  ;;  %v1499_v54 = vmul.f32 %v9801_v55, %v9668_v45  ;;  %v1502_v8 = vmul.f32 %v9674_v30, %v9801_v55 }
 0x636   :  { %v1501_v24 = vmul.f32 %v9801_v55, %v9678_v9  ;;  %v1504_v46 = vmul.f32 %v9684_v51, %v9801_v55  ;;  %v1503_v2 = vmul.f32 %v9801_v55, %v9688_v7  ;;  %v1506_v60 = vmul.f32 %v9694_v20, %v9801_v55 }
 0x637   :  { %v9822_v12 = vrot.slane %v1517_v26, %v9227_v16  ;;  %v1505_v45 = vmul.f32 %v9801_v55, %v9698_v61  ;;  %v1508_v30 = vmul.f32 %v9704_v36, %v9801_v55  ;;  %v1507_v9 = vmul.f32 %v9801_v55, %v9708_v38 }
 0x638   :  { %v1510_v51 = vmul.f32 %v9714_v15, %v9801_v55  ;;  %v1509_v7 = vmul.f32 %v9801_v55, %v9718_v48  ;;  %v1511_v20 = vmul.f32 %v9801_v55, %v9728_v58  ;;  %v1512_v56 = vmul.f32 %v9724_v21, %v9801_v55 }
 0x639   :  { %v1523_v61 = vadd.f32 %v9822_v12, %v1500_v41  ;;  %v1522_v10 = vadd.f32 %v9822_v12, %v1499_v54  ;;  %v1525_v36 = vadd.f32 %v9822_v12, %v1502_v8  ;;  %v1524_v38 = vadd.f32 %v9822_v12, %v1501_v24 }
 0x63a   :  { %v1527_v17 = vadd.f32 %v9822_v12, %v1504_v46  ;;  %v1526_v15 = vadd.f32 %v9822_v12, %v1503_v2  ;;  %v1529_v48 = vadd.f32 %v9822_v12, %v1506_v60  ;;  %v1528_v14 = vadd.f32 %v9822_v12, %v1505_v45 }
 0x63b   :  { %v9846_v58 = vmax.f32 %v1523_v61, 0.0  ;;  %v9848_v59 = vmax.f32 %v1522_v10, 0.0  ;;  %v9850_v21 = vmax.f32 %v1525_v36, 0.0  ;;  %v9852_v22 = vmax.f32 %v1524_v38, 0.0 }
 0x63c   :  { %v9854_v47 = vmax.f32 %v1527_v17, 0.0  ;;  %v9856_v28 = vmax.f32 %v1526_v15, 0.0  ;;  %v9858_v35 = vmax.f32 %v1529_v48, 0.0  ;;  %v9860_v29 = vmax.f32 %v1528_v14, 0.0 }
 0x63d   :  { %1668 = vrot.lane.b32.xlu1 %v9846_v58, %s8746_s0  ;;  %1666 = vrot.lane.b32.xlu0 %v9848_v59, %s8746_s0  ;;  %v1531_v25 = vadd.f32 %v9822_v12, %v1508_v30  ;;  %v1530_v37 = vadd.f32 %v9822_v12, %v1507_v9  ;;  %v1533_v53 = vadd.f32 %v9822_v12, %v1510_v51  ;;  %v1603_v4 = vrot.slane %v9846_v58, 1 }
 0x63e   :  { %v1532_v26 = vadd.f32 %v9822_v12, %v1509_v7  ;;  %v1604_v41 = vrot.slane %v9852_v22, 1  ;;  %v1534_v54 = vadd.f32 %v9822_v12, %v1511_v20  ;;  %v1605_v8 = vrot.slane %v9850_v21, 1 }
 0x63f   :  { %v9874_v24 = vmax.f32 %v1531_v25, 0.0  ;;  %v9876_v46 = vmax.f32 %v1530_v37, 0.0  ;;  %v9878_v2 = vmax.f32 %v1533_v53, 0.0  ;;  %v1606_v60 = vrot.slane %v9856_v28, 1 }
 0x640   :  { %v9881_v45 = vmax.f32 %v1532_v26, 0.0  ;;  %v9885_v30 = vsel %vm175_vm0, %v1603_v4, %v1604_v41  ;;  %v9887_v9 = vmax.f32 %v1534_v54, 0.0  ;;  %v1602_v51 = vrot.slane %v9848_v59, 1 }
 0x641   :  { %1672 = vrot.lane.b32.xlu1 %v9850_v21, %s8746_s0  ;;  %1670 = vrot.lane.b32.xlu0 %v9852_v22, %s8746_s0  ;;  %v9896_v7 = vsel %vm175_vm0, %v1605_v8, %v1606_v60  ;;  %v1607_v20 = vrot.slane %v9854_v47, 1  ;;  %v1608_v61 = vrot.slane %v9860_v29, 1  ;;  %v9902_v10 = vsel %vm175_vm0, %v1604_v41, %v1605_v8 }
 0x642   :  { %v9906_v36 = vsel %vm175_vm0, %v1602_v51, %v1603_v4  ;;  %v1611_v38 = vrot.slane %v9874_v24, 1  ;;  %v1612_v17 = vrot.slane %v9881_v45, 1  ;;  %v1613_v15 = vrot.slane %v9878_v2, 1 }
 0x643   :  { %v9913_v48 = vsel %vm175_vm0, %v1607_v20, %v1608_v61  ;;  %v9917_v14 = vsel %vm175_vm0, %v1606_v60, %v1607_v20  ;;  %v1614_v25 = vrot.slane %v9887_v9, 1  ;;  %v1609_v37 = vrot.slane %v9858_v35, 1 }
 0x644   :  { %v9923_v53 = vsel %vm175_vm0, %v1611_v38, %v1612_v17  ;;  %v1610_v4 = vrot.slane %v9876_v46, 1  ;;  %v1535_v26 = vadd.f32 %v9822_v12, %v1512_v56  ;;  %v9929_v41 = vsel %vm175_vm0, %v1612_v17, %v1613_v15 }
 0x645   :  { %1676 = vrot.lane.b32.xlu1 %v9854_v47, %s8746_s0  ;;  %1674 = vrot.lane.b32.xlu0 %v9856_v28, %s8746_s0  ;;  %v9937_v54 = vsel %vm175_vm0, %v1613_v15, %v1614_v25  ;;  %v9941_v8 = vsel %vm175_vm0, %v1608_v61, %v1609_v37  ;;  %v1513_v56 = vmul.f32 %v9801_v55, %v9738_v32  ;;  %v1554_v60 = vrot.slane %v9848_v59, 7 }
 0x646   :  { %v9948_v20 = vsel %vm175_vm0, %v1609_v37, %v1610_v4  ;;  %v1624_v17 = vsel %vm175_vm0, %v1610_v4, %v1611_v38  ;;  %v1551_v0 = vmax.f32 %v1535_v26, 0.0  ;;  %v1514_v15 = vmul.f32 %v9734_v18, %v9801_v55 }
 0x647   :  { %v1536_v34 = vadd.f32 %v9822_v12, %v1513_v56  ;;  %v1555_v61 = vrot.slane %v9846_v58, 7  ;;  %v1556_v6 = vrot.slane %v9852_v22, 7  ;;  %v1557_v52 = vrot.slane %v9850_v21, 7 }
 0x648   :  { %v1615_v32 = vrot.slane %v1551_v0, 1  ;;  %v1537_v59 = vadd.f32 %v9822_v12, %v1514_v15  ;;  %v1558_v37 = vrot.slane %v9856_v28, 7  ;;  %v1559_v12 = vrot.slane %v9854_v47, 7 }
 0x649   :  { %1680 = vrot.lane.b32.xlu1 %v9858_v35, %s8746_s0  ;;  %1678 = vrot.lane.b32.xlu0 %v9860_v29, %s8746_s0  ;;  %v1552_v18 = vmax.f32 %v1536_v34, 0.0  ;;  %v9966_v55 = vsel %vm110_vm2, %v1554_v60, %v1555_v61  ;;  %v9970_v58 = vsel %vm110_vm2, %v1555_v61, %v1556_v6  ;;  %v9977_v28 = vsel %vm110_vm2, %v1556_v6, %v1557_v52 }
 0x64a   :  { %v1620_v21 = vsel %vm175_vm0, %v1614_v25, %v1615_v32  ;;  %v1553_v22 = vmax.f32 %v1537_v59, 0.0  ;;  %v9981_v34 = vsel %vm110_vm2, %v1557_v52, %v1558_v37  ;;  %v9985_v4 = vsel %vm110_vm2, %v1558_v37, %v1559_v12 }
 0x64b   :  { %v1616_v38 = vrot.slane %v1552_v18, 1  ;;  %v1560_v26 = vrot.slane %v9860_v29, 7  ;;  %v1561_v47 = vrot.slane %v9858_v35, 7  ;;  %v1562_v15 = vrot.slane %v9876_v46, 7 }
 0x64c   :  { %v1617_v56 = vrot.slane %v1553_v22, 1  ;;  %v1569_v25 = vrot.slane %v1553_v22, 7  ;;  %v1563_v6 = vrot.slane %v9874_v24, 7  ;;  %v1564_v61 = vrot.slane %v9881_v45, 7 }
 0x64d   :  { %1684 = vrot.lane.b32.xlu1 %v9874_v24, %s8746_s0  ;;  %1682 = vrot.lane.b32.xlu0 %v9876_v46, %s8746_s0  ;;  %v1619_v52 = vsel %vm175_vm0, %v1615_v32, %v1616_v38  ;;  %v9999_v29 = vsel %vm110_vm2, %v1560_v26, %v1561_v47  ;;  %v10003_v35 = vsel %vm110_vm2, %v1559_v12, %v1560_v26  ;;  %v1565_v12 = vrot.slane %v9878_v2, 7 }
 0x64e   :  { %v1633_v59 = vsel %vm175_vm0, %v1617_v56, %v1602_v51  ;;  %v1618_v24 = vsel %vm175_vm0, %v1616_v38, %v1617_v56  ;;  %v1585_v46 = vsel %vm110_vm2, %v1569_v25, %v1554_v60  ;;  %v10014_v32 = vsel %vm110_vm2, %v1562_v15, %v1563_v6 }
 0x64f   :  { %v10018_v37 = vsel %vm110_vm2, %v1561_v47, %v1562_v15  ;;  %v10023_v26 = vsel %vm110_vm2, %v1563_v6, %v1564_v61  ;;  %v1566_v51 = vrot.slane %v9887_v9, 7  ;;  %v1567_v38 = vrot.slane %v1551_v0, 7 }
 0x650   :  { %v10032_v60 = vsel %vm110_vm2, %v1564_v61, %v1565_v12  ;;  %v1568_v47 = vrot.slane %v1552_v18, 7 }
 0x651   :  { %1688 = vrot.lane.b32.xlu1 %v9878_v2, %s8746_s0  ;;  %1686 = vrot.lane.b32.xlu0 %v9881_v45, %s8746_s0  ;;  %v10036_v56 = vsel %vm110_vm2, %v1565_v12, %v1566_v51  ;;  %v10040_v15 = vsel %vm110_vm2, %v1566_v51, %v1567_v38  ;;  %v1641_v45 = vsel %vm8900_vm3, 0.0, %v9948_v20 }
 0x652   :  { %v10044_v6 = vsel %vm110_vm2, %v1568_v47, %v1569_v25  ;;  %v10048_v2 = vsel %vm110_vm2, %v1567_v38, %v1568_v47 }
 0x655   :  { %1732 = vrot.lane.b32.xlu1 %v9885_v30, %s8743_s23  ;;  %1690 = vrot.lane.b32.xlu0 %v9887_v9, %s8746_s0  ;;  %v1649_v30 = vsel %vm8986_vm4, 0.0, %v1633_v59 }
 0x659   :  { %1736 = vrot.lane.b32.xlu1 %v9896_v7, %s8743_s23  ;;  %1730 = vrot.lane.b32.xlu0 %v9906_v36, %s8743_s23 }
 0x65d   :  { %1740 = vrot.lane.b32.xlu1 %v9913_v48, %s8743_s23  ;;  %1734 = vrot.lane.b32.xlu0 %v9902_v10, %s8743_s23 }
 0x661   :  { %1748 = vrot.lane.b32.xlu1 %v9923_v53, %s8743_s23  ;;  %1738 = vrot.lane.b32.xlu0 %v9917_v14, %s8743_s23 }
 0x665   :  { %1752 = vrot.lane.b32.xlu1 %v9937_v54, %s8743_s23  ;;  %1742 = vrot.lane.b32.xlu0 %v9941_v8, %s8743_s23 }
 0x669   :  { %1744 = vrot.lane.b32.xlu1 %v1641_v45, %s8743_s23  ;;  %1746 = vrot.lane.b32.xlu0 %v1624_v17, %s8743_s23 }
 0x66d   :  { %1692 = vrot.lane.b32.xlu1 %v1551_v0, %s8746_s0  ;;  %1750 = vrot.lane.b32.xlu0 %v9929_v41, %s8743_s23 }
 0x671   :  { %1756 = vrot.lane.b32.xlu1 %v1619_v52, %s8743_s23  ;;  %1754 = vrot.lane.b32.xlu0 %v1620_v21, %s8743_s23  ;;  %v1586_v21 = vsel %vm9006_vm5, 0.0, %v1585_v46 }
 0x675   :  { %1696 = vrot.lane.b32.xlu1 %v1553_v22, %s8746_s0  ;;  %1694 = vrot.lane.b32.xlu0 %v1552_v18, %s8746_s0 }
 0x679   :  { %1760 = vrot.lane.b32.xlu1 %v1649_v30, %s8743_s23  ;;  %1758 = vrot.lane.b32.xlu0 %v1618_v24, %s8743_s23 }
 0x6af   :  { %v1669_v9 = vpop.permute.xlu1 %1668  ;;  %v1667_v0 = vpop.permute.xlu0 %1666 }
 0x6b0   :  { %v1778_v22 = vsel %vm649_vm10, %v1586_v21, %v1667_v0  ;;  %v1779_v61 = vsel %vm649_vm10, %v9966_v55, %v1669_v9 }
 0x6b3   :  { %v1673_v7 = vpop.permute.xlu1 %1672  ;;  %v1671_v10 = vpop.permute.xlu0 %1670 }
 0x6b4   :  { %v1780_v12 = vsel %vm649_vm10, %v9970_v58, %v1671_v10  ;;  %v1781_v38 = vsel %vm649_vm10, %v9977_v28, %v1673_v7 }
 0x6b7   :  { %v1677_v36 = vpop.permute.xlu1 %1676  ;;  %v1675_v48 = vpop.permute.xlu0 %1674 }
 0x6b8   :  { %v1782_v45 = vsel %vm649_vm10, %v9981_v34, %v1675_v48  ;;  %v1783_v58 = vsel %vm649_vm10, %v9985_v4, %v1677_v36  ;;  %v1594_v4 = vsel %vm9049_vm9, 0.0, %v10018_v37 }
 0x6bb   :  { %v1681_v14 = vpop.permute.xlu1 %1680  ;;  %v1679_v53 = vpop.permute.xlu0 %1678 }
 0x6bc   :  { %v1784_v7 = vsel %vm649_vm10, %v10003_v35, %v1679_v53  ;;  %v1785_v36 = vsel %vm649_vm10, %v9999_v29, %v1681_v14 }
 0x6bf   :  { %v1685_v41 = vpop.permute.xlu1 %1684  ;;  %v1683_v54 = vpop.permute.xlu0 %1682 }
 0x6c0   :  { %v1786_v48 = vsel %vm649_vm10, %v1594_v4, %v1683_v54  ;;  %v1787_v53 = vsel %vm649_vm10, %v10014_v32, %v1685_v41 }
 0x6c3   :  { %v1689_v8 = vpop.permute.xlu1 %1688  ;;  %v1687_v20 = vpop.permute.xlu0 %1686 }
 0x6c4   :  { %v1788_v37 = vsel %vm649_vm10, %v10023_v26, %v1687_v20 }
 0x6c7   :  { %v1733_v17 = vpop.permute.xlu1 %1732  ;;  %v1691_v18 = vpop.permute.xlu0 %1690 }
 0x6c8   :  { %v1795_v24 = vsel %vm666_vm11, %v1779_v61, %v1733_v17  ;;  %v1789_v61 = vsel %vm649_vm10, %v10032_v60, %v1689_v8 }
 0x6cb   :  { %v1737_v25 = vpop.permute.xlu1 %1736  ;;  %v1731_v52 = vpop.permute.xlu0 %1730 }
 0x6cc   :  { %v1794_v59 = vsel %vm666_vm11, %v1778_v22, %v1731_v52  ;;  %v1797_v55 = vsel %vm666_vm11, %v1781_v38, %v1737_v25 }
 0x6cd   :  { %8103 = vmatprep.mubr.msk.f32.mxu0 %vm1149_vm15, %v1794_v59  ;;  %v1790_v59 = vsel %vm649_vm10, %v10036_v56, %v1691_v18 }
 0x6ce   :  { %8104 = vmatmul.mubr.msk.f32.vlgmr.msra.gmra.mrb[16].mxu0 %vm1149_vm15, %v1795_v24 }
 0x6cf   :  { %v1741_v51 = vpop.permute.xlu1 %1740  ;;  %v1735_v46 = vpop.permute.xlu0 %1734 }
 0x6d0   :  { %v1796_v47 = vsel %vm666_vm11, %v1780_v12, %v1735_v46  ;;  %v1799_v28 = vsel %vm666_vm11, %v1783_v58, %v1741_v51 }
 0x6d1   :  { %8106 = vmatprep.mubr.msk.f32.mxu0 %vm1149_vm15, %v1796_v47 }
 0x6d2   :  { %8107 = vmatmul.mubr.msk.f32.gmra.mrb[18].mxu0 %vm1149_vm15, %v1797_v55 }
 0x6d3   :  { %v1749_v30 = vpop.permute.xlu1 %1748  ;;  %v1739_v9 = vpop.permute.xlu0 %1738 }
 0x6d4   :  { %v1798_v0 = vsel %vm666_vm11, %v1782_v45, %v1739_v9  ;;  %v1803_v14 = vsel %vm666_vm11, %v1787_v53, %v1749_v30 }
 0x6d5   :  { %8109 = vmatprep.mubr.msk.f32.mxu0 %vm1149_vm15, %v1798_v0 }
 0x6d6   :  { %8110 = vmatmul.mubr.msk.f32.gmra.mrb[20].mxu0 %vm1149_vm15, %v1799_v28 }
 0x6d7   :  { %v1753_v10 = vpop.permute.xlu1 %1752  ;;  %v1743_v17 = vpop.permute.xlu0 %1742 }
 0x6d8   :  { %v1800_v34 = vsel %vm666_vm11, %v1784_v7, %v1743_v17  ;;  %v1805_v26 = vsel %vm666_vm11, %v1789_v61, %v1753_v10 }
 0x6d9   :  { %8112 = vmatprep.mubr.msk.f32.mxu0 %vm1149_vm15, %v1800_v34 }
 0x6db   :  { %v1745_v21 = vpop.permute.xlu1 %1744  ;;  %v1747_v22 = vpop.permute.xlu0 %1746 }
 0x6dc   :  { %v1801_v25 = vsel %vm666_vm11, %v1785_v36, %v1745_v21  ;;  %v1802_v35 = vsel %vm666_vm11, %v1786_v48, %v1747_v22 }
 0x6dd   :  { %8113 = vmatmul.mubr.msk.f32.gmra.mrb[22].mxu0 %vm1149_vm15, %v1801_v25 }
 0x6de   :  { %8115 = vmatprep.mubr.msk.f32.mxu0 %vm1149_vm15, %v1802_v35 }
 0x6df   :  { %v1693_v52 = vpop.permute.xlu1 %1692  ;;  %v1751_v29 = vpop.permute.xlu0 %1750 }
 0x6e0   :  { %v1804_v54 = vsel %vm666_vm11, %v1788_v37, %v1751_v29  ;;  %v1791_v24 = vsel %vm649_vm10, %v10040_v15, %v1693_v52 }
 0x6e1   :  { %8116 = vmatmul.mubr.msk.f32.gmra.mrb[24].mxu0 %vm1149_vm15, %v1803_v14 }
 0x6e2   :  { %8118 = vmatprep.mubr.msk.f32.mxu0 %vm1149_vm15, %v1804_v54 }
 0x6e3   :  { %v1757_v32 = vpop.permute.xlu1 %1756  ;;  %v1755_v41 = vpop.permute.xlu0 %1754 }
 0x6e4   :  { %v1806_v20 = vsel %vm666_vm11, %v1790_v59, %v1755_v41  ;;  %v1807_v60 = vsel %vm666_vm11, %v1791_v24, %v1757_v32 }
 0x6e5   :  { %8119 = vmatmul.mubr.msk.f32.gmra.mrb[26].mxu0 %vm1149_vm15, %v1805_v26 }
 0x6e6   :  { %8121 = vmatprep.mubr.msk.f32.mxu0 %vm1149_vm15, %v1806_v20 }
 0x6e7   :  { %v1697_v12 = vpop.permute.xlu1 %1696  ;;  %v1695_v51 = vpop.permute.xlu0 %1694 }
 0x6e8   :  { %v1793_v56 = vsel %vm649_vm10, %v10044_v6, %v1697_v12  ;;  %v1792_v8 = vsel %vm649_vm10, %v10048_v2, %v1695_v51 }
 0x6e9   :  { %8122 = vmatmul.mubr.msk.f32.gmra.mrb[28].mxu0 %vm1149_vm15, %v1807_v60 }
 0x6eb   :  { %v1761_v18 = vpop.permute.xlu1 %1760  ;;  %v1759_v46 = vpop.permute.xlu0 %1758 }
 0x6ec   :  { %v1809_v38 = vsel %vm666_vm11, %v1793_v56, %v1761_v18  ;;  %v1808_v47 = vsel %vm666_vm11, %v1792_v8, %v1759_v46 }
 0x6ed   :  { %8124 = vmatprep.mubr.msk.f32.mxu0 %vm1149_vm15, %v1808_v47 }
 0x6ee   :  { %8125 = vmatmul.mubr.msk.f32.gmra.mrb[30].mxu0 %vm1149_vm15, %v1809_v38 }
 0x7a1   :  { %v10153_v15 = vpop.f32.mrb[16].mxu0 }
 0x7a2   :  { %v2009_v55 = vmul.f32 %v10153_v15, %v10153_v15  ;;  %v10157_v45 = vpop.f32.mrb[17].mxu0 }
 0x7a3   :  { %v2008_v6 = vmul.f32 %v10157_v45, %v10157_v45 }
 0x7a4   :  { %2042 = vrot.lane.b32.xlu1 %v2009_v55, %s8746_s0 }
 0x7a5   :  { %2040 = vrot.lane.b32.xlu0 %v2008_v6, %s8746_s0  ;;  %v10163_v2 = vpop.f32.mrb[18].mxu0 }
 0x7a6   :  { %v2011_v30 = vmul.f32 %v10163_v2, %v10163_v2  ;;  %v10167_v9 = vpop.f32.mrb[19].mxu0 }
 0x7a7   :  { %v2010_v58 = vmul.f32 %v10167_v9, %v10167_v9 }
 0x7a8   :  { %2046 = vrot.lane.b32.xlu1 %v2011_v30, %s8746_s0 }
 0x7a9   :  { %2044 = vrot.lane.b32.xlu0 %v2010_v58, %s8746_s0  ;;  %v10173_v0 = vpop.f32.mrb[20].mxu0 }
 0x7aa   :  { %v2013_v28 = vmul.f32 %v10173_v0, %v10173_v0  ;;  %v10177_v7 = vpop.f32.mrb[21].mxu0 }
 0x7ab   :  { %v2012_v10 = vmul.f32 %v10177_v7, %v10177_v7 }
 0x7ac   :  { %2050 = vrot.lane.b32.xlu1 %v2013_v28, %s8746_s0 }
 0x7ad   :  { %2048 = vrot.lane.b32.xlu0 %v2012_v10, %s8746_s0 }
 0x7b0   :  { %v10183_v17 = vpop.f32.mrb[22].mxu0 }
 0x7b1   :  { %v2015_v34 = vmul.f32 %v10183_v17, %v10183_v17  ;;  %v10187_v4 = vpop.f32.mrb[23].mxu0 }
 0x7b2   :  { %v2014_v36 = vmul.f32 %v10187_v4, %v10187_v4 }
 0x7b3   :  { %2054 = vrot.lane.b32.xlu1 %v2015_v34, %s8746_s0 }
 0x7b4   :  { %2052 = vrot.lane.b32.xlu0 %v2014_v36, %s8746_s0  ;;  %v10193_v48 = vpop.f32.mrb[24].mxu0 }
 0x7b5   :  { %v2017_v21 = vmul.f32 %v10193_v48, %v10193_v48  ;;  %v10197_v22 = vpop.f32.mrb[25].mxu0 }
 0x7b6   :  { %v2016_v25 = vmul.f32 %v10197_v22, %v10197_v22 }
 0x7b7   :  { %2058 = vrot.lane.b32.xlu1 %v2017_v21, %s8746_s0 }
 0x7b8   :  { %2056 = vrot.lane.b32.xlu0 %v2016_v25, %s8746_s0  ;;  %v10203_v35 = vpop.f32.mrb[26].mxu0 }
 0x7b9   :  { %v2019_v53 = vmul.f32 %v10203_v35, %v10203_v35  ;;  %v10207_v37 = vpop.f32.mrb[27].mxu0 }
 0x7ba   :  { %v2018_v52 = vmul.f32 %v10207_v37, %v10207_v37 }
 0x7bb   :  { %2062 = vrot.lane.b32.xlu1 %v2019_v53, %s8746_s0 }
 0x7bc   :  { %2060 = vrot.lane.b32.xlu0 %v2018_v52, %s8746_s0  ;;  %v10213_v29 = vpop.f32.mrb[28].mxu0 }
 0x7bd   :  { %v2021_v14 = vmul.f32 %v10213_v29, %v10213_v29  ;;  %v10217_v54 = vpop.f32.mrb[29].mxu0 }
 0x7be   :  { %v2020_v61 = vmul.f32 %v10217_v54, %v10217_v54 }
 0x7bf   :  { %2066 = vrot.lane.b32.xlu1 %v2021_v14, %s8746_s0 }
 0x7c0   :  { %2064 = vrot.lane.b32.xlu0 %v2020_v61, %s8746_s0 }
 0x7c1   :  { %v10223_v59 = vpop.f32.mrb[30].mxu0 }
 0x7c2   :  { %v2023_v32 = vmul.f32 %v10223_v59, %v10223_v59  ;;  %v10227_v41 = vpop.f32.mrb[31].mxu0 }
 0x7c3   :  { %v2022_v26 = vmul.f32 %v10227_v41, %v10227_v41 }
 0x7c4   :  { %2070 = vrot.lane.b32.xlu1 %v2023_v32, %s8746_s0 }
 0x7c5   :  { %2068 = vrot.lane.b32.xlu0 %v2022_v26, %s8746_s0 }
 0x816   :  { %v2043_v20 = vpop.permute.xlu1 %2042 }
 0x817   :  { %v2089_v24 = vsel %vm649_vm10, %v10153_v15, %v2043_v20  ;;  %v2041_v12 = vpop.permute.xlu0 %2040 }
 0x818   :  { %v2105_v51 = vsel %vm666_vm11, %v2089_v24, 0.0  ;;  %v2088_v60 = vsel %vm649_vm10, %v10157_v45, %v2041_v12 }
 0x819   :  { %v2104_v56 = vsel %vm666_vm11, %v2088_v60, 0.0 }
 0x81a   :  { %v2106_v8 = vadd.f32 %v2105_v51, %v2104_v56  ;;  %v2047_v18 = vpop.permute.xlu1 %2046 }
 0x81b   :  { %v2045_v46 = vpop.permute.xlu0 %2044  ;;  %v2091_v38 = vsel %vm649_vm10, %v10163_v2, %v2047_v18 }
 0x81c   :  { %v2090_v47 = vsel %vm649_vm10, %v10167_v9, %v2045_v46  ;;  %v2109_v58 = vsel %vm666_vm11, %v2091_v38, 0.0 }
 0x81d   :  { %v2107_v55 = vsel %vm666_vm11, %v2090_v47, 0.0 }
 0x81e   :  { %v2108_v6 = vadd.f32 %v2107_v55, %v2106_v8  ;;  %v2051_v30 = vpop.permute.xlu1 %2050 }
 0x81f   :  { %v2049_v28 = vpop.permute.xlu0 %2048  ;;  %v2093_v10 = vsel %vm649_vm10, %v10173_v0, %v2051_v30 }
 0x820   :  { %v2110_v34 = vadd.f32 %v2109_v58, %v2108_v6  ;;  %v2092_v36 = vsel %vm649_vm10, %v10177_v7, %v2049_v28  ;;  %v2113_v53 = vsel %vm666_vm11, %v2093_v10, 0.0 }
 0x821   :  { %v2111_v21 = vsel %vm666_vm11, %v2092_v36, 0.0 }
 0x822   :  { %v2112_v25 = vadd.f32 %v2111_v21, %v2110_v34 }
 0x824   :  { %v2114_v52 = vadd.f32 %v2113_v53, %v2112_v25 }
 0x825   :  { %v2055_v14 = vpop.permute.xlu1 %2054 }
 0x826   :  { %v2053_v61 = vpop.permute.xlu0 %2052  ;;  %v2095_v32 = vsel %vm649_vm10, %v10183_v17, %v2055_v14 }
 0x827   :  { %v2094_v26 = vsel %vm649_vm10, %v10187_v4, %v2053_v61  ;;  %v2117_v51 = vsel %vm666_vm11, %v2095_v32, 0.0 }
 0x828   :  { %v2115_v20 = vsel %vm666_vm11, %v2094_v26, 0.0 }
 0x829   :  { %v2116_v24 = vadd.f32 %v2115_v20, %v2114_v52  ;;  %v2059_v12 = vpop.permute.xlu1 %2058 }
 0x82a   :  { %v2057_v60 = vpop.permute.xlu0 %2056  ;;  %v2097_v56 = vsel %vm649_vm10, %v10193_v48, %v2059_v12 }
 0x82b   :  { %v2118_v8 = vadd.f32 %v2117_v51, %v2116_v24  ;;  %v2096_v18 = vsel %vm649_vm10, %v10197_v22, %v2057_v60  ;;  %v2121_v55 = vsel %vm666_vm11, %v2097_v56, 0.0 }
 0x82c   :  { %v2119_v46 = vsel %vm666_vm11, %v2096_v18, 0.0 }
 0x82d   :  { %v2120_v38 = vadd.f32 %v2119_v46, %v2118_v8  ;;  %v2063_v47 = vpop.permute.xlu1 %2062 }
 0x82e   :  { %v2061_v6 = vpop.permute.xlu0 %2060  ;;  %v2099_v30 = vsel %vm649_vm10, %v10203_v35, %v2063_v47 }
 0x82f   :  { %v2122_v58 = vadd.f32 %v2121_v55, %v2120_v38  ;;  %v2098_v28 = vsel %vm649_vm10, %v10207_v37, %v2061_v6  ;;  %v2125_v21 = vsel %vm666_vm11, %v2099_v30, 0.0 }
 0x830   :  { %v2123_v10 = vsel %vm666_vm11, %v2098_v28, 0.0 }
 0x831   :  { %v2124_v34 = vadd.f32 %v2123_v10, %v2122_v58  ;;  %v2067_v36 = vpop.permute.xlu1 %2066 }
 0x832   :  { %v2065_v25 = vpop.permute.xlu0 %2064  ;;  %v2101_v53 = vsel %vm649_vm10, %v10213_v29, %v2067_v36 }
 0x833   :  { %v2126_v52 = vadd.f32 %v2125_v21, %v2124_v34  ;;  %v2100_v14 = vsel %vm649_vm10, %v10217_v54, %v2065_v25  ;;  %v2129_v26 = vsel %vm666_vm11, %v2101_v53, 0.0  ;;  %v2148_v53 = vld [vmem:[%s13015_s2 + $0x4] sm:$0x1] }
 0x834   :  { %v2127_v61 = vsel %vm666_vm11, %v2100_v14, 0.0 }
 0x835   :  { %v2128_v32 = vadd.f32 %v2127_v61, %v2126_v52  ;;  %v2176_v61 = vld [vmem:[%s13015_s2 + $0x5] sm:$0x1] }
 0x836   :  { %v2071_v20 = vpop.permute.xlu1 %2070 }
 0x837   :  { %v2130_v24 = vadd.f32 %v2129_v26, %v2128_v32  ;;  %v2069_v12 = vpop.permute.xlu0 %2068  ;;  %v2103_v51 = vsel %vm649_vm10, %v10223_v59, %v2071_v20  ;;  %v2487_v32 = vld [vmem:[#allocation3 + $0x28] sm:$0xff]  ;;  %v2488_v26 = vld [vmem:[#allocation3 + $0x30] sm:$0xf] }
 0x838   :  { %v2102_v60 = vsel %vm649_vm10, %v10227_v41, %v2069_v12  ;;  %v2133_v18 = vsel %vm666_vm11, %v2103_v51, 0.0  ;;  %v8474_v12 = vpack.c.bf16 %v2488_v26, %v2487_v32 }
 0x839   :  { %v2131_v56 = vsel %vm666_vm11, %v2102_v60, 0.0 }
 0x83a   :  { %v2132_v8 = vadd.f32 %v2131_v56, %v2130_v24  ;;  %8476 = vmatprep.subr.msk.bf16.mxu1 %vm9498_vm14, %v8474_v12 }
 0x83b   :  { %8479 = vmatpush3.bf16.msk.msra.mxu1 %vm9498_vm14, %v8474_v12 }
 0x83c   :  { %v2134_v46 = vadd.f32 %v2133_v18, %v2132_v8 }
 0x83e   :  { %v2135_v38 = vrot.slane %v2134_v46, 4 }
 0x840   :  { %v2136_v47 = vadd.f32 %v2135_v38, %v2134_v46 }
 0x842   :  { %v2137_v55 = vrot.slane %v2136_v47, 2 }
 0x844   :  { %v2138_v6 = vadd.f32 %v2137_v55, %v2136_v47 }
 0x846   :  { %v2139_v30 = vrot.slane %v2138_v6, 1 }
 0x848   :  { %v2140_v58 = vadd.f32 %v2139_v30, %v2138_v6 }
 0x84a   :  { %v2141_v28 = vmul.f32 0.0078125, %v2140_v58 }
 0x84c   :  { %v2142_v10 = vmul.f32 %v2141_v28, %v2141_v28 }
 0x84e   :  { %2144 = vrot.lane.b32.xlu0 %v2142_v10, %s8746_s0 }
 0x8c0   :  { %v2145_v34 = vpop.permute.xlu0 %2144 }
 0x8c1   :  { %v2147_v36 = vsub.f32 %v2141_v28, %v2145_v34 }
 0x8c3   :  { %v2149_v21 = vadd.f32 1e-05, %v2147_v36 }
 0x8c5   :  { %8663 = vrsqrt.f32 %v2149_v21 }
 0x8cf   :  { %v8664_v25 = vpop.eup %8663 }
 0x8d0   :  { %2152 = vrot.lane.b32.xlu1 %v8664_v25, %s8747_s1 }
 0x942   :  { %v2153_v52 = vpop.permute.xlu1 %2152 }
 0x943   :  { %v2155_v14 = vmul.f32 %v2153_v52, %v2148_v53 }
 0x945   :  { %v10290_v20 = vrot.slane %v2155_v14, %v9227_v16  ;;  %v2177_v24 = vmul.f32 %v2155_v14, %v2141_v28 }
 0x947   :  { %v2178_v51 = vsub.f32 %v2176_v61, %v2177_v24  ;;  %v2161_v60 = vmul.f32 %v10153_v15, %v10290_v20  ;;  %v2160_v8 = vmul.f32 %v10290_v20, %v10157_v45  ;;  %v2163_v18 = vmul.f32 %v10163_v2, %v10290_v20 }
 0x948   :  { %v2162_v46 = vmul.f32 %v10290_v20, %v10167_v9  ;;  %v2165_v6 = vmul.f32 %v10173_v0, %v10290_v20  ;;  %v2164_v45 = vmul.f32 %v10290_v20, %v10177_v7  ;;  %v2167_v0 = vmul.f32 %v10183_v17, %v10290_v20 }
 0x949   :  { %v10299_v56 = vrot.slane %v2178_v51, %v9227_v16  ;;  %v2168_v25 = vmul.f32 %v10290_v20, %v10197_v22  ;;  %v2172_v51 = vmul.f32 %v10290_v20, %v10217_v54 }
 0x94b   :  { %v2184_v38 = vadd.f32 %v10299_v56, %v2161_v60  ;;  %v2183_v47 = vadd.f32 %v10299_v56, %v2160_v8  ;;  %v2186_v15 = vadd.f32 %v10299_v56, %v2163_v18  ;;  %v2185_v55 = vadd.f32 %v10299_v56, %v2162_v46 }
 0x94c   :  { %v2188_v9 = vadd.f32 %v10299_v56, %v2165_v6  ;;  %v2187_v58 = vadd.f32 %v10299_v56, %v2164_v45  ;;  %v2191_v61 = vadd.f32 %v10299_v56, %v2168_v25 }
 0x94d   :  { %v2200_v30 = vadd.f32 %v2184_v38, %v9308_v13  ;;  %v2199_v2 = vadd.f32 %v2183_v47, %v9401_v44  ;;  %v2202_v34 = vadd.f32 %v2186_v15, %v9317_v5  ;;  %v2201_v36 = vadd.f32 %v2185_v55, %v9305_v63 }
 0x94e   :  { %v2166_v13 = vmul.f32 %v10290_v20, %v10187_v4  ;;  %v2190_v44 = vadd.f32 %v10299_v56, %v2167_v0  ;;  %v2204_v63 = vadd.f32 %v2188_v9, %v9340_v3  ;;  %v2203_v17 = vadd.f32 %v2187_v58, %v9315_v31 }
 0x94f   :  { %v10319_v28 = vmax.f32 %v2200_v30, 0.0  ;;  %v10321_v10 = vmax.f32 %v2199_v2, 0.0  ;;  %v10335_v21 = vmax.f32 %v2202_v34, 0.0  ;;  %v10337_v5 = vmax.f32 %v2201_v36, 0.0 }
 0x950   :  { %v2189_v7 = vadd.f32 %v10299_v56, %v2166_v13  ;;  %v2169_v4 = vmul.f32 %v10193_v48, %v10290_v20  ;;  %v2206_v53 = vadd.f32 %v2190_v44, %v9414_v23  ;;  %v10351_v14 = vmax.f32 %v2204_v63, 0.0 }
 0x951   :  { %2345 = vrot.lane.b32.xlu1 %v10319_v28, %s8746_s0  ;;  %2343 = vrot.lane.b32.xlu0 %v10321_v10, %s8746_s0  ;;  %v10353_v3 = vmax.f32 %v2203_v17, 0.0  ;;  %v2171_v48 = vmul.f32 %v10203_v35, %v10290_v20  ;;  %v2207_v26 = vadd.f32 %v2191_v61, %v9411_v43  ;;  %v2195_v35 = vadd.f32 %v10299_v56, %v2172_v51  ;;  %v13038_v61 = vld [vmem:[#allocation10_spill] sm:$0xff] }
 0x952   :  { %v2205_v52 = vadd.f32 %v2189_v7, %v9338_v57  ;;  %v2192_v31 = vadd.f32 %v10299_v56, %v2169_v4  ;;  %v2170_v57 = vmul.f32 %v10290_v20, %v10207_v37  ;;  %v10365_v23 = vmax.f32 %v2206_v53, 0.0 }
 0x953   :  { %v2194_v24 = vadd.f32 %v10299_v56, %v2171_v48  ;;  %v2211_v18 = vadd.f32 %v2195_v35, %v9465_v11  ;;  %v2280_v46 = vrot.slane %v10319_v28, 1  ;;  %v2281_v38 = vrot.slane %v10337_v5, 1 }
 0x954   :  { %v10367_v22 = vmax.f32 %v2205_v52, 0.0  ;;  %v2208_v32 = vadd.f32 %v2192_v31, %v9386_v62  ;;  %v2193_v12 = vadd.f32 %v10299_v56, %v2170_v57  ;;  %v10382_v62 = vmax.f32 %v2207_v26, 0.0 }
 0x955   :  { %2349 = vrot.lane.b32.xlu1 %v10335_v21, %s8746_s0  ;;  %2347 = vrot.lane.b32.xlu0 %v10337_v5, %s8746_s0  ;;  %v2210_v43 = vadd.f32 %v2194_v24, %v9409_v42  ;;  %v2308_v42 = vsel %vm175_vm0, %v2280_v46, %v2281_v38  ;;  %v2282_v47 = vrot.slane %v10335_v21, 1  ;;  %v2283_v15 = vrot.slane %v10353_v3, 1  ;;  %v13040_v24 = vld [vmem:[#allocation11_spill] sm:$0xff] }
 0x956   :  { %v10380_v37 = vmax.f32 %v2208_v32, 0.0  ;;  %v2209_v60 = vadd.f32 %v2193_v12, %v9379_v50  ;;  %v10401_v50 = vmax.f32 %v2211_v18, 0.0  ;;  %v2279_v11 = vrot.slane %v10321_v10, 1 }
 0x957   :  { %v10390_v54 = vmax.f32 %v2210_v43, 0.0  ;;  %v2306_v55 = vsel %vm175_vm0, %v2282_v47, %v2283_v15  ;;  %v2284_v45 = vrot.slane %v10351_v14, 1  ;;  %v2285_v30 = vrot.slane %v10367_v22, 1 }
 0x958   :  { %v10392_v8 = vmax.f32 %v2209_v60, 0.0  ;;  %v2309_v6 = vsel %vm175_vm0, %v2279_v11, %v2280_v46  ;;  %v2307_v9 = vsel %vm175_vm0, %v2281_v38, %v2282_v47  ;;  %v2288_v58 = vrot.slane %v10380_v37, 1 }
 0x959   :  { %2353 = vrot.lane.b32.xlu1 %v10351_v14, %s8746_s0  ;;  %2351 = vrot.lane.b32.xlu0 %v10353_v3, %s8746_s0  ;;  %v2304_v2 = vsel %vm175_vm0, %v2284_v45, %v2285_v30  ;;  %v2173_v36 = vmul.f32 %v10213_v29, %v10290_v20  ;;  %v2174_v0 = vmul.f32 %v10290_v20, %v10227_v41  ;;  %v2290_v44 = vrot.slane %v10390_v54, 1 }
 0x95a   :  { %v2289_v34 = vrot.slane %v10392_v8, 1  ;;  %v2305_v13 = vsel %vm175_vm0, %v2283_v15, %v2284_v45  ;;  %v2291_v7 = vrot.slane %v10401_v50, 1  ;;  %v2286_v17 = vrot.slane %v10365_v23, 1 }
 0x95b   :  { %v2196_v4 = vadd.f32 %v10299_v56, %v2173_v36  ;;  %v2197_v25 = vadd.f32 %v10299_v56, %v2174_v0  ;;  %v2287_v29 = vrot.slane %v10382_v62, 1  ;;  %v2175_v41 = vmul.f32 %v10223_v59, %v10290_v20 }
 0x95c   :  { %v2300_v63 = vsel %vm175_vm0, %v2288_v58, %v2289_v34  ;;  %v2298_v53 = vsel %vm175_vm0, %v2290_v44, %v2291_v7  ;;  %v2303_v52 = vsel %vm175_vm0, %v2285_v30, %v2286_v17  ;;  %v2299_v51 = vsel %vm175_vm0, %v2289_v34, %v2290_v44 }
 0x95d   :  { %2357 = vrot.lane.b32.xlu1 %v10365_v23, %s8746_s0  ;;  %2355 = vrot.lane.b32.xlu0 %v10367_v22, %s8746_s0  ;;  %v2212_v31 = vadd.f32 %v2196_v4, %v9474_v39  ;;  %v2213_v48 = vadd.f32 %v2197_v25, %v13038_v61  ;;  %v2302_v57 = vsel %vm175_vm0, %v2286_v17, %v2287_v29  ;;  %v2231_v36 = vrot.slane %v10321_v10, 7 }
 0x95e   :  { %v2198_v32 = vadd.f32 %v10299_v56, %v2175_v41  ;;  %v2318_v59 = vsel %vm8900_vm3, 0.0, %v2302_v57  ;;  %v2301_v20 = vsel %vm175_vm0, %v2287_v29, %v2288_v58  ;;  %v2233_v29 = vrot.slane %v10337_v5, 7 }
 0x95f   :  { %v10460_v26 = vmax.f32 %v2212_v31, 0.0  ;;  %v10462_v39 = vmax.f32 %v2213_v48, 0.0 }
 0x960   :  { %v2214_v12 = vadd.f32 %v2198_v32, %v13040_v24 }
 0x961   :  { %2361 = vrot.lane.b32.xlu1 %v10380_v37, %s8746_s0  ;;  %2359 = vrot.lane.b32.xlu0 %v10382_v62, %s8746_s0  ;;  %13039 = vst [vmem:[#allocation10_spill] sm:$0xff] %v10462_v39  ;;  %v2292_v56 = vrot.slane %v10460_v26, 1  ;;  %v2293_v35 = vrot.slane %v10462_v39, 1 }
 0x962   :  { %v10474_v43 = vmax.f32 %v2214_v12, 0.0 }
 0x963   :  { %v2296_v60 = vsel %vm175_vm0, %v2292_v56, %v2293_v35  ;;  %v2297_v18 = vsel %vm175_vm0, %v2291_v7, %v2292_v56  ;;  %v2232_v7 = vrot.slane %v10319_v28, 7 }
 0x964   :  { %v2294_v46 = vrot.slane %v10474_v43, 1  ;;  %v2246_v0 = vrot.slane %v10474_v43, 7 }
 0x965   :  { %2365 = vrot.lane.b32.xlu1 %v10390_v54, %s8746_s0  ;;  %2363 = vrot.lane.b32.xlu0 %v10392_v8, %s8746_s0  ;;  %v2261_v41 = vsel %vm110_vm2, %v2231_v36, %v2232_v7 }
 0x966   :  { %v2310_v38 = vsel %vm175_vm0, %v2294_v46, %v2279_v11  ;;  %v2295_v47 = vsel %vm175_vm0, %v2293_v35, %v2294_v46 }
 0x969   :  { %2409 = vrot.lane.b32.xlu1 %v2308_v42, %s8743_s23  ;;  %2367 = vrot.lane.b32.xlu0 %v10401_v50, %s8746_s0  ;;  %v2326_v42 = vsel %vm8986_vm4, 0.0, %v2310_v38 }
 0x96d   :  { %2413 = vrot.lane.b32.xlu1 %v2306_v55, %s8743_s23  ;;  %2407 = vrot.lane.b32.xlu0 %v2309_v6, %s8743_s23 }
 0x971   :  { %2417 = vrot.lane.b32.xlu1 %v2304_v2, %s8743_s23  ;;  %2411 = vrot.lane.b32.xlu0 %v2307_v9, %s8743_s23 }
 0x975   :  { %2425 = vrot.lane.b32.xlu1 %v2300_v63, %s8743_s23  ;;  %2415 = vrot.lane.b32.xlu0 %v2305_v13, %s8743_s23  ;;  %v2262_v63 = vsel %vm110_vm2, %v2246_v0, %v2231_v36 }
 0x976   :  { %v2263_v25 = vsel %vm9006_vm5, 0.0, %v2262_v63 }
 0x979   :  { %2429 = vrot.lane.b32.xlu1 %v2298_v53, %s8743_s23  ;;  %2419 = vrot.lane.b32.xlu0 %v2303_v52, %s8743_s23  ;;  %v2234_v52 = vrot.slane %v10335_v21, 7 }
 0x97b   :  { %v2259_v24 = vsel %vm110_vm2, %v2233_v29, %v2234_v52 }
 0x97d   :  { %2421 = vrot.lane.b32.xlu1 %v2318_v59, %s8743_s23  ;;  %2423 = vrot.lane.b32.xlu0 %v2301_v20, %s8743_s23  ;;  %v2260_v59 = vsel %vm110_vm2, %v2232_v7, %v2233_v29  ;;  %v2235_v20 = vrot.slane %v10353_v3, 7 }
 0x97f   :  { %v2258_v38 = vsel %vm110_vm2, %v2234_v52, %v2235_v20 }
 0x981   :  { %2369 = vrot.lane.b32.xlu1 %v10460_v26, %s8746_s0  ;;  %2427 = vrot.lane.b32.xlu0 %v2299_v51, %s8743_s23  ;;  %v2236_v51 = vrot.slane %v10351_v14, 7 }
 0x985   :  { %2433 = vrot.lane.b32.xlu1 %v2296_v60, %s8743_s23  ;;  %2431 = vrot.lane.b32.xlu0 %v2297_v18, %s8743_s23 }
 0x989   :  { %2373 = vrot.lane.b32.xlu1 %v10474_v43, %s8746_s0  ;;  %2371 = vrot.lane.b32.xlu0 %v10462_v39, %s8746_s0 }
 0x98d   :  { %2437 = vrot.lane.b32.xlu1 %v2326_v42, %s8743_s23  ;;  %2435 = vrot.lane.b32.xlu0 %v2295_v47, %s8743_s23  ;;  %v2237_v42 = vrot.slane %v10367_v22, 7  ;;  %v2257_v47 = vsel %vm110_vm2, %v2235_v20, %v2236_v51 }
 0x9c3   :  { %v2346_v15 = vpop.permute.xlu1 %2345  ;;  %v2344_v55 = vpop.permute.xlu0 %2343 }
 0x9c4   :  { %v2455_v53 = vsel %vm649_vm10, %v2263_v25, %v2344_v55  ;;  %v2456_v48 = vsel %vm649_vm10, %v2261_v41, %v2346_v15  ;;  %v2238_v55 = vrot.slane %v10365_v23, 7  ;;  %v2256_v25 = vsel %vm110_vm2, %v2236_v51, %v2237_v42 }
 0x9c5   :  { %v2242_v51 = vrot.slane %v10390_v54, 7 }
 0x9c6   :  { %v2255_v52 = vsel %vm110_vm2, %v2237_v42, %v2238_v55 }
 0x9c7   :  { %v2350_v6 = vpop.permute.xlu1 %2349  ;;  %v2348_v45 = vpop.permute.xlu0 %2347 }
 0x9c8   :  { %v2457_v12 = vsel %vm649_vm10, %v2260_v59, %v2348_v45  ;;  %v2458_v60 = vsel %vm649_vm10, %v2259_v24, %v2350_v6  ;;  %v2239_v6 = vrot.slane %v10382_v62, 7 }
 0x9ca   :  { %v2254_v29 = vsel %vm110_vm2, %v2238_v55, %v2239_v6 }
 0x9cb   :  { %v2354_v30 = vpop.permute.xlu1 %2353  ;;  %v2352_v2 = vpop.permute.xlu0 %2351 }
 0x9cc   :  { %v2459_v15 = vsel %vm649_vm10, %v2258_v38, %v2352_v2  ;;  %v2460_v7 = vsel %vm649_vm10, %v2257_v47, %v2354_v30 }
 0x9cf   :  { %v2358_v9 = vpop.permute.xlu1 %2357  ;;  %v2356_v58 = vpop.permute.xlu0 %2355 }
 0x9d0   :  { %v2461_v2 = vsel %vm649_vm10, %v2256_v25, %v2356_v58  ;;  %v2462_v58 = vsel %vm649_vm10, %v2255_v52, %v2358_v9  ;;  %v2243_v9 = vrot.slane %v10401_v50, 7 }
 0x9d2   :  { %v2250_v47 = vsel %vm110_vm2, %v2242_v51, %v2243_v9 }
 0x9d3   :  { %v10495_v34 = vpop.permute.xlu1 %2361  ;;  %v2360_v11 = vpop.permute.xlu0 %2359 }
 0x9d7   :  { %v10499_v13 = vpop.permute.xlu1 %2365  ;;  %v10501_v44 = vpop.permute.xlu0 %2363 }
 0x9db   :  { %v2410_v17 = vpop.permute.xlu1 %2409  ;;  %v10508_v4 = vpop.permute.xlu0 %2367 }
 0x9dc   :  { %v2472_v32 = vsel %vm666_vm11, %v2456_v48, %v2410_v17  ;;  %v2241_v48 = vrot.slane %v10392_v8, 7 }
 0x9de   :  { %v2251_v42 = vsel %vm110_vm2, %v2241_v48, %v2242_v51 }
 0x9df   :  { %v2414_v31 = vpop.permute.xlu1 %2413  ;;  %v2408_v61 = vpop.permute.xlu0 %2407 }
 0x9e0   :  { %v2471_v57 = vsel %vm666_vm11, %v2455_v53, %v2408_v61  ;;  %v2474_v46 = vsel %vm666_vm11, %v2458_v60, %v2414_v31  ;;  %v2240_v31 = vrot.slane %v10380_v37, 7  ;;  %v2271_v61 = vsel %vm9049_vm9, 0.0, %v2254_v29 }
 0x9e1   :  { %8131 = vmatprep.mubr.msk.f32.mxu1 %vm1149_vm15, %v2471_v57  ;;  %v2463_v57 = vsel %vm649_vm10, %v2271_v61, %v2360_v11 }
 0x9e2   :  { %8132 = vmatmul.mubr.msk.f32.vlgmr.msra.gmra.mrb[16].mxu1 %vm1149_vm15, %v2472_v32 }
 0x9e3   :  { %v2418_v56 = vpop.permute.xlu1 %2417  ;;  %v2412_v35 = vpop.permute.xlu0 %2411 }
 0x9e4   :  { %v2473_v18 = vsel %vm666_vm11, %v2457_v12, %v2412_v35  ;;  %v2476_v17 = vsel %vm666_vm11, %v2460_v7, %v2418_v56  ;;  %v2253_v12 = vsel %vm110_vm2, %v2239_v6, %v2240_v31  ;;  %v2252_v56 = vsel %vm110_vm2, %v2240_v31, %v2241_v48 }
 0x9e5   :  { %8134 = vmatprep.mubr.msk.f32.mxu1 %vm1149_vm15, %v2473_v18  ;;  %v2464_v11 = vsel %vm649_vm10, %v2253_v12, %v10495_v34  ;;  %v2465_v35 = vsel %vm649_vm10, %v2252_v56, %v10501_v44  ;;  %v2466_v34 = vsel %vm649_vm10, %v2251_v42, %v10499_v13  ;;  %v2467_v44 = vsel %vm649_vm10, %v2250_v47, %v10508_v4 }
 0x9e6   :  { %8135 = vmatmul.mubr.msk.f32.gmra.mrb[18].mxu1 %vm1149_vm15, %v2474_v46 }
 0x9e7   :  { %v2426_v45 = vpop.permute.xlu1 %2425  ;;  %v2416_v36 = vpop.permute.xlu0 %2415 }
 0x9e8   :  { %v2475_v63 = vsel %vm666_vm11, %v2459_v15, %v2416_v36  ;;  %v2480_v46 = vsel %vm666_vm11, %v2464_v11, %v2426_v45  ;;  %v2244_v15 = vrot.slane %v10460_v26, 7 }
 0x9e9   :  { %8137 = vmatprep.mubr.msk.f32.mxu1 %vm1149_vm15, %v2475_v63  ;;  %v2245_v63 = vrot.slane %v10462_v39, 7 }
 0x9ea   :  { %8138 = vmatmul.mubr.msk.f32.gmra.mrb[20].mxu1 %vm1149_vm15, %v2476_v17  ;;  %v2249_v7 = vsel %vm110_vm2, %v2243_v9, %v2244_v15 }
 0x9eb   :  { %v2430_v41 = vpop.permute.xlu1 %2429  ;;  %v2420_v53 = vpop.permute.xlu0 %2419  ;;  %v2248_v29 = vsel %vm110_vm2, %v2244_v15, %v2245_v63 }
 0x9ec   :  { %v2477_v30 = vsel %vm666_vm11, %v2461_v2, %v2420_v53  ;;  %v2482_v45 = vsel %vm666_vm11, %v2466_v34, %v2430_v41  ;;  %v2247_v2 = vsel %vm110_vm2, %v2245_v63, %v2246_v0 }
 0x9ed   :  { %8140 = vmatprep.mubr.msk.f32.mxu1 %vm1149_vm15, %v2477_v30 }
 0x9ef   :  { %v2422_v32 = vpop.permute.xlu1 %2421  ;;  %v2424_v59 = vpop.permute.xlu0 %2423 }
 0x9f0   :  { %v2478_v20 = vsel %vm666_vm11, %v2462_v58, %v2422_v32  ;;  %v2479_v24 = vsel %vm666_vm11, %v2463_v57, %v2424_v59 }
 0x9f1   :  { %8141 = vmatmul.mubr.msk.f32.gmra.mrb[22].mxu1 %vm1149_vm15, %v2478_v20 }
 0x9f2   :  { %8143 = vmatprep.mubr.msk.f32.mxu1 %vm1149_vm15, %v2479_v24 }
 0x9f3   :  { %v2370_v60 = vpop.permute.xlu1 %2369  ;;  %v2428_v18 = vpop.permute.xlu0 %2427 }
 0x9f4   :  { %v2481_v38 = vsel %vm666_vm11, %v2465_v35, %v2428_v18  ;;  %v2468_v13 = vsel %vm649_vm10, %v2249_v7, %v2370_v60 }
 0x9f5   :  { %8144 = vmatmul.mubr.msk.f32.gmra.mrb[24].mxu1 %vm1149_vm15, %v2480_v46 }
 0x9f6   :  { %8146 = vmatprep.mubr.msk.f32.mxu1 %vm1149_vm15, %v2481_v38 }
 0x9f7   :  { %v2434_v55 = vpop.permute.xlu1 %2433  ;;  %v2432_v6 = vpop.permute.xlu0 %2431 }
 0x9f8   :  { %v2483_v36 = vsel %vm666_vm11, %v2467_v44, %v2432_v6  ;;  %v2484_v4 = vsel %vm666_vm11, %v2468_v13, %v2434_v55 }
 0x9f9   :  { %8147 = vmatmul.mubr.msk.f32.gmra.mrb[26].mxu1 %vm1149_vm15, %v2482_v45 }
 0x9fa   :  { %8149 = vmatprep.mubr.msk.f32.mxu1 %vm1149_vm15, %v2483_v36 }
 0x9fb   :  { %v2374_v17 = vpop.permute.xlu1 %2373  ;;  %v2372_v25 = vpop.permute.xlu0 %2371 }
 0x9fc   :  { %v2470_v41 = vsel %vm649_vm10, %v2247_v2, %v2374_v17  ;;  %v2469_v53 = vsel %vm649_vm10, %v2248_v29, %v2372_v25 }
 0x9fd   :  { %8150 = vmatmul.mubr.msk.f32.gmra.mrb[28].mxu1 %vm1149_vm15, %v2484_v4 }
 0x9ff   :  { %v2438_v30 = vpop.permute.xlu1 %2437  ;;  %v2436_v52 = vpop.permute.xlu0 %2435 }
 0xa00   :  { %v2486_v31 = vsel %vm666_vm11, %v2470_v41, %v2438_v30  ;;  %v2485_v61 = vsel %vm666_vm11, %v2469_v53, %v2436_v52 }
 0xa01   :  { %8152 = vmatprep.mubr.msk.f32.mxu1 %vm1149_vm15, %v2485_v61 }
 0xa02   :  { %8153 = vmatmul.mubr.msk.f32.gmra.mrb[30].mxu1 %vm1149_vm15, %v2486_v31 }
 0xab5   :  { %v10611_v48 = vpop.f32.mrb[16].mxu1 }
 0xab6   :  { %v2686_v0 = vmul.f32 %v10611_v48, %v10611_v48  ;;  %v10615_v58 = vpop.f32.mrb[17].mxu1 }
 0xab7   :  { %v2685_v57 = vmul.f32 %v10615_v58, %v10615_v58 }
 0xab8   :  { %2719 = vrot.lane.b32.xlu1 %v2686_v0, %s8746_s0 }
 0xab9   :  { %2717 = vrot.lane.b32.xlu0 %v2685_v57, %s8746_s0  ;;  %v10621_v32 = vpop.f32.mrb[18].mxu1 }
 0xaba   :  { %v2688_v59 = vmul.f32 %v10621_v32, %v10621_v32  ;;  %v10625_v20 = vpop.f32.mrb[19].mxu1 }
 0xabb   :  { %v2687_v24 = vmul.f32 %v10625_v20, %v10625_v20 }
 0xabc   :  { %2723 = vrot.lane.b32.xlu1 %v2688_v59, %s8746_s0 }
 0xabd   :  { %2721 = vrot.lane.b32.xlu0 %v2687_v24, %s8746_s0  ;;  %v10631_v12 = vpop.f32.mrb[20].mxu1 }
 0xabe   :  { %v2690_v51 = vmul.f32 %v10631_v12, %v10631_v12  ;;  %v10635_v56 = vpop.f32.mrb[21].mxu1 }
 0xabf   :  { %v2689_v9 = vmul.f32 %v10635_v56, %v10635_v56 }
 0xac0   :  { %2727 = vrot.lane.b32.xlu1 %v2690_v51, %s8746_s0 }
 0xac1   :  { %2725 = vrot.lane.b32.xlu0 %v2689_v9, %s8746_s0 }
 0xac4   :  { %v10641_v11 = vpop.f32.mrb[22].mxu1 }
 0xac5   :  { %v2692_v35 = vmul.f32 %v10641_v11, %v10641_v11  ;;  %v10645_v60 = vpop.f32.mrb[23].mxu1 }
 0xac6   :  { %v2691_v18 = vmul.f32 %v10645_v60, %v10645_v60 }
 0xac7   :  { %2731 = vrot.lane.b32.xlu1 %v2692_v35, %s8746_s0 }
 0xac8   :  { %2729 = vrot.lane.b32.xlu0 %v2691_v18, %s8746_s0  ;;  %v10651_v46 = vpop.f32.mrb[24].mxu1 }
 0xac9   :  { %v2694_v38 = vmul.f32 %v10651_v46, %v10651_v46  ;;  %v10655_v42 = vpop.f32.mrb[25].mxu1 }
 0xaca   :  { %v2693_v47 = vmul.f32 %v10655_v42, %v10655_v42 }
 0xacb   :  { %2735 = vrot.lane.b32.xlu1 %v2694_v38, %s8746_s0 }
 0xacc   :  { %2733 = vrot.lane.b32.xlu0 %v2693_v47, %s8746_s0  ;;  %v10661_v15 = vpop.f32.mrb[26].mxu1 }
 0xacd   :  { %v2696_v34 = vmul.f32 %v10661_v15, %v10661_v15  ;;  %v10665_v44 = vpop.f32.mrb[27].mxu1 }
 0xace   :  { %v2695_v55 = vmul.f32 %v10665_v44, %v10665_v44 }
 0xacf   :  { %2739 = vrot.lane.b32.xlu1 %v2696_v34, %s8746_s0 }
 0xad0   :  { %2737 = vrot.lane.b32.xlu0 %v2695_v55, %s8746_s0  ;;  %v10671_v6 = vpop.f32.mrb[28].mxu1 }
 0xad1   :  { %v2698_v45 = vmul.f32 %v10671_v6, %v10671_v6  ;;  %v10675_v36 = vpop.f32.mrb[29].mxu1 }
 0xad2   :  { %v2697_v7 = vmul.f32 %v10675_v36, %v10675_v36 }
 0xad3   :  { %2743 = vrot.lane.b32.xlu1 %v2698_v45, %s8746_s0 }
 0xad4   :  { %2741 = vrot.lane.b32.xlu0 %v2697_v7, %s8746_s0 }
 0xad5   :  { %v10681_v63 = vpop.f32.mrb[30].mxu1 }
 0xad6   :  { %v2700_v13 = vmul.f32 %v10681_v63, %v10681_v63  ;;  %v10685_v17 = vpop.f32.mrb[31].mxu1 }
 0xad7   :  { %v2699_v25 = vmul.f32 %v10685_v17, %v10685_v17 }
 0xad8   :  { %2747 = vrot.lane.b32.xlu1 %v2700_v13, %s8746_s0 }
 0xad9   :  { %2745 = vrot.lane.b32.xlu0 %v2699_v25, %s8746_s0 }
 0xb2a   :  { %v2720_v4 = vpop.permute.xlu1 %2719 }
 0xb2b   :  { %v2766_v2 = vsel %vm649_vm10, %v10611_v48, %v2720_v4  ;;  %v2718_v29 = vpop.permute.xlu0 %2717 }
 0xb2c   :  { %v2782_v41 = vsel %vm666_vm11, %v2766_v2, 0.0  ;;  %v2765_v53 = vsel %vm649_vm10, %v10615_v58, %v2718_v29 }
 0xb2d   :  { %v2781_v30 = vsel %vm666_vm11, %v2765_v53, 0.0 }
 0xb2e   :  { %v2783_v52 = vadd.f32 %v2782_v41, %v2781_v30  ;;  %v2724_v31 = vpop.permute.xlu1 %2723 }
 0xb2f   :  { %v2722_v61 = vpop.permute.xlu0 %2721  ;;  %v2768_v0 = vsel %vm649_vm10, %v10621_v32, %v2724_v31 }
 0xb30   :  { %v2767_v57 = vsel %vm649_vm10, %v10625_v20, %v2722_v61  ;;  %v2786_v9 = vsel %vm666_vm11, %v2768_v0, 0.0 }
 0xb31   :  { %v2784_v59 = vsel %vm666_vm11, %v2767_v57, 0.0 }
 0xb32   :  { %v2785_v24 = vadd.f32 %v2784_v59, %v2783_v52  ;;  %v2728_v51 = vpop.permute.xlu1 %2727 }
 0xb33   :  { %v2726_v35 = vpop.permute.xlu0 %2725  ;;  %v2770_v18 = vsel %vm649_vm10, %v10631_v12, %v2728_v51 }
 0xb34   :  { %v2787_v38 = vadd.f32 %v2786_v9, %v2785_v24  ;;  %v2769_v47 = vsel %vm649_vm10, %v10635_v56, %v2726_v35  ;;  %v2790_v45 = vsel %vm666_vm11, %v2770_v18, 0.0 }
 0xb35   :  { %v2788_v34 = vsel %vm666_vm11, %v2769_v47, 0.0 }
 0xb36   :  { %v2789_v55 = vadd.f32 %v2788_v34, %v2787_v38 }
 0xb38   :  { %v2791_v7 = vadd.f32 %v2790_v45, %v2789_v55 }
 0xb39   :  { %v2732_v13 = vpop.permute.xlu1 %2731 }
 0xb3a   :  { %v2730_v25 = vpop.permute.xlu0 %2729  ;;  %v2772_v4 = vsel %vm649_vm10, %v10641_v11, %v2732_v13 }
 0xb3b   :  { %v2771_v2 = vsel %vm649_vm10, %v10645_v60, %v2730_v25  ;;  %v2794_v30 = vsel %vm666_vm11, %v2772_v4, 0.0 }
 0xb3c   :  { %v2792_v29 = vsel %vm666_vm11, %v2771_v2, 0.0 }
 0xb3d   :  { %v2793_v41 = vadd.f32 %v2792_v29, %v2791_v7  ;;  %v2736_v53 = vpop.permute.xlu1 %2735 }
 0xb3e   :  { %v2734_v52 = vpop.permute.xlu0 %2733  ;;  %v2774_v31 = vsel %vm649_vm10, %v10651_v46, %v2736_v53 }
 0xb3f   :  { %v2795_v61 = vadd.f32 %v2794_v30, %v2793_v41  ;;  %v2773_v0 = vsel %vm649_vm10, %v10655_v42, %v2734_v52  ;;  %v2798_v51 = vsel %vm666_vm11, %v2774_v31, 0.0 }
 0xb40   :  { %v2796_v57 = vsel %vm666_vm11, %v2773_v0, 0.0 }
 0xb41   :  { %v2797_v59 = vadd.f32 %v2796_v57, %v2795_v61  ;;  %v2740_v24 = vpop.permute.xlu1 %2739 }
 0xb42   :  { %v2738_v9 = vpop.permute.xlu0 %2737  ;;  %v2776_v35 = vsel %vm649_vm10, %v10661_v15, %v2740_v24 }
 0xb43   :  { %v2799_v18 = vadd.f32 %v2798_v51, %v2797_v59  ;;  %v2775_v38 = vsel %vm649_vm10, %v10665_v44, %v2738_v9  ;;  %v2802_v45 = vsel %vm666_vm11, %v2776_v35, 0.0 }
 0xb44   :  { %v2800_v47 = vsel %vm666_vm11, %v2775_v38, 0.0 }
 0xb45   :  { %v2801_v34 = vadd.f32 %v2800_v47, %v2799_v18  ;;  %v2744_v55 = vpop.permute.xlu1 %2743 }
 0xb46   :  { %v2742_v7 = vpop.permute.xlu0 %2741  ;;  %v2778_v13 = vsel %vm649_vm10, %v10671_v6, %v2744_v55 }
 0xb47   :  { %v2803_v25 = vadd.f32 %v2802_v45, %v2801_v34  ;;  %v2777_v4 = vsel %vm649_vm10, %v10675_v36, %v2742_v7  ;;  %v2806_v41 = vsel %vm666_vm11, %v2778_v13, 0.0 }
 0xb48   :  { %v2804_v2 = vsel %vm666_vm11, %v2777_v4, 0.0  ;;  %v2825_v4 = vld [vmem:[%s13015_s2 + $0x6] sm:$0x1] }
 0xb49   :  { %v2805_v29 = vadd.f32 %v2804_v2, %v2803_v25 }
 0xb4a   :  { %v2748_v53 = vpop.permute.xlu1 %2747 }
 0xb4b   :  { %v2807_v30 = vadd.f32 %v2806_v41, %v2805_v29  ;;  %v2746_v52 = vpop.permute.xlu0 %2745  ;;  %v2780_v31 = vsel %vm649_vm10, %v10681_v63, %v2748_v53  ;;  %v3148_v29 = vld [vmem:[#allocation3 + $0x38] sm:$0xff]  ;;  %v3149_v41 = vld [vmem:[#allocation3 + $0x40] sm:$0xf] }
 0xb4c   :  { %v2779_v61 = vsel %vm649_vm10, %v10685_v17, %v2746_v52  ;;  %v2810_v59 = vsel %vm666_vm11, %v2780_v31, 0.0  ;;  %v2853_v52 = vld [vmem:[%s13015_s2 + $0x7] sm:$0x1] }
 0xb4d   :  { %v2808_v0 = vsel %vm666_vm11, %v2779_v61, 0.0 }
 0xb4e   :  { %v2809_v57 = vadd.f32 %v2808_v0, %v2807_v30  ;;  %v8480_v30 = vpack.c.bf16 %v3149_v41, %v3148_v29 }
 0xb50   :  { %v2811_v24 = vadd.f32 %v2810_v59, %v2809_v57  ;;  %8482 = vmatprep.subr.msk.bf16.mxu0 %vm9498_vm14, %v8480_v30 }
 0xb51   :  { %8485 = vmatpush3.bf16.msk.msra.mxu0 %vm9498_vm14, %v8480_v30 }
 0xb52   :  { %v2812_v51 = vrot.slane %v2811_v24, 4 }
 0xb54   :  { %v2813_v9 = vadd.f32 %v2812_v51, %v2811_v24 }
 0xb56   :  { %v2814_v35 = vrot.slane %v2813_v9, 2 }
 0xb58   :  { %v2815_v18 = vadd.f32 %v2814_v35, %v2813_v9 }
 0xb5a   :  { %v2816_v38 = vrot.slane %v2815_v18, 1 }
 0xb5c   :  { %v2817_v47 = vadd.f32 %v2816_v38, %v2815_v18 }
 0xb5e   :  { %v2818_v34 = vmul.f32 0.0078125, %v2817_v47 }
 0xb60   :  { %v2819_v55 = vmul.f32 %v2818_v34, %v2818_v34 }
 0xb62   :  { %2821 = vrot.lane.b32.xlu0 %v2819_v55, %s8746_s0 }
 0xbd4   :  { %v2822_v45 = vpop.permute.xlu0 %2821 }
 0xbd5   :  { %v2824_v7 = vsub.f32 %v2818_v34, %v2822_v45 }
 0xbd7   :  { %v2826_v13 = vadd.f32 1e-05, %v2824_v7 }
 0xbd9   :  { %8665 = vrsqrt.f32 %v2826_v13 }
 0xbe3   :  { %v8666_v25 = vpop.eup %8665 }
 0xbe4   :  { %2829 = vrot.lane.b32.xlu1 %v8666_v25, %s8747_s1 }
 0xc56   :  { %v2830_v2 = vpop.permute.xlu1 %2829 }
 0xc57   :  { %v2832_v53 = vmul.f32 %v2830_v2, %v2825_v4 }
 0xc59   :  { %v10748_v31 = vrot.slane %v2832_v53, %v9227_v16  ;;  %v2854_v61 = vmul.f32 %v2832_v53, %v2818_v34 }
 0xc5b   :  { %v2855_v0 = vsub.f32 %v2853_v52, %v2854_v61  ;;  %v2838_v57 = vmul.f32 %v10611_v48, %v10748_v31  ;;  %v2837_v59 = vmul.f32 %v10748_v31, %v10615_v58  ;;  %v2840_v24 = vmul.f32 %v10621_v32, %v10748_v31 }
 0xc5c   :  { %v2839_v51 = vmul.f32 %v10748_v31, %v10625_v20  ;;  %v2842_v9 = vmul.f32 %v10631_v12, %v10748_v31  ;;  %v2841_v35 = vmul.f32 %v10748_v31, %v10635_v56  ;;  %v2844_v18 = vmul.f32 %v10641_v11, %v10748_v31 }
 0xc5d   :  { %v10769_v48 = vrot.slane %v2855_v0, %v9227_v16  ;;  %v2843_v58 = vmul.f32 %v10748_v31, %v10645_v60  ;;  %v2846_v32 = vmul.f32 %v10651_v46, %v10748_v31  ;;  %v2845_v20 = vmul.f32 %v10748_v31, %v10655_v42 }
 0xc5e   :  { %v2848_v12 = vmul.f32 %v10661_v15, %v10748_v31  ;;  %v2847_v56 = vmul.f32 %v10748_v31, %v10665_v44  ;;  %v2849_v11 = vmul.f32 %v10748_v31, %v10675_v36  ;;  %v2850_v38 = vmul.f32 %v10671_v6, %v10748_v31 }
 0xc5f   :  { %v2861_v60 = vadd.f32 %v10769_v48, %v2838_v57  ;;  %v2860_v47 = vadd.f32 %v10769_v48, %v2837_v59  ;;  %v2863_v46 = vadd.f32 %v10769_v48, %v2840_v24  ;;  %v2862_v42 = vadd.f32 %v10769_v48, %v2839_v51 }
 0xc60   :  { %v2865_v34 = vadd.f32 %v10769_v48, %v2842_v9  ;;  %v2864_v15 = vadd.f32 %v10769_v48, %v2841_v35  ;;  %v2867_v44 = vadd.f32 %v10769_v48, %v2844_v18  ;;  %v2866_v55 = vadd.f32 %v10769_v48, %v2843_v58 }
 0xc61   :  { %v10793_v36 = vmax.f32 %v2861_v60, 0.0  ;;  %v10795_v45 = vmax.f32 %v2860_v47, 0.0  ;;  %v10797_v6 = vmax.f32 %v2863_v46, 0.0  ;;  %v10799_v7 = vmax.f32 %v2862_v42, 0.0 }
 0xc62   :  { %v10801_v13 = vmax.f32 %v2865_v34, 0.0  ;;  %v10803_v25 = vmax.f32 %v2864_v15, 0.0  ;;  %v10805_v4 = vmax.f32 %v2867_v44, 0.0  ;;  %v10807_v2 = vmax.f32 %v2866_v55, 0.0 }
 0xc63   :  { %3006 = vrot.lane.b32.xlu1 %v10793_v36, %s8746_s0  ;;  %3004 = vrot.lane.b32.xlu0 %v10795_v45, %s8746_s0  ;;  %v2869_v29 = vadd.f32 %v10769_v48, %v2846_v32  ;;  %v2868_v41 = vadd.f32 %v10769_v48, %v2845_v20  ;;  %v2871_v53 = vadd.f32 %v10769_v48, %v2848_v12  ;;  %v2941_v30 = vrot.slane %v10793_v36, 1 }
 0xc64   :  { %v2870_v52 = vadd.f32 %v10769_v48, %v2847_v56  ;;  %v2942_v61 = vrot.slane %v10799_v7, 1  ;;  %v2872_v0 = vadd.f32 %v10769_v48, %v2849_v11  ;;  %v2943_v57 = vrot.slane %v10797_v6, 1 }
 0xc65   :  { %v10821_v59 = vmax.f32 %v2869_v29, 0.0  ;;  %v10823_v24 = vmax.f32 %v2868_v41, 0.0  ;;  %v10825_v51 = vmax.f32 %v2871_v53, 0.0  ;;  %v2944_v9 = vrot.slane %v10803_v25, 1 }
 0xc66   :  { %v10828_v35 = vmax.f32 %v2870_v52, 0.0  ;;  %v10832_v18 = vsel %vm175_vm0, %v2941_v30, %v2942_v61  ;;  %v10834_v58 = vmax.f32 %v2872_v0, 0.0  ;;  %v2940_v32 = vrot.slane %v10795_v45, 1 }
 0xc67   :  { %3010 = vrot.lane.b32.xlu1 %v10797_v6, %s8746_s0  ;;  %3008 = vrot.lane.b32.xlu0 %v10799_v7, %s8746_s0  ;;  %v10843_v20 = vsel %vm175_vm0, %v2943_v57, %v2944_v9  ;;  %v2945_v12 = vrot.slane %v10801_v13, 1  ;;  %v2946_v56 = vrot.slane %v10807_v2, 1  ;;  %v10849_v11 = vsel %vm175_vm0, %v2942_v61, %v2943_v57 }
 0xc68   :  { %v10853_v60 = vsel %vm175_vm0, %v2940_v32, %v2941_v30  ;;  %v2949_v47 = vrot.slane %v10821_v59, 1  ;;  %v2950_v46 = vrot.slane %v10828_v35, 1  ;;  %v2951_v42 = vrot.slane %v10825_v51, 1 }
 0xc69   :  { %v10860_v34 = vsel %vm175_vm0, %v2945_v12, %v2946_v56  ;;  %v10864_v15 = vsel %vm175_vm0, %v2944_v9, %v2945_v12  ;;  %v2952_v44 = vrot.slane %v10834_v58, 1  ;;  %v2947_v55 = vrot.slane %v10805_v4, 1 }
 0xc6a   :  { %v10870_v29 = vsel %vm175_vm0, %v2949_v47, %v2950_v46  ;;  %v2948_v41 = vrot.slane %v10823_v24, 1  ;;  %v2873_v53 = vadd.f32 %v10769_v48, %v2850_v38  ;;  %v10876_v30 = vsel %vm175_vm0, %v2950_v46, %v2951_v42 }
 0xc6b   :  { %3014 = vrot.lane.b32.xlu1 %v10801_v13, %s8746_s0  ;;  %3012 = vrot.lane.b32.xlu0 %v10803_v25, %s8746_s0  ;;  %v10884_v52 = vsel %vm175_vm0, %v2951_v42, %v2952_v44  ;;  %v10888_v61 = vsel %vm175_vm0, %v2946_v56, %v2947_v55  ;;  %v2851_v38 = vmul.f32 %v10748_v31, %v10685_v17  ;;  %v2892_v0 = vrot.slane %v10795_v45, 7 }
 0xc6c   :  { %v10895_v57 = vsel %vm175_vm0, %v2947_v55, %v2948_v41  ;;  %v2962_v9 = vsel %vm175_vm0, %v2948_v41, %v2949_v47  ;;  %v2889_v12 = vmax.f32 %v2873_v53, 0.0  ;;  %v2852_v46 = vmul.f32 %v10681_v63, %v10748_v31 }
 0xc6d   :  { %v2874_v42 = vadd.f32 %v10769_v48, %v2851_v38  ;;  %v2893_v56 = vrot.slane %v10793_v36, 7  ;;  %v2894_v40 = vrot.slane %v10799_v7, 7  ;;  %v2895_v39 = vrot.slane %v10797_v6, 7 }
 0xc6e   :  { %v2953_v17 = vrot.slane %v2889_v12, 1  ;;  %v2875_v45 = vadd.f32 %v10769_v48, %v2852_v46  ;;  %v2896_v55 = vrot.slane %v10803_v25, 7  ;;  %v2897_v48 = vrot.slane %v10801_v13, 7 }
 0xc6f   :  { %3018 = vrot.lane.b32.xlu1 %v10805_v4, %s8746_s0  ;;  %3016 = vrot.lane.b32.xlu0 %v10807_v2, %s8746_s0  ;;  %v2890_v63 = vmax.f32 %v2874_v42, 0.0  ;;  %v10913_v31 = vsel %vm110_vm2, %v2892_v0, %v2893_v56  ;;  %v10917_v36 = vsel %vm110_vm2, %v2893_v56, %v2894_v40  ;;  %v10924_v25 = vsel %vm110_vm2, %v2894_v40, %v2895_v39 }
 0xc70   :  { %v2958_v6 = vsel %vm175_vm0, %v2952_v44, %v2953_v17  ;;  %v2891_v7 = vmax.f32 %v2875_v45, 0.0  ;;  %v10928_v47 = vsel %vm110_vm2, %v2895_v39, %v2896_v55  ;;  %v10932_v53 = vsel %vm110_vm2, %v2896_v55, %v2897_v48 }
 0xc71   :  { %v2954_v41 = vrot.slane %v2890_v63, 1  ;;  %v2898_v38 = vrot.slane %v10807_v2, 7  ;;  %v2899_v13 = vrot.slane %v10805_v4, 7  ;;  %v2900_v42 = vrot.slane %v10823_v24, 7 }
 0xc72   :  { %v2955_v46 = vrot.slane %v2891_v7, 1  ;;  %v2907_v44 = vrot.slane %v2891_v7, 7  ;;  %v2901_v40 = vrot.slane %v10821_v59, 7  ;;  %v2902_v56 = vrot.slane %v10828_v35, 7 }
 0xc73   :  { %3022 = vrot.lane.b32.xlu1 %v10821_v59, %s8746_s0  ;;  %3020 = vrot.lane.b32.xlu0 %v10823_v24, %s8746_s0  ;;  %v2957_v39 = vsel %vm175_vm0, %v2953_v17, %v2954_v41  ;;  %v10946_v2 = vsel %vm110_vm2, %v2898_v38, %v2899_v13  ;;  %v10950_v4 = vsel %vm110_vm2, %v2897_v48, %v2898_v38  ;;  %v2903_v48 = vrot.slane %v10825_v51, 7 }
 0xc74   :  { %v2971_v45 = vsel %vm175_vm0, %v2955_v46, %v2940_v32  ;;  %v2956_v59 = vsel %vm175_vm0, %v2954_v41, %v2955_v46  ;;  %v2923_v24 = vsel %vm110_vm2, %v2907_v44, %v2892_v0  ;;  %v10961_v17 = vsel %vm110_vm2, %v2900_v42, %v2901_v40 }
 0xc75   :  { %v10965_v55 = vsel %vm110_vm2, %v2899_v13, %v2900_v42  ;;  %v10970_v38 = vsel %vm110_vm2, %v2901_v40, %v2902_v56  ;;  %v2904_v32 = vrot.slane %v10834_v58, 7  ;;  %v2905_v41 = vrot.slane %v2889_v12, 7 }
 0xc76   :  { %v10979_v0 = vsel %vm110_vm2, %v2902_v56, %v2903_v48  ;;  %v2906_v13 = vrot.slane %v2890_v63, 7 }
 0xc77   :  { %3026 = vrot.lane.b32.xlu1 %v10825_v51, %s8746_s0  ;;  %3024 = vrot.lane.b32.xlu0 %v10828_v35, %s8746_s0  ;;  %v10983_v46 = vsel %vm110_vm2, %v2903_v48, %v2904_v32  ;;  %v10987_v42 = vsel %vm110_vm2, %v2904_v32, %v2905_v41  ;;  %v2979_v35 = vsel %vm8900_vm3, 0.0, %v10895_v57 }
 0xc78   :  { %v10991_v40 = vsel %vm110_vm2, %v2906_v13, %v2907_v44  ;;  %v10995_v51 = vsel %vm110_vm2, %v2905_v41, %v2906_v13 }
 0xc7b   :  { %3070 = vrot.lane.b32.xlu1 %v10832_v18, %s8743_s23  ;;  %3028 = vrot.lane.b32.xlu0 %v10834_v58, %s8746_s0  ;;  %v2987_v18 = vsel %vm8986_vm4, 0.0, %v2971_v45 }
 0xc7f   :  { %3074 = vrot.lane.b32.xlu1 %v10843_v20, %s8743_s23  ;;  %3068 = vrot.lane.b32.xlu0 %v10853_v60, %s8743_s23 }
 0xc83   :  { %3078 = vrot.lane.b32.xlu1 %v10860_v34, %s8743_s23  ;;  %3072 = vrot.lane.b32.xlu0 %v10849_v11, %s8743_s23 }
 0xc87   :  { %3086 = vrot.lane.b32.xlu1 %v10870_v29, %s8743_s23  ;;  %3076 = vrot.lane.b32.xlu0 %v10864_v15, %s8743_s23 }
 0xc8b   :  { %3090 = vrot.lane.b32.xlu1 %v10884_v52, %s8743_s23  ;;  %3080 = vrot.lane.b32.xlu0 %v10888_v61, %s8743_s23 }
 0xc8f   :  { %3082 = vrot.lane.b32.xlu1 %v2979_v35, %s8743_s23  ;;  %3084 = vrot.lane.b32.xlu0 %v2962_v9, %s8743_s23 }
 0xc93   :  { %3030 = vrot.lane.b32.xlu1 %v2889_v12, %s8746_s0  ;;  %3088 = vrot.lane.b32.xlu0 %v10876_v30, %s8743_s23 }
 0xc97   :  { %3094 = vrot.lane.b32.xlu1 %v2957_v39, %s8743_s23  ;;  %3092 = vrot.lane.b32.xlu0 %v2958_v6, %s8743_s23  ;;  %v2924_v6 = vsel %vm9006_vm5, 0.0, %v2923_v24 }
 0xc9b   :  { %3034 = vrot.lane.b32.xlu1 %v2891_v7, %s8746_s0  ;;  %3032 = vrot.lane.b32.xlu0 %v2890_v63, %s8746_s0 }
 0xc9f   :  { %3098 = vrot.lane.b32.xlu1 %v2987_v18, %s8743_s23  ;;  %3096 = vrot.lane.b32.xlu0 %v2956_v59, %s8743_s23 }
 0xcd5   :  { %v3007_v58 = vpop.permute.xlu1 %3006  ;;  %v3005_v20 = vpop.permute.xlu0 %3004 }
 0xcd6   :  { %v3116_v7 = vsel %vm649_vm10, %v2924_v6, %v3005_v20  ;;  %v3117_v56 = vsel %vm649_vm10, %v10913_v31, %v3007_v58 }
 0xcd9   :  { %v3011_v11 = vpop.permute.xlu1 %3010  ;;  %v3009_v60 = vpop.permute.xlu0 %3008 }
 0xcda   :  { %v3118_v48 = vsel %vm649_vm10, %v10917_v36, %v3009_v60  ;;  %v3119_v41 = vsel %vm649_vm10, %v10924_v25, %v3011_v11 }
 0xcdd   :  { %v3015_v34 = vpop.permute.xlu1 %3014  ;;  %v3013_v15 = vpop.permute.xlu0 %3012 }
 0xcde   :  { %v3120_v35 = vsel %vm649_vm10, %v10928_v47, %v3013_v15  ;;  %v3121_v36 = vsel %vm649_vm10, %v10932_v53, %v3015_v34  ;;  %v2932_v53 = vsel %vm9049_vm9, 0.0, %v10965_v55 }
 0xce1   :  { %v3019_v29 = vpop.permute.xlu1 %3018  ;;  %v3017_v30 = vpop.permute.xlu0 %3016 }
 0xce2   :  { %v3122_v11 = vsel %vm649_vm10, %v10950_v4, %v3017_v30  ;;  %v3123_v34 = vsel %vm649_vm10, %v10946_v2, %v3019_v29 }
 0xce5   :  { %v3023_v52 = vpop.permute.xlu1 %3022  ;;  %v3021_v61 = vpop.permute.xlu0 %3020 }
 0xce6   :  { %v3124_v15 = vsel %vm649_vm10, %v2932_v53, %v3021_v61  ;;  %v3125_v30 = vsel %vm649_vm10, %v10961_v17, %v3023_v52 }
 0xce9   :  { %v3027_v57 = vpop.permute.xlu1 %3026  ;;  %v3025_v9 = vpop.permute.xlu0 %3024 }
 0xcea   :  { %v3126_v55 = vsel %vm649_vm10, %v10970_v38, %v3025_v9 }
 0xced   :  { %v3071_v12 = vpop.permute.xlu1 %3070  ;;  %v3029_v63 = vpop.permute.xlu0 %3028 }
 0xcee   :  { %v3133_v59 = vsel %vm666_vm11, %v3117_v56, %v3071_v12  ;;  %v3127_v56 = vsel %vm649_vm10, %v10979_v0, %v3027_v57 }
 0xcf1   :  { %v3075_v44 = vpop.permute.xlu1 %3074  ;;  %v3069_v39 = vpop.permute.xlu0 %3068 }
 0xcf2   :  { %v3132_v45 = vsel %vm666_vm11, %v3116_v7, %v3069_v39  ;;  %v3135_v31 = vsel %vm666_vm11, %v3119_v41, %v3075_v44 }
 0xcf3   :  { %8159 = vmatprep.mubr.msk.f32.mxu0 %vm1149_vm15, %v3132_v45  ;;  %v3128_v45 = vsel %vm649_vm10, %v10983_v46, %v3029_v63 }
 0xcf4   :  { %8160 = vmatmul.mubr.msk.f32.vlgmr.msra.gmra.mrb[32].mxu0 %vm1149_vm15, %v3133_v59 }
 0xcf5   :  { %v3079_v32 = vpop.permute.xlu1 %3078  ;;  %v3073_v24 = vpop.permute.xlu0 %3072 }
 0xcf6   :  { %v3134_v13 = vsel %vm666_vm11, %v3118_v48, %v3073_v24  ;;  %v3137_v25 = vsel %vm666_vm11, %v3121_v36, %v3079_v32 }
 0xcf7   :  { %8162 = vmatprep.mubr.msk.f32.mxu0 %vm1149_vm15, %v3134_v13 }
 0xcf8   :  { %8163 = vmatmul.mubr.msk.f32.gmra.mrb[34].mxu0 %vm1149_vm15, %v3135_v31 }
 0xcf9   :  { %v3087_v18 = vpop.permute.xlu1 %3086  ;;  %v3077_v58 = vpop.permute.xlu0 %3076 }
 0xcfa   :  { %v3136_v20 = vsel %vm666_vm11, %v3120_v35, %v3077_v58  ;;  %v3141_v29 = vsel %vm666_vm11, %v3125_v30, %v3087_v18 }
 0xcfb   :  { %8165 = vmatprep.mubr.msk.f32.mxu0 %vm1149_vm15, %v3136_v20 }
 0xcfc   :  { %8166 = vmatmul.mubr.msk.f32.gmra.mrb[36].mxu0 %vm1149_vm15, %v3137_v25 }
 0xcfd   :  { %v3091_v60 = vpop.permute.xlu1 %3090  ;;  %v3081_v12 = vpop.permute.xlu0 %3080 }
 0xcfe   :  { %v3138_v47 = vsel %vm666_vm11, %v3122_v11, %v3081_v12  ;;  %v3143_v38 = vsel %vm666_vm11, %v3127_v56, %v3091_v60 }
 0xcff   :  { %8168 = vmatprep.mubr.msk.f32.mxu0 %vm1149_vm15, %v3138_v47 }
 0xd01   :  { %v3083_v6 = vpop.permute.xlu1 %3082  ;;  %v3085_v7 = vpop.permute.xlu0 %3084 }
 0xd02   :  { %v3139_v44 = vsel %vm666_vm11, %v3123_v34, %v3083_v6  ;;  %v3140_v4 = vsel %vm666_vm11, %v3124_v15, %v3085_v7 }
 0xd03   :  { %8169 = vmatmul.mubr.msk.f32.gmra.mrb[38].mxu0 %vm1149_vm15, %v3139_v44 }
 0xd04   :  { %8171 = vmatprep.mubr.msk.f32.mxu0 %vm1149_vm15, %v3140_v4 }
 0xd05   :  { %v3031_v39 = vpop.permute.xlu1 %3030  ;;  %v3089_v2 = vpop.permute.xlu0 %3088 }
 0xd06   :  { %v3142_v61 = vsel %vm666_vm11, %v3126_v55, %v3089_v2  ;;  %v3129_v59 = vsel %vm649_vm10, %v10987_v42, %v3031_v39 }
 0xd07   :  { %8172 = vmatmul.mubr.msk.f32.gmra.mrb[40].mxu0 %vm1149_vm15, %v3141_v29 }
 0xd08   :  { %8174 = vmatprep.mubr.msk.f32.mxu0 %vm1149_vm15, %v3142_v61 }
 0xd09   :  { %v3095_v17 = vpop.permute.xlu1 %3094  ;;  %v3093_v52 = vpop.permute.xlu0 %3092 }
 0xd0a   :  { %v3144_v9 = vsel %vm666_vm11, %v3128_v45, %v3093_v52  ;;  %v3145_v0 = vsel %vm666_vm11, %v3129_v59, %v3095_v17 }
 0xd0b   :  { %8175 = vmatmul.mubr.msk.f32.gmra.mrb[42].mxu0 %vm1149_vm15, %v3143_v38 }
 0xd0c   :  { %8177 = vmatprep.mubr.msk.f32.mxu0 %vm1149_vm15, %v3144_v9 }
 0xd0d   :  { %v3035_v48 = vpop.permute.xlu1 %3034  ;;  %v3033_v32 = vpop.permute.xlu0 %3032 }
 0xd0e   :  { %v3131_v46 = vsel %vm649_vm10, %v10991_v40, %v3035_v48  ;;  %v3130_v57 = vsel %vm649_vm10, %v10995_v51, %v3033_v32 }
 0xd0f   :  { %8178 = vmatmul.mubr.msk.f32.gmra.mrb[44].mxu0 %vm1149_vm15, %v3145_v0 }
 0xd11   :  { %v3099_v63 = vpop.permute.xlu1 %3098  ;;  %v3097_v24 = vpop.permute.xlu0 %3096 }
 0xd12   :  { %v3147_v41 = vsel %vm666_vm11, %v3131_v46, %v3099_v63  ;;  %v3146_v13 = vsel %vm666_vm11, %v3130_v57, %v3097_v24 }
 0xd13   :  { %8180 = vmatprep.mubr.msk.f32.mxu0 %vm1149_vm15, %v3146_v13 }
 0xd14   :  { %8181 = vmatmul.mubr.msk.f32.gmra.mrb[46].mxu0 %vm1149_vm15, %v3147_v41 }
 0xdc7   :  { %v11100_v42 = vpop.f32.mrb[32].mxu0 }
 0xdc8   :  { %v3347_v31 = vmul.f32 %v11100_v42, %v11100_v42  ;;  %v11104_v35 = vpop.f32.mrb[33].mxu0 }
 0xdc9   :  { %v3346_v40 = vmul.f32 %v11104_v35, %v11104_v35 }
 0xdca   :  { %3380 = vrot.lane.b32.xlu1 %v3347_v31, %s8746_s0 }
 0xdcb   :  { %3378 = vrot.lane.b32.xlu0 %v3346_v40, %s8746_s0  ;;  %v11110_v51 = vpop.f32.mrb[34].mxu0 }
 0xdcc   :  { %v3349_v18 = vmul.f32 %v11110_v51, %v11110_v51  ;;  %v11114_v58 = vpop.f32.mrb[35].mxu0 }
 0xdcd   :  { %v3348_v36 = vmul.f32 %v11114_v58, %v11114_v58 }
 0xdce   :  { %3384 = vrot.lane.b32.xlu1 %v3349_v18, %s8746_s0 }
 0xdcf   :  { %3382 = vrot.lane.b32.xlu0 %v3348_v36, %s8746_s0  ;;  %v11120_v20 = vpop.f32.mrb[36].mxu0 }
 0xdd0   :  { %v3351_v25 = vmul.f32 %v11120_v20, %v11120_v20  ;;  %v11124_v11 = vpop.f32.mrb[37].mxu0 }
 0xdd1   :  { %v3350_v60 = vmul.f32 %v11124_v11, %v11124_v11 }
 0xdd2   :  { %3388 = vrot.lane.b32.xlu1 %v3351_v25, %s8746_s0 }
 0xdd3   :  { %3386 = vrot.lane.b32.xlu0 %v3350_v60, %s8746_s0 }
 0xdd6   :  { %v11130_v12 = vpop.f32.mrb[38].mxu0 }
 0xdd7   :  { %v3353_v47 = vmul.f32 %v11130_v12, %v11130_v12  ;;  %v11134_v53 = vpop.f32.mrb[39].mxu0 }
 0xdd8   :  { %v3352_v34 = vmul.f32 %v11134_v53, %v11134_v53 }
 0xdd9   :  { %3392 = vrot.lane.b32.xlu1 %v3353_v47, %s8746_s0 }
 0xdda   :  { %3390 = vrot.lane.b32.xlu0 %v3352_v34, %s8746_s0  ;;  %v11140_v15 = vpop.f32.mrb[40].mxu0 }
 0xddb   :  { %v3355_v6 = vmul.f32 %v11140_v15, %v11140_v15  ;;  %v11144_v7 = vpop.f32.mrb[41].mxu0 }
 0xddc   :  { %v3354_v44 = vmul.f32 %v11144_v7, %v11144_v7 }
 0xddd   :  { %3396 = vrot.lane.b32.xlu1 %v3355_v6, %s8746_s0 }
 0xdde   :  { %3394 = vrot.lane.b32.xlu0 %v3354_v44, %s8746_s0  ;;  %v11150_v4 = vpop.f32.mrb[42].mxu0 }
 0xddf   :  { %v3357_v30 = vmul.f32 %v11150_v4, %v11150_v4  ;;  %v11154_v55 = vpop.f32.mrb[43].mxu0 }
 0xde0   :  { %v3356_v39 = vmul.f32 %v11154_v55, %v11154_v55 }
 0xde1   :  { %3400 = vrot.lane.b32.xlu1 %v3357_v30, %s8746_s0 }
 0xde2   :  { %3398 = vrot.lane.b32.xlu0 %v3356_v39, %s8746_s0  ;;  %v11160_v2 = vpop.f32.mrb[44].mxu0 }
 0xde3   :  { %v3359_v29 = vmul.f32 %v11160_v2, %v11160_v2  ;;  %v11164_v61 = vpop.f32.mrb[45].mxu0 }
 0xde4   :  { %v3358_v56 = vmul.f32 %v11164_v61, %v11164_v61 }
 0xde5   :  { %3404 = vrot.lane.b32.xlu1 %v3359_v29, %s8746_s0 }
 0xde6   :  { %3402 = vrot.lane.b32.xlu0 %v3358_v56, %s8746_s0 }
 0xde7   :  { %v11170_v45 = vpop.f32.mrb[46].mxu0 }
 0xde8   :  { %v3361_v17 = vmul.f32 %v11170_v45, %v11170_v45  ;;  %v11174_v52 = vpop.f32.mrb[47].mxu0 }
 0xde9   :  { %v3360_v38 = vmul.f32 %v11174_v52, %v11174_v52 }
 0xdea   :  { %3408 = vrot.lane.b32.xlu1 %v3361_v17, %s8746_s0 }
 0xdeb   :  { %3406 = vrot.lane.b32.xlu0 %v3360_v38, %s8746_s0 }
 0xe3c   :  { %v3381_v9 = vpop.permute.xlu1 %3380 }
 0xe3d   :  { %v3427_v59 = vsel %vm649_vm10, %v11100_v42, %v3381_v9  ;;  %v3379_v48 = vpop.permute.xlu0 %3378 }
 0xe3e   :  { %v3443_v32 = vsel %vm666_vm11, %v3427_v59, 0.0  ;;  %v3426_v0 = vsel %vm649_vm10, %v11104_v35, %v3379_v48 }
 0xe3f   :  { %v3442_v46 = vsel %vm666_vm11, %v3426_v0, 0.0 }
 0xe40   :  { %v3444_v57 = vadd.f32 %v3443_v32, %v3442_v46  ;;  %v3385_v63 = vpop.permute.xlu1 %3384 }
 0xe41   :  { %v3383_v24 = vpop.permute.xlu0 %3382  ;;  %v3429_v41 = vsel %vm649_vm10, %v11110_v51, %v3385_v63 }
 0xe42   :  { %v3428_v13 = vsel %vm649_vm10, %v11114_v58, %v3383_v24  ;;  %v3447_v36 = vsel %vm666_vm11, %v3429_v41, 0.0 }
 0xe43   :  { %v3445_v31 = vsel %vm666_vm11, %v3428_v13, 0.0 }
 0xe44   :  { %v3446_v40 = vadd.f32 %v3445_v31, %v3444_v57  ;;  %v3389_v18 = vpop.permute.xlu1 %3388 }
 0xe45   :  { %v3387_v25 = vpop.permute.xlu0 %3386  ;;  %v3431_v60 = vsel %vm649_vm10, %v11120_v20, %v3389_v18 }
 0xe46   :  { %v3448_v47 = vadd.f32 %v3447_v36, %v3446_v40  ;;  %v3430_v34 = vsel %vm649_vm10, %v11124_v11, %v3387_v25  ;;  %v3451_v30 = vsel %vm666_vm11, %v3431_v60, 0.0 }
 0xe47   :  { %v3449_v6 = vsel %vm666_vm11, %v3430_v34, 0.0 }
 0xe48   :  { %v3450_v44 = vadd.f32 %v3449_v6, %v3448_v47 }
 0xe4a   :  { %v3452_v39 = vadd.f32 %v3451_v30, %v3450_v44 }
 0xe4b   :  { %v3393_v29 = vpop.permute.xlu1 %3392 }
 0xe4c   :  { %v3391_v56 = vpop.permute.xlu0 %3390  ;;  %v3433_v17 = vsel %vm649_vm10, %v11130_v12, %v3393_v29 }
 0xe4d   :  { %v3432_v38 = vsel %vm649_vm10, %v11134_v53, %v3391_v56  ;;  %v3455_v32 = vsel %vm666_vm11, %v3433_v17, 0.0 }
 0xe4e   :  { %v3453_v9 = vsel %vm666_vm11, %v3432_v38, 0.0 }
 0xe4f   :  { %v3454_v59 = vadd.f32 %v3453_v9, %v3452_v39  ;;  %v3397_v48 = vpop.permute.xlu1 %3396 }
 0xe50   :  { %v3395_v0 = vpop.permute.xlu0 %3394  ;;  %v3435_v46 = vsel %vm649_vm10, %v11140_v15, %v3397_v48 }
 0xe51   :  { %v3456_v57 = vadd.f32 %v3455_v32, %v3454_v59  ;;  %v3434_v63 = vsel %vm649_vm10, %v11144_v7, %v3395_v0  ;;  %v3459_v31 = vsel %vm666_vm11, %v3435_v46, 0.0 }
 0xe52   :  { %v3457_v24 = vsel %vm666_vm11, %v3434_v63, 0.0 }
 0xe53   :  { %v3458_v41 = vadd.f32 %v3457_v24, %v3456_v57  ;;  %v3401_v13 = vpop.permute.xlu1 %3400 }
 0xe54   :  { %v3399_v40 = vpop.permute.xlu0 %3398  ;;  %v3437_v18 = vsel %vm649_vm10, %v11150_v4, %v3401_v13 }
 0xe55   :  { %v3460_v36 = vadd.f32 %v3459_v31, %v3458_v41  ;;  %v3436_v25 = vsel %vm649_vm10, %v11154_v55, %v3399_v40  ;;  %v3463_v6 = vsel %vm666_vm11, %v3437_v18, 0.0 }
 0xe56   :  { %v3461_v60 = vsel %vm666_vm11, %v3436_v25, 0.0 }
 0xe57   :  { %v3462_v47 = vadd.f32 %v3461_v60, %v3460_v36  ;;  %v3405_v34 = vpop.permute.xlu1 %3404 }
 0xe58   :  { %v3403_v44 = vpop.permute.xlu0 %3402  ;;  %v3439_v30 = vsel %vm649_vm10, %v11160_v2, %v3405_v34 }
 0xe59   :  { %v3464_v39 = vadd.f32 %v3463_v6, %v3462_v47  ;;  %v3438_v29 = vsel %vm649_vm10, %v11164_v61, %v3403_v44  ;;  %v3467_v38 = vsel %vm666_vm11, %v3439_v30, 0.0  ;;  %v3486_v30 = vld [vmem:[%s13015_s2 + $0x8] sm:$0x1] }
 0xe5a   :  { %v3465_v56 = vsel %vm666_vm11, %v3438_v29, 0.0 }
 0xe5b   :  { %v3466_v17 = vadd.f32 %v3465_v56, %v3464_v39  ;;  %v3514_v56 = vld [vmem:[%s13015_s2 + $0x9] sm:$0x1] }
 0xe5c   :  { %v3409_v9 = vpop.permute.xlu1 %3408 }
 0xe5d   :  { %v3468_v59 = vadd.f32 %v3467_v38, %v3466_v17  ;;  %v3407_v48 = vpop.permute.xlu0 %3406  ;;  %v3441_v32 = vsel %vm649_vm10, %v11170_v45, %v3409_v9 }
 0xe5e   :  { %v3440_v0 = vsel %vm649_vm10, %v11174_v52, %v3407_v48  ;;  %v3471_v63 = vsel %vm666_vm11, %v3441_v32, 0.0 }
 0xe5f   :  { %v3469_v46 = vsel %vm666_vm11, %v3440_v0, 0.0 }
 0xe60   :  { %v3470_v57 = vadd.f32 %v3469_v46, %v3468_v59 }
 0xe62   :  { %v3472_v24 = vadd.f32 %v3471_v63, %v3470_v57 }
 0xe64   :  { %v3473_v41 = vrot.slane %v3472_v24, 4 }
 0xe66   :  { %v3474_v13 = vadd.f32 %v3473_v41, %v3472_v24 }
 0xe68   :  { %v3475_v31 = vrot.slane %v3474_v13, 2 }
 0xe6a   :  { %v3476_v40 = vadd.f32 %v3475_v31, %v3474_v13 }
 0xe6c   :  { %v3477_v18 = vrot.slane %v3476_v40, 1 }
 0xe6e   :  { %v3478_v36 = vadd.f32 %v3477_v18, %v3476_v40 }
 0xe70   :  { %v3479_v25 = vmul.f32 0.0078125, %v3478_v36 }
 0xe72   :  { %v3480_v60 = vmul.f32 %v3479_v25, %v3479_v25 }
 0xe74   :  { %3482 = vrot.lane.b32.xlu0 %v3480_v60, %s8746_s0 }
 0xee6   :  { %v3483_v47 = vpop.permute.xlu0 %3482 }
 0xee7   :  { %v3485_v34 = vsub.f32 %v3479_v25, %v3483_v47 }
 0xee9   :  { %v3487_v6 = vadd.f32 1e-05, %v3485_v34 }
 0xeeb   :  { %8667 = vrsqrt.f32 %v3487_v6 }
 0xef5   :  { %v8668_v44 = vpop.eup %8667 }
 0xef6   :  { %3490 = vrot.lane.b32.xlu1 %v8668_v44, %s8747_s1 }
 0xf68   :  { %v3491_v39 = vpop.permute.xlu1 %3490 }
 0xf69   :  { %v3493_v29 = vmul.f32 %v3491_v39, %v3486_v30 }
 0xf6b   :  { %v3497_v17 = vrot.slane %v3493_v29, %v9227_v16  ;;  %v3515_v38 = vmul.f32 %v3493_v29, %v3479_v25 }
 0xf6d   :  { %v3516_v9 = vsub.f32 %v3514_v56, %v3515_v38  ;;  %v3499_v59 = vmul.f32 %v11100_v42, %v3497_v17  ;;  %v3498_v48 = vmul.f32 %v3497_v17, %v11104_v35  ;;  %v3501_v32 = vmul.f32 %v11110_v51, %v3497_v17 }
 0xf6e   :  { %v3500_v0 = vmul.f32 %v3497_v17, %v11114_v58  ;;  %v3503_v46 = vmul.f32 %v11120_v20, %v3497_v17  ;;  %v3502_v57 = vmul.f32 %v3497_v17, %v11124_v11  ;;  %v3505_v63 = vmul.f32 %v11130_v12, %v3497_v17 }
 0xf6f   :  { %v3520_v24 = vrot.slane %v3516_v9, %v9227_v16  ;;  %v3504_v41 = vmul.f32 %v3497_v17, %v11134_v53  ;;  %v3507_v13 = vmul.f32 %v11140_v15, %v3497_v17  ;;  %v3506_v42 = vmul.f32 %v3497_v17, %v11144_v7 }
 0xf70   :  { %v3509_v35 = vmul.f32 %v11150_v4, %v3497_v17  ;;  %v3508_v51 = vmul.f32 %v3497_v17, %v11154_v55  ;;  %v3511_v58 = vmul.f32 %v11160_v2, %v3497_v17  ;;  %v3510_v20 = vmul.f32 %v3497_v17, %v11164_v61 }
 0xf71   :  { %v3522_v31 = vadd.f32 %v3520_v24, %v3499_v59  ;;  %v3521_v11 = vadd.f32 %v3520_v24, %v3498_v48  ;;  %v3524_v40 = vadd.f32 %v3520_v24, %v3501_v32  ;;  %v3523_v12 = vadd.f32 %v3520_v24, %v3500_v0 }
 0xf72   :  { %v3526_v18 = vadd.f32 %v3520_v24, %v3503_v46  ;;  %v3525_v36 = vadd.f32 %v3520_v24, %v3502_v57  ;;  %v3528_v25 = vadd.f32 %v3520_v24, %v3505_v63  ;;  %v3527_v53 = vadd.f32 %v3520_v24, %v3504_v41 }
 0xf73   :  { %v3538_v15 = vadd.f32 %v3522_v31, %v10319_v28  ;;  %v3537_v7 = vadd.f32 %v3521_v11, %v10321_v10  ;;  %v3540_v4 = vadd.f32 %v3524_v40, %v10335_v21  ;;  %v3539_v55 = vadd.f32 %v3523_v12, %v10337_v5 }
 0xf74   :  { %v3542_v2 = vadd.f32 %v3526_v18, %v10351_v14  ;;  %v3541_v61 = vadd.f32 %v3525_v36, %v10353_v3  ;;  %v3544_v60 = vadd.f32 %v3528_v25, %v10365_v23  ;;  %v3543_v47 = vadd.f32 %v3527_v53, %v10367_v22 }
 0xf75   :  { %v11260_v34 = vmax.f32 %v3538_v15, 0.0  ;;  %v11262_v6 = vmax.f32 %v3537_v7, 0.0  ;;  %v11264_v44 = vmax.f32 %v3540_v4, 0.0  ;;  %v11266_v28 = vmax.f32 %v3539_v55, 0.0 }
 0xf76   :  { %v11268_v10 = vmax.f32 %v3542_v2, 0.0  ;;  %v11270_v21 = vmax.f32 %v3541_v61, 0.0  ;;  %v11272_v5 = vmax.f32 %v3544_v60, 0.0  ;;  %v11274_v14 = vmax.f32 %v3543_v47, 0.0 }
 0xf77   :  { %3683 = vrot.lane.b32.xlu1 %v11260_v34, %s8746_s0  ;;  %3681 = vrot.lane.b32.xlu0 %v11262_v6, %s8746_s0  ;;  %v3530_v3 = vadd.f32 %v3520_v24, %v3507_v13  ;;  %v3529_v23 = vadd.f32 %v3520_v24, %v3506_v42  ;;  %v3532_v22 = vadd.f32 %v3520_v24, %v3509_v35  ;;  %v3618_v30 = vrot.slane %v11260_v34, 1 }
 0xf78   :  { %v3531_v39 = vadd.f32 %v3520_v24, %v3508_v51  ;;  %v3534_v29 = vadd.f32 %v3520_v24, %v3511_v58  ;;  %v3533_v56 = vadd.f32 %v3520_v24, %v3510_v20  ;;  %v3513_v38 = vmul.f32 %v11170_v45, %v3497_v17 }
 0xf79   :  { %v3546_v9 = vadd.f32 %v3530_v3, %v10380_v37  ;;  %v3545_v59 = vadd.f32 %v3529_v23, %v10382_v62  ;;  %v3548_v48 = vadd.f32 %v3532_v22, %v10390_v54  ;;  %v3512_v32 = vmul.f32 %v3497_v17, %v11174_v52  ;;  %v13041_v17 = vld [vmem:[#allocation10_spill] sm:$0xff] }
 0xf7a   :  { %v3547_v0 = vadd.f32 %v3531_v39, %v10392_v8  ;;  %v3550_v46 = vadd.f32 %v3534_v29, %v10460_v26  ;;  %v3549_v57 = vadd.f32 %v3533_v56, %v10401_v50  ;;  %v3536_v63 = vadd.f32 %v3520_v24, %v3513_v38 }
 0xf7b   :  { %3687 = vrot.lane.b32.xlu1 %v11264_v44, %s8746_s0  ;;  %3685 = vrot.lane.b32.xlu0 %v11266_v28, %s8746_s0  ;;  %v11293_v37 = vmax.f32 %v3546_v9, 0.0  ;;  %v11295_v62 = vmax.f32 %v3545_v59, 0.0  ;;  %v11297_v54 = vmax.f32 %v3548_v48, 0.0  ;;  %v3535_v45 = vadd.f32 %v3520_v24, %v3512_v32 }
 0xf7c   :  { %v11299_v52 = vmax.f32 %v3547_v0, 0.0  ;;  %v11301_v8 = vmax.f32 %v3550_v46, 0.0  ;;  %v11303_v26 = vmax.f32 %v3549_v57, 0.0  ;;  %v3552_v50 = vadd.f32 %v3536_v63, %v10474_v43 }
 0xf7d   :  { %v3551_v41 = vadd.f32 %v3535_v45, %v13041_v17  ;;  %v3619_v13 = vrot.slane %v11266_v28, 1  ;;  %v3617_v42 = vrot.slane %v11262_v6, 1  ;;  %v3620_v35 = vrot.slane %v11264_v44, 1  ;;  %v3857_v17 = vld [vmem:[#allocation3 + $0x50] sm:$0xf] }
 0xf7e   :  { %v11310_v51 = vmax.f32 %v3552_v50, 0.0  ;;  %v3621_v24 = vrot.slane %v11270_v21, 1  ;;  %v3622_v58 = vrot.slane %v11268_v10, 1  ;;  %v3623_v20 = vrot.slane %v11274_v14, 1  ;;  %v3856_v50 = vld [vmem:[#allocation3 + $0x48] sm:$0xff] }
 0xf7f   :  { %3691 = vrot.lane.b32.xlu1 %v11268_v10, %s8746_s0  ;;  %3689 = vrot.lane.b32.xlu0 %v11270_v21, %s8746_s0  ;;  %v11319_v43 = vmax.f32 %v3551_v41, 0.0  ;;  %v11323_v31 = vsel %vm175_vm0, %v3618_v30, %v3619_v13  ;;  %v11327_v11 = vsel %vm175_vm0, %v3617_v42, %v3618_v30  ;;  %v11331_v40 = vsel %vm175_vm0, %v3619_v13, %v3620_v35 }
 0xf80   :  { %v11335_v12 = vsel %vm175_vm0, %v3620_v35, %v3621_v24  ;;  %v11339_v18 = vsel %vm175_vm0, %v3622_v58, %v3623_v20  ;;  %v11343_v36 = vsel %vm175_vm0, %v3621_v24, %v3622_v58  ;;  %v3626_v25 = vrot.slane %v11293_v37, 1 }
 0xf81   :  { %v3627_v53 = vrot.slane %v11299_v52, 1  ;;  %v3624_v15 = vrot.slane %v11272_v5, 1  ;;  %v3628_v7 = vrot.slane %v11297_v54, 1  ;;  %v3629_v4 = vrot.slane %v11303_v26, 1 }
 0xf82   :  { %v3625_v55 = vrot.slane %v11295_v62, 1  ;;  %v3630_v2 = vrot.slane %v11301_v8, 1  ;;  %v3631_v61 = vrot.slane %v11319_v43, 1  ;;  %v3632_v60 = vrot.slane %v11310_v51, 1 }
 0xf83   :  { %3695 = vrot.lane.b32.xlu1 %v11272_v5, %s8746_s0  ;;  %3693 = vrot.lane.b32.xlu0 %v11274_v14, %s8746_s0  ;;  %v3638_v47 = vsel %vm175_vm0, %v3626_v25, %v3627_v53  ;;  %v3641_v3 = vsel %vm175_vm0, %v3623_v20, %v3624_v15  ;;  %v3636_v23 = vsel %vm175_vm0, %v3628_v7, %v3629_v4  ;;  %v3569_v22 = vrot.slane %v11262_v6, 7 }
 0xf84   :  { %v3639_v30 = vsel %vm175_vm0, %v3625_v55, %v3626_v25  ;;  %v3640_v39 = vsel %vm175_vm0, %v3624_v15, %v3625_v55  ;;  %v3637_v29 = vsel %vm175_vm0, %v3627_v53, %v3628_v7  ;;  %v3634_v56 = vsel %vm175_vm0, %v3630_v2, %v3631_v61 }
 0xf85   :  { %v3635_v38 = vsel %vm175_vm0, %v3629_v4, %v3630_v2  ;;  %v3648_v9 = vsel %vm175_vm0, %v3632_v60, %v3617_v42  ;;  %v3633_v6 = vsel %vm175_vm0, %v3631_v61, %v3632_v60  ;;  %v3570_v59 = vrot.slane %v11260_v34, 7 }
 0xf86   :  { %v3584_v48 = vrot.slane %v11310_v51, 7  ;;  %v3571_v32 = vrot.slane %v11266_v28, 7  ;;  %v3572_v0 = vrot.slane %v11264_v44, 7  ;;  %v3573_v46 = vrot.slane %v11270_v21, 7 }
 0xf87   :  { %3699 = vrot.lane.b32.xlu1 %v11293_v37, %s8746_s0  ;;  %3697 = vrot.lane.b32.xlu0 %v11295_v62, %s8746_s0  ;;  %v3574_v57 = vrot.slane %v11268_v10, 7  ;;  %v3575_v63 = vrot.slane %v11274_v14, 7  ;;  %v11392_v34 = vsel %vm110_vm2, %v3569_v22, %v3570_v59  ;;  %v3576_v44 = vrot.slane %v11272_v5, 7 }
 0xf88   :  { %v11396_v28 = vsel %vm110_vm2, %v3584_v48, %v3569_v22  ;;  %v11400_v45 = vsel %vm110_vm2, %v3570_v59, %v3571_v32  ;;  %v11405_v21 = vsel %vm110_vm2, %v3571_v32, %v3572_v0  ;;  %v11413_v14 = vsel %vm110_vm2, %v3572_v0, %v3573_v46 }
 0xf89   :  { %v11409_v10 = vsel %vm110_vm2, %v3573_v46, %v3574_v57  ;;  %v11417_v41 = vsel %vm110_vm2, %v3575_v63, %v3576_v44  ;;  %v11421_v5 = vsel %vm110_vm2, %v3574_v57, %v3575_v63  ;;  %v3577_v13 = vrot.slane %v11295_v62, 7 }
 0xf8a   :  { %v3578_v42 = vrot.slane %v11293_v37, 7  ;;  %v3579_v35 = vrot.slane %v11299_v52, 7  ;;  %v3580_v24 = vrot.slane %v11297_v54, 7  ;;  %v3581_v58 = vrot.slane %v11303_v26, 7 }
 0xf8b   :  { %3703 = vrot.lane.b32.xlu1 %v11297_v54, %s8746_s0  ;;  %3701 = vrot.lane.b32.xlu0 %v11299_v52, %s8746_s0  ;;  %v3582_v20 = vrot.slane %v11301_v8, 7  ;;  %v11439_v37 = vsel %vm110_vm2, %v3576_v44, %v3577_v13  ;;  %v8486_v62 = vpack.c.bf16 %v3857_v17, %v3856_v50  ;;  %v3583_v53 = vrot.slane %v11319_v43, 7 }
 0xf8c   :  { %v11435_v25 = vsel %vm110_vm2, %v3577_v13, %v3578_v42  ;;  %v11444_v52 = vsel %vm110_vm2, %v3579_v35, %v3580_v24  ;;  %v11448_v54 = vsel %vm110_vm2, %v3578_v42, %v3579_v35  ;;  %v11456_v7 = vsel %vm110_vm2, %v3580_v24, %v3581_v58 }
 0xf8d   :  { %v11452_v15 = vsel %vm110_vm2, %v3581_v58, %v3582_v20  ;;  %8488 = vmatprep.subr.msk.bf16.mxu1 %vm9498_vm14, %v8486_v62  ;;  %v11462_v55 = vsel %vm110_vm2, %v3583_v53, %v3584_v48  ;;  %v11466_v2 = vsel %vm110_vm2, %v3582_v20, %v3583_v53 }
 0xf8e   :  { %8491 = vmatpush3.bf16.msk.msra.mxu1 %vm9498_vm14, %v8486_v62 }
 0xf8f   :  { %3707 = vrot.lane.b32.xlu1 %v11301_v8, %s8746_s0  ;;  %3705 = vrot.lane.b32.xlu0 %v11303_v26, %s8746_s0  ;;  %v3656_v8 = vsel %vm8900_vm3, 0.0, %v3640_v39  ;;  %v3664_v26 = vsel %vm8986_vm4, 0.0, %v3648_v9 }
 0xf93   :  { %3711 = vrot.lane.b32.xlu1 %v11310_v51, %s8746_s0  ;;  %3709 = vrot.lane.b32.xlu0 %v11319_v43, %s8746_s0  ;;  %s7628_s0 = sshll.u32 %s8758_s4, 4  ;;  %s7629_s0 = int_to_ptr.vmem [resolvable:$true] %s7628_s0 }
 0xf94   :  { %p8720_p9 = scmp.lt.s32.totalorder %s7629_s0, %s7629_s0 }
 0xf97   :  { %3747 = vrot.lane.b32.xlu1 %v11323_v31, %s8743_s23  ;;  %3745 = vrot.lane.b32.xlu0 %v11327_v11, %s8743_s23 }
 0xf9b   :  { %3751 = vrot.lane.b32.xlu1 %v11335_v12, %s8743_s23  ;;  %3749 = vrot.lane.b32.xlu0 %v11331_v40, %s8743_s23 }
 0xf9f   :  { %3755 = vrot.lane.b32.xlu1 %v11339_v18, %s8743_s23  ;;  %3753 = vrot.lane.b32.xlu0 %v11343_v36, %s8743_s23 }
 0xfa3   :  { %3763 = vrot.lane.b32.xlu1 %v3638_v47, %s8743_s23  ;;  %3757 = vrot.lane.b32.xlu0 %v3641_v3, %s8743_s23 }
 0xfa7   :  { %3767 = vrot.lane.b32.xlu1 %v3636_v23, %s8743_s23  ;;  %3761 = vrot.lane.b32.xlu0 %v3639_v30, %s8743_s23  ;;  %v3601_v30 = vsel %vm9006_vm5, 0.0, %v11396_v28 }
 0xfab   :  { %3759 = vrot.lane.b32.xlu1 %v3656_v8, %s8743_s23  ;;  %3765 = vrot.lane.b32.xlu0 %v3637_v29, %s8743_s23 }
 0xfaf   :  { %3771 = vrot.lane.b32.xlu1 %v3634_v56, %s8743_s23  ;;  %3769 = vrot.lane.b32.xlu0 %v3635_v38, %s8743_s23 }
 0xfb3   :  { %3775 = vrot.lane.b32.xlu1 %v3664_v26, %s8743_s23  ;;  %3773 = vrot.lane.b32.xlu0 %v3633_v6, %s8743_s23 }
 0xfe9   :  { %v3684_v51 = vpop.permute.xlu1 %3683  ;;  %v3682_v43 = vpop.permute.xlu0 %3681 }
 0xfea   :  { %v3794_v39 = vsel %vm649_vm10, %v11392_v34, %v3684_v51  ;;  %v3793_v29 = vsel %vm649_vm10, %v3601_v30, %v3682_v43 }
 0xfed   :  { %v3688_v31 = vpop.permute.xlu1 %3687  ;;  %v3686_v49 = vpop.permute.xlu0 %3685 }
 0xfee   :  { %v3796_v59 = vsel %vm649_vm10, %v11405_v21, %v3688_v31  ;;  %v3795_v33 = vsel %vm649_vm10, %v11400_v45, %v3686_v49 }
 0xff1   :  { %v3692_v11 = vpop.permute.xlu1 %3691  ;;  %v3690_v40 = vpop.permute.xlu0 %3689 }
 0xff2   :  { %v3798_v57 = vsel %vm649_vm10, %v11409_v10, %v3692_v11  ;;  %v3797_v63 = vsel %vm649_vm10, %v11413_v14, %v3690_v40 }
 0xff5   :  { %v3696_v12 = vpop.permute.xlu1 %3695  ;;  %v3694_v18 = vpop.permute.xlu0 %3693 }
 0xff6   :  { %v3799_v10 = vsel %vm649_vm10, %v11421_v5, %v3694_v18  ;;  %v3609_v5 = vsel %vm9049_vm9, 0.0, %v11439_v37  ;;  %v3800_v19 = vsel %vm649_vm10, %v11417_v41, %v3696_v12 }
 0xff9   :  { %v3700_v36 = vpop.permute.xlu1 %3699  ;;  %v3698_v61 = vpop.permute.xlu0 %3697 }
 0xffa   :  { %v3802_v14 = vsel %vm649_vm10, %v11435_v25, %v3700_v36  ;;  %v3801_v24 = vsel %vm649_vm10, %v3609_v5, %v3698_v61 }
 0xffd   :  { %v3704_v60 = vpop.permute.xlu1 %3703  ;;  %v3702_v47 = vpop.permute.xlu0 %3701 }
 0xffe   :  { %v3804_v58 = vsel %vm649_vm10, %v11444_v52, %v3704_v60  ;;  %v3803_v37 = vsel %vm649_vm10, %v11448_v54, %v3702_v47 }
0x1001   :  { %v3708_v3 = vpop.permute.xlu1 %3707  ;;  %v3706_v23 = vpop.permute.xlu0 %3705 }
0x1002   :  { %v3806_v43 = vsel %vm649_vm10, %v11452_v15, %v3708_v3  ;;  %v3805_v31 = vsel %vm649_vm10, %v11456_v7, %v3706_v23 }
0x1005   :  { %v11504_v27 = vpop.permute.xlu1 %3711  ;;  %v11506_v22 = vpop.permute.xlu0 %3709 }
0x1006   :  { %v3808_v40 = vsel %vm649_vm10, %v11462_v55, %v11504_v27  ;;  %v3807_v15 = vsel %vm649_vm10, %v11466_v2, %v11506_v22 }
0x1009   :  { %v3748_v56 = vpop.permute.xlu1 %3747  ;;  %v3746_v38 = vpop.permute.xlu0 %3745 }
0x100a   :  { %v3810_v9 = vsel %vm666_vm11, %v3794_v39, %v3748_v56  ;;  %v3809_v6 = vsel %vm666_vm11, %v3793_v29, %v3746_v38 }
0x100b   :  { %3826 = vst.msk [vmem:[#allocation2 + $0x8] sm:$0xff] %vm1149_vm15, %v3810_v9  ;;  %3825 = vst.msk [vmem:[#allocation2] sm:$0xff] %vm1149_vm15, %v3809_v6 }
0x100d   :  { %v3752_v48 = vpop.permute.xlu1 %3751  ;;  %v3750_v32 = vpop.permute.xlu0 %3749 }
0x100e   :  { %v3812_v0 = vsel %vm666_vm11, %v3796_v59, %v3752_v48  ;;  %v3811_v46 = vsel %vm666_vm11, %v3795_v33, %v3750_v32 }
0x100f   :  { %3828 = vst.msk [vmem:[#allocation2 + $0x18] sm:$0xff] %vm1149_vm15, %v3812_v0  ;;  %3827 = vst.msk [vmem:[#allocation2 + $0x10] sm:$0xff] %vm1149_vm15, %v3811_v46 }
0x1011   :  { %v3756_v34 = vpop.permute.xlu1 %3755  ;;  %v3754_v28 = vpop.permute.xlu0 %3753 }
0x1012   :  { %v3814_v45 = vsel %vm666_vm11, %v3798_v57, %v3756_v34  ;;  %v3813_v44 = vsel %vm666_vm11, %v3797_v63, %v3754_v28  ;;  %v11532_v21 = vld [vmem:[#allocation2] ss:$2 sm:$0xff] }
0x1013   :  { %3830 = vst.msk [vmem:[#allocation2 + $0x28] sm:$0xff] %vm1149_vm15, %v3814_v45  ;;  %3829 = vst.msk [vmem:[#allocation2 + $0x20] sm:$0xff] %vm1149_vm15, %v3813_v44  ;;  %8187 = vmatprep.mubr.msk.f32.mxu1 %vm1149_vm15, %v11532_v21 }
0x1015   :  { %v3764_v50 = vpop.permute.xlu1 %3763  ;;  %v3758_v17 = vpop.permute.xlu0 %3757 }
0x1016   :  { %v3818_v13 = vsel %vm666_vm11, %v3802_v14, %v3764_v50  ;;  %v3815_v42 = vsel %vm666_vm11, %v3799_v10, %v3758_v17  ;;  %v11544_v35 = vld [vmem:[#allocation2 + $0x10] ss:$2 sm:$0xff] }
0x1017   :  { %3834 = vst.msk [vmem:[#allocation2 + $0x48] sm:$0xff] %vm1149_vm15, %v3818_v13  ;;  %3831 = vst.msk [vmem:[#allocation2 + $0x30] sm:$0xff] %vm1149_vm15, %v3815_v42  ;;  %8188 = vmatmul.mubr.msk.f32.vlgmr.msra.gmra.mrb[32].mxu1 %vm1149_vm15, %v11544_v35 }
0x1019   :  { %v3768_v20 = vpop.permute.xlu1 %3767  ;;  %v3762_v25 = vpop.permute.xlu0 %3761 }
0x101a   :  { %v3820_v62 = vsel %vm666_vm11, %v3804_v58, %v3768_v20  ;;  %v3817_v53 = vsel %vm666_vm11, %v3801_v24, %v3762_v25  ;;  %v11558_v4 = vld [vmem:[#allocation2 + $0x20] ss:$2 sm:$0xff] }
0x101b   :  { %3836 = vst.msk [vmem:[#allocation2 + $0x58] sm:$0xff] %vm1149_vm15, %v3820_v62  ;;  %3833 = vst.msk [vmem:[#allocation2 + $0x40] sm:$0xff] %vm1149_vm15, %v3817_v53  ;;  %8190 = vmatprep.mubr.msk.f32.mxu1 %vm1149_vm15, %v11558_v4 }
0x101d   :  { %v3760_v52 = vpop.permute.xlu1 %3759  ;;  %v3766_v8 = vpop.permute.xlu0 %3765 }
0x101e   :  { %v3816_v26 = vsel %vm666_vm11, %v3800_v19, %v3760_v52  ;;  %v3819_v51 = vsel %vm666_vm11, %v3803_v37, %v3766_v8 }
0x101f   :  { %3832 = vst.msk [vmem:[#allocation2 + $0x38] sm:$0xff] %vm1149_vm15, %v3816_v26  ;;  %3835 = vst.msk [vmem:[#allocation2 + $0x50] sm:$0xff] %vm1149_vm15, %v3819_v51 }
0x1021   :  { %v3772_v41 = vpop.permute.xlu1 %3771  ;;  %v3770_v49 = vpop.permute.xlu0 %3769 }
0x1022   :  { %v3822_v54 = vsel %vm666_vm11, %v3806_v43, %v3772_v41  ;;  %v3821_v11 = vsel %vm666_vm11, %v3805_v31, %v3770_v49  ;;  %v11594_v55 = vld [vmem:[#allocation2 + $0x40] ss:$2 sm:$0xff] }
0x1023   :  { %3838 = vst.msk [vmem:[#allocation2 + $0x68] sm:$0xff] %vm1149_vm15, %v3822_v54  ;;  %3837 = vst.msk [vmem:[#allocation2 + $0x60] sm:$0xff] %vm1149_vm15, %v3821_v11 }
0x1025   :  { %v3776_v12 = vpop.permute.xlu1 %3775  ;;  %v3774_v7 = vpop.permute.xlu0 %3773 }
0x1026   :  { %v3824_v18 = vsel %vm666_vm11, %v3808_v40, %v3776_v12  ;;  %v3823_v36 = vsel %vm666_vm11, %v3807_v15, %v3774_v7  ;;  %v11588_v61 = vld [vmem:[#allocation2 + $0x30] ss:$2 sm:$0xff] }
0x1027   :  { %3840 = vst.msk [vmem:[#allocation2 + $0x78] sm:$0xff] %vm1149_vm15, %v3824_v18  ;;  %3839 = vst.msk [vmem:[#allocation2 + $0x70] sm:$0xff] %vm1149_vm15, %v3823_v36  ;;  %8191 = vmatmul.mubr.msk.f32.gmra.mrb[34].mxu1 %vm1149_vm15, %v11588_v61  ;;  %v11598_v2 = vld [vmem:[#allocation2 + $0x50] ss:$2 sm:$0xff] }
0x1028   :  { %8193 = vmatprep.mubr.msk.f32.mxu1 %vm1149_vm15, %v11594_v55 }
0x102a   :  { %v11600_v60 = vld [vmem:[#allocation2 + $0x60] ss:$2 sm:$0xff] }
0x102b   :  { %8194 = vmatmul.mubr.msk.f32.gmra.mrb[36].mxu1 %vm1149_vm15, %v11598_v2 }
0x102c   :  { %8196 = vmatprep.mubr.msk.f32.mxu1 %vm1149_vm15, %v11600_v60 }
0x102e   :  { %v11606_v47 = vld [vmem:[#allocation2 + $0x70] ss:$2 sm:$0xff] }
0x102f   :  { %8197 = vmatmul.mubr.msk.f32.gmra.mrb[38].mxu1 %vm1149_vm15, %v11606_v47 }
0x10ea   :  { %v11610_v3 = vpop.f32.mrb[32].mxu1 }
0x10eb   :  { %v3991_v23 = vmul.f32 %v11610_v3, %v11610_v3  ;;  %v11614_v27 = vpop.f32.mrb[33].mxu1 }
0x10ec   :  { %v3990_v22 = vmul.f32 %v11614_v27, %v11614_v27 }
0x10ed   :  { %4008 = vrot.lane.b32.xlu1 %v3991_v23, %s8743_s23 }
0x10ee   :  { %4006 = vrot.lane.b32.xlu0 %v3990_v22, %s8743_s23 }
0x10fa   :  { %v11620_v30 = vpop.f32.mrb[34].mxu1 }
0x10fb   :  { %v3993_v39 = vmul.f32 %v11620_v30, %v11620_v30  ;;  %v11624_v29 = vpop.f32.mrb[35].mxu1 }
0x10fc   :  { %v3992_v56 = vmul.f32 %v11624_v29, %v11624_v29 }
0x10fd   :  { %4012 = vrot.lane.b32.xlu1 %v3993_v39, %s8743_s23 }
0x10fe   :  { %4010 = vrot.lane.b32.xlu0 %v3992_v56, %s8743_s23  ;;  %v11630_v38 = vpop.f32.mrb[36].mxu1 }
0x10ff   :  { %v3995_v9 = vmul.f32 %v11630_v38, %v11630_v38  ;;  %v11634_v6 = vpop.f32.mrb[37].mxu1 }
0x1100   :  { %v3994_v59 = vmul.f32 %v11634_v6, %v11634_v6 }
0x1101   :  { %4016 = vrot.lane.b32.xlu1 %v3995_v9, %s8743_s23 }
0x1102   :  { %4014 = vrot.lane.b32.xlu0 %v3994_v59, %s8743_s23  ;;  %v11640_v33 = vpop.f32.mrb[38].mxu1  ;;  %v4068_v59 = vld [vmem:[%s13015_s2 + $0xa] sm:$0x1] }
0x1103   :  { %v3997_v48 = vmul.f32 %v11640_v33, %v11640_v33  ;;  %v11644_v32 = vpop.f32.mrb[39].mxu1 }
0x1104   :  { %v3996_v0 = vmul.f32 %v11644_v32, %v11644_v32 }
0x1105   :  { %4020 = vrot.lane.b32.xlu1 %v3997_v48, %s8743_s23 }
0x1106   :  { %4018 = vrot.lane.b32.xlu0 %v3996_v0, %s8743_s23  ;;  %v4263_v0 = vld [vmem:[#allocation3 + $0x58] sm:$0xff] }
0x115f   :  { %v4009_v46 = vpop.permute.xlu1 %4008 }
0x1160   :  { %v4031_v57 = vsel %vm666_vm11, %v11610_v3, %v4009_v46  ;;  %v4007_v63 = vpop.permute.xlu0 %4006  ;;  %v4264_v46 = vld [vmem:[#allocation3 + $0x60] sm:$0xff] }
0x1161   :  { %v4040_v34 = vsel %vm4038_vm1, %v4031_v57, 0.0  ;;  %v4030_v28 = vsel %vm666_vm11, %v11614_v27, %v4007_v63  ;;  %v8492_v63 = vpack.c.bf16 %v4264_v46, %v4263_v0 }
0x1162   :  { %v4039_v45 = vsel %vm4038_vm1, %v4030_v28, 0.0 }
0x1163   :  { %v4041_v44 = vadd.f32 %v4040_v34, %v4039_v45  ;;  %v4088_v34 = vld [vmem:[%s13015_s2 + $0xb] sm:$0x1]  ;;  %8493 = vmatprep.subr.bf16.mxu1 %v8492_v63 }
0x1164   :  { %8495 = vmatpush3.bf16.msra.mxu1 %v8492_v63 }
0x116f   :  { %v4013_v10 = vpop.permute.xlu1 %4012 }
0x1170   :  { %v4011_v14 = vpop.permute.xlu0 %4010  ;;  %v4033_v50 = vsel %vm666_vm11, %v11620_v30, %v4013_v10 }
0x1171   :  { %v4032_v17 = vsel %vm666_vm11, %v11624_v29, %v4011_v14  ;;  %v4044_v24 = vsel %vm4038_vm1, %v4033_v50, 0.0 }
0x1172   :  { %v4042_v13 = vsel %vm4038_vm1, %v4032_v17, 0.0 }
0x1173   :  { %v4043_v42 = vadd.f32 %v4042_v13, %v4041_v44  ;;  %v4017_v5 = vpop.permute.xlu1 %4016 }
0x1174   :  { %v4015_v58 = vpop.permute.xlu0 %4014  ;;  %v4035_v20 = vsel %vm666_vm11, %v11630_v38, %v4017_v5 }
0x1175   :  { %v4045_v25 = vadd.f32 %v4044_v24, %v4043_v42  ;;  %v4034_v62 = vsel %vm666_vm11, %v11634_v6, %v4015_v58  ;;  %v4048_v52 = vsel %vm4038_vm1, %v4035_v20, 0.0  ;;  %v4265_v20 = vld [vmem:[#allocation3 + $0x68] sm:$0xff] }
0x1176   :  { %v4046_v53 = vsel %vm4038_vm1, %v4034_v62, 0.0  ;;  %8203 = vmatprep.subr.mxu1 %v4265_v20 }
0x1177   :  { %v4047_v19 = vadd.f32 %v4046_v53, %v4045_v25  ;;  %v4021_v37 = vpop.permute.xlu1 %4020  ;;  %8204 = vmatpush3.msra.mxu1 %v4265_v20  ;;  %v13045_v20 = vld [vmem:[#allocation9_spill] sm:$0xff] }
0x1178   :  { %v4019_v8 = vpop.permute.xlu0 %4018  ;;  %v4037_v26 = vsel %vm666_vm11, %v11640_v33, %v4021_v37 }
0x1179   :  { %v4049_v51 = vadd.f32 %v4048_v52, %v4047_v19  ;;  %v4036_v43 = vsel %vm666_vm11, %v11644_v32, %v4019_v8  ;;  %v4052_v49 = vsel %vm4038_vm1, %v4037_v26, 0.0 }
0x117a   :  { %v4050_v31 = vsel %vm4038_vm1, %v4036_v43, 0.0 }
0x117b   :  { %v4051_v41 = vadd.f32 %v4050_v31, %v4049_v51 }
0x117d   :  { %v4053_v54 = vadd.f32 %v4052_v49, %v4051_v41 }
0x117f   :  { %v4054_v11 = vrot.slane %v4053_v54, 4 }
0x1181   :  { %v4055_v40 = vadd.f32 %v4054_v11, %v4053_v54 }
0x1183   :  { %v4056_v15 = vrot.slane %v4055_v40, 2 }
0x1185   :  { %v4057_v12 = vadd.f32 %v4056_v15, %v4055_v40 }
0x1187   :  { %v4058_v7 = vrot.slane %v4057_v12, 1 }
0x1189   :  { %v4059_v18 = vadd.f32 %v4058_v7, %v4057_v12 }
0x118b   :  { %v4061_v36 = vmul.f32 0.015625, %v4059_v18 }
0x118d   :  { %v4062_v23 = vmul.f32 %v4061_v36, %v4061_v36 }
0x118f   :  { %4064 = vrot.lane.b32.xlu0 %v4062_v23, %s8743_s23 }
0x1201   :  { %v4065_v22 = vpop.permute.xlu0 %4064 }
0x1202   :  { %v4067_v39 = vsub.f32 %v4061_v36, %v4065_v22 }
0x1204   :  { %v4069_v56 = vadd.f32 1e-05, %v4067_v39 }
0x1206   :  { %8669 = vrsqrt.f32 %v4069_v56 }
0x1210   :  { %v8670_v9 = vpop.eup %8669 }
0x1211   :  { %4072 = vrot.lane.b32.xlu1 %v8670_v9, %s8749_s27 }
0x1283   :  { %v4073_v48 = vpop.permute.xlu1 %4072 }
0x1284   :  { %v4075_v57 = vmul.f32 %v4073_v48, %v4068_v59 }
0x1286   :  { %v4079_v28 = vrot.slane %v4075_v57, %v9227_v16  ;;  %v4089_v45 = vmul.f32 %v4075_v57, %v4061_v36 }
0x1288   :  { %v4090_v44 = vsub.f32 %v4088_v34, %v4089_v45  ;;  %v4081_v10 = vmul.f32 %v11610_v3, %v4079_v28  ;;  %v4080_v50 = vmul.f32 %v4079_v28, %v11614_v27  ;;  %v4083_v17 = vmul.f32 %v11620_v30, %v4079_v28 }
0x1289   :  { %v4082_v13 = vmul.f32 %v4079_v28, %v11624_v29  ;;  %v4085_v42 = vmul.f32 %v11630_v38, %v4079_v28  ;;  %v4084_v5 = vmul.f32 %v4079_v28, %v11634_v6  ;;  %v4086_v24 = vmul.f32 %v4079_v28, %v11644_v32 }
0x128a   :  { %v4094_v14 = vrot.slane %v4090_v44, %v9227_v16  ;;  %v4087_v58 = vmul.f32 %v11640_v33, %v4079_v28 }
0x128c   :  { %v4096_v25 = vadd.f32 %v4094_v14, %v4081_v10  ;;  %v4095_v62 = vadd.f32 %v4094_v14, %v4080_v50  ;;  %v4098_v3 = vadd.f32 %v4094_v14, %v4083_v17  ;;  %v4097_v53 = vadd.f32 %v4094_v14, %v4082_v13 }
0x128d   :  { %v4100_v19 = vadd.f32 %v4094_v14, %v4085_v42  ;;  %v4099_v27 = vadd.f32 %v4094_v14, %v4084_v5  ;;  %v4101_v37 = vadd.f32 %v4094_v14, %v4086_v24  ;;  %v4102_v30 = vadd.f32 %v4094_v14, %v4087_v58  ;;  %v4507_v24 = vld [vmem:[#allocation3 + $0x70] sm:$0xf] }
0x128e   :  { %v4104_v29 = vmax.f32 %v4096_v25, 0.0  ;;  %v4103_v52 = vmax.f32 %v4095_v62, 0.0  ;;  %v4106_v38 = vmax.f32 %v4098_v3, 0.0  ;;  %v4105_v8 = vmax.f32 %v4097_v53, 0.0  ;;  %8217 = vmatprep.subr.msk.mxu0 %vm1198_vm12, %v4507_v24 }
0x128f   :  { %v4108_v6 = vmax.f32 %v4100_v19, 0.0  ;;  %v4107_v26 = vmax.f32 %v4099_v27, 0.0  ;;  %v4109_v32 = vmax.f32 %v4101_v37, 0.0  ;;  %v4110_v51 = vmax.f32 %v4102_v30, 0.0  ;;  %8218 = vmatpush3.msk.msra.mxu0 %vm1198_vm12, %v4507_v24 }
0x1290   :  { %4193 = vrot.lane.b32.xlu1 %v4104_v29, %s8743_s23  ;;  %4191 = vrot.lane.b32.xlu0 %v4103_v52, %s8743_s23  ;;  %v4162_v33 = vrot.slane %v4106_v38, 1  ;;  %v4160_v43 = vrot.slane %v4104_v29, 1  ;;  %v4161_v31 = vrot.slane %v4105_v8, 1  ;;  %v4159_v41 = vrot.slane %v4103_v52, 1 }
0x1291   :  { %v4163_v49 = vrot.slane %v4107_v26, 1  ;;  %v4164_v54 = vrot.slane %v4108_v6, 1  ;;  %v4165_v11 = vrot.slane %v4109_v32, 1  ;;  %v4134_v40 = vrot.slane %v4110_v51, 7 }
0x1292   :  { %v4172_v15 = vsel %vm175_vm0, %v4160_v43, %v4161_v31  ;;  %v4173_v12 = vsel %vm175_vm0, %v4159_v41, %v4160_v43  ;;  %v4171_v7 = vsel %vm175_vm0, %v4161_v31, %v4162_v33  ;;  %v4166_v18 = vrot.slane %v4110_v51, 1 }
0x1293   :  { %v4168_v36 = vsel %vm175_vm0, %v4164_v54, %v4165_v11  ;;  %v4170_v23 = vsel %vm175_vm0, %v4162_v33, %v4163_v49  ;;  %v4169_v22 = vsel %vm175_vm0, %v4163_v49, %v4164_v54  ;;  %v4127_v39 = vrot.slane %v4103_v52, 7 }
0x1294   :  { %4197 = vrot.lane.b32.xlu1 %v4106_v38, %s8743_s23  ;;  %4195 = vrot.lane.b32.xlu0 %v4105_v8, %s8743_s23  ;;  %v4174_v56 = vsel %vm175_vm0, %v4166_v18, %v4159_v41  ;;  %v4167_v9 = vsel %vm175_vm0, %v4165_v11, %v4166_v18  ;;  %v4128_v59 = vrot.slane %v4104_v29, 7  ;;  %v4129_v0 = vrot.slane %v4105_v8, 7 }
0x1295   :  { %v4142_v48 = vsel %vm110_vm2, %v4134_v40, %v4127_v39  ;;  %v4130_v46 = vrot.slane %v4106_v38, 7  ;;  %v4131_v63 = vrot.slane %v4107_v26, 7  ;;  %v4132_v34 = vrot.slane %v4108_v6, 7 }
0x1296   :  { %v4141_v57 = vsel %vm110_vm2, %v4127_v39, %v4128_v59  ;;  %v4140_v45 = vsel %vm110_vm2, %v4128_v59, %v4129_v0  ;;  %v4133_v44 = vrot.slane %v4109_v32, 7  ;;  %v11723_v10 = vadd.s32 24, %v8793_v1 }
0x1297   :  { %v4139_v28 = vsel %vm110_vm2, %v4129_v0, %v4130_v46  ;;  %v11727_v14 = vsel %vm110_vm2, %v4131_v63, %v4132_v34  ;;  %v11731_v50 = vsel %vm110_vm2, %v4130_v46, %v4131_v63  ;;  %v4118_v25 = vand.u32 31, %v13045_v20 }
0x1298   :  { %4201 = vrot.lane.b32.xlu1 %v4108_v6, %s8743_s23  ;;  %4199 = vrot.lane.b32.xlu0 %v4107_v26, %s8743_s23  ;;  %v11735_v17 = vsel %vm110_vm2, %v4132_v34, %v4133_v44  ;;  %v11739_v13 = vsel %vm110_vm2, %v4133_v44, %v4134_v40  ;;  %v4114_v42 = vand.u32 31, %v11723_v10 }
0x1299   :  { %vm11759_vm4 = vcmp.eq.s32.totalorder %v4118_v25, 31 }
0x129a   :  { %vm11746_vm3 = vcmp.eq.s32.totalorder %v4114_v42, 31  ;;  %v4182_v3 = vsel %vm11759_vm4, 0.0, %v4174_v56 }
0x129b   :  { %v4178_v58 = vsel %vm11746_vm3, 0.0, %v4170_v23 }
0x129c   :  { %4225 = vrot.lane.b32.xlu1 %v4172_v15, %s8750_s5  ;;  %4203 = vrot.lane.b32.xlu0 %v4109_v32, %s8743_s23 }
0x12a0   :  { %4233 = vrot.lane.b32.xlu1 %v4168_v36, %s8750_s5  ;;  %4223 = vrot.lane.b32.xlu0 %v4173_v12, %s8750_s5 }
0x12a4   :  { %4229 = vrot.lane.b32.xlu1 %v4178_v58, %s8750_s5  ;;  %4227 = vrot.lane.b32.xlu0 %v4171_v7, %s8750_s5 }
0x12a8   :  { %4205 = vrot.lane.b32.xlu1 %v4110_v51, %s8743_s23  ;;  %4231 = vrot.lane.b32.xlu0 %v4169_v22, %s8750_s5 }
0x12ac   :  { %4237 = vrot.lane.b32.xlu1 %v4182_v3, %s8750_s5  ;;  %4235 = vrot.lane.b32.xlu0 %v4167_v9, %s8750_s5 }
0x12b0   :  { %4515 = vrot.lane.b32.xlu1 %v11544_v35, %s8747_s1  ;;  %4513 = vrot.lane.b32.xlu0 %v11532_v21, %s8747_s1 }
0x12b4   :  { %4519 = vrot.lane.b32.xlu1 %v11588_v61, %s8747_s1  ;;  %4517 = vrot.lane.b32.xlu0 %v11558_v4, %s8747_s1  ;;  %v4111_v61 = vand.u32 31, %v8793_v1 }
0x12b6   :  { %vm11784_vm5 = vcmp.eq.s32.totalorder %v4111_v61, 0 }
0x12b8   :  { %4523 = vrot.lane.b32.xlu1 %v11598_v2, %s8747_s1  ;;  %4521 = vrot.lane.b32.xlu0 %v11594_v55, %s8747_s1  ;;  %v50_v55 = vadd.s32 32, %v8793_v1 }
0x12ba   :  { %v4115_v29 = vand.u32 31, %v50_v55 }
0x12bc   :  { %4527 = vrot.lane.b32.xlu1 %v11606_v47, %s8747_s1  ;;  %4525 = vrot.lane.b32.xlu0 %v11600_v60, %s8747_s1  ;;  %v4143_v47 = vsel %vm11784_vm5, 0.0, %v4142_v48  ;;  %vm11799_vm7 = vcmp.eq.s32.totalorder %v4115_v29, 0  ;;  %s8715_s1 = scalar_lea.vmem %s7629_s0, 32 }
0x12bd   :  { %v4147_v54 = vsel %vm11799_vm7, 0.0, %v11731_v50  ;;  %p8716_p8 = scmp.ne.s32.totalorder %s7629_s0, %s8715_s1  ;;  %p8721_p10 = scmp.lt.s32.totalorder %s8715_s1, %s8715_s1 }
0x12bf   :  { %p8722_p11 = por %p8721_p10, %p8720_p9 }
0x12c1   :  { %p8723_p12 = pnand %p8722_p11, %p8716_p8 }
0x1302   :  { %v4194_v35 = vpop.permute.xlu1 %4193  ;;  %v4192_v21 = vpop.permute.xlu0 %4191 }
0x1303   :  { %v4247_v60 = vsel %vm666_vm11, %v4143_v47, %v4192_v21  ;;  %v4248_v8 = vsel %vm666_vm11, %v4141_v57, %v4194_v35 }
0x1306   :  { %v4198_v53 = vpop.permute.xlu1 %4197  ;;  %v4196_v19 = vpop.permute.xlu0 %4195 }
0x1307   :  { %v4250_v32 = vsel %vm666_vm11, %v4139_v28, %v4198_v53  ;;  %v4249_v51 = vsel %vm666_vm11, %v4140_v45, %v4196_v19 }
0x130a   :  { %v4202_v27 = vpop.permute.xlu1 %4201  ;;  %v4200_v4 = vpop.permute.xlu0 %4199 }
0x130b   :  { %v4251_v11 = vsel %vm666_vm11, %v4147_v54, %v4200_v4  ;;  %v4252_v12 = vsel %vm666_vm11, %v11727_v14, %v4202_v27 }
0x130e   :  { %v4226_v2 = vpop.permute.xlu1 %4225  ;;  %v4204_v30 = vpop.permute.xlu0 %4203 }
0x130f   :  { %v4256_v26 = vsel %vm4038_vm1, %v4248_v8, %v4226_v2  ;;  %v4253_v36 = vsel %vm666_vm11, %v11735_v17, %v4204_v30 }
0x1312   :  { %v4234_v52 = vpop.permute.xlu1 %4233  ;;  %v4224_v38 = vpop.permute.xlu0 %4223 }
0x1313   :  { %v4255_v6 = vsel %vm4038_vm1, %v4247_v60, %v4224_v38  ;;  %v4260_v18 = vsel %vm4038_vm1, %v4252_v12, %v4234_v52 }
0x1314   :  { %8205 = vmatprep.mubr.msk.f32.mxu1 %vm4266_vm6, %v4255_v6 }
0x1315   :  { %8206 = vmatmul.mubr.msk.f32.vlgmr.msra.gmra.mrb[40].mxu1 %vm4266_vm6, %v4256_v26 }
0x1316   :  { %v4230_v43 = vpop.permute.xlu1 %4229  ;;  %v4228_v31 = vpop.permute.xlu0 %4227 }
0x1317   :  { %v4258_v41 = vsel %vm4038_vm1, %v4250_v32, %v4230_v43  ;;  %v4257_v49 = vsel %vm4038_vm1, %v4249_v51, %v4228_v31 }
0x1318   :  { %8208 = vmatprep.mubr.msk.f32.mxu1 %vm4266_vm6, %v4257_v49 }
0x1319   :  { %8209 = vmatmul.mubr.msk.f32.gmra.mrb[42].mxu1 %vm4266_vm6, %v4258_v41 }
0x131a   :  { %v4206_v40 = vpop.permute.xlu1 %4205  ;;  %v4232_v15 = vpop.permute.xlu0 %4231 }
0x131b   :  { %v4259_v7 = vsel %vm4038_vm1, %v4251_v11, %v4232_v15  ;;  %v4254_v23 = vsel %vm666_vm11, %v11739_v13, %v4206_v40 }
0x131c   :  { %8211 = vmatprep.mubr.msk.f32.mxu1 %vm4266_vm6, %v4259_v7 }
0x131d   :  { %8212 = vmatmul.mubr.msk.f32.gmra.mrb[44].mxu1 %vm4266_vm6, %v4260_v18 }
0x131e   :  { %v4238_v22 = vpop.permute.xlu1 %4237  ;;  %v4236_v39 = vpop.permute.xlu0 %4235 }
0x131f   :  { %v4262_v56 = vsel %vm4038_vm1, %v4254_v23, %v4238_v22  ;;  %v4261_v9 = vsel %vm4038_vm1, %v4253_v36, %v4236_v39 }
0x1320   :  { %8214 = vmatprep.mubr.msk.f32.mxu1 %vm4266_vm6, %v4261_v9 }
0x1321   :  { %8215 = vmatmul.mubr.msk.f32.gmra.mrb[46].mxu1 %vm4266_vm6, %v4262_v56 }
0x1322   :  { %v4516_v59 = vpop.permute.xlu1 %4515  ;;  %v4514_v48 = vpop.permute.xlu0 %4513 }
0x1323   :  { %8219 = vmatprep.mubr.msk.f32.mxu0 %vm649_vm10, %v4514_v48 }
0x1324   :  { %8220 = vmatmul.mubr.msk.f32.vlgmr.msra.gmra.mrb[48].mxu0 %vm649_vm10, %v4516_v59 }
0x1326   :  { %v4520_v0 = vpop.permute.xlu1 %4519  ;;  %v4518_v46 = vpop.permute.xlu0 %4517 }
0x1327   :  { %8222 = vmatprep.mubr.msk.f32.mxu0 %vm649_vm10, %v4518_v46 }
0x1328   :  { %8223 = vmatmul.mubr.msk.f32.gmra.mrb[50].mxu0 %vm649_vm10, %v4520_v0 }
0x132a   :  { %v4524_v57 = vpop.permute.xlu1 %4523  ;;  %v4522_v63 = vpop.permute.xlu0 %4521 }
0x132b   :  { %8225 = vmatprep.mubr.msk.f32.mxu0 %vm649_vm10, %v4522_v63 }
0x132c   :  { %8226 = vmatmul.mubr.msk.f32.gmra.mrb[52].mxu0 %vm649_vm10, %v4524_v57 }
0x132e   :  { %v4528_v34 = vpop.permute.xlu1 %4527  ;;  %v4526_v28 = vpop.permute.xlu0 %4525 }
0x132f   :  { %8228 = vmatprep.mubr.msk.f32.mxu0 %vm649_vm10, %v4526_v28 }
0x1330   :  { %8229 = vmatmul.mubr.msk.f32.gmra.mrb[54].mxu0 %vm649_vm10, %v4528_v34 }
0x13e8   :  { %v11833_v45 = vpop.f32.mrb[40].mxu1 }
0x13e9   :  { %v4397_v44 = vmul.f32 %v11833_v45, %v11833_v45  ;;  %v11837_v14 = vpop.f32.mrb[41].mxu1 }
0x13ea   :  { %v4396_v50 = vmul.f32 %v11837_v14, %v11837_v14 }
0x13eb   :  { %4414 = vrot.lane.b32.xlu1 %v4397_v44, %s8743_s23 }
0x13ec   :  { %4412 = vrot.lane.b32.xlu0 %v4396_v50, %s8743_s23  ;;  %v11843_v17 = vpop.f32.mrb[42].mxu1 }
0x13ed   :  { %v4399_v13 = vmul.f32 %v11843_v17, %v11843_v17  ;;  %v11847_v42 = vpop.f32.mrb[43].mxu1 }
0x13ee   :  { %v4398_v24 = vmul.f32 %v11847_v42, %v11847_v42 }
0x13ef   :  { %4418 = vrot.lane.b32.xlu1 %v4399_v13, %s8743_s23 }
0x13f0   :  { %4416 = vrot.lane.b32.xlu0 %v4398_v24, %s8743_s23  ;;  %v11853_v58 = vpop.f32.mrb[44].mxu1 }
0x13f1   :  { %v4401_v20 = vmul.f32 %v11853_v58, %v11853_v58  ;;  %v11857_v25 = vpop.f32.mrb[45].mxu1 }
0x13f2   :  { %v4400_v3 = vmul.f32 %v11857_v25, %v11857_v25 }
0x13f3   :  { %4422 = vrot.lane.b32.xlu1 %v4401_v20, %s8743_s23 }
0x13f4   :  { %4420 = vrot.lane.b32.xlu0 %v4400_v3, %s8743_s23  ;;  %v11863_v35 = vpop.f32.mrb[46].mxu1 }
0x13f5   :  { %v4403_v21 = vmul.f32 %v11863_v35, %v11863_v35  ;;  %v11867_v53 = vpop.f32.mrb[47].mxu1 }
0x13f6   :  { %v4402_v19 = vmul.f32 %v11867_v53, %v11867_v53 }
0x13f7   :  { %v11871_v61 = vpop.f32.mrb[48].mxu0  ;;  %4426 = vrot.lane.b32.xlu1 %v4403_v21, %s8743_s23 }
0x13f8   :  { %v11874_v27 = vpop.f32.mrb[49].mxu0  ;;  %4424 = vrot.lane.b32.xlu0 %v4402_v19, %s8743_s23 }
0x13fb   :  { %v11877_v4 = vpop.f32.mrb[50].mxu0 }
0x13fc   :  { %v11879_v55 = vpop.f32.mrb[51].mxu0 }
0x13ff   :  { %v11881_v2 = vpop.f32.mrb[52].mxu0 }
0x1400   :  { %v11883_v30 = vpop.f32.mrb[53].mxu0 }
0x1403   :  { %v11885_v47 = vpop.f32.mrb[54].mxu0 }
0x1404   :  { %v11887_v60 = vpop.f32.mrb[55].mxu0 }
0x145d   :  { %v4415_v29 = vpop.permute.xlu1 %4414 }
0x145e   :  { %v4437_v52 = vsel %vm666_vm11, %v11833_v45, %v4415_v29  ;;  %v4413_v38 = vpop.permute.xlu0 %4412 }
0x145f   :  { %v4445_v8 = vsel %vm4038_vm1, %v4437_v52, 0.0  ;;  %v4436_v6 = vsel %vm666_vm11, %v11837_v14, %v4413_v38  ;;  %v4472_v38 = vld [vmem:[%s13015_s2 + $0xc] sm:$0x1] }
0x1460   :  { %v4444_v26 = vsel %vm4038_vm1, %v4436_v6, 0.0  ;;  %v7739_v6 = vld [vmem:[%s13015_s2 + $0xe] ss:$0 sm:$0xff] }
0x1461   :  { %v4446_v32 = vadd.f32 %v4445_v8, %v4444_v26  ;;  %v4419_v51 = vpop.permute.xlu1 %4418 }
0x1462   :  { %v4417_v43 = vpop.permute.xlu0 %4416  ;;  %v4439_v31 = vsel %vm666_vm11, %v11843_v17, %v4419_v51  ;;  %v4797_v51 = vld [vmem:[#allocation3 + $0x78] sm:$0xff] }
0x1463   :  { %v4438_v41 = vsel %vm666_vm11, %v11847_v42, %v4417_v43  ;;  %v4449_v40 = vsel %vm4038_vm1, %v4439_v31, 0.0  ;;  %v4798_v43 = vld [vmem:[#allocation3 + $0x80] sm:$0xff] }
0x1464   :  { %v4447_v49 = vsel %vm4038_vm1, %v4438_v41, 0.0 }
0x1465   :  { %v4448_v54 = vadd.f32 %v4447_v49, %v4446_v32  ;;  %v4423_v11 = vpop.permute.xlu1 %4422  ;;  %v4492_v32 = vld [vmem:[%s13015_s2 + $0xd] sm:$0x1]  ;;  %v8496_v49 = vpack.c.bf16 %v4798_v43, %v4797_v51 }
0x1466   :  { %v4421_v15 = vpop.permute.xlu0 %4420  ;;  %v4441_v12 = vsel %vm666_vm11, %v11853_v58, %v4423_v11  ;;  %v4615_v11 = vadd.f32 %v7739_v6, %v11874_v27 }
0x1467   :  { %v4450_v7 = vadd.f32 %v4449_v40, %v4448_v54  ;;  %v4440_v18 = vsel %vm666_vm11, %v11857_v25, %v4421_v15  ;;  %v4453_v39 = vsel %vm4038_vm1, %v4441_v12, 0.0  ;;  %v4620_v54 = vadd.f32 %v11871_v61, %v7739_v6  ;;  %8497 = vmatprep.subr.bf16.mxu1 %v8496_v49 }
0x1468   :  { %v4451_v36 = vsel %vm4038_vm1, %v4440_v18, 0.0  ;;  %v4630_v40 = vadd.f32 %v11877_v4, %v7739_v6  ;;  %v4625_v15 = vadd.f32 %v7739_v6, %v11879_v55  ;;  %v4640_v12 = vadd.f32 %v11881_v2, %v7739_v6  ;;  %8499 = vmatpush3.bf16.msra.mxu1 %v8496_v49 }
0x1469   :  { %v4452_v23 = vadd.f32 %v4451_v36, %v4450_v7  ;;  %v4427_v22 = vpop.permute.xlu1 %4426  ;;  %v4635_v18 = vadd.f32 %v7739_v6, %v11883_v30  ;;  %v4650_v36 = vadd.f32 %v11885_v47, %v7739_v6 }
0x146a   :  { %v4425_v56 = vpop.permute.xlu0 %4424  ;;  %v4443_v9 = vsel %vm666_vm11, %v11863_v35, %v4427_v22 }
0x146b   :  { %v4454_v59 = vadd.f32 %v4453_v39, %v4452_v23  ;;  %v4442_v48 = vsel %vm666_vm11, %v11867_v53, %v4425_v56  ;;  %v4457_v57 = vsel %vm4038_vm1, %v4443_v9, 0.0  ;;  %v4645_v23 = vadd.f32 %v7739_v6, %v11887_v60 }
0x146c   :  { %v4455_v0 = vsel %vm4038_vm1, %v4442_v48, 0.0 }
0x146d   :  { %v4456_v46 = vadd.f32 %v4455_v0, %v4454_v59 }
0x146f   :  { %v4458_v63 = vadd.f32 %v4457_v57, %v4456_v46  ;;  %v4799_v46 = vld [vmem:[#allocation3 + $0x88] sm:$0xff] }
0x1470   :  { %8235 = vmatprep.subr.mxu1 %v4799_v46 }
0x1471   :  { %v4459_v34 = vrot.slane %v4458_v63, 4  ;;  %8236 = vmatpush3.msra.mxu1 %v4799_v46 }
0x1473   :  { %v4460_v28 = vadd.f32 %v4459_v34, %v4458_v63 }
0x1475   :  { %v4461_v44 = vrot.slane %v4460_v28, 2 }
0x1477   :  { %v4462_v50 = vadd.f32 %v4461_v44, %v4460_v28 }
0x1479   :  { %v4463_v13 = vrot.slane %v4462_v50, 1 }
0x147b   :  { %v4464_v24 = vadd.f32 %v4463_v13, %v4462_v50 }
0x147d   :  { %v4465_v20 = vmul.f32 0.015625, %v4464_v24 }
0x147f   :  { %v4466_v3 = vmul.f32 %v4465_v20, %v4465_v20 }
0x1481   :  { %4468 = vrot.lane.b32.xlu0 %v4466_v3, %s8743_s23 }
0x14f3   :  { %v4469_v21 = vpop.permute.xlu0 %4468 }
0x14f4   :  { %v4471_v19 = vsub.f32 %v4465_v20, %v4469_v21 }
0x14f6   :  { %v4473_v29 = vadd.f32 1e-05, %v4471_v19 }
0x14f8   :  { %8671 = vrsqrt.f32 %v4473_v29 }
0x1502   :  { %v8672_v52 = vpop.eup %8671 }
0x1503   :  { %4476 = vrot.lane.b32.xlu1 %v8672_v52, %s8749_s27 }
0x1575   :  { %v4477_v8 = vpop.permute.xlu1 %4476 }
0x1576   :  { %v4479_v26 = vmul.f32 %v4477_v8, %v4472_v38 }
0x1578   :  { %v4483_v31 = vrot.slane %v4479_v26, %v9227_v16  ;;  %v4493_v41 = vmul.f32 %v4479_v26, %v4465_v20 }
0x157a   :  { %v4494_v7 = vsub.f32 %v4492_v32, %v4493_v41  ;;  %v4485_v22 = vmul.f32 %v11833_v45, %v4483_v31  ;;  %v4484_v27 = vmul.f32 %v4483_v31, %v11837_v14  ;;  %v4487_v4 = vmul.f32 %v11843_v17, %v4483_v31 }
0x157b   :  { %v4486_v55 = vmul.f32 %v4483_v31, %v11847_v42  ;;  %v4489_v2 = vmul.f32 %v11853_v58, %v4483_v31  ;;  %v4488_v39 = vmul.f32 %v4483_v31, %v11857_v25  ;;  %v4490_v30 = vmul.f32 %v4483_v31, %v11867_v53 }
0x157c   :  { %v4498_v61 = vrot.slane %v4494_v7, %v9227_v16  ;;  %v4491_v47 = vmul.f32 %v11863_v35, %v4483_v31 }
0x157e   :  { %v4500_v60 = vadd.f32 %v4498_v61, %v4485_v22  ;;  %v4499_v56 = vadd.f32 %v4498_v61, %v4484_v27  ;;  %v4502_v45 = vadd.f32 %v4498_v61, %v4487_v4  ;;  %v4501_v9 = vadd.f32 %v4498_v61, %v4486_v55 }
0x157f   :  { %v4504_v59 = vadd.f32 %v4498_v61, %v4489_v2  ;;  %v4503_v48 = vadd.f32 %v4498_v61, %v4488_v39  ;;  %v4505_v0 = vadd.f32 %v4498_v61, %v4490_v30  ;;  %v4506_v14 = vadd.f32 %v4498_v61, %v4491_v47 }
0x1580   :  { %v4654_v17 = vadd.f32 %v4620_v54, %v4500_v60  ;;  %v4653_v57 = vadd.f32 %v4615_v11, %v4499_v56  ;;  %v4656_v42 = vadd.f32 %v4630_v40, %v4502_v45  ;;  %v4655_v63 = vadd.f32 %v4625_v15, %v4501_v9 }
0x1581   :  { %v4658_v58 = vadd.f32 %v4640_v12, %v4504_v59  ;;  %v4657_v25 = vadd.f32 %v4635_v18, %v4503_v48  ;;  %v4659_v34 = vadd.f32 %v4645_v23, %v4505_v0  ;;  %v4660_v53 = vadd.f32 %v4650_v36, %v4506_v14 }
0x1582   :  { %v11942_v35 = vmax.f32 %v4654_v17, 0.0  ;;  %v11944_v28 = vmax.f32 %v4653_v57, 0.0  ;;  %v11950_v44 = vmax.f32 %v4656_v42, 0.0  ;;  %v11952_v50 = vmax.f32 %v4655_v63, 0.0 }
0x1583   :  { %v11958_v13 = vmax.f32 %v4658_v58, 0.0  ;;  %v11960_v24 = vmax.f32 %v4657_v25, 0.0  ;;  %v11964_v21 = vmax.f32 %v4659_v34, 0.0  ;;  %v11988_v43 = vmax.f32 %v4660_v53, 0.0 }
0x1584   :  { %4727 = vrot.lane.b32.xlu1 %v11942_v35, %s8743_s23  ;;  %4725 = vrot.lane.b32.xlu0 %v11944_v28, %s8743_s23  ;;  %v4694_v20 = vrot.slane %v11942_v35, 1  ;;  %v4695_v3 = vrot.slane %v11952_v50, 1  ;;  %v4693_v38 = vrot.slane %v11944_v28, 1  ;;  %v4696_v8 = vrot.slane %v11950_v44, 1 }
0x1585   :  { %v4698_v29 = vrot.slane %v11958_v13, 1  ;;  %v4699_v52 = vrot.slane %v11964_v21, 1  ;;  %v4697_v6 = vrot.slane %v11960_v24, 1  ;;  %v4700_v49 = vrot.slane %v11988_v43, 1 }
0x1586   :  { %v4706_v19 = vsel %vm175_vm0, %v4694_v20, %v4695_v3  ;;  %v4707_v32 = vsel %vm175_vm0, %v4693_v38, %v4694_v20  ;;  %v4705_v41 = vsel %vm175_vm0, %v4695_v3, %v4696_v8  ;;  %v4669_v23 = vrot.slane %v11944_v28, 7 }
0x1587   :  { %v4702_v26 = vsel %vm175_vm0, %v4698_v29, %v4699_v52  ;;  %v4704_v51 = vsel %vm175_vm0, %v4696_v8, %v4697_v6  ;;  %v4703_v54 = vsel %vm175_vm0, %v4697_v6, %v4698_v29  ;;  %v4708_v11 = vsel %vm175_vm0, %v4700_v49, %v4693_v38 }
0x1588   :  { %4731 = vrot.lane.b32.xlu1 %v11950_v44, %s8743_s23  ;;  %4729 = vrot.lane.b32.xlu0 %v11952_v50, %s8743_s23  ;;  %v4712_v31 = vsel %vm11746_vm3, 0.0, %v4704_v51  ;;  %v4716_v40 = vsel %vm11759_vm4, 0.0, %v4708_v11  ;;  %v4701_v15 = vsel %vm175_vm0, %v4699_v52, %v4700_v49  ;;  %v4676_v22 = vrot.slane %v11988_v43, 7 }
0x1589   :  { %v4670_v4 = vrot.slane %v11942_v35, 7  ;;  %v4671_v47 = vrot.slane %v11952_v50, 7  ;;  %v4672_v60 = vrot.slane %v11950_v44, 7  ;;  %v4673_v9 = vrot.slane %v11960_v24, 7 }
0x158a   :  { %v4684_v55 = vsel %vm110_vm2, %v4676_v22, %v4669_v23  ;;  %v4674_v58 = vrot.slane %v11958_v13, 7  ;;  %v4675_v29 = vrot.slane %v11964_v21, 7 }
0x158b   :  { %v4685_v30 = vsel %vm11784_vm5, 0.0, %v4684_v55  ;;  %v4683_v56 = vsel %vm110_vm2, %v4669_v23, %v4670_v4  ;;  %v4681_v17 = vsel %vm110_vm2, %v4671_v47, %v4672_v60  ;;  %v4682_v57 = vsel %vm110_vm2, %v4670_v4, %v4671_v47 }
0x158c   :  { %4735 = vrot.lane.b32.xlu1 %v11958_v13, %s8743_s23  ;;  %4733 = vrot.lane.b32.xlu0 %v11960_v24, %s8743_s23  ;;  %v4680_v25 = vsel %vm110_vm2, %v4672_v60, %v4673_v9  ;;  %v4679_v52 = vsel %vm110_vm2, %v4673_v9, %v4674_v58 }
0x1590   :  { %4759 = vrot.lane.b32.xlu1 %v4706_v19, %s8750_s5  ;;  %4737 = vrot.lane.b32.xlu0 %v11964_v21, %s8743_s23  ;;  %v4689_v19 = vsel %vm11799_vm7, 0.0, %v4680_v25 }
0x1594   :  { %4767 = vrot.lane.b32.xlu1 %v4702_v26, %s8750_s5  ;;  %4757 = vrot.lane.b32.xlu0 %v4707_v32, %s8750_s5 }
0x1598   :  { %4763 = vrot.lane.b32.xlu1 %v4712_v31, %s8750_s5  ;;  %4761 = vrot.lane.b32.xlu0 %v4705_v41, %s8750_s5  ;;  %v4678_v31 = vsel %vm110_vm2, %v4674_v58, %v4675_v29  ;;  %v4677_v41 = vsel %vm110_vm2, %v4675_v29, %v4676_v22 }
0x159c   :  { %4739 = vrot.lane.b32.xlu1 %v11988_v43, %s8743_s23  ;;  %4765 = vrot.lane.b32.xlu0 %v4703_v54, %s8750_s5 }
0x15a0   :  { %4771 = vrot.lane.b32.xlu1 %v4716_v40, %s8750_s5  ;;  %4769 = vrot.lane.b32.xlu0 %v4701_v15, %s8750_s5 }
0x15f6   :  { %v4728_v12 = vpop.permute.xlu1 %4727  ;;  %v4726_v7 = vpop.permute.xlu0 %4725 }
0x15f7   :  { %v4781_v45 = vsel %vm666_vm11, %v4685_v30, %v4726_v7  ;;  %v4782_v0 = vsel %vm666_vm11, %v4683_v56, %v4728_v12 }
0x15fa   :  { %v4732_v18 = vpop.permute.xlu1 %4731  ;;  %v4730_v36 = vpop.permute.xlu0 %4729 }
0x15fb   :  { %v4784_v42 = vsel %vm666_vm11, %v4681_v17, %v4732_v18  ;;  %v4783_v63 = vsel %vm666_vm11, %v4682_v57, %v4730_v36 }
0x15fe   :  { %v4736_v61 = vpop.permute.xlu1 %4735  ;;  %v4734_v27 = vpop.permute.xlu0 %4733 }
0x15ff   :  { %v4785_v38 = vsel %vm666_vm11, %v4689_v19, %v4734_v27  ;;  %v4786_v26 = vsel %vm666_vm11, %v4679_v52, %v4736_v61 }
0x1602   :  { %v4760_v2 = vpop.permute.xlu1 %4759  ;;  %v4738_v39 = vpop.permute.xlu0 %4737 }
0x1603   :  { %v4790_v46 = vsel %vm4038_vm1, %v4782_v0, %v4760_v2  ;;  %v4787_v49 = vsel %vm666_vm11, %v4678_v31, %v4738_v39 }
0x1606   :  { %v4768_v59 = vpop.permute.xlu1 %4767  ;;  %v4758_v48 = vpop.permute.xlu0 %4757 }
0x1607   :  { %v4789_v14 = vsel %vm4038_vm1, %v4781_v45, %v4758_v48  ;;  %v4794_v51 = vsel %vm4038_vm1, %v4786_v26, %v4768_v59 }
0x1608   :  { %8237 = vmatprep.mubr.msk.f32.mxu1 %vm4266_vm6, %v4789_v14 }
0x1609   :  { %8238 = vmatmul.mubr.msk.f32.vlgmr.msra.gmra.mrb[48].mxu1 %vm4266_vm6, %v4790_v46 }
0x160a   :  { %v4764_v34 = vpop.permute.xlu1 %4763  ;;  %v4762_v53 = vpop.permute.xlu0 %4761 }
0x160b   :  { %v4792_v20 = vsel %vm4038_vm1, %v4784_v42, %v4764_v34  ;;  %v4791_v3 = vsel %vm4038_vm1, %v4783_v63, %v4762_v53 }
0x160c   :  { %8240 = vmatprep.mubr.msk.f32.mxu1 %vm4266_vm6, %v4791_v3 }
0x160d   :  { %8241 = vmatmul.mubr.msk.f32.gmra.mrb[50].mxu1 %vm4266_vm6, %v4792_v20 }
0x160e   :  { %v4740_v8 = vpop.permute.xlu1 %4739  ;;  %v4766_v6 = vpop.permute.xlu0 %4765 }
0x160f   :  { %v4793_v32 = vsel %vm4038_vm1, %v4785_v38, %v4766_v6  ;;  %v4788_v54 = vsel %vm666_vm11, %v4677_v41, %v4740_v8 }
0x1610   :  { %8243 = vmatprep.mubr.msk.f32.mxu1 %vm4266_vm6, %v4793_v32 }
0x1611   :  { %8244 = vmatmul.mubr.msk.f32.gmra.mrb[52].mxu1 %vm4266_vm6, %v4794_v51 }
0x1612   :  { %v4772_v11 = vpop.permute.xlu1 %4771  ;;  %v4770_v40 = vpop.permute.xlu0 %4769 }
0x1613   :  { %v4796_v15 = vsel %vm4038_vm1, %v4788_v54, %v4772_v11  ;;  %v4795_v12 = vsel %vm4038_vm1, %v4787_v49, %v4770_v40 }
0x1614   :  { %8246 = vmatprep.mubr.msk.f32.mxu1 %vm4266_vm6, %v4795_v12 }
0x1615   :  { %8247 = vmatmul.mubr.msk.f32.gmra.mrb[54].mxu1 %vm4266_vm6, %v4796_v15 }
0x16dc   :  { %v12062_v7 = vpop.f32.mrb[48].mxu1 }
0x16dd   :  { %v4930_v18 = vmul.f32 %v12062_v7, %v12062_v7  ;;  %v12066_v36 = vpop.f32.mrb[49].mxu1 }
0x16de   :  { %v4929_v23 = vmul.f32 %v12066_v36, %v12066_v36 }
0x16df   :  { %4947 = vrot.lane.b32.xlu1 %v4930_v18, %s8743_s23 }
0x16e0   :  { %4945 = vrot.lane.b32.xlu0 %v4929_v23, %s8743_s23  ;;  %v12072_v22 = vpop.f32.mrb[50].mxu1 }
0x16e1   :  { %v4932_v61 = vmul.f32 %v12072_v22, %v12072_v22  ;;  %v12076_v27 = vpop.f32.mrb[51].mxu1 }
0x16e2   :  { %v4931_v4 = vmul.f32 %v12076_v27, %v12076_v27 }
0x16e3   :  { %4951 = vrot.lane.b32.xlu1 %v4932_v61, %s8743_s23 }
0x16e4   :  { %4949 = vrot.lane.b32.xlu0 %v4931_v4, %s8743_s23  ;;  %v12082_v55 = vpop.f32.mrb[52].mxu1 }
0x16e5   :  { %v4934_v2 = vmul.f32 %v12082_v55, %v12082_v55  ;;  %v12086_v39 = vpop.f32.mrb[53].mxu1 }
0x16e6   :  { %v4933_v30 = vmul.f32 %v12086_v39, %v12086_v39 }
0x16e7   :  { %4955 = vrot.lane.b32.xlu1 %v4934_v2, %s8743_s23 }
0x16e8   :  { %4953 = vrot.lane.b32.xlu0 %v4933_v30, %s8743_s23  ;;  %v12092_v47 = vpop.f32.mrb[54].mxu1 }
0x16e9   :  { %v4936_v60 = vmul.f32 %v12092_v47, %v12092_v47  ;;  %v12096_v56 = vpop.f32.mrb[55].mxu1 }
0x16ea   :  { %v4935_v45 = vmul.f32 %v12096_v56, %v12096_v56 }
0x16eb   :  { %4959 = vrot.lane.b32.xlu1 %v4936_v60, %s8743_s23 }
0x16ec   :  { %4957 = vrot.lane.b32.xlu0 %v4935_v45, %s8743_s23 }
0x1751   :  { %v4948_v9 = vpop.permute.xlu1 %4947 }
0x1752   :  { %v4970_v59 = vsel %vm666_vm11, %v12062_v7, %v4948_v9  ;;  %v4946_v48 = vpop.permute.xlu0 %4945 }
0x1753   :  { %v4978_v0 = vsel %vm4038_vm1, %v4970_v59, 0.0  ;;  %v4969_v14 = vsel %vm666_vm11, %v12066_v36, %v4946_v48  ;;  %v5005_v48 = vld [vmem:[%s13015_s2 + $0xf] sm:$0x1] }
0x1754   :  { %v4977_v46 = vsel %vm4038_vm1, %v4969_v14, 0.0  ;;  %v5176_v14 = vld [vmem:[#allocation3 + $0x90] sm:$0xff] }
0x1755   :  { %v4979_v17 = vadd.f32 %v4978_v0, %v4977_v46  ;;  %v4952_v57 = vpop.permute.xlu1 %4951  ;;  %v5177_v46 = vld [vmem:[#allocation3 + $0x98] sm:$0xff] }
0x1756   :  { %v4950_v42 = vpop.permute.xlu0 %4949  ;;  %v4972_v63 = vsel %vm666_vm11, %v12072_v22, %v4952_v57  ;;  %v8500_v57 = vpack.c.bf16 %v5177_v46, %v5176_v14 }
0x1757   :  { %v4971_v58 = vsel %vm666_vm11, %v12076_v27, %v4950_v42  ;;  %v4982_v20 = vsel %vm4038_vm1, %v4972_v63, 0.0  ;;  %v5025_v42 = vld [vmem:[%s13015_s2 + $0x10] sm:$0x1] }
0x1758   :  { %v4980_v25 = vsel %vm4038_vm1, %v4971_v58, 0.0  ;;  %8501 = vmatprep.subr.bf16.mxu0 %v8500_v57 }
0x1759   :  { %v4981_v34 = vadd.f32 %v4980_v25, %v4979_v17  ;;  %v4956_v53 = vpop.permute.xlu1 %4955  ;;  %8503 = vmatpush3.bf16.msra.mxu0 %v8500_v57 }
0x175a   :  { %v4954_v3 = vpop.permute.xlu0 %4953  ;;  %v4974_v19 = vsel %vm666_vm11, %v12082_v55, %v4956_v53 }
0x175b   :  { %v4983_v29 = vadd.f32 %v4982_v20, %v4981_v34  ;;  %v4973_v52 = vsel %vm666_vm11, %v12086_v39, %v4954_v3  ;;  %v4986_v26 = vsel %vm4038_vm1, %v4974_v19, 0.0 }
0x175c   :  { %v4984_v38 = vsel %vm4038_vm1, %v4973_v52, 0.0 }
0x175d   :  { %v4985_v8 = vadd.f32 %v4984_v38, %v4983_v29  ;;  %v4960_v6 = vpop.permute.xlu1 %4959 }
0x175e   :  { %v4958_v32 = vpop.permute.xlu0 %4957  ;;  %v4976_v51 = vsel %vm666_vm11, %v12092_v47, %v4960_v6  ;;  %v5178_v6 = vld [vmem:[#allocation3 + $0xa0] sm:$0xff] }
0x175f   :  { %v4987_v31 = vadd.f32 %v4986_v26, %v4985_v8  ;;  %v4975_v41 = vsel %vm666_vm11, %v12096_v56, %v4958_v32  ;;  %v4990_v11 = vsel %vm4038_vm1, %v4976_v51, 0.0  ;;  %8253 = vmatprep.subr.mxu0 %v5178_v6 }
0x1760   :  { %v4988_v49 = vsel %vm4038_vm1, %v4975_v41, 0.0  ;;  %8254 = vmatpush3.msra.mxu0 %v5178_v6 }
0x1761   :  { %v4989_v54 = vadd.f32 %v4988_v49, %v4987_v31 }
0x1763   :  { %v4991_v40 = vadd.f32 %v4990_v11, %v4989_v54 }
0x1765   :  { %v4992_v15 = vrot.slane %v4991_v40, 4 }
0x1767   :  { %v4993_v12 = vadd.f32 %v4992_v15, %v4991_v40 }
0x1769   :  { %v4994_v18 = vrot.slane %v4993_v12, 2 }
0x176b   :  { %v4995_v23 = vadd.f32 %v4994_v18, %v4993_v12 }
0x176d   :  { %v4996_v61 = vrot.slane %v4995_v23, 1 }
0x176f   :  { %v4997_v4 = vadd.f32 %v4996_v61, %v4995_v23 }
0x1771   :  { %v4998_v2 = vmul.f32 0.015625, %v4997_v4 }
0x1773   :  { %v4999_v30 = vmul.f32 %v4998_v2, %v4998_v2 }
0x1775   :  { %5001 = vrot.lane.b32.xlu0 %v4999_v30, %s8743_s23 }
0x17e7   :  { %v5002_v60 = vpop.permute.xlu0 %5001 }
0x17e8   :  { %v5004_v45 = vsub.f32 %v4998_v2, %v5002_v60 }
0x17ea   :  { %v5006_v9 = vadd.f32 1e-05, %v5004_v45 }
0x17ec   :  { %8673 = vrsqrt.f32 %v5006_v9 }
0x17f6   :  { %v8674_v59 = vpop.eup %8673 }
0x17f7   :  { %5009 = vrot.lane.b32.xlu1 %v8674_v59, %s8749_s27 }
0x1869   :  { %v5010_v0 = vpop.permute.xlu1 %5009 }
0x186a   :  { %v5012_v17 = vmul.f32 %v5010_v0, %v5005_v48 }
0x186c   :  { %v5016_v63 = vrot.slane %v5012_v17, %v9227_v16  ;;  %v5026_v58 = vmul.f32 %v5012_v17, %v4998_v2 }
0x186e   :  { %v5027_v25 = vsub.f32 %v5025_v42, %v5026_v58  ;;  %v5018_v34 = vmul.f32 %v12062_v7, %v5016_v63  ;;  %v5017_v20 = vmul.f32 %v5016_v63, %v12066_v36  ;;  %v5020_v3 = vmul.f32 %v12072_v22, %v5016_v63 }
0x186f   :  { %v5019_v19 = vmul.f32 %v5016_v63, %v12076_v27  ;;  %v5022_v29 = vmul.f32 %v12082_v55, %v5016_v63  ;;  %v5021_v52 = vmul.f32 %v5016_v63, %v12086_v39  ;;  %v5023_v38 = vmul.f32 %v5016_v63, %v12096_v56 }
0x1870   :  { %v5031_v53 = vrot.slane %v5027_v25, %v9227_v16  ;;  %v5024_v8 = vmul.f32 %v12092_v47, %v5016_v63 }
0x1872   :  { %v5033_v26 = vadd.f32 %v5031_v53, %v5018_v34  ;;  %v5032_v32 = vadd.f32 %v5031_v53, %v5017_v20  ;;  %v5035_v7 = vadd.f32 %v5031_v53, %v5020_v3  ;;  %v5034_v51 = vadd.f32 %v5031_v53, %v5019_v19 }
0x1873   :  { %v5037_v31 = vadd.f32 %v5031_v53, %v5022_v29  ;;  %v5036_v36 = vadd.f32 %v5031_v53, %v5021_v52  ;;  %v5038_v41 = vadd.f32 %v5031_v53, %v5023_v38  ;;  %v5039_v22 = vadd.f32 %v5031_v53, %v5024_v8 }
0x1874   :  { %v5041_v27 = vmax.f32 %v5033_v26, 0.0  ;;  %v5040_v49 = vmax.f32 %v5032_v32, 0.0  ;;  %v5043_v55 = vmax.f32 %v5035_v7, 0.0  ;;  %v5042_v54 = vmax.f32 %v5034_v51, 0.0 }
0x1875   :  { %v5045_v39 = vmax.f32 %v5037_v31, 0.0  ;;  %v5044_v11 = vmax.f32 %v5036_v36, 0.0  ;;  %v5046_v56 = vmax.f32 %v5038_v41, 0.0  ;;  %v5047_v40 = vmax.f32 %v5039_v22, 0.0 }
0x1876   :  { %5106 = vrot.lane.b32.xlu1 %v5041_v27, %s8743_s23  ;;  %5104 = vrot.lane.b32.xlu0 %v5040_v49, %s8743_s23  ;;  %v5075_v47 = vrot.slane %v5043_v55, 1  ;;  %v5073_v15 = vrot.slane %v5041_v27, 1  ;;  %v5074_v12 = vrot.slane %v5042_v54, 1  ;;  %v5072_v18 = vrot.slane %v5040_v49, 1 }
0x1877   :  { %v5076_v23 = vrot.slane %v5044_v11, 1  ;;  %v5077_v61 = vrot.slane %v5045_v39, 1  ;;  %v5078_v4 = vrot.slane %v5046_v56, 1  ;;  %v5055_v2 = vrot.slane %v5047_v40, 7 }
0x1878   :  { %v5085_v30 = vsel %vm175_vm0, %v5073_v15, %v5074_v12  ;;  %v5086_v60 = vsel %vm175_vm0, %v5072_v18, %v5073_v15  ;;  %v5084_v45 = vsel %vm175_vm0, %v5074_v12, %v5075_v47  ;;  %v5079_v9 = vrot.slane %v5047_v40, 1 }
0x1879   :  { %v5081_v59 = vsel %vm175_vm0, %v5077_v61, %v5078_v4  ;;  %v5083_v48 = vsel %vm175_vm0, %v5075_v47, %v5076_v23  ;;  %v5082_v0 = vsel %vm175_vm0, %v5076_v23, %v5077_v61  ;;  %v5048_v14 = vrot.slane %v5040_v49, 7 }
0x187a   :  { %5110 = vrot.lane.b32.xlu1 %v5043_v55, %s8743_s23  ;;  %5108 = vrot.lane.b32.xlu0 %v5042_v54, %s8743_s23  ;;  %v5087_v46 = vsel %vm175_vm0, %v5079_v9, %v5072_v18  ;;  %v5080_v17 = vsel %vm175_vm0, %v5078_v4, %v5079_v9  ;;  %v5049_v57 = vrot.slane %v5041_v27, 7  ;;  %v5050_v63 = vrot.slane %v5042_v54, 7 }
0x187b   :  { %v5063_v42 = vsel %vm110_vm2, %v5055_v2, %v5048_v14  ;;  %v5051_v58 = vrot.slane %v5043_v55, 7  ;;  %v5052_v34 = vrot.slane %v5044_v11, 7  ;;  %v5053_v53 = vrot.slane %v5045_v39, 7 }
0x187c   :  { %v5062_v25 = vsel %vm110_vm2, %v5048_v14, %v5049_v57  ;;  %v5061_v3 = vsel %vm110_vm2, %v5049_v57, %v5050_v63  ;;  %v5054_v19 = vrot.slane %v5046_v56, 7  ;;  %v5091_v6 = vsel %vm11746_vm3, 0.0, %v5083_v48 }
0x187d   :  { %v5060_v20 = vsel %vm110_vm2, %v5050_v63, %v5051_v58  ;;  %v5058_v29 = vsel %vm110_vm2, %v5052_v34, %v5053_v53  ;;  %v5059_v52 = vsel %vm110_vm2, %v5051_v58, %v5052_v34  ;;  %v5095_v26 = vsel %vm11759_vm4, 0.0, %v5087_v46 }
0x187e   :  { %5114 = vrot.lane.b32.xlu1 %v5045_v39, %s8743_s23  ;;  %5112 = vrot.lane.b32.xlu0 %v5044_v11, %s8743_s23  ;;  %v5057_v38 = vsel %vm110_vm2, %v5053_v53, %v5054_v19  ;;  %v5056_v8 = vsel %vm110_vm2, %v5054_v19, %v5055_v2  ;;  %v5064_v49 = vsel %vm11784_vm5, 0.0, %v5063_v42  ;;  %v5068_v4 = vsel %vm11799_vm7, 0.0, %v5059_v52 }
0x1882   :  { %5138 = vrot.lane.b32.xlu1 %v5085_v30, %s8750_s5  ;;  %5116 = vrot.lane.b32.xlu0 %v5046_v56, %s8743_s23 }
0x1886   :  { %5146 = vrot.lane.b32.xlu1 %v5081_v59, %s8750_s5  ;;  %5136 = vrot.lane.b32.xlu0 %v5086_v60, %s8750_s5 }
0x188a   :  { %5142 = vrot.lane.b32.xlu1 %v5091_v6, %s8750_s5  ;;  %5140 = vrot.lane.b32.xlu0 %v5084_v45, %s8750_s5 }
0x188e   :  { %5118 = vrot.lane.b32.xlu1 %v5047_v40, %s8743_s23  ;;  %5144 = vrot.lane.b32.xlu0 %v5082_v0, %s8750_s5 }
0x1892   :  { %5150 = vrot.lane.b32.xlu1 %v5095_v26, %s8750_s5  ;;  %5148 = vrot.lane.b32.xlu0 %v5080_v17, %s8750_s5 }
0x18e8   :  { %v5107_v32 = vpop.permute.xlu1 %5106  ;;  %v5105_v7 = vpop.permute.xlu0 %5104 }
0x18e9   :  { %v5160_v55 = vsel %vm666_vm11, %v5064_v49, %v5105_v7  ;;  %v5161_v11 = vsel %vm666_vm11, %v5062_v25, %v5107_v32 }
0x18ec   :  { %v5111_v51 = vpop.permute.xlu1 %5110  ;;  %v5109_v31 = vpop.permute.xlu0 %5108 }
0x18ed   :  { %v5163_v47 = vsel %vm666_vm11, %v5060_v20, %v5111_v51  ;;  %v5162_v15 = vsel %vm666_vm11, %v5061_v3, %v5109_v31 }
0x18f0   :  { %v5115_v36 = vpop.permute.xlu1 %5114  ;;  %v5113_v41 = vpop.permute.xlu0 %5112 }
0x18f1   :  { %v5164_v2 = vsel %vm666_vm11, %v5068_v4, %v5113_v41  ;;  %v5165_v45 = vsel %vm666_vm11, %v5058_v29, %v5115_v36 }
0x18f4   :  { %v5139_v22 = vpop.permute.xlu1 %5138  ;;  %v5117_v27 = vpop.permute.xlu0 %5116 }
0x18f5   :  { %v5169_v40 = vsel %vm4038_vm1, %v5161_v11, %v5139_v22  ;;  %v5166_v48 = vsel %vm666_vm11, %v5057_v38, %v5117_v27 }
0x18f8   :  { %v5147_v54 = vpop.permute.xlu1 %5146  ;;  %v5137_v39 = vpop.permute.xlu0 %5136 }
0x18f9   :  { %v5168_v56 = vsel %vm4038_vm1, %v5160_v55, %v5137_v39  ;;  %v5173_v59 = vsel %vm4038_vm1, %v5165_v45, %v5147_v54 }
0x18fa   :  { %8255 = vmatprep.mubr.msk.f32.mxu0 %vm4266_vm6, %v5168_v56 }
0x18fb   :  { %8256 = vmatmul.mubr.msk.f32.vlgmr.msra.gmra.mrb[56].mxu0 %vm4266_vm6, %v5169_v40 }
0x18fc   :  { %v5143_v12 = vpop.permute.xlu1 %5142  ;;  %v5141_v18 = vpop.permute.xlu0 %5140 }
0x18fd   :  { %v5171_v23 = vsel %vm4038_vm1, %v5163_v47, %v5143_v12  ;;  %v5170_v61 = vsel %vm4038_vm1, %v5162_v15, %v5141_v18 }
0x18fe   :  { %8258 = vmatprep.mubr.msk.f32.mxu0 %vm4266_vm6, %v5170_v61 }
0x18ff   :  { %8259 = vmatmul.mubr.msk.f32.gmra.mrb[58].mxu0 %vm4266_vm6, %v5171_v23 }
0x1900   :  { %v5119_v30 = vpop.permute.xlu1 %5118  ;;  %v5145_v60 = vpop.permute.xlu0 %5144 }
0x1901   :  { %v5172_v9 = vsel %vm4038_vm1, %v5164_v2, %v5145_v60  ;;  %v5167_v0 = vsel %vm666_vm11, %v5056_v8, %v5119_v30 }
0x1902   :  { %8261 = vmatprep.mubr.msk.f32.mxu0 %vm4266_vm6, %v5172_v9 }
0x1903   :  { %8262 = vmatmul.mubr.msk.f32.gmra.mrb[60].mxu0 %vm4266_vm6, %v5173_v59 }
0x1904   :  { %v5151_v14 = vpop.permute.xlu1 %5150  ;;  %v5149_v46 = vpop.permute.xlu0 %5148 }
0x1905   :  { %v5175_v17 = vsel %vm4038_vm1, %v5167_v0, %v5151_v14  ;;  %v5174_v57 = vsel %vm4038_vm1, %v5166_v48, %v5149_v46 }
0x1906   :  { %8264 = vmatprep.mubr.msk.f32.mxu0 %vm4266_vm6, %v5174_v57 }
0x1907   :  { %8265 = vmatmul.mubr.msk.f32.gmra.mrb[62].mxu0 %vm4266_vm6, %v5175_v17 }
0x19ce   :  { %v12224_v42 = vpop.f32.mrb[56].mxu0 }
0x19cf   :  { %v5309_v63 = vmul.f32 %v12224_v42, %v12224_v42  ;;  %v12228_v58 = vpop.f32.mrb[57].mxu0 }
0x19d0   :  { %v5308_v25 = vmul.f32 %v12228_v58, %v12228_v58 }
0x19d1   :  { %5326 = vrot.lane.b32.xlu1 %v5309_v63, %s8743_s23 }
0x19d2   :  { %5324 = vrot.lane.b32.xlu0 %v5308_v25, %s8743_s23  ;;  %v12234_v34 = vpop.f32.mrb[58].mxu0 }
0x19d3   :  { %v5311_v53 = vmul.f32 %v12234_v34, %v12234_v34  ;;  %v12238_v20 = vpop.f32.mrb[59].mxu0 }
0x19d4   :  { %v5310_v3 = vmul.f32 %v12238_v20, %v12238_v20 }
0x19d5   :  { %5330 = vrot.lane.b32.xlu1 %v5311_v53, %s8743_s23 }
0x19d6   :  { %5328 = vrot.lane.b32.xlu0 %v5310_v3, %s8743_s23  ;;  %v12244_v19 = vpop.f32.mrb[60].mxu0 }
0x19d7   :  { %v5313_v29 = vmul.f32 %v12244_v19, %v12244_v19  ;;  %v12248_v52 = vpop.f32.mrb[61].mxu0 }
0x19d8   :  { %v5312_v38 = vmul.f32 %v12248_v52, %v12248_v52 }
0x19d9   :  { %5334 = vrot.lane.b32.xlu1 %v5313_v29, %s8743_s23 }
0x19da   :  { %5332 = vrot.lane.b32.xlu0 %v5312_v38, %s8743_s23  ;;  %v12254_v8 = vpop.f32.mrb[62].mxu0 }
0x19db   :  { %v5315_v6 = vmul.f32 %v12254_v8, %v12254_v8  ;;  %v12258_v26 = vpop.f32.mrb[63].mxu0 }
0x19dc   :  { %v5314_v32 = vmul.f32 %v12258_v26, %v12258_v26 }
0x19dd   :  { %5338 = vrot.lane.b32.xlu1 %v5315_v6, %s8743_s23 }
0x19de   :  { %5336 = vrot.lane.b32.xlu0 %v5314_v32, %s8743_s23 }
0x1a43   :  { %v5327_v7 = vpop.permute.xlu1 %5326 }
0x1a44   :  { %v5349_v51 = vsel %vm666_vm11, %v12224_v42, %v5327_v7  ;;  %v5325_v31 = vpop.permute.xlu0 %5324 }
0x1a45   :  { %v5357_v36 = vsel %vm4038_vm1, %v5349_v51, 0.0  ;;  %v5348_v41 = vsel %vm666_vm11, %v12228_v58, %v5325_v31  ;;  %v5384_v31 = vld [vmem:[%s13015_s2 + $0x11] sm:$0x1] }
0x1a46   :  { %v5356_v22 = vsel %vm4038_vm1, %v5348_v41, 0.0 }
0x1a47   :  { %v5358_v27 = vadd.f32 %v5357_v36, %v5356_v22  ;;  %v5331_v49 = vpop.permute.xlu1 %5330  ;;  %v5404_v22 = vld [vmem:[%s13015_s2 + $0x12] sm:$0x1] }
0x1a48   :  { %v5329_v55 = vpop.permute.xlu0 %5328  ;;  %v5351_v54 = vsel %vm666_vm11, %v12234_v34, %v5331_v49 }
0x1a49   :  { %v5350_v39 = vsel %vm666_vm11, %v12238_v20, %v5329_v55  ;;  %v5361_v47 = vsel %vm4038_vm1, %v5351_v54, 0.0 }
0x1a4a   :  { %v5359_v11 = vsel %vm4038_vm1, %v5350_v39, 0.0 }
0x1a4b   :  { %v5360_v56 = vadd.f32 %v5359_v11, %v5358_v27  ;;  %v5335_v40 = vpop.permute.xlu1 %5334 }
0x1a4c   :  { %v5333_v15 = vpop.permute.xlu0 %5332  ;;  %v5353_v12 = vsel %vm666_vm11, %v12244_v19, %v5335_v40 }
0x1a4d   :  { %v5362_v18 = vadd.f32 %v5361_v47, %v5360_v56  ;;  %v5352_v23 = vsel %vm666_vm11, %v12248_v52, %v5333_v15  ;;  %v5365_v30 = vsel %vm4038_vm1, %v5353_v12, 0.0 }
0x1a4e   :  { %v5363_v61 = vsel %vm4038_vm1, %v5352_v23, 0.0 }
0x1a4f   :  { %v5364_v4 = vadd.f32 %v5363_v61, %v5362_v18  ;;  %v5339_v2 = vpop.permute.xlu1 %5338 }
0x1a50   :  { %v5337_v60 = vpop.permute.xlu0 %5336  ;;  %v5355_v45 = vsel %vm666_vm11, %v12254_v8, %v5339_v2 }
0x1a51   :  { %v5366_v9 = vadd.f32 %v5365_v30, %v5364_v4  ;;  %v5354_v59 = vsel %vm666_vm11, %v12258_v26, %v5337_v60  ;;  %v5369_v14 = vsel %vm4038_vm1, %v5355_v45, 0.0 }
0x1a52   :  { %v5367_v48 = vsel %vm4038_vm1, %v5354_v59, 0.0 }
0x1a53   :  { %v5368_v0 = vadd.f32 %v5367_v48, %v5366_v9 }
0x1a55   :  { %v5370_v46 = vadd.f32 %v5369_v14, %v5368_v0 }
0x1a57   :  { %v5371_v17 = vrot.slane %v5370_v46, 4 }
0x1a59   :  { %v5372_v57 = vadd.f32 %v5371_v17, %v5370_v46 }
0x1a5b   :  { %v5373_v63 = vrot.slane %v5372_v57, 2 }
0x1a5d   :  { %v5374_v25 = vadd.f32 %v5373_v63, %v5372_v57 }
0x1a5f   :  { %v5375_v53 = vrot.slane %v5374_v25, 1 }
0x1a61   :  { %v5376_v3 = vadd.f32 %v5375_v53, %v5374_v25 }
0x1a63   :  { %v5377_v29 = vmul.f32 0.015625, %v5376_v3 }
0x1a65   :  { %v5378_v38 = vmul.f32 %v5377_v29, %v5377_v29 }
0x1a67   :  { %5380 = vrot.lane.b32.xlu0 %v5378_v38, %s8743_s23 }
0x1ad9   :  { %v5381_v6 = vpop.permute.xlu0 %5380 }
0x1ada   :  { %v5383_v32 = vsub.f32 %v5377_v29, %v5381_v6 }
0x1adc   :  { %v5385_v7 = vadd.f32 1e-05, %v5383_v32 }
0x1ade   :  { %8675 = vrsqrt.f32 %v5385_v7 }
0x1ae8   :  { %v8676_v51 = vpop.eup %8675 }
0x1ae9   :  { %5388 = vrot.lane.b32.xlu1 %v8676_v51, %s8749_s27 }
0x1b5b   :  { %v5389_v36 = vpop.permute.xlu1 %5388 }
0x1b5c   :  { %v5391_v41 = vmul.f32 %v5389_v36, %v5384_v31  ;;  %v5578_v36 = vld [vmem:[#allocation3 + $0xa8] sm:$0xff] }
0x1b5e   :  { %v5395_v27 = vrot.slane %v5391_v41, %v9227_v16  ;;  %v5405_v49 = vmul.f32 %v5391_v41, %v5377_v29  ;;  %v5579_v41 = vld [vmem:[#allocation3 + $0xb0] sm:$0xff] }
0x1b60   :  { %v5406_v55 = vsub.f32 %v5404_v22, %v5405_v49  ;;  %v5397_v54 = vmul.f32 %v12224_v42, %v5395_v27  ;;  %v5396_v11 = vmul.f32 %v5395_v27, %v12228_v58  ;;  %v5399_v56 = vmul.f32 %v12234_v34, %v5395_v27 }
0x1b61   :  { %v5398_v40 = vmul.f32 %v5395_v27, %v12238_v20  ;;  %v5401_v47 = vmul.f32 %v12244_v19, %v5395_v27  ;;  %v5400_v15 = vmul.f32 %v5395_v27, %v12248_v52  ;;  %v5403_v12 = vmul.f32 %v12254_v8, %v5395_v27 }
0x1b62   :  { %v5410_v39 = vrot.slane %v5406_v55, %v9227_v16  ;;  %v5402_v18 = vmul.f32 %v5395_v27, %v12258_v26 }
0x1b64   :  { %v5412_v23 = vadd.f32 %v5410_v39, %v5397_v54  ;;  %v5411_v61 = vadd.f32 %v5410_v39, %v5396_v11  ;;  %v5414_v4 = vadd.f32 %v5410_v39, %v5399_v56  ;;  %v5413_v42 = vadd.f32 %v5410_v39, %v5398_v40 }
0x1b65   :  { %v5416_v2 = vadd.f32 %v5410_v39, %v5401_v47  ;;  %v5415_v30 = vadd.f32 %v5410_v39, %v5400_v15  ;;  %v5418_v60 = vadd.f32 %v5410_v39, %v5403_v12  ;;  %v5417_v58 = vadd.f32 %v5410_v39, %v5402_v18 }
0x1b66   :  { %v5420_v34 = vadd.f32 %v5412_v23, %v11942_v35  ;;  %v5419_v20 = vadd.f32 %v5411_v61, %v11944_v28  ;;  %v5422_v19 = vadd.f32 %v5414_v4, %v11950_v44  ;;  %v5421_v52 = vadd.f32 %v5413_v42, %v11952_v50  ;;  %v5580_v4 = vld [vmem:[#allocation3 + $0xb8] sm:$0xff] }
0x1b67   :  { %v5424_v8 = vadd.f32 %v5416_v2, %v11958_v13  ;;  %v5423_v26 = vadd.f32 %v5415_v30, %v11960_v24  ;;  %v5426_v45 = vadd.f32 %v5418_v60, %v11988_v43  ;;  %v5425_v9 = vadd.f32 %v5417_v58, %v11964_v21 }
0x1b68   :  { %v5428_v59 = vmax.f32 %v5420_v34, 0.0  ;;  %v5427_v48 = vmax.f32 %v5419_v20, 0.0  ;;  %v5430_v0 = vmax.f32 %v5422_v19, 0.0  ;;  %v5429_v14 = vmax.f32 %v5421_v52, 0.0 }
0x1b69   :  { %v5432_v46 = vmax.f32 %v5424_v8, 0.0  ;;  %v5431_v35 = vmax.f32 %v5423_v26, 0.0  ;;  %v5434_v17 = vmax.f32 %v5426_v45, 0.0  ;;  %v5433_v28 = vmax.f32 %v5425_v9, 0.0 }
0x1b6a   :  { %5493 = vrot.lane.b32.xlu1 %v5428_v59, %s8743_s23  ;;  %5491 = vrot.lane.b32.xlu0 %v5427_v48, %s8743_s23  ;;  %v5460_v44 = vrot.slane %v5428_v59, 1  ;;  %v5461_v50 = vrot.slane %v5429_v14, 1  ;;  %v5459_v13 = vrot.slane %v5427_v48, 1  ;;  %v5462_v24 = vrot.slane %v5430_v0, 1 }
0x1b6b   :  { %v5463_v57 = vrot.slane %v5431_v35, 1  ;;  %v5442_v43 = vrot.slane %v5434_v17, 7  ;;  %v5466_v63 = vrot.slane %v5434_v17, 1  ;;  %v5464_v21 = vrot.slane %v5432_v46, 1 }
0x1b6c   :  { %v5472_v25 = vsel %vm175_vm0, %v5460_v44, %v5461_v50  ;;  %v5473_v53 = vsel %vm175_vm0, %v5459_v13, %v5460_v44  ;;  %v5465_v3 = vrot.slane %v5433_v28, 1  ;;  %v5471_v29 = vsel %vm175_vm0, %v5461_v50, %v5462_v24 }
0x1b6d   :  { %v5470_v38 = vsel %vm175_vm0, %v5462_v24, %v5463_v57  ;;  %v5469_v6 = vsel %vm175_vm0, %v5463_v57, %v5464_v21  ;;  %v5474_v32 = vsel %vm175_vm0, %v5466_v63, %v5459_v13  ;;  %v5435_v7 = vrot.slane %v5427_v48, 7 }
0x1b6e   :  { %5497 = vrot.lane.b32.xlu1 %v5430_v0, %s8743_s23  ;;  %5495 = vrot.lane.b32.xlu0 %v5429_v14, %s8743_s23  ;;  %v5468_v51 = vsel %vm175_vm0, %v5464_v21, %v5465_v3  ;;  %v5467_v31 = vsel %vm175_vm0, %v5465_v3, %v5466_v63  ;;  %v5436_v22 = vrot.slane %v5428_v59, 7  ;;  %v5437_v49 = vrot.slane %v5429_v14, 7 }
0x1b6f   :  { %v5450_v27 = vsel %vm110_vm2, %v5442_v43, %v5435_v7  ;;  %v5438_v55 = vrot.slane %v5430_v0, 7  ;;  %v5439_v54 = vrot.slane %v5431_v35, 7  ;;  %v5440_v39 = vrot.slane %v5432_v46, 7 }
0x1b70   :  { %v5441_v11 = vrot.slane %v5433_v28, 7  ;;  %v5449_v56 = vsel %vm110_vm2, %v5435_v7, %v5436_v22  ;;  %v5448_v47 = vsel %vm110_vm2, %v5436_v22, %v5437_v49  ;;  %v8504_v15 = vpack.c.bf16 %v5579_v41, %v5578_v36 }
0x1b71   :  { %v5447_v40 = vsel %vm110_vm2, %v5437_v49, %v5438_v55  ;;  %v5445_v12 = vsel %vm110_vm2, %v5439_v54, %v5440_v39  ;;  %v5446_v18 = vsel %vm110_vm2, %v5438_v55, %v5439_v54  ;;  %v5478_v42 = vsel %vm11746_vm3, 0.0, %v5470_v38 }
0x1b72   :  { %5501 = vrot.lane.b32.xlu1 %v5432_v46, %s8743_s23  ;;  %5499 = vrot.lane.b32.xlu0 %v5431_v35, %s8743_s23  ;;  %v5443_v23 = vsel %vm110_vm2, %v5441_v11, %v5442_v43  ;;  %v5444_v61 = vsel %vm110_vm2, %v5440_v39, %v5441_v11  ;;  %v5482_v2 = vsel %vm11759_vm4, 0.0, %v5474_v32  ;;  %v5451_v8 = vsel %vm11784_vm5, 0.0, %v5450_v27 }
0x1b73   :  { %8505 = vmatprep.subr.bf16.mxu1 %v8504_v15 }
0x1b74   :  { %8507 = vmatpush3.bf16.msra.mxu1 %v8504_v15 }
0x1b75   :  { %8271 = vmatprep.subr.mxu1 %v5580_v4 }
0x1b76   :  { %5505 = vrot.lane.b32.xlu1 %v5434_v17, %s8743_s23  ;;  %5503 = vrot.lane.b32.xlu0 %v5433_v28, %s8743_s23  ;;  %v5455_v28 = vsel %vm11799_vm7, 0.0, %v5446_v18  ;;  %s8751_s23 = smov 112  }
0x1b78   :  { %8272 = vmatpush3.msra.mxu1 %v5580_v4 }
0x1b7a   :  { %5525 = vrot.lane.b32.xlu1 %v5472_v25, %s8750_s5  ;;  %5523 = vrot.lane.b32.xlu0 %v5473_v53, %s8750_s5 }
0x1b7e   :  { %5533 = vrot.lane.b32.xlu1 %v5468_v51, %s8750_s5  ;;  %5527 = vrot.lane.b32.xlu0 %v5471_v29, %s8750_s5 }
0x1b82   :  { %5529 = vrot.lane.b32.xlu1 %v5478_v42, %s8750_s5  ;;  %5531 = vrot.lane.b32.xlu0 %v5469_v6, %s8750_s5 }
0x1b86   :  { %5537 = vrot.lane.b32.xlu1 %v5482_v2, %s8750_s5  ;;  %5535 = vrot.lane.b32.xlu0 %v5467_v31, %s8750_s5 }
0x1bdc   :  { %v5494_v30 = vpop.permute.xlu1 %5493  ;;  %v5492_v60 = vpop.permute.xlu0 %5491 }
0x1bdd   :  { %v5548_v26 = vsel %vm666_vm11, %v5449_v56, %v5494_v30  ;;  %v5547_v62 = vsel %vm666_vm11, %v5451_v8, %v5492_v60 }
0x1be0   :  { %v5498_v58 = vpop.permute.xlu1 %5497  ;;  %v5496_v34 = vpop.permute.xlu0 %5495 }
0x1be1   :  { %v5549_v0 = vsel %vm666_vm11, %v5448_v47, %v5496_v34  ;;  %v5550_v44 = vsel %vm666_vm11, %v5447_v40, %v5498_v58 }
0x1be4   :  { %v5502_v20 = vpop.permute.xlu1 %5501  ;;  %v5500_v19 = vpop.permute.xlu0 %5499 }
0x1be5   :  { %v5552_v14 = vsel %vm666_vm11, %v5445_v12, %v5502_v20  ;;  %v5551_v50 = vsel %vm666_vm11, %v5455_v28, %v5500_v19  ;;  %v5740_v28 = vld [vmem:[%s13015_s2 + $0x14] sm:$0x1] }
0x1be8   :  { %v5506_v52 = vpop.permute.xlu1 %5505  ;;  %v5504_v5 = vpop.permute.xlu0 %5503 }
0x1be9   :  { %v5554_v33 = vsel %vm666_vm11, %v5443_v23, %v5506_v52  ;;  %v5553_v21 = vsel %vm666_vm11, %v5444_v61, %v5504_v5 }
0x1bec   :  { %v5526_v45 = vpop.permute.xlu1 %5525  ;;  %v5524_v9 = vpop.permute.xlu0 %5523 }
0x1bed   :  { %v5556_v59 = vsel %vm4038_vm1, %v5548_v26, %v5526_v45  ;;  %v5555_v48 = vsel %vm4038_vm1, %v5547_v62, %v5524_v9  ;;  %v5831_v9 = vld [vmem:[#allocation3 + $0xc0] sm:$0xff] }
0x1bee   :  { %5564 = vst.msk [vmem:[#allocation2 + $0x8] sm:$0xff] %vm4266_vm6, %v5556_v59  ;;  %5563 = vst.msk [vmem:[#allocation2] sm:$0xff] %vm4266_vm6, %v5555_v48  ;;  %v5832_v59 = vld [vmem:[#allocation3 + $0xc8] sm:$0xff] }
0x1bef   :  { %v8508_v48 = vpack.c.bf16 %v5832_v59, %v5831_v9 }
0x1bf0   :  { %v5534_v37 = vpop.permute.xlu1 %5533  ;;  %v5528_v46 = vpop.permute.xlu0 %5527 }
0x1bf1   :  { %v5560_v35 = vsel %vm4038_vm1, %v5552_v14, %v5534_v37  ;;  %v5557_v17 = vsel %vm4038_vm1, %v5549_v0, %v5528_v46  ;;  %8509 = vmatprep.subr.bf16.mxu1 %v8508_v48  ;;  %v5724_v0 = vld [vmem:[%s13015_s2 + $0x13] sm:$0x1]  ;;  %v5833_v37 = vld [vmem:[#allocation3 + $0xd0] sm:$0xff]  ;;  %v5834_v46 = vld [vmem:[#allocation3 + $0xd8] sm:$0xff] }
0x1bf2   :  { %5568 = vst.msk [vmem:[#allocation2 + $0x28] sm:$0xff] %vm4266_vm6, %v5560_v35  ;;  %5565 = vst.msk [vmem:[#allocation2 + $0x10] sm:$0xff] %vm4266_vm6, %v5557_v17  ;;  %v8512_v17 = vpack.c.bf16 %v5834_v46, %v5833_v37 }
0x1bf4   :  { %v5530_v13 = vpop.permute.xlu1 %5529  ;;  %v5532_v24 = vpop.permute.xlu0 %5531 }
0x1bf5   :  { %v5558_v57 = vsel %vm4038_vm1, %v5550_v44, %v5530_v13  ;;  %v5559_v43 = vsel %vm4038_vm1, %v5551_v50, %v5532_v24  ;;  %v12386_v63 = vld [vmem:[#allocation2] ss:$2 sm:$0xff] }
0x1bf6   :  { %5566 = vst.msk [vmem:[#allocation2 + $0x18] sm:$0xff] %vm4266_vm6, %v5558_v57  ;;  %5567 = vst.msk [vmem:[#allocation2 + $0x20] sm:$0xff] %vm4266_vm6, %v5559_v43  ;;  %8273 = vmatprep.mubr.msk.f32.mxu1 %vm4266_vm6, %v12386_v63  ;;  %v5835_v13 = vld [vmem:[#allocation3 + $0xe0] sm:$0xff]  ;;  %v5836_v24 = vld [vmem:[#allocation3 + $0xe8] sm:$0xff] }
0x1bf8   :  { %v5538_v25 = vpop.permute.xlu1 %5537  ;;  %v5536_v53 = vpop.permute.xlu0 %5535 }
0x1bf9   :  { %v5562_v3 = vsel %vm4038_vm1, %v5554_v33, %v5538_v25  ;;  %v5561_v29 = vsel %vm4038_vm1, %v5553_v21, %v5536_v53  ;;  %v8516_v33 = vpack.c.bf16 %v5836_v24, %v5835_v13 }
0x1bfa   :  { %5570 = vst.msk [vmem:[#allocation2 + $0x38] sm:$0xff] %vm4266_vm6, %v5562_v3  ;;  %5569 = vst.msk [vmem:[#allocation2 + $0x30] sm:$0xff] %vm4266_vm6, %v5561_v29  ;;  %v12445_v29 = vadd.s32 8, %v8793_v1 }
0x1bfd   :  { %v12398_v38 = vld [vmem:[#allocation2 + $0x10] ss:$2 sm:$0xff]  ;;  %v12400_v6 = vld [vmem:[#allocation2 + $0x20] ss:$2 sm:$0xff] }
0x1bfe   :  { %8274 = vmatmul.mubr.msk.f32.vlgmr.msra.gmra.mrb[56].mxu1 %vm4266_vm6, %v12398_v38 }
0x1bff   :  { %8276 = vmatprep.mubr.msk.f32.mxu1 %vm4266_vm6, %v12400_v6  ;;  %8511 = vmatpush3.bf16.msra.mxu1 %v8508_v48 }
0x1c00   :  { %8513 = vmatprep.subr.bf16.mxu1 %v8512_v17 }
0x1c01   :  { %v12406_v32 = vld [vmem:[#allocation2 + $0x30] ss:$2 sm:$0xff] }
0x1c02   :  { %8277 = vmatmul.mubr.msk.f32.gmra.mrb[58].mxu1 %vm4266_vm6, %v12406_v32  ;;  %vm6871_vm6 = vcmask 785408  }
0x1c03   :  { %8515 = vmatpush3.bf16.msra.mxu1 %v8512_v17 }
0x1c04   :  { %8517 = vmatprep.subr.bf16.mxu1 %v8516_v33 }
0x1c07   :  { %8519 = vmatpush3.bf16.msra.mxu1 %v8516_v33 }
0x1cd1   :  { %v12410_v7 = vpop.f32.mrb[56].mxu1 }
0x1cd2   :  { %v5679_v51 = vmul.f32 %v12410_v7, %v12410_v7  ;;  %v12414_v31 = vpop.f32.mrb[57].mxu1 }
0x1cd3   :  { %v5678_v36 = vmul.f32 %v12414_v31, %v12414_v31 }
0x1cd4   :  { %5688 = vrot.lane.b32.xlu1 %v5679_v51, %s8750_s5 }
0x1cd5   :  { %5686 = vrot.lane.b32.xlu0 %v5678_v36, %s8750_s5  ;;  %v8278_v41 = vpop.f32.mrb[58].mxu1 }
0x1cd6   :  { %v5681_v22 = vmul.f32 %v8278_v41, %v8278_v41  ;;  %v5669_v27 = vpop.f32.mrb[59].mxu1 }
0x1cd7   :  { %v5680_v49 = vmul.f32 %v5669_v27, %v5669_v27 }
0x1cd8   :  { %5692 = vrot.lane.b32.xlu1 %v5681_v22, %s8750_s5 }
0x1cd9   :  { %5690 = vrot.lane.b32.xlu0 %v5680_v49, %s8750_s5 }
0x1d46   :  { %v5689_v55 = vpop.permute.xlu1 %5688 }
0x1d47   :  { %v5699_v54 = vsel %vm4038_vm1, %v12410_v7, %v5689_v55  ;;  %v5687_v39 = vpop.permute.xlu0 %5686 }
0x1d48   :  { %v5704_v11 = vsel %vm5702_vm8, %v5699_v54, 0.0  ;;  %v5698_v56 = vsel %vm4038_vm1, %v12414_v31, %v5687_v39 }
0x1d49   :  { %v5703_v40 = vsel %vm5702_vm8, %v5698_v56, 0.0 }
0x1d4a   :  { %v5705_v47 = vadd.f32 %v5704_v11, %v5703_v40  ;;  %v5693_v15 = vpop.permute.xlu1 %5692  ;;  %v5756_v11 = vand.u32 15, %v12445_v29 }
0x1d4b   :  { %v5691_v12 = vpop.permute.xlu0 %5690  ;;  %v5701_v18 = vsel %vm4038_vm1, %v8278_v41, %v5693_v15 }
0x1d4c   :  { %v5700_v23 = vsel %vm4038_vm1, %v5669_v27, %v5691_v12  ;;  %v5708_v42 = vsel %vm5702_vm8, %v5701_v18, 0.0  ;;  %v6006_v18 = vld [vmem:[#allocation3 + $0xf0] sm:$0xff]  ;;  %vm12464_vm9 = vcmp.eq.s32.totalorder %v5756_v11, 15 }
0x1d4d   :  { %v5706_v61 = vsel %vm5702_vm8, %v5700_v23, 0.0  ;;  %8297 = vmatprep.subr.mxu0 %v6006_v18 }
0x1d4e   :  { %v5707_v4 = vadd.f32 %v5706_v61, %v5705_v47  ;;  %8298 = vmatpush3.msra.mxu0 %v6006_v18 }
0x1d50   :  { %v5709_v2 = vadd.f32 %v5708_v42, %v5707_v4 }
0x1d52   :  { %v5710_v30 = vrot.slane %v5709_v2, 4 }
0x1d54   :  { %v5711_v60 = vadd.f32 %v5710_v30, %v5709_v2 }
0x1d56   :  { %v5712_v58 = vrot.slane %v5711_v60, 2 }
0x1d58   :  { %v5713_v34 = vadd.f32 %v5712_v58, %v5711_v60  ;;  %v5758_v58 = vand.u32 15, %v11723_v10 }
0x1d5a   :  { %v5714_v20 = vrot.slane %v5713_v34, 1  ;;  %vm12477_vm10 = vcmp.eq.s32.totalorder %v5758_v58, 15 }
0x1d5c   :  { %v5715_v19 = vadd.f32 %v5714_v20, %v5713_v34 }
0x1d5e   :  { %v5717_v52 = vmul.f32 0.03125, %v5715_v19 }
0x1d60   :  { %v5718_v5 = vmul.f32 %v5717_v52, %v5717_v52 }
0x1d62   :  { %5720 = vrot.lane.b32.xlu0 %v5718_v5, %s8750_s5 }
0x1dd4   :  { %v5721_v8 = vpop.permute.xlu0 %5720 }
0x1dd5   :  { %v5723_v26 = vsub.f32 %v5717_v52, %v5721_v8  ;;  %v5755_v8 = vand.u32 15, %v8793_v1 }
0x1dd7   :  { %v5725_v62 = vadd.f32 1e-05, %v5723_v26  ;;  %vm12495_vm12 = vcmp.eq.s32.totalorder %v5755_v8, 0 }
0x1dd9   :  { %8677 = vrsqrt.f32 %v5725_v62  ;;  %v48_v62 = vadd.s32 16, %v8793_v1 }
0x1ddb   :  { %v5757_v9 = vand.u32 15, %v48_v62 }
0x1ddd   :  { %vm12503_vm14 = vcmp.eq.s32.totalorder %v5757_v9, 0 }
0x1de3   :  { %v8678_v45 = vpop.eup %8677 }
0x1de4   :  { %5728 = vrot.lane.b32.xlu1 %v8678_v45, %s8751_s23 }
0x1e56   :  { %v5729_v14 = vpop.permute.xlu1 %5728 }
0x1e57   :  { %v5731_v35 = vmul.f32 %v5729_v14, %v5724_v0 }
0x1e59   :  { %v5735_v44 = vrot.slane %v5731_v35, %v9227_v16  ;;  %v5741_v50 = vmul.f32 %v5731_v35, %v5717_v52 }
0x1e5b   :  { %v5742_v57 = vsub.f32 %v5740_v28, %v5741_v50  ;;  %v5737_v43 = vmul.f32 %v12410_v7, %v5735_v44  ;;  %v5736_v25 = vmul.f32 %v5735_v44, %v12414_v31  ;;  %v5739_v53 = vmul.f32 %v8278_v41, %v5735_v44 }
0x1e5c   :  { %v5738_v3 = vmul.f32 %v5735_v44, %v5669_v27 }
0x1e5d   :  { %v5746_v21 = vrot.slane %v5742_v57, %v9227_v16 }
0x1e5f   :  { %v5748_v51 = vadd.f32 %v5746_v21, %v5737_v43  ;;  %v5747_v36 = vadd.f32 %v5746_v21, %v5736_v25  ;;  %v5750_v22 = vadd.f32 %v5746_v21, %v5739_v53  ;;  %v5749_v49 = vadd.f32 %v5746_v21, %v5738_v3 }
0x1e61   :  { %v5752_v55 = vmax.f32 %v5748_v51, 0.0  ;;  %v5751_v54 = vmax.f32 %v5747_v36, 0.0  ;;  %v5754_v39 = vmax.f32 %v5750_v22, 0.0  ;;  %v5753_v7 = vmax.f32 %v5749_v49, 0.0 }
0x1e63   :  { %5797 = vrot.lane.b32.xlu1 %v5752_v55, %s8750_s5  ;;  %5795 = vrot.lane.b32.xlu0 %v5751_v54, %s8750_s5  ;;  %v5780_v31 = vrot.slane %v5752_v55, 1  ;;  %v5781_v41 = vrot.slane %v5753_v7, 1  ;;  %v5779_v27 = vrot.slane %v5751_v54, 1  ;;  %v5782_v56 = vrot.slane %v5754_v39, 1 }
0x1e64   :  { %v5763_v40 = vrot.slane %v5751_v54, 7  ;;  %v5764_v47 = vrot.slane %v5752_v55, 7  ;;  %v5766_v15 = vrot.slane %v5754_v39, 7  ;;  %v5765_v12 = vrot.slane %v5753_v7, 7 }
0x1e65   :  { %v5784_v23 = vsel %vm175_vm0, %v5780_v31, %v5781_v41  ;;  %v5785_v61 = vsel %vm175_vm0, %v5779_v27, %v5780_v31  ;;  %v5786_v4 = vsel %vm175_vm0, %v5782_v56, %v5779_v27  ;;  %v5783_v42 = vsel %vm175_vm0, %v5781_v41, %v5782_v56 }
0x1e66   :  { %v5769_v2 = vsel %vm110_vm2, %v5763_v40, %v5764_v47  ;;  %v5770_v30 = vsel %vm110_vm2, %v5766_v15, %v5763_v40  ;;  %v5767_v34 = vsel %vm110_vm2, %v5765_v12, %v5766_v15  ;;  %v5768_v20 = vsel %vm110_vm2, %v5764_v47, %v5765_v12 }
0x1e67   :  { %5801 = vrot.lane.b32.xlu1 %v5754_v39, %s8750_s5  ;;  %5799 = vrot.lane.b32.xlu0 %v5753_v7, %s8750_s5  ;;  %v5788_v19 = vsel %vm12464_vm9, 0.0, %v5784_v23  ;;  %v5790_v10 = vsel %vm12477_vm10, 0.0, %v5786_v4  ;;  %v5773_v35 = vsel %vm12503_vm14, 0.0, %v5768_v20 }
0x1e6b   :  { %5813 = vrot.lane.b32.xlu1 %v5788_v19, %s8752_s22  ;;  %5811 = vrot.lane.b32.xlu0 %v5785_v61, %s8752_s22 }
0x1e6f   :  { %5817 = vrot.lane.b32.xlu1 %v5790_v10, %s8752_s22  ;;  %5815 = vrot.lane.b32.xlu0 %v5783_v42, %s8752_s22 }
0x1e73   :  { %6014 = vrot.lane.b32.xlu1 %v12398_v38, %s8749_s27  ;;  %6012 = vrot.lane.b32.xlu0 %v12386_v63, %s8749_s27  ;;  %v5771_v63 = vsel %vm12495_vm12, 0.0, %v5770_v30 }
0x1e77   :  { %6018 = vrot.lane.b32.xlu1 %v12406_v32, %s8749_s27  ;;  %6016 = vrot.lane.b32.xlu0 %v12400_v6, %s8749_s27 }
0x1ed5   :  { %v5798_v5 = vpop.permute.xlu1 %5797  ;;  %v5796_v26 = vpop.permute.xlu0 %5795 }
0x1ed6   :  { %v5824_v32 = vsel %vm4038_vm1, %v5769_v2, %v5798_v5  ;;  %v5823_v6 = vsel %vm4038_vm1, %v5771_v63, %v5796_v26  ;;  %v6185_v63 = vld [vmem:[#allocation3 + $0xf8] sm:$0xff] }
0x1ed9   :  { %v5802_v38 = vpop.permute.xlu1 %5801  ;;  %v5800_v59 = vpop.permute.xlu0 %5799 }
0x1eda   :  { %v5826_v17 = vsel %vm4038_vm1, %v5767_v34, %v5802_v38  ;;  %v5825_v28 = vsel %vm4038_vm1, %v5773_v35, %v5800_v59 }
0x1edd   :  { %v5814_v0 = vpop.permute.xlu1 %5813  ;;  %v5812_v14 = vpop.permute.xlu0 %5811 }
0x1ede   :  { %v5828_v37 = vsel %vm5702_vm8, %v5824_v32, %v5814_v0  ;;  %v5827_v46 = vsel %vm5702_vm8, %v5823_v6, %v5812_v14  ;;  %v6186_v32 = vld [vmem:[#allocation3 + $0x100] sm:$0xff]  ;;  %v5979_v0 = vld [vmem:[%s13015_s2 + $0x15] sm:$0x1] }
0x1edf   :  { %8291 = vmatprep.mubr.msk.f32.mxu1 %vm5837_vm13, %v5827_v46  ;;  %v8520_v6 = vpack.c.bf16 %v6186_v32, %v6185_v63  ;;  %v5995_v46 = vld [vmem:[%s13015_s2 + $0x16] sm:$0x1] }
0x1ee0   :  { %8292 = vmatmul.mubr.msk.f32.vlgmr.msra.gmra.mrb[60].mxu1 %vm5837_vm13, %v5828_v37 }
0x1ee1   :  { %v5818_v44 = vpop.permute.xlu1 %5817  ;;  %v5816_v50 = vpop.permute.xlu0 %5815  ;;  %8521 = vmatprep.subr.bf16.mxu1 %v8520_v6 }
0x1ee2   :  { %v5830_v13 = vsel %vm5702_vm8, %v5826_v17, %v5818_v44  ;;  %v5829_v24 = vsel %vm5702_vm8, %v5825_v28, %v5816_v50  ;;  %8523 = vmatpush3.bf16.msra.mxu1 %v8520_v6  ;;  %v6187_v28 = vld [vmem:[#allocation3 + $0x108] sm:$0xff]  ;;  %v6188_v44 = vld [vmem:[#allocation3 + $0x110] sm:$0xff] }
0x1ee3   :  { %8294 = vmatprep.mubr.msk.f32.mxu1 %vm5837_vm13, %v5829_v24  ;;  %v8524_v50 = vpack.c.bf16 %v6188_v44, %v6187_v28 }
0x1ee4   :  { %8295 = vmatmul.mubr.msk.f32.gmra.mrb[62].mxu1 %vm5837_vm13, %v5830_v13  ;;  %v7773_v13 = vld [vmem:[%s13015_s2 + $0x17] ss:$0 sm:$0xff] }
0x1ee5   :  { %v6015_v57 = vpop.permute.xlu1 %6014  ;;  %v6013_v43 = vpop.permute.xlu0 %6012  ;;  %8525 = vmatprep.subr.bf16.mxu1 %v8524_v50 }
0x1ee6   :  { %8299 = vmatprep.mubr.msk.f32.mxu0 %vm666_vm11, %v6013_v43  ;;  %8527 = vmatpush3.bf16.msra.mxu1 %v8524_v50 }
0x1ee7   :  { %8300 = vmatmul.mubr.msk.f32.vlgmr.msra.gmra.mrb[64].mxu0 %vm666_vm11, %v6015_v57 }
0x1ee9   :  { %v6019_v33 = vpop.permute.xlu1 %6018  ;;  %v6017_v21 = vpop.permute.xlu0 %6016 }
0x1eea   :  { %8302 = vmatprep.mubr.msk.f32.mxu0 %vm666_vm11, %v6017_v21  ;;  %v6190_v21 = vld [vmem:[#allocation3 + $0x120] sm:$0xff] }
0x1eeb   :  { %8303 = vmatmul.mubr.msk.f32.gmra.mrb[66].mxu0 %vm666_vm11, %v6019_v33  ;;  %v6189_v33 = vld [vmem:[#allocation3 + $0x118] sm:$0xff]  ;;  %vm6778_vm11 = vcmask 523264  }
0x1fb3   :  { %v12523_v25 = vpop.f32.mrb[60].mxu1 }
0x1fb4   :  { %v5936_v53 = vmul.f32 %v12523_v25, %v12523_v25  ;;  %v5916_v3 = vpop.f32.mrb[61].mxu1 }
0x1fb5   :  { %v5935_v51 = vmul.f32 %v5916_v3, %v5916_v3 }
0x1fb6   :  { %5945 = vrot.lane.b32.xlu1 %v5936_v53, %s8750_s5 }
0x1fb7   :  { %5943 = vrot.lane.b32.xlu0 %v5935_v51, %s8750_s5  ;;  %v12529_v36 = vpop.f32.mrb[62].mxu1 }
0x1fb8   :  { %v5938_v22 = vmul.f32 %v12529_v36, %v12529_v36  ;;  %v5926_v49 = vpop.f32.mrb[63].mxu1 }
0x1fb9   :  { %v5937_v55 = vmul.f32 %v5926_v49, %v5926_v49 }
0x1fba   :  { %v8301_v54 = vpop.f32.mrb[64].mxu0  ;;  %5949 = vrot.lane.b32.xlu1 %v5938_v22, %s8750_s5 }
0x1fbb   :  { %v6094_v39 = vpop.f32.mrb[65].mxu0  ;;  %5947 = vrot.lane.b32.xlu0 %v5937_v55, %s8750_s5  ;;  %v8528_v55 = vpack.c.bf16 %v6190_v21, %v6189_v33 }
0x1fbd   :  { %8529 = vmatprep.subr.bf16.mxu1 %v8528_v55 }
0x1fbe   :  { %v8304_v7 = vpop.f32.mrb[66].mxu0  ;;  %8531 = vmatpush3.bf16.msra.mxu1 %v8528_v55 }
0x1fbf   :  { %v6104_v11 = vpop.f32.mrb[67].mxu0 }
0x2028   :  { %v5946_v31 = vpop.permute.xlu1 %5945 }
0x2029   :  { %v5956_v41 = vsel %vm4038_vm1, %v12523_v25, %v5946_v31  ;;  %v5944_v27 = vpop.permute.xlu0 %5943  ;;  %v6100_v31 = vadd.f32 %v8301_v54, %v7773_v13 }
0x202a   :  { %v5960_v56 = vsel %vm5702_vm8, %v5956_v41, 0.0  ;;  %v5955_v40 = vsel %vm4038_vm1, %v5916_v3, %v5944_v27  ;;  %v6095_v41 = vadd.f32 %v7773_v13, %v6094_v39  ;;  %v6110_v27 = vadd.f32 %v8304_v7, %v7773_v13 }
0x202b   :  { %v5959_v47 = vsel %vm5702_vm8, %v5955_v40, 0.0 }
0x202c   :  { %v5961_v15 = vadd.f32 %v5960_v56, %v5959_v47  ;;  %v5950_v12 = vpop.permute.xlu1 %5949  ;;  %v6105_v56 = vadd.f32 %v7773_v13, %v6104_v11 }
0x202d   :  { %v5948_v18 = vpop.permute.xlu0 %5947  ;;  %v5958_v23 = vsel %vm4038_vm1, %v12529_v36, %v5950_v12 }
0x202e   :  { %v5957_v61 = vsel %vm4038_vm1, %v5926_v49, %v5948_v18  ;;  %v5964_v2 = vsel %vm5702_vm8, %v5958_v23, 0.0 }
0x202f   :  { %v5962_v4 = vsel %vm5702_vm8, %v5957_v61, 0.0 }
0x2030   :  { %v5963_v42 = vadd.f32 %v5962_v4, %v5961_v15 }
0x2032   :  { %v5965_v30 = vadd.f32 %v5964_v2, %v5963_v42 }
0x2034   :  { %v5966_v58 = vrot.slane %v5965_v30, 4 }
0x2036   :  { %v5967_v34 = vadd.f32 %v5966_v58, %v5965_v30 }
0x2038   :  { %v5968_v20 = vrot.slane %v5967_v34, 2 }
0x203a   :  { %v5969_v19 = vadd.f32 %v5968_v20, %v5967_v34 }
0x203c   :  { %v5970_v10 = vrot.slane %v5969_v19, 1 }
0x203e   :  { %v5971_v5 = vadd.f32 %v5970_v10, %v5969_v19 }
0x2040   :  { %v5972_v8 = vmul.f32 0.03125, %v5971_v5 }
0x2042   :  { %v5973_v26 = vmul.f32 %v5972_v8, %v5972_v8 }
0x2044   :  { %5975 = vrot.lane.b32.xlu0 %v5973_v26, %s8750_s5 }
0x20b6   :  { %v5976_v62 = vpop.permute.xlu0 %5975 }
0x20b7   :  { %v5978_v38 = vsub.f32 %v5972_v8, %v5976_v62 }
0x20b9   :  { %v5980_v9 = vadd.f32 1e-05, %v5978_v38 }
0x20bb   :  { %8679 = vrsqrt.f32 %v5980_v9 }
0x20c5   :  { %v8680_v59 = vpop.eup %8679 }
0x20c6   :  { %5983 = vrot.lane.b32.xlu1 %v8680_v59, %s8751_s23 }
0x2138   :  { %v5984_v14 = vpop.permute.xlu1 %5983 }
0x2139   :  { %v5986_v37 = vmul.f32 %v5984_v14, %v5979_v0 }
0x213b   :  { %v5990_v35 = vrot.slane %v5986_v37, %v9227_v16  ;;  %v5996_v17 = vmul.f32 %v5986_v37, %v5972_v8 }
0x213d   :  { %v5997_v24 = vsub.f32 %v5995_v46, %v5996_v17  ;;  %v5991_v57 = vmul.f32 %v5990_v35, %v5916_v3  ;;  %v5992_v43 = vmul.f32 %v12523_v25, %v5990_v35  ;;  %v5993_v53 = vmul.f32 %v5990_v35, %v5926_v49 }
0x213e   :  { %v5994_v51 = vmul.f32 %v12529_v36, %v5990_v35 }
0x213f   :  { %v6001_v22 = vrot.slane %v5997_v24, %v9227_v16 }
0x2141   :  { %v6003_v40 = vadd.f32 %v6001_v22, %v5992_v43  ;;  %v6002_v47 = vadd.f32 %v6001_v22, %v5991_v57  ;;  %v6005_v15 = vadd.f32 %v6001_v22, %v5994_v51  ;;  %v6004_v12 = vadd.f32 %v6001_v22, %v5993_v53 }
0x2143   :  { %v6114_v25 = vadd.f32 %v6100_v31, %v6003_v40  ;;  %v6113_v3 = vadd.f32 %v6095_v41, %v6002_v47  ;;  %v6116_v18 = vadd.f32 %v6110_v27, %v6005_v15  ;;  %v6115_v23 = vadd.f32 %v6105_v56, %v6004_v12 }
0x2145   :  { %v12560_v49 = vmax.f32 %v6114_v25, 0.0  ;;  %v12562_v36 = vmax.f32 %v6113_v3, 0.0  ;;  %v12564_v61 = vmax.f32 %v6115_v23, 0.0  ;;  %v12570_v54 = vmax.f32 %v6116_v18, 0.0 }
0x2147   :  { %6151 = vrot.lane.b32.xlu1 %v12560_v49, %s8750_s5  ;;  %6149 = vrot.lane.b32.xlu0 %v12562_v36, %s8750_s5  ;;  %v6134_v39 = vrot.slane %v12560_v49, 1  ;;  %v6135_v7 = vrot.slane %v12564_v61, 1  ;;  %v6133_v11 = vrot.slane %v12562_v36, 1  ;;  %v6136_v42 = vrot.slane %v12570_v54, 1 }
0x2148   :  { %v6121_v10 = vrot.slane %v12562_v36, 7  ;;  %v6124_v5 = vrot.slane %v12570_v54, 7  ;;  %v6122_v26 = vrot.slane %v12560_v49, 7  ;;  %v6123_v38 = vrot.slane %v12564_v61, 7 }
0x2149   :  { %v6138_v4 = vsel %vm175_vm0, %v6134_v39, %v6135_v7  ;;  %v6139_v30 = vsel %vm175_vm0, %v6133_v11, %v6134_v39  ;;  %v6140_v58 = vsel %vm175_vm0, %v6136_v42, %v6133_v11  ;;  %v6137_v20 = vsel %vm175_vm0, %v6135_v7, %v6136_v42 }
0x214a   :  { %v6142_v2 = vsel %vm12464_vm9, 0.0, %v6138_v4  ;;  %v6144_v34 = vsel %vm12477_vm10, 0.0, %v6140_v58  ;;  %v6128_v62 = vsel %vm110_vm2, %v6124_v5, %v6121_v10  ;;  %v6127_v63 = vsel %vm110_vm2, %v6121_v10, %v6122_v26 }
0x214b   :  { %6155 = vrot.lane.b32.xlu1 %v12570_v54, %s8750_s5  ;;  %6153 = vrot.lane.b32.xlu0 %v12564_v61, %s8750_s5  ;;  %v6129_v32 = vsel %vm12495_vm12, 0.0, %v6128_v62  ;;  %v6126_v14 = vsel %vm110_vm2, %v6122_v26, %v6123_v38  ;;  %v6125_v28 = vsel %vm110_vm2, %v6123_v38, %v6124_v5 }
0x214c   :  { %v6131_v44 = vsel %vm12503_vm14, 0.0, %v6126_v14  ;;  %v6429_v14 = vld [vmem:[#allocation3 + $0x138] sm:$0xff] }
0x214f   :  { %6167 = vrot.lane.b32.xlu1 %v6142_v2, %s8752_s22  ;;  %6165 = vrot.lane.b32.xlu0 %v6139_v30, %s8752_s22 }
0x2153   :  { %6171 = vrot.lane.b32.xlu1 %v6144_v34, %s8752_s22  ;;  %6169 = vrot.lane.b32.xlu0 %v6137_v20, %s8752_s22 }
0x21b9   :  { %v6152_v19 = vpop.permute.xlu1 %6151  ;;  %v6150_v8 = vpop.permute.xlu0 %6149 }
0x21ba   :  { %v6178_v6 = vsel %vm4038_vm1, %v6127_v63, %v6152_v19  ;;  %v6177_v0 = vsel %vm4038_vm1, %v6129_v32, %v6150_v8  ;;  %v6428_v63 = vld [vmem:[#allocation3 + $0x130] sm:$0xff] }
0x21bd   :  { %v6156_v9 = vpop.permute.xlu1 %6155  ;;  %v6154_v59 = vpop.permute.xlu0 %6153 }
0x21be   :  { %v6180_v50 = vsel %vm4038_vm1, %v6125_v28, %v6156_v9  ;;  %v6179_v13 = vsel %vm4038_vm1, %v6131_v44, %v6154_v59  ;;  %v6427_v59 = vld [vmem:[#allocation3 + $0x128] sm:$0xff] }
0x21bf   :  { %v8532_v32 = vpack.c.bf16 %v6428_v63, %v6427_v59 }
0x21c1   :  { %v6168_v37 = vpop.permute.xlu1 %6167  ;;  %v6166_v46 = vpop.permute.xlu0 %6165  ;;  %8533 = vmatprep.subr.bf16.mxu0 %v8532_v32 }
0x21c2   :  { %v6182_v35 = vsel %vm5702_vm8, %v6178_v6, %v6168_v37  ;;  %v6181_v17 = vsel %vm5702_vm8, %v6177_v0, %v6166_v46  ;;  %8535 = vmatpush3.bf16.msra.mxu0 %v8532_v32  ;;  %v6332_v6 = vld [vmem:[%s13015_s2 + $0x18] sm:$0x1]  ;;  %v6430_v37 = vld [vmem:[#allocation3 + $0x140] sm:$0xff] }
0x21c3   :  { %8317 = vmatprep.mubr.msk.f32.mxu1 %vm5837_vm13, %v6181_v17  ;;  %v6348_v17 = vld [vmem:[%s13015_s2 + $0x19] sm:$0x1] }
0x21c4   :  { %8318 = vmatmul.mubr.msk.f32.vlgmr.msra.gmra.mrb[64].mxu1 %vm5837_vm13, %v6182_v35  ;;  %v8536_v35 = vpack.c.bf16 %v6430_v37, %v6429_v14 }
0x21c5   :  { %v6172_v24 = vpop.permute.xlu1 %6171  ;;  %v6170_v57 = vpop.permute.xlu0 %6169 }
0x21c6   :  { %v6184_v43 = vsel %vm5702_vm8, %v6180_v50, %v6172_v24  ;;  %v6183_v33 = vsel %vm5702_vm8, %v6179_v13, %v6170_v57  ;;  %8537 = vmatprep.subr.bf16.mxu0 %v8536_v35  ;;  %v6431_v50 = vld [vmem:[#allocation3 + $0x148] sm:$0xff]  ;;  %v6432_v13 = vld [vmem:[#allocation3 + $0x150] sm:$0xff] }
0x21c7   :  { %8320 = vmatprep.mubr.msk.f32.mxu1 %vm5837_vm13, %v6183_v33  ;;  %8539 = vmatpush3.bf16.msra.mxu0 %v8536_v35 }
0x21c8   :  { %8321 = vmatmul.mubr.msk.f32.gmra.mrb[66].mxu1 %vm5837_vm13, %v6184_v43  ;;  %v8540_v43 = vpack.c.bf16 %v6432_v13, %v6431_v50 }
0x21ca   :  { %8541 = vmatprep.subr.bf16.mxu0 %v8540_v43 }
0x21cb   :  { %8543 = vmatpush3.bf16.msra.mxu0 %v8540_v43 }
0x2297   :  { %v8319_v21 = vpop.f32.mrb[64].mxu1 }
0x2298   :  { %v6289_v53 = vmul.f32 %v8319_v21, %v8319_v21  ;;  %v6269_v51 = vpop.f32.mrb[65].mxu1 }
0x2299   :  { %v6288_v22 = vmul.f32 %v6269_v51, %v6269_v51 }
0x229a   :  { %6298 = vrot.lane.b32.xlu1 %v6289_v53, %s8750_s5 }
0x229b   :  { %6296 = vrot.lane.b32.xlu0 %v6288_v22, %s8750_s5  ;;  %v8322_v55 = vpop.f32.mrb[66].mxu1 }
0x229c   :  { %v6291_v31 = vmul.f32 %v8322_v55, %v8322_v55  ;;  %v6279_v41 = vpop.f32.mrb[67].mxu1 }
0x229d   :  { %v6290_v27 = vmul.f32 %v6279_v41, %v6279_v41 }
0x229e   :  { %6302 = vrot.lane.b32.xlu1 %v6291_v31, %s8750_s5 }
0x229f   :  { %6300 = vrot.lane.b32.xlu0 %v6290_v27, %s8750_s5 }
0x230c   :  { %v6299_v56 = vpop.permute.xlu1 %6298 }
0x230d   :  { %v6309_v40 = vsel %vm4038_vm1, %v8319_v21, %v6299_v56  ;;  %v6297_v47 = vpop.permute.xlu0 %6296 }
0x230e   :  { %v6313_v15 = vsel %vm5702_vm8, %v6309_v40, 0.0  ;;  %v6308_v12 = vsel %vm4038_vm1, %v6269_v51, %v6297_v47 }
0x230f   :  { %v6312_v25 = vsel %vm5702_vm8, %v6308_v12, 0.0 }
0x2310   :  { %v6314_v3 = vadd.f32 %v6313_v15, %v6312_v25  ;;  %v6303_v18 = vpop.permute.xlu1 %6302 }
0x2311   :  { %v6301_v23 = vpop.permute.xlu0 %6300  ;;  %v6311_v39 = vsel %vm4038_vm1, %v8322_v55, %v6303_v18 }
0x2312   :  { %v6310_v7 = vsel %vm4038_vm1, %v6279_v41, %v6301_v23  ;;  %v6317_v42 = vsel %vm5702_vm8, %v6311_v39, 0.0 }
0x2313   :  { %v6315_v11 = vsel %vm5702_vm8, %v6310_v7, 0.0 }
0x2314   :  { %v6316_v4 = vadd.f32 %v6315_v11, %v6314_v3 }
0x2316   :  { %v6318_v2 = vadd.f32 %v6317_v42, %v6316_v4 }
0x2318   :  { %v6319_v30 = vrot.slane %v6318_v2, 4 }
0x231a   :  { %v6320_v58 = vadd.f32 %v6319_v30, %v6318_v2 }
0x231c   :  { %v6321_v34 = vrot.slane %v6320_v58, 2 }
0x231e   :  { %v6322_v20 = vadd.f32 %v6321_v34, %v6320_v58 }
0x2320   :  { %v6323_v19 = vrot.slane %v6322_v20, 1 }
0x2322   :  { %v6324_v10 = vadd.f32 %v6323_v19, %v6322_v20 }
0x2324   :  { %v6325_v5 = vmul.f32 0.03125, %v6324_v10 }
0x2326   :  { %v6326_v8 = vmul.f32 %v6325_v5, %v6325_v5 }
0x2328   :  { %6328 = vrot.lane.b32.xlu0 %v6326_v8, %s8750_s5 }
0x239a   :  { %v6329_v26 = vpop.permute.xlu0 %6328 }
0x239b   :  { %v6331_v62 = vsub.f32 %v6325_v5, %v6329_v26 }
0x239d   :  { %v6333_v38 = vadd.f32 1e-05, %v6331_v62 }
0x239f   :  { %8681 = vrsqrt.f32 %v6333_v38 }
0x23a9   :  { %v8682_v9 = vpop.eup %8681 }
0x23aa   :  { %6336 = vrot.lane.b32.xlu1 %v8682_v9, %s8751_s23 }
0x241c   :  { %v6337_v0 = vpop.permute.xlu1 %6336 }
0x241d   :  { %v6339_v46 = vmul.f32 %v6337_v0, %v6332_v6 }
0x241f   :  { %v6343_v28 = vrot.slane %v6339_v46, %v9227_v16  ;;  %v6349_v44 = vmul.f32 %v6339_v46, %v6325_v5 }
0x2421   :  { %v6350_v24 = vsub.f32 %v6348_v17, %v6349_v44  ;;  %v6345_v57 = vmul.f32 %v8319_v21, %v6343_v28  ;;  %v6344_v53 = vmul.f32 %v6343_v28, %v6269_v51  ;;  %v6347_v22 = vmul.f32 %v8322_v55, %v6343_v28 }
0x2422   :  { %v6346_v31 = vmul.f32 %v6343_v28, %v6279_v41 }
0x2423   :  { %v6354_v33 = vrot.slane %v6350_v24, %v9227_v16 }
0x2425   :  { %v6356_v27 = vadd.f32 %v6354_v33, %v6345_v57  ;;  %v6355_v56 = vadd.f32 %v6354_v33, %v6344_v53  ;;  %v6358_v40 = vadd.f32 %v6354_v33, %v6347_v22  ;;  %v6357_v47 = vadd.f32 %v6354_v33, %v6346_v31 }
0x2427   :  { %v6360_v15 = vmax.f32 %v6356_v27, 0.0  ;;  %v6359_v12 = vmax.f32 %v6355_v56, 0.0  ;;  %v6362_v25 = vmax.f32 %v6358_v40, 0.0  ;;  %v6361_v3 = vmax.f32 %v6357_v47, 0.0 }
0x2429   :  { %6393 = vrot.lane.b32.xlu1 %v6360_v15, %s8750_s5  ;;  %6391 = vrot.lane.b32.xlu0 %v6359_v12, %s8750_s5  ;;  %v6376_v21 = vrot.slane %v6360_v15, 1  ;;  %v6377_v18 = vrot.slane %v6361_v3, 1  ;;  %v6375_v23 = vrot.slane %v6359_v12, 1  ;;  %v6378_v51 = vrot.slane %v6362_v25, 1 }
0x242a   :  { %v6363_v55 = vrot.slane %v6359_v12, 7  ;;  %v6364_v41 = vrot.slane %v6360_v15, 7  ;;  %v6366_v39 = vrot.slane %v6362_v25, 7  ;;  %v6365_v7 = vrot.slane %v6361_v3, 7 }
0x242b   :  { %v6380_v11 = vsel %vm175_vm0, %v6376_v21, %v6377_v18  ;;  %v6381_v4 = vsel %vm175_vm0, %v6375_v23, %v6376_v21  ;;  %v6382_v42 = vsel %vm175_vm0, %v6378_v51, %v6375_v23  ;;  %v6379_v2 = vsel %vm175_vm0, %v6377_v18, %v6378_v51 }
0x242c   :  { %v6369_v30 = vsel %vm110_vm2, %v6363_v55, %v6364_v41  ;;  %v6370_v58 = vsel %vm110_vm2, %v6366_v39, %v6363_v55  ;;  %v6367_v34 = vsel %vm110_vm2, %v6365_v7, %v6366_v39  ;;  %v6368_v20 = vsel %vm110_vm2, %v6364_v41, %v6365_v7 }
0x242d   :  { %6397 = vrot.lane.b32.xlu1 %v6362_v25, %s8750_s5  ;;  %6395 = vrot.lane.b32.xlu0 %v6361_v3, %s8750_s5  ;;  %v6384_v19 = vsel %vm12464_vm9, 0.0, %v6380_v11  ;;  %v6386_v10 = vsel %vm12477_vm10, 0.0, %v6382_v42  ;;  %v6371_v38 = vsel %vm12495_vm12, 0.0, %v6370_v58  ;;  %v6373_v14 = vsel %vm12503_vm14, 0.0, %v6368_v20 }
0x2431   :  { %6409 = vrot.lane.b32.xlu1 %v6384_v19, %s8752_s22  ;;  %6407 = vrot.lane.b32.xlu0 %v6381_v4, %s8752_s22 }
0x2435   :  { %6413 = vrot.lane.b32.xlu1 %v6386_v10, %s8752_s22  ;;  %6411 = vrot.lane.b32.xlu0 %v6379_v2, %s8752_s22 }
0x249b   :  { %v6394_v5 = vpop.permute.xlu1 %6393  ;;  %v6392_v8 = vpop.permute.xlu0 %6391 }
0x249c   :  { %v6420_v9 = vsel %vm4038_vm1, %v6369_v30, %v6394_v5  ;;  %v6419_v59 = vsel %vm4038_vm1, %v6371_v38, %v6392_v8  ;;  %v6574_v5 = vld [vmem:[%s13015_s2 + $0x1a] sm:$0x1] }
0x249f   :  { %v6398_v26 = vpop.permute.xlu1 %6397  ;;  %v6396_v62 = vpop.permute.xlu0 %6395 }
0x24a0   :  { %v6422_v37 = vsel %vm4038_vm1, %v6367_v34, %v6398_v26  ;;  %v6421_v46 = vsel %vm4038_vm1, %v6373_v14, %v6396_v62  ;;  %v6590_v62 = vld [vmem:[%s13015_s2 + $0x1b] sm:$0x1] }
0x24a3   :  { %v6410_v63 = vpop.permute.xlu1 %6409  ;;  %v6408_v32 = vpop.permute.xlu0 %6407 }
0x24a4   :  { %v6424_v6 = vsel %vm5702_vm8, %v6420_v9, %v6410_v63  ;;  %v6423_v0 = vsel %vm5702_vm8, %v6419_v59, %v6408_v32 }
0x24a5   :  { %8335 = vmatprep.mubr.msk.f32.mxu0 %vm5837_vm13, %v6423_v0 }
0x24a6   :  { %8336 = vmatmul.mubr.msk.f32.vlgmr.msra.gmra.mrb[68].mxu0 %vm5837_vm13, %v6424_v6 }
0x24a7   :  { %v6414_v35 = vpop.permute.xlu1 %6413  ;;  %v6412_v17 = vpop.permute.xlu0 %6411 }
0x24a8   :  { %v6426_v28 = vsel %vm5702_vm8, %v6422_v37, %v6414_v35  ;;  %v6425_v44 = vsel %vm5702_vm8, %v6421_v46, %v6412_v17 }
0x24a9   :  { %8338 = vmatprep.mubr.msk.f32.mxu0 %vm5837_vm13, %v6425_v44 }
0x24aa   :  { %8339 = vmatmul.mubr.msk.f32.gmra.mrb[70].mxu0 %vm5837_vm13, %v6426_v28 }
0x2579   :  { %v8337_v50 = vpop.f32.mrb[68].mxu0 }
0x257a   :  { %v6531_v13 = vmul.f32 %v8337_v50, %v8337_v50  ;;  %v6511_v24 = vpop.f32.mrb[69].mxu0 }
0x257b   :  { %v6530_v57 = vmul.f32 %v6511_v24, %v6511_v24 }
0x257c   :  { %6540 = vrot.lane.b32.xlu1 %v6531_v13, %s8750_s5 }
0x257d   :  { %6538 = vrot.lane.b32.xlu0 %v6530_v57, %s8750_s5  ;;  %v8340_v43 = vpop.f32.mrb[70].mxu0 }
0x257e   :  { %v6533_v33 = vmul.f32 %v8340_v43, %v8340_v43  ;;  %v6521_v53 = vpop.f32.mrb[71].mxu0 }
0x257f   :  { %v6532_v22 = vmul.f32 %v6521_v53, %v6521_v53 }
0x2580   :  { %6544 = vrot.lane.b32.xlu1 %v6533_v33, %s8750_s5  ;;  %v6679_v33 = vld [vmem:[#allocation3 + $0x158] sm:$0xff] }
0x2581   :  { %6542 = vrot.lane.b32.xlu0 %v6532_v22, %s8750_s5  ;;  %v6680_v22 = vld [vmem:[#allocation3 + $0x160] sm:$0xff] }
0x25ee   :  { %v6541_v31 = vpop.permute.xlu1 %6540 }
0x25ef   :  { %v6551_v27 = vsel %vm4038_vm1, %v8337_v50, %v6541_v31  ;;  %v6539_v56 = vpop.permute.xlu0 %6538 }
0x25f0   :  { %v6555_v40 = vsel %vm5702_vm8, %v6551_v27, 0.0  ;;  %v6550_v47 = vsel %vm4038_vm1, %v6511_v24, %v6539_v56 }
0x25f1   :  { %v6554_v15 = vsel %vm5702_vm8, %v6550_v47, 0.0 }
0x25f2   :  { %v6556_v12 = vadd.f32 %v6555_v40, %v6554_v15  ;;  %v6545_v25 = vpop.permute.xlu1 %6544  ;;  %v6681_v15 = vld [vmem:[#allocation3 + $0x168] sm:$0xff] }
0x25f3   :  { %v6543_v3 = vpop.permute.xlu0 %6542  ;;  %v6553_v21 = vsel %vm4038_vm1, %v8340_v43, %v6545_v25 }
0x25f4   :  { %v6552_v18 = vsel %vm4038_vm1, %v6521_v53, %v6543_v3  ;;  %v6559_v55 = vsel %vm5702_vm8, %v6553_v21, 0.0 }
0x25f5   :  { %v6557_v23 = vsel %vm5702_vm8, %v6552_v18, 0.0 }
0x25f6   :  { %v6558_v51 = vadd.f32 %v6557_v23, %v6556_v12  ;;  %v6682_v12 = vld [vmem:[#allocation3 + $0x170] sm:$0xff]  ;;  %v6683_v23 = vld [vmem:[#allocation3 + $0x178] sm:$0xff] }
0x25f8   :  { %v6560_v41 = vadd.f32 %v6559_v55, %v6558_v51  ;;  %v6684_v51 = vld [vmem:[#allocation3 + $0x180] sm:$0xff] }
0x25fa   :  { %v6561_v39 = vrot.slane %v6560_v41, 4 }
0x25fc   :  { %v6562_v7 = vadd.f32 %v6561_v39, %v6560_v41 }
0x25fe   :  { %v6563_v11 = vrot.slane %v6562_v7, 2 }
0x2600   :  { %v6564_v4 = vadd.f32 %v6563_v11, %v6562_v7  ;;  %v8548_v11 = vpack.c.bf16 %v6682_v12, %v6681_v15  ;;  %v6861_v15 = vld [vmem:[#allocation3 + $0x198] sm:$0xff] }
0x2602   :  { %v6565_v42 = vrot.slane %v6564_v4, 1 }
0x2604   :  { %v6566_v2 = vadd.f32 %v6565_v42, %v6564_v4  ;;  %v8552_v4 = vpack.c.bf16 %v6684_v51, %v6683_v23  ;;  %v6865_v51 = vld [vmem:[#allocation3 + $0x1b8] sm:$0xff] }
0x2606   :  { %v6567_v30 = vmul.f32 0.03125, %v6566_v2 }
0x2608   :  { %v6568_v58 = vmul.f32 %v6567_v30, %v6567_v30 }
0x260a   :  { %6570 = vrot.lane.b32.xlu0 %v6568_v58, %s8750_s5 }
0x267c   :  { %v6571_v34 = vpop.permute.xlu0 %6570 }
0x267d   :  { %v6573_v20 = vsub.f32 %v6567_v30, %v6571_v34 }
0x267f   :  { %v6575_v19 = vadd.f32 1e-05, %v6573_v20 }
0x2681   :  { %8683 = vrsqrt.f32 %v6575_v19 }
0x268b   :  { %v8684_v10 = vpop.eup %8683 }
0x268c   :  { %6578 = vrot.lane.b32.xlu1 %v8684_v10, %s8751_s23 }
0x26fe   :  { %v6579_v8 = vpop.permute.xlu1 %6578 }
0x26ff   :  { %v6581_v26 = vmul.f32 %v6579_v8, %v6574_v5 }
0x2701   :  { %v6585_v38 = vrot.slane %v6581_v26, %v9227_v16  ;;  %v6591_v9 = vmul.f32 %v6581_v26, %v6567_v30 }
0x2703   :  { %v6592_v59 = vsub.f32 %v6590_v62, %v6591_v9  ;;  %v6586_v63 = vmul.f32 %v6585_v38, %v6511_v24  ;;  %v6587_v32 = vmul.f32 %v8337_v50, %v6585_v38  ;;  %v6588_v6 = vmul.f32 %v6585_v38, %v6521_v53 }
0x2704   :  { %v6589_v0 = vmul.f32 %v8340_v43, %v6585_v38  ;;  %v8544_v24 = vpack.c.bf16 %v6680_v22, %v6679_v33 }
0x2705   :  { %v6596_v14 = vrot.slane %v6592_v59, %v9227_v16 }
0x2706   :  { %8545 = vmatprep.subr.bf16.mxu1 %v8544_v24 }
0x2707   :  { %v6598_v37 = vadd.f32 %v6596_v14, %v6587_v32  ;;  %v6597_v46 = vadd.f32 %v6596_v14, %v6586_v63  ;;  %v6600_v35 = vadd.f32 %v6596_v14, %v6589_v0  ;;  %v6599_v17 = vadd.f32 %v6596_v14, %v6588_v6  ;;  %8547 = vmatpush3.bf16.msra.mxu1 %v8544_v24 }
0x2708   :  { %8549 = vmatprep.subr.bf16.mxu1 %v8548_v11 }
0x2709   :  { %v6602_v28 = vadd.f32 %v6598_v37, %v12560_v49  ;;  %v6601_v44 = vadd.f32 %v6597_v46, %v12562_v36  ;;  %v6604_v13 = vadd.f32 %v6600_v35, %v12570_v54  ;;  %v6603_v57 = vadd.f32 %v6599_v17, %v12564_v61 }
0x270b   :  { %v6606_v50 = vmax.f32 %v6602_v28, 0.0  ;;  %v6605_v53 = vmax.f32 %v6601_v44, 0.0  ;;  %v6608_v43 = vmax.f32 %v6604_v13, 0.0  ;;  %v6607_v31 = vmax.f32 %v6603_v57, 0.0  ;;  %8551 = vmatpush3.bf16.msra.mxu1 %v8548_v11 }
0x270c   :  { %8553 = vmatprep.subr.bf16.mxu1 %v8552_v4 }
0x270d   :  { %6639 = vrot.lane.b32.xlu1 %v6606_v50, %s8750_s5  ;;  %6637 = vrot.lane.b32.xlu0 %v6605_v53, %s8750_s5  ;;  %v6622_v27 = vrot.slane %v6606_v50, 1  ;;  %v6623_v49 = vrot.slane %v6607_v31, 1  ;;  %v6621_v56 = vrot.slane %v6605_v53, 1  ;;  %v6624_v36 = vrot.slane %v6608_v43, 1 }
0x270e   :  { %v6609_v40 = vrot.slane %v6605_v53, 7  ;;  %v6610_v54 = vrot.slane %v6606_v50, 7  ;;  %v6612_v47 = vrot.slane %v6608_v43, 7  ;;  %v6611_v61 = vrot.slane %v6607_v31, 7 }
0x270f   :  { %v6626_v25 = vsel %vm175_vm0, %v6622_v27, %v6623_v49  ;;  %v6627_v3 = vsel %vm175_vm0, %v6621_v56, %v6622_v27  ;;  %v6628_v21 = vsel %vm175_vm0, %v6624_v36, %v6621_v56  ;;  %v6625_v18 = vsel %vm175_vm0, %v6623_v49, %v6624_v36  ;;  %8555 = vmatpush3.bf16.msra.mxu1 %v8552_v4  ;;  %v6796_v4 = vld [vmem:[%s13015_s2 + $0x1c] sm:$0x1] }
0x2710   :  { %v6615_v55 = vsel %vm110_vm2, %v6609_v40, %v6610_v54  ;;  %v6616_v41 = vsel %vm110_vm2, %v6612_v47, %v6609_v40  ;;  %v6613_v39 = vsel %vm110_vm2, %v6611_v61, %v6612_v47  ;;  %v6614_v7 = vsel %vm110_vm2, %v6610_v54, %v6611_v61  ;;  %v6859_v47 = vld [vmem:[#allocation3 + $0x188] sm:$0xff]  ;;  %v6860_v61 = vld [vmem:[#allocation3 + $0x190] sm:$0xff] }
0x2711   :  { %6643 = vrot.lane.b32.xlu1 %v6608_v43, %s8750_s5  ;;  %6641 = vrot.lane.b32.xlu0 %v6607_v31, %s8750_s5  ;;  %v6630_v42 = vsel %vm12464_vm9, 0.0, %v6626_v25  ;;  %v6632_v2 = vsel %vm12477_vm10, 0.0, %v6628_v21  ;;  %v6617_v60 = vsel %vm12495_vm12, 0.0, %v6616_v41  ;;  %v6619_v62 = vsel %vm12503_vm14, 0.0, %v6614_v7  ;;  %s8753_s5 = smov 96   ;;  %v6862_v25 = vld [vmem:[#allocation3 + $0x1a0] sm:$0xff] }
0x2712   :  { %v8556_v12 = vpack.c.bf16 %v6860_v61, %v6859_v47  ;;  %v6863_v21 = vld [vmem:[#allocation3 + $0x1a8] sm:$0xff]  ;;  %v6868_v7 = vld [vmem:[#allocation3 + $0x1d0] sm:$0xff]  ;;  %vm7620_vm10 = vcmask 33792  }
0x2714   :  { %8557 = vmatprep.subr.bf16.mxu0 %v8556_v12 }
0x2715   :  { %6655 = vrot.lane.b32.xlu1 %v6630_v42, %s8752_s22  ;;  %6653 = vrot.lane.b32.xlu0 %v6627_v3, %s8752_s22  ;;  %v8560_v3 = vpack.c.bf16 %v6862_v25, %v6861_v15 }
0x2716   :  { %8559 = vmatpush3.bf16.msra.mxu0 %v8556_v12 }
0x2717   :  { %8561 = vmatprep.subr.bf16.mxu0 %v8560_v3 }
0x2719   :  { %6659 = vrot.lane.b32.xlu1 %v6632_v2, %s8752_s22  ;;  %6657 = vrot.lane.b32.xlu0 %v6625_v18, %s8752_s22  ;;  %v6864_v18 = vld [vmem:[#allocation3 + $0x1b0] sm:$0xff]  ;;  %v6869_v2 = vld [vmem:[#allocation3 + $0x1d8] sm:$0xff] }
0x271a   :  { %v8564_v23 = vpack.c.bf16 %v6864_v18, %v6863_v21  ;;  %8563 = vmatpush3.bf16.msra.mxu0 %v8560_v3 }
0x271c   :  { %8565 = vmatprep.subr.bf16.mxu0 %v8564_v23 }
0x271e   :  { %8567 = vmatpush3.bf16.msra.mxu0 %v8564_v23 }
0x277f   :  { %v6640_v30 = vpop.permute.xlu1 %6639  ;;  %v6638_v58 = vpop.permute.xlu0 %6637 }
0x2780   :  { %v6666_v19 = vsel %vm4038_vm1, %v6615_v55, %v6640_v30  ;;  %v6665_v10 = vsel %vm4038_vm1, %v6617_v60, %v6638_v58  ;;  %v6866_v55 = vld [vmem:[#allocation3 + $0x1c0] sm:$0xff] }
0x2781   :  { %v8568_v41 = vpack.c.bf16 %v6866_v55, %v6865_v51  ;;  %v6870_v30 = vld [vmem:[#allocation3 + $0x1e0] sm:$0xff] }
0x2783   :  { %v6644_v34 = vpop.permute.xlu1 %6643  ;;  %v6642_v20 = vpop.permute.xlu0 %6641  ;;  %8569 = vmatprep.subr.bf16.mxu0 %v8568_v41 }
0x2784   :  { %v6668_v45 = vsel %vm4038_vm1, %v6613_v39, %v6644_v34  ;;  %v6667_v38 = vsel %vm4038_vm1, %v6619_v62, %v6642_v20  ;;  %v6867_v39 = vld [vmem:[#allocation3 + $0x1c8] sm:$0xff]  ;;  %8571 = vmatpush3.bf16.msra.mxu0 %v8568_v41  ;;  %v8576_v34 = vpack.c.bf16 %v6870_v30, %v6869_v2  ;;  %v6810_v20 = vld [vmem:[%s13015_s2 + $0x1d] sm:$0x1] }
0x2785   :  { %v8572_v11 = vpack.c.bf16 %v6868_v7, %v6867_v39 }
0x2787   :  { %v6656_v5 = vpop.permute.xlu1 %6655  ;;  %v6654_v8 = vpop.permute.xlu0 %6653  ;;  %8573 = vmatprep.subr.bf16.mxu0 %v8572_v11 }
0x2788   :  { %v6670_v52 = vsel %vm5702_vm8, %v6666_v19, %v6656_v5  ;;  %v6669_v26 = vsel %vm5702_vm8, %v6665_v10, %v6654_v8  ;;  %8575 = vmatpush3.bf16.msra.mxu0 %v8572_v11  ;;  %v7004_v5 = vld [vmem:[#allocation3 + $0x1e8] sm:$0xff]  ;;  %v7005_v8 = vld [vmem:[#allocation3 + $0x1f0] sm:$0xff] }
0x2789   :  { %6674 = vst.msk [vmem:[#allocation2 + $0x8] sm:$0xff] %vm5837_vm13, %v6670_v52  ;;  %6673 = vst.msk [vmem:[#allocation2] sm:$0xff] %vm5837_vm13, %v6669_v26  ;;  %8577 = vmatprep.subr.bf16.mxu0 %v8576_v34  ;;  %v8580_v52 = vpack.c.bf16 %v7005_v8, %v7004_v5  ;;  %v7130_v8 = vld [vmem:[#allocation3 + $0x1f8] sm:$0xff] }
0x278b   :  { %v6660_v9 = vpop.permute.xlu1 %6659  ;;  %v6658_v59 = vpop.permute.xlu0 %6657  ;;  %8581 = vmatprep.subr.bf16.mxu1 %v8580_v52 }
0x278c   :  { %v6672_v63 = vsel %vm5702_vm8, %v6668_v45, %v6660_v9  ;;  %v6671_v32 = vsel %vm5702_vm8, %v6667_v38, %v6658_v59  ;;  %8579 = vmatpush3.bf16.msra.mxu0 %v8576_v34  ;;  %v6822_v38 = vand.u32 7, %v12445_v29  ;;  %v6821_v9 = vand.u32 7, %v8793_v1 }
0x278d   :  { %6676 = vst.msk [vmem:[#allocation2 + $0x18] sm:$0xff] %vm5837_vm13, %v6672_v63  ;;  %6675 = vst.msk [vmem:[#allocation2 + $0x10] sm:$0xff] %vm5837_vm13, %v6671_v32 }
0x278e   :  { %vm12798_vm15 = vcmp.eq.s32.totalorder %v6822_v38, 7  ;;  %vm12802_vm3 = vcmp.eq.s32.totalorder %v6821_v9, 7  ;;  %vm12826_vm4 = vcmp.eq.s32.totalorder %v6822_v38, 0  ;;  %vm12830_vm5 = vcmp.eq.s32.totalorder %v6821_v9, 0  ;;  %v7134_v9 = vld [vmem:[#allocation3 + $0x218] sm:$0xff] }
0x2790   :  { %v12760_v6 = vld [vmem:[#allocation2] ss:$2 sm:$0xff] }
0x2791   :  { %8353 = vmatprep.mubr.msk.f32.mxu1 %vm5837_vm13, %v12760_v6 }
0x2794   :  { %v12764_v48 = vld [vmem:[#allocation2 + $0x10] ss:$2 sm:$0xff] }
0x2795   :  { %8354 = vmatmul.mubr.msk.f32.vlgmr.msra.gmra.mrb[68].mxu1 %vm5837_vm13, %v12764_v48 }
0x2796   :  { %8583 = vmatpush3.bf16.msra.mxu1 %v8580_v52  ;;  %v7131_v52 = vld [vmem:[#allocation3 + $0x200] sm:$0xff] }
0x2868   :  { %v12768_v0 = vpop.f32.mrb[68].mxu1 }
0x2869   :  { %v6767_v14 = vmul.f32 %v12768_v0, %v12768_v0  ;;  %v12772_v37 = vpop.f32.mrb[69].mxu1 }
0x286a   :  { %v6766_v46 = vmul.f32 %v12772_v37, %v12772_v37 }
0x286b   :  { %6772 = vrot.lane.b32.xlu1 %v6767_v14, %s8752_s22 }
0x286c   :  { %6770 = vrot.lane.b32.xlu0 %v6766_v46, %s8752_s22 }
0x28dd   :  { %v6773_v35 = vpop.permute.xlu1 %6772 }
0x28de   :  { %v6777_v17 = vsel %vm5702_vm8, %v12768_v0, %v6773_v35  ;;  %v6771_v28 = vpop.permute.xlu0 %6770 }
0x28df   :  { %v6780_v44 = vsel %vm6778_vm11, %v6777_v17, 0.0  ;;  %v6776_v13 = vsel %vm5702_vm8, %v12772_v37, %v6771_v28 }
0x28e0   :  { %v6779_v57 = vsel %vm6778_vm11, %v6776_v13, 0.0 }
0x28e1   :  { %v6781_v33 = vadd.f32 %v6780_v44, %v6779_v57 }
0x28e3   :  { %v6782_v22 = vrot.slane %v6781_v33, 4 }
0x28e5   :  { %v6783_v24 = vadd.f32 %v6782_v22, %v6781_v33 }
0x28e7   :  { %v6784_v50 = vrot.slane %v6783_v24, 2 }
0x28e9   :  { %v6785_v53 = vadd.f32 %v6784_v50, %v6783_v24 }
0x28eb   :  { %v6786_v43 = vrot.slane %v6785_v53, 1 }
0x28ed   :  { %v6787_v31 = vadd.f32 %v6786_v43, %v6785_v53 }
0x28ef   :  { %v6789_v27 = vmul.f32 0.0625, %v6787_v31 }
0x28f1   :  { %v6790_v49 = vmul.f32 %v6789_v27, %v6789_v27 }
0x28f3   :  { %6792 = vrot.lane.b32.xlu0 %v6790_v49, %s8752_s22 }
0x2965   :  { %v6793_v56 = vpop.permute.xlu0 %6792 }
0x2966   :  { %v6795_v36 = vsub.f32 %v6789_v27, %v6793_v56 }
0x2968   :  { %v6797_v40 = vadd.f32 1e-05, %v6795_v36 }
0x296a   :  { %8685 = vrsqrt.f32 %v6797_v40 }
0x2974   :  { %v8686_v54 = vpop.eup %8685 }
0x2975   :  { %6800 = vrot.lane.b32.xlu1 %v8686_v54, %s8753_s5 }
0x29e7   :  { %v6801_v42 = vpop.permute.xlu1 %6800 }
0x29e8   :  { %v6803_v58 = vmul.f32 %v6801_v42, %v6796_v4 }
0x29ea   :  { %v6807_v60 = vrot.slane %v6803_v58, %v9227_v16  ;;  %v6811_v19 = vmul.f32 %v6803_v58, %v6789_v27 }
0x29ec   :  { %v6812_v10 = vsub.f32 %v6810_v20, %v6811_v19  ;;  %v6808_v26 = vmul.f32 %v6807_v60, %v12772_v37  ;;  %v6809_v62 = vmul.f32 %v12768_v0, %v6807_v60 }
0x29ee   :  { %v6816_v45 = vrot.slane %v6812_v10, %v9227_v16 }
0x29f0   :  { %v6817_v59 = vadd.f32 %v6816_v45, %v6808_v26  ;;  %v6818_v63 = vadd.f32 %v6816_v45, %v6809_v62  ;;  %v7132_v26 = vld [vmem:[#allocation3 + $0x208] sm:$0xff]  ;;  %v8584_v62 = vpack.c.bf16 %v7131_v52, %v7130_v8  ;;  %v7133_v45 = vld [vmem:[#allocation3 + $0x210] sm:$0xff] }
0x29f1   :  { %v8588_v38 = vpack.c.bf16 %v7133_v45, %v7132_v26 }
0x29f2   :  { %v6819_v32 = vmax.f32 %v6817_v59, 0.0  ;;  %v6820_v14 = vmax.f32 %v6818_v63, 0.0  ;;  %v7135_v59 = vld [vmem:[#allocation3 + $0x220] sm:$0xff]  ;;  %8585 = vmatprep.subr.bf16.mxu1 %v8584_v62 }
0x29f3   :  { %v8592_v63 = vpack.c.bf16 %v7135_v59, %v7134_v9 }
0x29f4   :  { %6843 = vrot.lane.b32.xlu1 %v6820_v14, %s8752_s22  ;;  %6841 = vrot.lane.b32.xlu0 %v6819_v32, %s8752_s22  ;;  %v6833_v29 = vrot.slane %v6819_v32, 1  ;;  %v6834_v0 = vrot.slane %v6820_v14, 1  ;;  %v6825_v35 = vrot.slane %v6819_v32, 7  ;;  %v6826_v17 = vrot.slane %v6820_v14, 7  ;;  %v7136_v32 = vld [vmem:[#allocation3 + $0x228] sm:$0xff]  ;;  %v7137_v14 = vld [vmem:[#allocation3 + $0x230] sm:$0xff] }
0x29f6   :  { %v6836_v28 = vsel %vm175_vm0, %v6834_v0, %v6833_v29  ;;  %v6835_v44 = vsel %vm175_vm0, %v6833_v29, %v6834_v0  ;;  %v6827_v13 = vsel %vm110_vm2, %v6825_v35, %v6826_v17  ;;  %v6828_v57 = vsel %vm110_vm2, %v6826_v17, %v6825_v35  ;;  %v7138_v0 = vld [vmem:[#allocation3 + $0x238] sm:$0xff]  ;;  %v7139_v35 = vld [vmem:[#allocation3 + $0x240] sm:$0xff] }
0x29f7   :  { %v6838_v33 = vsel %vm12798_vm15, 0.0, %v6836_v28  ;;  %v6837_v22 = vsel %vm12802_vm3, 0.0, %v6835_v44  ;;  %v6830_v31 = vsel %vm12826_vm4, 0.0, %v6827_v13  ;;  %v6829_v27 = vsel %vm12830_vm5, 0.0, %v6828_v57  ;;  %v6981_v28 = vld [vmem:[%s13015_s2 + $0x1e] sm:$0x1] }
0x29f8   :  { %6851 = vrot.lane.b32.xlu1 %v6838_v33, %s8754_s14  ;;  %6849 = vrot.lane.b32.xlu0 %v6837_v22, %s8754_s14  ;;  %v8596_v29 = vpack.c.bf16 %v7137_v14, %v7136_v32  ;;  %v8600_v17 = vpack.c.bf16 %v7139_v35, %v7138_v0  ;;  %v6995_v57 = vld [vmem:[%s13015_s2 + $0x1f] sm:$0x1]  ;;  %v7140_v33 = vld [vmem:[#allocation3 + $0x248] sm:$0xff] }
0x29f9   :  { %v7141_v22 = vld [vmem:[#allocation3 + $0x250] sm:$0xff] }
0x29fc   :  { %7013 = vrot.lane.b32.xlu1 %v12764_v48, %s8751_s23  ;;  %7011 = vrot.lane.b32.xlu0 %v12760_v6, %s8751_s23 }
0x2a66   :  { %v6844_v50 = vpop.permute.xlu1 %6843  ;;  %v6842_v43 = vpop.permute.xlu0 %6841 }
0x2a67   :  { %v6856_v48 = vsel %vm5702_vm8, %v6830_v31, %v6844_v50  ;;  %v6855_v6 = vsel %vm5702_vm8, %v6829_v27, %v6842_v43  ;;  %v8604_v31 = vpack.c.bf16 %v7141_v22, %v7140_v33 }
0x2a6a   :  { %v6852_v49 = vpop.permute.xlu1 %6851  ;;  %v6850_v56 = vpop.permute.xlu0 %6849 }
0x2a6b   :  { %v6858_v36 = vsel %vm6778_vm11, %v6856_v48, %v6852_v49  ;;  %v6857_v40 = vsel %vm6778_vm11, %v6855_v6, %v6850_v56  ;;  %v7790_v48 = vld [vmem:[%s13015_s2 + $0x20] ss:$0 sm:$0xff] }
0x2a6c   :  { %8380 = vmatprep.mubr.msk.f32.mxu0 %vm6871_vm6, %v6857_v40 }
0x2a6d   :  { %8381 = vmatmul.mubr.msk.f32.vlgmr.msra.gmra.mrb[72].mxu0 %vm6871_vm6, %v6858_v36 }
0x2a6e   :  { %v7014_v54 = vpop.permute.xlu1 %7013  ;;  %v7012_v47 = vpop.permute.xlu0 %7011 }
0x2a6f   :  { %8387 = vmatprep.mubr.msk.f32.mxu1 %vm4038_vm1, %v7012_v47 }
0x2a70   :  { %8388 = vmatmul.mubr.msk.f32.vlgmr.msra.gmra.mrb[70].mxu1 %vm4038_vm1, %v7014_v54 }
0x2a71   :  { %8587 = vmatpush3.bf16.msra.mxu1 %v8584_v62 }
0x2a72   :  { %8589 = vmatprep.subr.bf16.mxu1 %v8588_v38 }
0x2a75   :  { %8591 = vmatpush3.bf16.msra.mxu1 %v8588_v38 }
0x2a76   :  { %8593 = vmatprep.subr.bf16.mxu1 %v8592_v63 }
0x2a79   :  { %8595 = vmatpush3.bf16.msra.mxu1 %v8592_v63 }
0x2a7a   :  { %8597 = vmatprep.subr.bf16.mxu1 %v8596_v29 }
0x2a7d   :  { %8599 = vmatpush3.bf16.msra.mxu1 %v8596_v29 }
0x2a7e   :  { %8601 = vmatprep.subr.bf16.mxu1 %v8600_v17 }
0x2a81   :  { %8603 = vmatpush3.bf16.msra.mxu1 %v8600_v17 }
0x2a82   :  { %8605 = vmatprep.subr.bf16.mxu1 %v8604_v31 }
0x2a85   :  { %8607 = vmatpush3.bf16.msra.mxu1 %v8604_v31  ;;  %v7309_v31 = vld [vmem:[#allocation3 + $0x260] sm:$0xff] }
0x2b40   :  { %v12846_v61 = vpop.f32.mrb[72].mxu0 }
0x2b41   :  { %v6954_v15 = vmul.f32 %v12846_v61, %v12846_v61  ;;  %v12850_v12 = vpop.f32.mrb[73].mxu0 }
0x2b42   :  { %v6953_v25 = vmul.f32 %v12850_v12, %v12850_v12 }
0x2b43   :  { %v12854_v3 = vpop.f32.mrb[70].mxu1  ;;  %6959 = vrot.lane.b32.xlu1 %v6954_v15, %s8752_s22 }
0x2b44   :  { %v12857_v21 = vpop.f32.mrb[71].mxu1  ;;  %6957 = vrot.lane.b32.xlu0 %v6953_v25, %s8752_s22  ;;  %v7091_v36 = vadd.f32 %v12854_v3, %v7790_v48 }
0x2b45   :  { %v7086_v40 = vadd.f32 %v7790_v48, %v12857_v21 }
0x2bb5   :  { %v6960_v18 = vpop.permute.xlu1 %6959 }
0x2bb6   :  { %v6964_v23 = vsel %vm5702_vm8, %v12846_v61, %v6960_v18  ;;  %v6958_v51 = vpop.permute.xlu0 %6957 }
0x2bb7   :  { %v6966_v55 = vsel %vm6778_vm11, %v6964_v23, 0.0  ;;  %v6963_v41 = vsel %vm5702_vm8, %v12850_v12, %v6958_v51 }
0x2bb8   :  { %v6965_v39 = vsel %vm6778_vm11, %v6963_v41, 0.0 }
0x2bb9   :  { %v6967_v7 = vadd.f32 %v6966_v55, %v6965_v39 }
0x2bbb   :  { %v6968_v11 = vrot.slane %v6967_v7, 4 }
0x2bbd   :  { %v6969_v4 = vadd.f32 %v6968_v11, %v6967_v7 }
0x2bbf   :  { %v6970_v42 = vrot.slane %v6969_v4, 2 }
0x2bc1   :  { %v6971_v2 = vadd.f32 %v6970_v42, %v6969_v4 }
0x2bc3   :  { %v6972_v30 = vrot.slane %v6971_v2, 1 }
0x2bc5   :  { %v6973_v58 = vadd.f32 %v6972_v30, %v6971_v2 }
0x2bc7   :  { %v6974_v34 = vmul.f32 0.0625, %v6973_v58 }
0x2bc9   :  { %v6975_v20 = vmul.f32 %v6974_v34, %v6974_v34 }
0x2bcb   :  { %6977 = vrot.lane.b32.xlu0 %v6975_v20, %s8752_s22 }
0x2c3d   :  { %v6978_v60 = vpop.permute.xlu0 %6977 }
0x2c3e   :  { %v6980_v19 = vsub.f32 %v6974_v34, %v6978_v60 }
0x2c40   :  { %v6982_v10 = vadd.f32 1e-05, %v6980_v19 }
0x2c42   :  { %8687 = vrsqrt.f32 %v6982_v10 }
0x2c4c   :  { %v8688_v5 = vpop.eup %8687 }
0x2c4d   :  { %6985 = vrot.lane.b32.xlu1 %v8688_v5, %s8753_s5 }
0x2cbf   :  { %v6986_v44 = vpop.permute.xlu1 %6985 }
0x2cc0   :  { %v6988_v13 = vmul.f32 %v6986_v44, %v6981_v28 }
0x2cc2   :  { %v6992_v50 = vrot.slane %v6988_v13, %v9227_v16  ;;  %v6996_v43 = vmul.f32 %v6988_v13, %v6974_v34 }
0x2cc4   :  { %v6997_v27 = vsub.f32 %v6995_v57, %v6996_v43  ;;  %v6993_v6 = vmul.f32 %v6992_v50, %v12850_v12  ;;  %v6994_v49 = vmul.f32 %v12846_v61, %v6992_v50  ;;  %v7308_v43 = vld [vmem:[#allocation3 + $0x258] sm:$0xff] }
0x2cc5   :  { %v8608_v48 = vpack.c.bf16 %v7309_v31, %v7308_v43 }
0x2cc6   :  { %v7001_v56 = vrot.slane %v6997_v27, %v9227_v16  ;;  %v7310_v27 = vld [vmem:[#allocation3 + $0x268] sm:$0xff] }
0x2cc7   :  { %8609 = vmatprep.subr.bf16.mxu0 %v8608_v48 }
0x2cc8   :  { %v7002_v54 = vadd.f32 %v7001_v56, %v6993_v6  ;;  %v7003_v47 = vadd.f32 %v7001_v56, %v6994_v49  ;;  %v7311_v6 = vld [vmem:[#allocation3 + $0x270] sm:$0xff]  ;;  %v7312_v56 = vld [vmem:[#allocation3 + $0x278] sm:$0xff]  ;;  %8611 = vmatpush3.bf16.msra.mxu0 %v8608_v48 }
0x2cc9   :  { %v8612_v49 = vpack.c.bf16 %v7311_v6, %v7310_v27 }
0x2cca   :  { %v7095_v15 = vadd.f32 %v7091_v36, %v7003_v47  ;;  %v7094_v25 = vadd.f32 %v7086_v40, %v7002_v54  ;;  %v7313_v36 = vld [vmem:[#allocation3 + $0x280] sm:$0xff]  ;;  %v7314_v54 = vld [vmem:[#allocation3 + $0x288] sm:$0xff]  ;;  %v7315_v47 = vld [vmem:[#allocation3 + $0x290] sm:$0xff] }
0x2ccb   :  { %8613 = vmatprep.subr.bf16.mxu0 %v8612_v49  ;;  %v8616_v40 = vpack.c.bf16 %v7313_v36, %v7312_v56 }
0x2ccc   :  { %v12883_v18 = vmax.f32 %v7095_v15, 0.0  ;;  %v12885_v23 = vmax.f32 %v7094_v25, 0.0  ;;  %8615 = vmatpush3.bf16.msra.mxu0 %v8612_v49  ;;  %v8620_v15 = vpack.c.bf16 %v7315_v47, %v7314_v54  ;;  %v7316_v25 = vld [vmem:[#allocation3 + $0x298] sm:$0xff] }
0x2ccd   :  { %8617 = vmatprep.subr.bf16.mxu0 %v8616_v40 }
0x2cce   :  { %7114 = vrot.lane.b32.xlu1 %v12883_v18, %s8752_s22  ;;  %7112 = vrot.lane.b32.xlu0 %v12885_v23, %s8752_s22  ;;  %v7104_v61 = vrot.slane %v12885_v23, 1  ;;  %v7105_v12 = vrot.slane %v12883_v18, 1  ;;  %v7098_v41 = vrot.slane %v12885_v23, 7  ;;  %v7099_v39 = vrot.slane %v12883_v18, 7 }
0x2cd0   :  { %v7107_v3 = vsel %vm175_vm0, %v7105_v12, %v7104_v61  ;;  %v7106_v21 = vsel %vm175_vm0, %v7104_v61, %v7105_v12  ;;  %v7100_v11 = vsel %vm110_vm2, %v7098_v41, %v7099_v39  ;;  %v7101_v42 = vsel %vm110_vm2, %v7099_v39, %v7098_v41  ;;  %v7317_v61 = vld [vmem:[#allocation3 + $0x2a0] sm:$0xff]  ;;  %8619 = vmatpush3.bf16.msra.mxu0 %v8616_v40 }
0x2cd1   :  { %v7109_v51 = vsel %vm12798_vm15, 0.0, %v7107_v3  ;;  %v7108_v55 = vsel %vm12802_vm3, 0.0, %v7106_v21  ;;  %v7103_v2 = vsel %vm12826_vm4, 0.0, %v7100_v11  ;;  %v7102_v30 = vsel %vm12830_vm5, 0.0, %v7101_v42  ;;  %8621 = vmatprep.subr.bf16.mxu0 %v8620_v15  ;;  %v7251_v3 = vld [vmem:[%s13015_s2 + $0x21] sm:$0x1] }
0x2cd2   :  { %7122 = vrot.lane.b32.xlu1 %v7109_v51, %s8754_s14  ;;  %7120 = vrot.lane.b32.xlu0 %v7108_v55, %s8754_s14  ;;  %v8624_v12 = vpack.c.bf16 %v7317_v61, %v7316_v25  ;;  %v7318_v51 = vld [vmem:[#allocation3 + $0x2a8] sm:$0xff]  ;;  %v7319_v55 = vld [vmem:[#allocation3 + $0x2b0] sm:$0xff] }
0x2cd3   :  { %v8628_v39 = vpack.c.bf16 %v7319_v55, %v7318_v51  ;;  %v7429_v51 = vld [vmem:[%s13015_s2 + $0x23] sm:$0x1] }
0x2cd4   :  { %8623 = vmatpush3.bf16.msra.mxu0 %v8620_v15 }
0x2cd5   :  { %8625 = vmatprep.subr.bf16.mxu0 %v8624_v12 }
0x2cd8   :  { %8627 = vmatpush3.bf16.msra.mxu0 %v8624_v12 }
0x2cd9   :  { %8629 = vmatprep.subr.bf16.mxu0 %v8628_v39 }
0x2cdc   :  { %8631 = vmatpush3.bf16.msra.mxu0 %v8628_v39  ;;  %v7443_v39 = vld [vmem:[%s13015_s2 + $0x24] sm:$0x1] }
0x2d40   :  { %v7115_v7 = vpop.permute.xlu1 %7114  ;;  %v7113_v4 = vpop.permute.xlu0 %7112 }
0x2d41   :  { %v7127_v58 = vsel %vm5702_vm8, %v7103_v2, %v7115_v7  ;;  %v7126_v34 = vsel %vm5702_vm8, %v7102_v30, %v7113_v4  ;;  %v7265_v7 = vld [vmem:[%s13015_s2 + $0x22] sm:$0x1] }
0x2d44   :  { %v7123_v20 = vpop.permute.xlu1 %7122  ;;  %v7121_v60 = vpop.permute.xlu0 %7120 }
0x2d45   :  { %v7129_v19 = vsel %vm6778_vm11, %v7127_v58, %v7123_v20  ;;  %v7128_v10 = vsel %vm6778_vm11, %v7126_v34, %v7121_v60 }
0x2d46   :  { %8414 = vmatprep.mubr.msk.f32.mxu1 %vm6871_vm6, %v7128_v10 }
0x2d47   :  { %8415 = vmatmul.mubr.msk.f32.vlgmr.msra.gmra.mrb[72].mxu1 %vm6871_vm6, %v7129_v19 }
0x2e1a   :  { %v12919_v5 = vpop.f32.mrb[72].mxu1 }
0x2e1b   :  { %v7224_v8 = vmul.f32 %v12919_v5, %v12919_v5  ;;  %v12923_v52 = vpop.f32.mrb[73].mxu1 }
0x2e1c   :  { %v7223_v26 = vmul.f32 %v12923_v52, %v12923_v52 }
0x2e1d   :  { %7229 = vrot.lane.b32.xlu1 %v7224_v8, %s8752_s22 }
0x2e1e   :  { %7227 = vrot.lane.b32.xlu0 %v7223_v26, %s8752_s22 }
0x2e8f   :  { %v7230_v62 = vpop.permute.xlu1 %7229 }
0x2e90   :  { %v7234_v45 = vsel %vm5702_vm8, %v12919_v5, %v7230_v62  ;;  %v7228_v38 = vpop.permute.xlu0 %7227 }
0x2e91   :  { %v7236_v9 = vsel %vm6778_vm11, %v7234_v45, 0.0  ;;  %v7233_v59 = vsel %vm5702_vm8, %v12923_v52, %v7228_v38 }
0x2e92   :  { %v7235_v63 = vsel %vm6778_vm11, %v7233_v59, 0.0 }
0x2e93   :  { %v7237_v32 = vadd.f32 %v7236_v9, %v7235_v63 }
0x2e95   :  { %v7238_v14 = vrot.slane %v7237_v32, 4 }
0x2e97   :  { %v7239_v29 = vadd.f32 %v7238_v14, %v7237_v32 }
0x2e99   :  { %v7240_v0 = vrot.slane %v7239_v29, 2 }
0x2e9b   :  { %v7241_v35 = vadd.f32 %v7240_v0, %v7239_v29 }
0x2e9d   :  { %v7242_v17 = vrot.slane %v7241_v35, 1 }
0x2e9f   :  { %v7243_v28 = vadd.f32 %v7242_v17, %v7241_v35 }
0x2ea1   :  { %v7244_v44 = vmul.f32 0.0625, %v7243_v28 }
0x2ea3   :  { %v7245_v13 = vmul.f32 %v7244_v44, %v7244_v44 }
0x2ea5   :  { %7247 = vrot.lane.b32.xlu0 %v7245_v13, %s8752_s22 }
0x2f17   :  { %v7248_v57 = vpop.permute.xlu0 %7247 }
0x2f18   :  { %v7250_v33 = vsub.f32 %v7244_v44, %v7248_v57 }
0x2f1a   :  { %v7252_v22 = vadd.f32 1e-05, %v7250_v33 }
0x2f1c   :  { %8689 = vrsqrt.f32 %v7252_v22 }
0x2f26   :  { %v8690_v50 = vpop.eup %8689 }
0x2f27   :  { %7255 = vrot.lane.b32.xlu1 %v8690_v50, %s8753_s5 }
0x2f99   :  { %v7256_v21 = vpop.permute.xlu1 %7255 }
0x2f9a   :  { %v7258_v41 = vmul.f32 %v7256_v21, %v7251_v3  ;;  %v8755_v3 = vmov 0.0|0.0   ;;  %v8757_v21 = vmov 0.0  }
0x2f9b   :  { %8632 = vmatprep.subr.bf16.mxu1 %v8755_v3 }
0x2f9c   :  { %v7262_v11 = vrot.slane %v7258_v41, %v9227_v16  ;;  %v7266_v4 = vmul.f32 %v7258_v41, %v7244_v44 }
0x2f9e   :  { %v7267_v42 = vsub.f32 %v7265_v7, %v7266_v4  ;;  %v7263_v2 = vmul.f32 %v7262_v11, %v12923_v52  ;;  %v7264_v30 = vmul.f32 %v12919_v5, %v7262_v11  ;;  %v7460_v4 = vadd.s32 1, %v8793_v1 }
0x2fa0   :  { %v7271_v58 = vrot.slane %v7267_v42, %v9227_v16 }
0x2fa2   :  { %v7272_v34 = vadd.f32 %v7271_v58, %v7263_v2  ;;  %v7273_v20 = vadd.f32 %v7271_v58, %v7264_v30  ;;  %v13068_v2 = vlaneseq  ;;  %v7458_v58 = vmul.u32 8, %v8793_v1 }
0x2fa4   :  { %v7274_v60 = vmax.f32 %v7272_v34, 0.0  ;;  %v7275_v19 = vmax.f32 %v7273_v20, 0.0  ;;  %v7457_v30 = vand.u32 127, %v13068_v2 }
0x2fa6   :  { %7292 = vrot.lane.b32.xlu1 %v7275_v19, %s8752_s22  ;;  %7290 = vrot.lane.b32.xlu0 %v7274_v60, %s8752_s22  ;;  %v7282_v10 = vrot.slane %v7274_v60, 1  ;;  %v7283_v8 = vrot.slane %v7275_v19, 1  ;;  %v7276_v26 = vrot.slane %v7274_v60, 7  ;;  %v7277_v62 = vrot.slane %v7275_v19, 7 }
0x2fa7   :  { %v7461_v19 = vmul.u32 8, %v7460_v4 }
0x2fa8   :  { %v7285_v45 = vsel %vm175_vm0, %v7283_v8, %v7282_v10  ;;  %v7284_v5 = vsel %vm175_vm0, %v7282_v10, %v7283_v8  ;;  %v7278_v52 = vsel %vm110_vm2, %v7276_v26, %v7277_v62  ;;  %v7279_v38 = vsel %vm110_vm2, %v7277_v62, %v7276_v26 }
0x2fa9   :  { %v7287_v9 = vsel %vm12798_vm15, 0.0, %v7285_v45  ;;  %v7286_v59 = vsel %vm12802_vm3, 0.0, %v7284_v5  ;;  %v7281_v14 = vsel %vm12826_vm4, 0.0, %v7278_v52  ;;  %v7280_v29 = vsel %vm12830_vm5, 0.0, %v7279_v38  ;;  %v7538_v52 = vld [vmem:[#allocation3 + $0x2b8] sm:$0xff]  ;;  %v7539_v38 = vld [vmem:[#allocation3 + $0x2c0] sm:$0xff] }
0x2faa   :  { %7300 = vrot.lane.b32.xlu1 %v7287_v9, %s8754_s14  ;;  %7298 = vrot.lane.b32.xlu0 %v7286_v59, %s8754_s14  ;;  %vm8756_vm0 = vmmov 0   ;;  %vm7459_vm2 = vcmp.ge.s32.totalorder %v7457_v30, %v7458_v58  ;;  %vm7462_vm7 = vcmp.lt.s32.totalorder %v7457_v30, %v7461_v19  ;;  %v8636_v59 = vpack.c.bf16 %v7539_v38, %v7538_v52 }
0x2fab   :  { %8448 = vmatprep.mubr.msk.f32.mxu1 %vm8756_vm0, %v8757_v21  ;;  %vm7463_vm9 = vmand %vm7459_vm2, %vm7462_vm7 }
0x2fac   :  { %v7464_v1 = vsel %vm7463_vm9, 0.125, %v8757_v21 }
0x3018   :  { %v7293_v63 = vpop.permute.xlu1 %7292  ;;  %v7291_v32 = vpop.permute.xlu0 %7290 }
0x3019   :  { %v7305_v0 = vsel %vm5702_vm8, %v7281_v14, %v7293_v63  ;;  %v7304_v46 = vsel %vm5702_vm8, %v7280_v29, %v7291_v32  ;;  %v7541_v63 = vld [vmem:[#allocation3 + $0x2d0] sm:$0xff]  ;;  %v7798_v14 = vld [vmem:[%s13015_s2 + $0x25] ss:$0 sm:$0xff] }
0x301c   :  { %v7301_v35 = vpop.permute.xlu1 %7300  ;;  %v7299_v17 = vpop.permute.xlu0 %7298 }
0x301d   :  { %v7307_v37 = vsel %vm6778_vm11, %v7305_v0, %v7301_v35  ;;  %v7306_v28 = vsel %vm6778_vm11, %v7304_v46, %v7299_v17 }
0x301e   :  { %8441 = vmatprep.mubr.msk.f32.mxu0 %vm6871_vm6, %v7306_v28 }
0x301f   :  { %8442 = vmatmul.mubr.msk.f32.vlgmr.msra.gmra.mrb[74].mxu0 %vm6871_vm6, %v7307_v37 }
0x30f2   :  { %v8443_v44 = vpop.f32.mrb[74].mxu0 }
0x30f3   :  { %v7402_v24 = vmul.f32 %v8443_v44, %v8443_v44  ;;  %v7392_v13 = vpop.f32.mrb[75].mxu0 }
0x30f4   :  { %v7401_v57 = vmul.f32 %v7392_v13, %v7392_v13 }
0x30f5   :  { %7407 = vrot.lane.b32.xlu1 %v7402_v24, %s8752_s22 }
0x30f6   :  { %7405 = vrot.lane.b32.xlu0 %v7401_v57, %s8752_s22 }
0x3167   :  { %v7408_v53 = vpop.permute.xlu1 %7407 }
0x3168   :  { %v7412_v33 = vsel %vm5702_vm8, %v8443_v44, %v7408_v53  ;;  %v7406_v22 = vpop.permute.xlu0 %7405 }
0x3169   :  { %v7414_v50 = vsel %vm6778_vm11, %v7412_v33, 0.0  ;;  %v7411_v43 = vsel %vm5702_vm8, %v7392_v13, %v7406_v22 }
0x316a   :  { %v7413_v31 = vsel %vm6778_vm11, %v7411_v43, 0.0 }
0x316b   :  { %v7415_v27 = vadd.f32 %v7414_v50, %v7413_v31 }
0x316d   :  { %v7416_v48 = vrot.slane %v7415_v27, 4 }
0x316f   :  { %v7417_v6 = vadd.f32 %v7416_v48, %v7415_v27 }
0x3171   :  { %v7418_v49 = vrot.slane %v7417_v6, 2 }
0x3173   :  { %v7419_v56 = vadd.f32 %v7418_v49, %v7417_v6 }
0x3175   :  { %v7420_v36 = vrot.slane %v7419_v56, 1 }
0x3177   :  { %v7421_v40 = vadd.f32 %v7420_v36, %v7419_v56 }
0x3179   :  { %v7422_v54 = vmul.f32 0.0625, %v7421_v40 }
0x317b   :  { %v7423_v47 = vmul.f32 %v7422_v54, %v7422_v54 }
0x317d   :  { %7425 = vrot.lane.b32.xlu0 %v7423_v47, %s8752_s22 }
0x31ef   :  { %v7426_v15 = vpop.permute.xlu0 %7425 }
0x31f0   :  { %v7428_v25 = vsub.f32 %v7422_v54, %v7426_v15 }
0x31f2   :  { %v7430_v61 = vadd.f32 1e-05, %v7428_v25 }
0x31f4   :  { %8691 = vrsqrt.f32 %v7430_v61 }
0x31fe   :  { %v8692_v12 = vpop.eup %8691 }
0x31ff   :  { %7433 = vrot.lane.b32.xlu1 %v8692_v12, %s8753_s5 }
0x3271   :  { %v7434_v55 = vpop.permute.xlu1 %7433 }
0x3272   :  { %v7436_v41 = vmul.f32 %v7434_v55, %v7429_v51 }
0x3274   :  { %v7440_v7 = vrot.slane %v7436_v41, %v9227_v16  ;;  %v7444_v11 = vmul.f32 %v7436_v41, %v7422_v54 }
0x3276   :  { %v7445_v42 = vsub.f32 %v7443_v39, %v7444_v11  ;;  %v7441_v34 = vmul.f32 %v7440_v7, %v7392_v13  ;;  %v7442_v20 = vmul.f32 %v8443_v44, %v7440_v7 }
0x3278   :  { %v7449_v60 = vrot.slane %v7445_v42, %v9227_v16  ;;  %v7540_v16 = vld [vmem:[#allocation3 + $0x2c8] sm:$0xff] }
0x327a   :  { %v7450_v10 = vadd.f32 %v7449_v60, %v7441_v34  ;;  %v7451_v8 = vadd.f32 %v7449_v60, %v7442_v20 }
0x327c   :  { %v7452_v26 = vadd.f32 %v7450_v10, %v12885_v23  ;;  %v7453_v62 = vadd.f32 %v7451_v8, %v12883_v18  ;;  %v8639_v23 = vpack.c.bf16 %v7541_v63, %v7540_v16 }
0x327e   :  { %v7454_v45 = vmax.f32 %v7452_v26, 0.0  ;;  %v7455_v5 = vmax.f32 %v7453_v62, 0.0 }
0x3280   :  { %v8633_v9 = vpack.c.bf16 %v7455_v5, %v7454_v45 }
0x3282   :  { %8634 = vmatpush3.bf16.msra.mxu1 %v8633_v9 }
0x3283   :  { %8635 = vmatprep.subr.bf16.mxu1 %v8755_v3 }
0x3285   :  { %8449 = vmatmul.mubr.msk.f32.vlgmr.msra.gmra.mrb[74].mxu1 %vm4038_vm1, %v7464_v1 }
0x3286   :  { %8637 = vmatpush3.bf16.msra.mxu1 %v8636_v59  ;;  %8459 = vmatprep.mubr.msk.f32.mxu1 %vm8756_vm0, %v8757_v21 }
0x3287   :  { %8638 = vmatprep.subr.bf16.mxu1 %v8755_v3 }
0x328a   :  { %8640 = vmatpush3.bf16.msra.mxu1 %v8639_v23 }
0x3358   :  { %v7534_v18 = vpop.f32.mrb[74].mxu1 }
0x3359   :  { %v8450_v32 = vpop.f32.mrb[75].mxu1  ;;  %8460 = vmatmul.mubr.msk.f32.vlgmr.msra.gmra.mrb[76].mxu1 %vm5702_vm8, %v7534_v18 }
0x342c   :  { %v7616_v29 = vpop.f32.mrb[76].mxu1 }
0x342d   :  { %v7617_v0 = vadd.f32 %v7798_v14, %v7616_v29  ;;  %v8461_v46 = vpop.f32.mrb[77].mxu1 }
0x342f   :  { %7621 = vst.msk [vmem:[#allocation6] sm:$0x3] %vm7620_vm10, %v7617_v0 }
0x3430   :  { %8726 = shalt.err (!%p8723_p12)
}
0x3431   :  { %s8727_s8 = scalar_lea.hbm %s13016_s3, 32 }
0x3432   :  { %p8728_p13 = scmp.ne.s32.totalorder %s13016_s3, %s8727_s8  ;;  %p8731_p0 = scmp.lt.u32.totalorder %s8727_s8, %s13016_s3 }
0x3434   :  { %p8733_p1 = pnand %p8731_p0, %p8728_p13 }
0x3436   :  { %8736 = shalt.err (!%p8733_p1)
}
0x3437   :  { %7631 = dma.vmem_to_hbm [thread:$0]  %s7629_s0, 32, %s13016_s3, [#allocation5]  }
0x3438   :  { %8739 = dma.done.wait [#allocation5], 32  }
0x3439   :  { %8740 = vsyncadd [#allocation5], 4294967264 }
0x343a   :  { %7635 = vsyncpa [#allocation4], 1 }
0x343b   :  { %7636 = vsyncpa [#allocation5], 1 }

</bundles_post_ra>
